<compile_context>
chip_gen: v5e
topology: v5e:2x2
jax: 0.10.0
libtpu: 0.0.40
codegen_flags: <defaults>
</compile_context>

<pallas_src>
import jax
import jax.numpy as jnp
from jax import lax
from jax.experimental import pallas as pl
from jax.experimental.pallas import tpu as pltpu

_LN_EPS = 1e-5


def _co_concat_kernel(q_ref, v_ref, wp_ref, w1_ref, w2_ref, oq_ref, ov_ref):
    """One batch-block, all layers. Weight refs hold 2*n_layers fused matrices."""
    f32 = jnp.float32
    cdt = q_ref.dtype                       # compute (MXU) dtype, e.g. bf16
    Bt, Lq, D = q_ref.shape
    Lv = v_ref.shape[1]
    n_layers = wp_ref.shape[0] // 2
    scale = D ** -0.5

    q_cur = q_ref[...]                      # (Bt, Lq, D) layer-0 question
    v_cur = v_ref[...]                      # (Bt, Lv, D) layer-0 video

    # Padding masks from the ORIGINAL inputs (torch: bmm-with-ones == 0),
    # kept as tiny broadcastable vectors instead of (L, L) tensors.
    q_pad_q = jnp.sum(q_cur.astype(f32), axis=-1, keepdims=True) == 0.0   # (Bt, Lq, 1)
    v_pad_q = jnp.sum(v_cur.astype(f32), axis=-1, keepdims=True) == 0.0   # (Bt, Lv, 1)
    q_pad_k = (jnp.sum(q_cur.astype(f32), axis=-1) == 0.0)[:, None, :]    # (Bt, 1, Lq)
    v_pad_k = (jnp.sum(v_cur.astype(f32), axis=-1) == 0.0)[:, None, :]    # (Bt, 1, Lv)

    def masked_softmax(scores, key_pad, query_pad):
        # softmax(-1) with -inf on padded keys, then zero padded query rows.
        scores = jnp.where(key_pad, -jnp.inf, scores)
        m = jnp.max(scores, axis=-1, keepdims=True)
        e = jnp.exp(scores - m)
        attn = e * pl.reciprocal(jnp.sum(e, axis=-1, keepdims=True), approx=True)
        return jnp.where(query_pad, 0.0, attn)

    def layer_norm(y):                      # f32 in / f32 out, no affine
        mu = jnp.mean(y, axis=-1, keepdims=True)
        var = jnp.mean(jnp.square(y - mu), axis=-1, keepdims=True)
        return (y - mu) * lax.rsqrt(var + _LN_EPS)

    q_out = v_out = None
    for l in range(n_layers):               # static unroll over layers
        xq = q_cur.reshape(Bt * Lq, D)      # flattened rows -> fat MXU matmuls
        xv = v_cur.reshape(Bt * Lv, D)

        # Fused projections: one N=2D matmul per input.
        pq = jnp.dot(xq, wp_ref[2 * l], preferred_element_type=f32)       # [Qq | Qv]
        pv = jnp.dot(xv, wp_ref[2 * l + 1], preferred_element_type=f32)   # [Vk | Vv]
        question_q = pq[:, :D].astype(cdt).reshape(Bt, Lq, D)
        question_v = pq[:, D:].astype(cdt).reshape(Bt, Lq, D)
        video_k    = pv[:, :D].astype(cdt).reshape(Bt, Lv, D)
        video_v    = pv[:, D:].astype(cdt).reshape(Bt, Lv, D)

        # Single score matmul; the vq scores are its transpose (XLU, not MXU).
        scores = jnp.einsum("bqd,bkd->bqk", question_q, video_k,
                            preferred_element_type=f32) * scale           # (Bt, Lq, Lv)
        attn_qv = masked_softmax(scores, v_pad_k, q_pad_q)                 # (Bt, Lq, Lv)
        attn_vq = masked_softmax(jnp.swapaxes(scores, 1, 2),
                                 q_pad_k, v_pad_q)                         # (Bt, Lv, Lq)

        ctx_qv = jnp.einsum("bqk,bkd->bqd", attn_qv.astype(cdt), video_v,
                            preferred_element_type=f32)                    # (Bt, Lq, D)
        ctx_vq = jnp.einsum("bkq,bqd->bkd", attn_vq.astype(cdt), question_v,
                            preferred_element_type=f32)                    # (Bt, Lv, D)

        # cat(ctx, residual) along lanes -> one K=2D matmul against the original W1.
        cat_qv = jnp.concatenate(
            [ctx_qv.astype(cdt).reshape(Bt * Lq, D), xq], axis=-1)         # (Bt*Lq, 2D)
        h_qv = jnp.maximum(jnp.dot(cat_qv, w1_ref[2 * l],
                                   preferred_element_type=f32), 0.0)
        out_qv = jnp.dot(h_qv.astype(cdt), w2_ref[2 * l],
                         preferred_element_type=f32)
        q_out = layer_norm(out_qv).reshape(Bt, Lq, D)                      # f32

        cat_vq = jnp.concatenate(
            [ctx_vq.astype(cdt).reshape(Bt * Lv, D), xv], axis=-1)         # (Bt*Lv, 2D)
        h_vq = jnp.maximum(jnp.dot(cat_vq, w1_ref[2 * l + 1],
                                   preferred_element_type=f32), 0.0)
        out_vq = jnp.dot(h_vq.astype(cdt), w2_ref[2 * l + 1],
                         preferred_element_type=f32)
        v_out = layer_norm(out_vq).reshape(Bt, Lv, D)                      # f32

        q_cur = q_out.astype(cdt)           # next layer's MXU operands
        v_cur = v_out.astype(cdt)

    oq_ref[...] = q_out.astype(oq_ref.dtype)
    ov_ref[...] = v_out.astype(ov_ref.dtype)


def co_concat_attention(question, video, wp, w1, w2, *,
                        compute_dtype=jnp.bfloat16, max_block_b=8):
    """CoConcatAttention.forward (all layers) as a single pallas_call.

    Weight layout (all stored (in, out), fused for MXU fill):
      wp: (2*n_layers, D, 2D)  wp[2l]   = [W_question | W_v_question]
                               wp[2l+1] = [W_video    | W_v_video   ]
      w1: (2*n_layers, 2D, D)  w1[2l] = W1_qv (rows: [ctx, residual]), w1[2l+1] = W1_vq
      w2: (2*n_layers, D, D)   w2[2l] = W2_qv, w2[2l+1] = W2_vq
    """
    B, Lq, D = question.shape
    Lv = video.shape[1]
    nl2 = wp.shape[0]
    n_layers = nl2 // 2
    assert n_layers >= 1
    out_dtype = question.dtype

    # Batch block: largest divisor of B that is <= max_block_b and leaves at
    # least two grid steps (keeps megacore / v7x's two TensorCores busy).
    cap = max(1, min(max_block_b, B // 2 if B > 1 else 1))
    bt = max(d for d in range(1, cap + 1) if B % d == 0)
    grid = (B // bt,)

    # bf16 MXU operands (f32 accumulation inside the kernel); elementwise math
    # (softmax / LayerNorm) stays f32 — important on v5e (no bf16 VPU/EUP).
    qc, vc = question.astype(compute_dtype), video.astype(compute_dtype)
    wpc, w1c, w2c = (w.astype(compute_dtype) for w in (wp, w1, w2))

    isz = jnp.dtype(compute_dtype).itemsize
    flops = int(B * n_layers * (10 * (Lq + Lv) * D * D + 6 * Lq * Lv * D))
    transcendentals = int(B * n_layers * (2 * Lq * Lv + 3 * (Lq + Lv)))
    bytes_accessed = int(B * (Lq + Lv) * D * (isz + 4) + 10 * n_layers * D * D * isz)

    grid_spec = pltpu.PrefetchScalarGridSpec(
        num_scalar_prefetch=0,
        grid=grid,
        in_specs=[
            pl.BlockSpec((bt, Lq, D), lambda b: (b, 0, 0)),          # question block
            pl.BlockSpec((bt, Lv, D), lambda b: (b, 0, 0)),          # video block
            # Constant-index weight blocks: fetched once, resident across steps.
            pl.BlockSpec((nl2, D, 2 * D), lambda b: (0, 0, 0)),
            pl.BlockSpec((nl2, 2 * D, D), lambda b: (0, 0, 0)),
            pl.BlockSpec((nl2, D, D), lambda b: (0, 0, 0)),
        ],
        out_specs=(
            pl.BlockSpec((bt, Lq, D), lambda b: (b, 0, 0)),
            pl.BlockSpec((bt, Lv, D), lambda b: (b, 0, 0)),
        ),
    )
    # Note: VMEM use here is tiny (<2 MiB); set vmem_limit_bytes in
    # CompilerParams only if bt / sequence lengths grow near the 32 MiB default.
    out_q, out_v = pl.pallas_call(
        _co_concat_kernel,
        out_shape=(jax.ShapeDtypeStruct((B, Lq, D), out_dtype),
                   jax.ShapeDtypeStruct((B, Lv, D), out_dtype)),
        grid_spec=grid_spec,
        compiler_params=pltpu.CompilerParams(dimension_semantics=("parallel",)),
        cost_estimate=pl.CostEstimate(flops=flops,
                                      transcendentals=transcendentals,
                                      bytes_accessed=bytes_accessed),
    )(qc, vc, wpc, w1c, w2c)
    return out_q, out_v


def _reference(question, video, wp, w1, w2, compute_dtype=jnp.bfloat16):
    """Pure-JAX mirror of the PyTorch forward with the same bf16 MXU operands."""
    f32, cdt = jnp.float32, compute_dtype
    B, Lq, D = question.shape
    Lv = video.shape[1]
    n_layers = wp.shape[0] // 2
    scale = D ** -0.5

    q_pad = jnp.sum(question, axis=-1) == 0.0
    v_pad = jnp.sum(video, axis=-1) == 0.0
    am_qv, sm_qv = v_pad[:, None, :], q_pad[:, :, None]
    am_vq, sm_vq = q_pad[:, None, :], v_pad[:, :, None]

    def ln(y):
        mu = jnp.mean(y, -1, keepdims=True)
        var = jnp.mean((y - mu) ** 2, -1, keepdims=True)
        return (y - mu) * lax.rsqrt(var + _LN_EPS)

    wp_c, w1_c, w2_c = wp.astype(cdt), w1.astype(cdt), w2.astype(cdt)
    q_cur, v_cur = question.astype(cdt), video.astype(cdt)
    out_q = out_v = None
    for l in range(n_layers):
        pq = jnp.einsum("bld,de->ble", q_cur, wp_c[2 * l], preferred_element_type=f32)
        pv = jnp.einsum("bld,de->ble", v_cur, wp_c[2 * l + 1], preferred_element_type=f32)
        qq, q_val = pq[..., :D].astype(cdt), pq[..., D:].astype(cdt)
        vk, v_val = pv[..., :D].astype(cdt), pv[..., D:].astype(cdt)

        s = jnp.einsum("bqd,bkd->bqk", qq, vk, preferred_element_type=f32) * scale
        a_qv = jnp.where(sm_qv, 0.0,
                         jax.nn.softmax(jnp.where(am_qv, -jnp.inf, s), axis=-1))
        s_t = jnp.swapaxes(s, 1, 2)
        a_vq = jnp.where(sm_vq, 0.0,
                         jax.nn.softmax(jnp.where(am_vq, -jnp.inf, s_t), axis=-1))

        ctx_qv = jnp.einsum("bqk,bkd->bqd", a_qv.astype(cdt), v_val,
                            preferred_element_type=f32)
        ctx_vq = jnp.einsum("bkq,bqd->bkd", a_vq.astype(cdt), q_val,
                            preferred_element_type=f32)

        h_q = jnp.maximum(jnp.einsum(
            "blk,kd->bld", jnp.concatenate([ctx_qv.astype(cdt), q_cur], -1),
            w1_c[2 * l], preferred_element_type=f32), 0.0)
        out_q = ln(jnp.einsum("bld,de->ble", h_q.astype(cdt), w2_c[2 * l],
                              preferred_element_type=f32))
        h_v = jnp.maximum(jnp.einsum(
            "blk,kd->bld", jnp.concatenate([ctx_vq.astype(cdt), v_cur], -1),
            w1_c[2 * l + 1], preferred_element_type=f32), 0.0)
        out_v = ln(jnp.einsum("bld,de->ble", h_v.astype(cdt), w2_c[2 * l + 1],
                              preferred_element_type=f32))
        q_cur, v_cur = out_q.astype(cdt), out_v.astype(cdt)
    return out_q, out_v


if __name__ == "__main__":
    # Small shapes consistent with the module: hidden=128 (lane-dense), batch=4,
    # question length 8, video length 16, two fused layers.
    B, Lq, Lv, D, n_layers = 4, 8, 16, 128, 2

    key = jax.random.PRNGKey(0)
    kq, kv, kp, k1, k2 = jax.random.split(key, 5)
    question = jax.random.normal(kq, (B, Lq, D), dtype=jnp.float32)
    video = jax.random.normal(kv, (B, Lv, D), dtype=jnp.float32)
    # Exact-zero padded positions so the masking path is exercised.
    question = question.at[0, Lq - 2:, :].set(0.0)
    question = question.at[2, Lq - 3:, :].set(0.0)
    video = video.at[1, Lv - 4:, :].set(0.0)
    video = video.at[3, Lv - 6:, :].set(0.0)

    # Stand-ins for the nn.Linear weights in the fused (in, out) layout.
    wp = jax.random.normal(kp, (2 * n_layers, D, 2 * D), jnp.float32) * (D ** -0.5)
    w1 = jax.random.normal(k1, (2 * n_layers, 2 * D, D), jnp.float32) * ((2 * D) ** -0.5)
    w2 = jax.random.normal(k2, (2 * n_layers, D, D), jnp.float32) * (D ** -0.5)

    # TODO(synk): WeightDropLinear / nn.Dropout with p>0 (training mode) are not
    # implemented; dropout_p defaults to 0 so they are the identity here.

    run = jax.jit(co_concat_attention)
    out_q, out_v = run(question, video, wp, w1, w2)
    jax.block_until_ready((out_q, out_v))

    ref_q, ref_v = _reference(question, video, wp, w1, w2)
    assert out_q.shape == (B, Lq, D) and out_v.shape == (B, Lv, D)
    assert jnp.all(jnp.isfinite(out_q)) and jnp.all(jnp.isfinite(out_v))
    assert jnp.allclose(out_q, ref_q, atol=2e-2, rtol=2e-2), "question output mismatch"
    assert jnp.allclose(out_v, ref_v, atol=2e-2, rtol=2e-2), "video output mismatch"

    print("KERNEL_OK")
</pallas_src>

<mosaic_0001>
module attributes {stable_mosaic.version = 11 : i64} {
  func.func @_co_concat_kernel(%arg0: i32, %arg1: memref<2x8x128xbf16, #tpu.memory_space<vmem>>, %arg2: memref<2x16x128xbf16, #tpu.memory_space<vmem>>, %arg3: memref<4x128x256xbf16, #tpu.memory_space<vmem>>, %arg4: memref<4x256x128xbf16, #tpu.memory_space<vmem>>, %arg5: memref<4x128x128xbf16, #tpu.memory_space<vmem>>, %arg6: memref<2x8x128xf32, #tpu.memory_space<vmem>>, %arg7: memref<2x16x128xf32, #tpu.memory_space<vmem>>) attributes {dimension_semantics = [#tpu.dimension_semantics<parallel>], iteration_bounds = array<i64: 2>, scalar_prefetch = 0 : i64, scratch_operands = 0 : i64, tpu.core_type = #tpu.core_type<tc>, window_params = [{transform_indices = @transform_0, window_bounds = array<i64: 2, 8, 128>}, {transform_indices = @transform_1, window_bounds = array<i64: 2, 16, 128>}, {pipeline_mode = #tpu.pipeline_mode<synchronous>, transform_indices = @transform_2, window_bounds = array<i64: 4, 128, 256>}, {pipeline_mode = #tpu.pipeline_mode<synchronous>, transform_indices = @transform_3, window_bounds = array<i64: 4, 256, 128>}, {pipeline_mode = #tpu.pipeline_mode<synchronous>, transform_indices = @transform_4, window_bounds = array<i64: 4, 128, 128>}, {transform_indices = @transform_5, window_bounds = array<i64: 2, 8, 128>}, {transform_indices = @transform_6, window_bounds = array<i64: 2, 16, 128>}]} {
    %c0 = arith.constant 0 : index
    %c0_0 = arith.constant 0 : index
    %c0_1 = arith.constant 0 : index
    %0 = vector.load %arg1[%c0, %c0_0, %c0_1] : memref<2x8x128xbf16, #tpu.memory_space<vmem>>, vector<2x8x128xbf16>
    %c0_2 = arith.constant 0 : index
    %c0_3 = arith.constant 0 : index
    %c0_4 = arith.constant 0 : index
    %1 = vector.load %arg2[%c0_2, %c0_3, %c0_4] : memref<2x16x128xbf16, #tpu.memory_space<vmem>>, vector<2x16x128xbf16>
    %2 = arith.extf %0 : vector<2x8x128xbf16> to vector<2x8x128xf32>
    %cst = arith.constant dense<0.000000e+00> : vector<2x8xf32>
    %3 = vector.multi_reduction <add>, %2, %cst [2] : vector<2x8x128xf32> to vector<2x8xf32>
    %4 = vector.shape_cast %3 : vector<2x8xf32> to vector<2x8x1xf32>
    %cst_5 = arith.constant 0.000000e+00 : f32
    %5 = vector.broadcast %cst_5 : f32 to vector<2x8x1xf32>
    %6 = arith.cmpf oeq, %4, %5 : vector<2x8x1xf32>
    %7 = arith.extf %1 : vector<2x16x128xbf16> to vector<2x16x128xf32>
    %cst_6 = arith.constant dense<0.000000e+00> : vector<2x16xf32>
    %8 = vector.multi_reduction <add>, %7, %cst_6 [2] : vector<2x16x128xf32> to vector<2x16xf32>
    %9 = vector.shape_cast %8 : vector<2x16xf32> to vector<2x16x1xf32>
    %cst_7 = arith.constant 0.000000e+00 : f32
    %10 = vector.broadcast %cst_7 : f32 to vector<2x16x1xf32>
    %11 = arith.cmpf oeq, %9, %10 : vector<2x16x1xf32>
    %12 = arith.extf %0 : vector<2x8x128xbf16> to vector<2x8x128xf32>
    %cst_8 = arith.constant dense<0.000000e+00> : vector<2x8xf32>
    %13 = vector.multi_reduction <add>, %12, %cst_8 [2] : vector<2x8x128xf32> to vector<2x8xf32>
    %cst_9 = arith.constant 0.000000e+00 : f32
    %14 = vector.broadcast %cst_9 : f32 to vector<2x8xf32>
    %15 = arith.cmpf oeq, %13, %14 : vector<2x8xf32>
    %16 = vector.shape_cast %15 : vector<2x8xi1> to vector<2x1x8xi1>
    %17 = arith.extf %1 : vector<2x16x128xbf16> to vector<2x16x128xf32>
    %cst_10 = arith.constant dense<0.000000e+00> : vector<2x16xf32>
    %18 = vector.multi_reduction <add>, %17, %cst_10 [2] : vector<2x16x128xf32> to vector<2x16xf32>
    %cst_11 = arith.constant 0.000000e+00 : f32
    %19 = vector.broadcast %cst_11 : f32 to vector<2x16xf32>
    %20 = arith.cmpf oeq, %18, %19 : vector<2x16xf32>
    %21 = vector.shape_cast %20 : vector<2x16xi1> to vector<2x1x16xi1>
    %22 = vector.shape_cast %0 : vector<2x8x128xbf16> to vector<16x128xbf16>
    %23 = vector.shape_cast %1 : vector<2x16x128xbf16> to vector<32x128xbf16>
    %c0_12 = arith.constant 0 : index
    %c0_13 = arith.constant 0 : index
    %c0_14 = arith.constant 0 : index
    %24 = vector.load %arg3[%c0_12, %c0_13, %c0_14] : memref<4x128x256xbf16, #tpu.memory_space<vmem>>, vector<1x128x256xbf16>
    %25 = vector.shape_cast %24 : vector<1x128x256xbf16> to vector<128x256xbf16>
    %cst_15 = arith.constant dense<0.000000e+00> : vector<16x256xf32>
    %26 = tpu.matmul %22, %25, %cst_15 {dimension_numbers = #tpu.dot_dimension_numbers<[1], [0], [0], [1], [0, 0, 1, 1], [], []>} : vector<16x128xbf16>, vector<128x256xbf16>, vector<16x256xf32> -> vector<16x256xf32>
    %c1 = arith.constant 1 : index
    %c0_16 = arith.constant 0 : index
    %c0_17 = arith.constant 0 : index
    %27 = vector.load %arg3[%c1, %c0_16, %c0_17] : memref<4x128x256xbf16, #tpu.memory_space<vmem>>, vector<1x128x256xbf16>
    %28 = vector.shape_cast %27 : vector<1x128x256xbf16> to vector<128x256xbf16>
    %cst_18 = arith.constant dense<0.000000e+00> : vector<32x256xf32>
    %29 = tpu.matmul %23, %28, %cst_18 {dimension_numbers = #tpu.dot_dimension_numbers<[1], [0], [0], [1], [0, 0, 1, 1], [], []>} : vector<32x128xbf16>, vector<128x256xbf16>, vector<32x256xf32> -> vector<32x256xf32>
    %30 = vector.extract_strided_slice %26 {offsets = [0, 0], sizes = [16, 128], strides = [1, 1]} : vector<16x256xf32> to vector<16x128xf32>
    %31 = arith.truncf %30 : vector<16x128xf32> to vector<16x128xbf16>
    %32 = vector.shape_cast %31 : vector<16x128xbf16> to vector<2x8x128xbf16>
    %33 = vector.extract_strided_slice %26 {offsets = [0, 128], sizes = [16, 128], strides = [1, 1]} : vector<16x256xf32> to vector<16x128xf32>
    %34 = arith.truncf %33 : vector<16x128xf32> to vector<16x128xbf16>
    %35 = vector.shape_cast %34 : vector<16x128xbf16> to vector<2x8x128xbf16>
    %36 = vector.extract_strided_slice %29 {offsets = [0, 0], sizes = [32, 128], strides = [1, 1]} : vector<32x256xf32> to vector<32x128xf32>
    %37 = arith.truncf %36 : vector<32x128xf32> to vector<32x128xbf16>
    %38 = vector.shape_cast %37 : vector<32x128xbf16> to vector<2x16x128xbf16>
    %39 = vector.extract_strided_slice %29 {offsets = [0, 128], sizes = [32, 128], strides = [1, 1]} : vector<32x256xf32> to vector<32x128xf32>
    %40 = arith.truncf %39 : vector<32x128xf32> to vector<32x128xbf16>
    %41 = vector.shape_cast %40 : vector<32x128xbf16> to vector<2x16x128xbf16>
    "tpu.trace_start"() <{level = 10 : i32, message = "bqd,bkd->bqk"}> : () -> ()
    %cst_19 = arith.constant dense<0.000000e+00> : vector<2x8x16xf32>
    %42 = tpu.matmul %32, %38, %cst_19 {dimension_numbers = #tpu.dot_dimension_numbers<[2], [2], [1], [1], [0, 0, 0, 1, 1, 1], [0], [0]>} : vector<2x8x128xbf16>, vector<2x16x128xbf16>, vector<2x8x16xf32> -> vector<2x8x16xf32>
    "tpu.trace_stop"() : () -> ()
    %cst_20 = arith.constant 0.0883883461 : f32
    %43 = vector.broadcast %cst_20 : f32 to vector<2x8x16xf32>
    %44 = arith.mulf %42, %43 : vector<2x8x16xf32>
    %cst_21 = arith.constant 0xFF800000 : f32
    %45 = vector.shape_cast %21 : vector<2x1x16xi1> to vector<2x1x16xi1>
    %46 = vector.broadcast %45 : vector<2x1x16xi1> to vector<2x8x16xi1>
    %47 = vector.broadcast %cst_21 : f32 to vector<2x8x16xf32>
    %48 = arith.select %46, %47, %44 : vector<2x8x16xi1>, vector<2x8x16xf32>
    %cst_22 = arith.constant dense<0xFF800000> : vector<2x8xf32>
    %49 = vector.multi_reduction <maximumf>, %48, %cst_22 [2] : vector<2x8x16xf32> to vector<2x8xf32>
    %50 = vector.shape_cast %49 : vector<2x8xf32> to vector<2x8x1xf32>
    %51 = vector.broadcast %50 : vector<2x8x1xf32> to vector<2x8x16xf32>
    %52 = arith.subf %48, %51 : vector<2x8x16xf32>
    %53 = math.exp %52 : vector<2x8x16xf32>
    %cst_23 = arith.constant dense<0.000000e+00> : vector<2x8xf32>
    %54 = vector.multi_reduction <add>, %53, %cst_23 [2] : vector<2x8x16xf32> to vector<2x8xf32>
    %55 = vector.shape_cast %54 : vector<2x8xf32> to vector<2x8x1xf32>
    %56 = tpu.reciprocal %55 {approx = true} : vector<2x8x1xf32> -> vector<2x8x1xf32>
    %57 = vector.broadcast %56 : vector<2x8x1xf32> to vector<2x8x16xf32>
    %58 = arith.mulf %53, %57 : vector<2x8x16xf32>
    %cst_24 = arith.constant 0.000000e+00 : f32
    %59 = vector.shape_cast %6 : vector<2x8x1xi1> to vector<2x8x1xi1>
    %60 = vector.broadcast %59 : vector<2x8x1xi1> to vector<2x8x16xi1>
    %61 = vector.broadcast %cst_24 : f32 to vector<2x8x16xf32>
    %62 = arith.select %60, %61, %58 : vector<2x8x16xi1>, vector<2x8x16xf32>
    %63 = tpu.transpose %44, [0, 2, 1] : vector<2x8x16xf32> -> vector<2x16x8xf32>
    %cst_25 = arith.constant 0xFF800000 : f32
    %64 = vector.shape_cast %16 : vector<2x1x8xi1> to vector<2x1x8xi1>
    %65 = vector.broadcast %64 : vector<2x1x8xi1> to vector<2x16x8xi1>
    %66 = vector.broadcast %cst_25 : f32 to vector<2x16x8xf32>
    %67 = arith.select %65, %66, %63 : vector<2x16x8xi1>, vector<2x16x8xf32>
    %cst_26 = arith.constant dense<0xFF800000> : vector<2x16xf32>
    %68 = vector.multi_reduction <maximumf>, %67, %cst_26 [2] : vector<2x16x8xf32> to vector<2x16xf32>
    %69 = vector.shape_cast %68 : vector<2x16xf32> to vector<2x16x1xf32>
    %70 = vector.broadcast %69 : vector<2x16x1xf32> to vector<2x16x8xf32>
    %71 = arith.subf %67, %70 : vector<2x16x8xf32>
    %72 = math.exp %71 : vector<2x16x8xf32>
    %cst_27 = arith.constant dense<0.000000e+00> : vector<2x16xf32>
    %73 = vector.multi_reduction <add>, %72, %cst_27 [2] : vector<2x16x8xf32> to vector<2x16xf32>
    %74 = vector.shape_cast %73 : vector<2x16xf32> to vector<2x16x1xf32>
    %75 = tpu.reciprocal %74 {approx = true} : vector<2x16x1xf32> -> vector<2x16x1xf32>
    %76 = vector.broadcast %75 : vector<2x16x1xf32> to vector<2x16x8xf32>
    %77 = arith.mulf %72, %76 : vector<2x16x8xf32>
    %cst_28 = arith.constant 0.000000e+00 : f32
    %78 = vector.shape_cast %11 : vector<2x16x1xi1> to vector<2x16x1xi1>
    %79 = vector.broadcast %78 : vector<2x16x1xi1> to vector<2x16x8xi1>
    %80 = vector.broadcast %cst_28 : f32 to vector<2x16x8xf32>
    %81 = arith.select %79, %80, %77 : vector<2x16x8xi1>, vector<2x16x8xf32>
    %82 = arith.truncf %62 : vector<2x8x16xf32> to vector<2x8x16xbf16>
    "tpu.trace_start"() <{level = 10 : i32, message = "bqk,bkd->bqd"}> : () -> ()
    %cst_29 = arith.constant dense<0.000000e+00> : vector<2x8x128xf32>
    %83 = tpu.matmul %82, %41, %cst_29 {dimension_numbers = #tpu.dot_dimension_numbers<[2], [1], [1], [2], [0, 0, 0, 1, 1, 2], [0], [0]>} : vector<2x8x16xbf16>, vector<2x16x128xbf16>, vector<2x8x128xf32> -> vector<2x8x128xf32>
    "tpu.trace_stop"() : () -> ()
    %84 = arith.truncf %81 : vector<2x16x8xf32> to vector<2x16x8xbf16>
    "tpu.trace_start"() <{level = 10 : i32, message = "bkq,bqd->bkd"}> : () -> ()
    %cst_30 = arith.constant dense<0.000000e+00> : vector<2x16x128xf32>
    %85 = tpu.matmul %84, %35, %cst_30 {dimension_numbers = #tpu.dot_dimension_numbers<[2], [1], [1], [2], [0, 0, 0, 1, 1, 2], [0], [0]>} : vector<2x16x8xbf16>, vector<2x8x128xbf16>, vector<2x16x128xf32> -> vector<2x16x128xf32>
    "tpu.trace_stop"() : () -> ()
    %86 = arith.truncf %83 : vector<2x8x128xf32> to vector<2x8x128xbf16>
    %87 = vector.shape_cast %86 : vector<2x8x128xbf16> to vector<16x128xbf16>
    %88 = tpu.concatenate %87, %22 in 1 : vector<16x128xbf16>, vector<16x128xbf16> -> vector<16x256xbf16>
    %c0_31 = arith.constant 0 : index
    %c0_32 = arith.constant 0 : index
    %c0_33 = arith.constant 0 : index
    %89 = vector.load %arg4[%c0_31, %c0_32, %c0_33] : memref<4x256x128xbf16, #tpu.memory_space<vmem>>, vector<1x256x128xbf16>
    %90 = vector.shape_cast %89 : vector<1x256x128xbf16> to vector<256x128xbf16>
    %cst_34 = arith.constant dense<0.000000e+00> : vector<16x128xf32>
    %91 = tpu.matmul %88, %90, %cst_34 {dimension_numbers = #tpu.dot_dimension_numbers<[1], [0], [0], [1], [0, 0, 1, 1], [], []>} : vector<16x256xbf16>, vector<256x128xbf16>, vector<16x128xf32> -> vector<16x128xf32>
    %cst_35 = arith.constant 0.000000e+00 : f32
    %92 = vector.broadcast %cst_35 : f32 to vector<16x128xf32>
    %93 = arith.maximumf %91, %92 : vector<16x128xf32>
    %94 = arith.truncf %93 : vector<16x128xf32> to vector<16x128xbf16>
    %c0_36 = arith.constant 0 : index
    %c0_37 = arith.constant 0 : index
    %c0_38 = arith.constant 0 : index
    %95 = vector.load %arg5[%c0_36, %c0_37, %c0_38] : memref<4x128x128xbf16, #tpu.memory_space<vmem>>, vector<1x128x128xbf16>
    %96 = vector.shape_cast %95 : vector<1x128x128xbf16> to vector<128x128xbf16>
    %cst_39 = arith.constant dense<0.000000e+00> : vector<16x128xf32>
    %97 = tpu.matmul %94, %96, %cst_39 {dimension_numbers = #tpu.dot_dimension_numbers<[1], [0], [0], [1], [0, 0, 1, 1], [], []>} : vector<16x128xbf16>, vector<128x128xbf16>, vector<16x128xf32> -> vector<16x128xf32>
    %cst_40 = arith.constant dense<0.000000e+00> : vector<16xf32>
    %98 = vector.multi_reduction <add>, %97, %cst_40 [1] : vector<16x128xf32> to vector<16xf32>
    %99 = vector.shape_cast %98 : vector<16xf32> to vector<16x1xf32>
    %cst_41 = arith.constant 1.280000e+02 : f32
    %100 = vector.broadcast %cst_41 : f32 to vector<16x1xf32>
    %101 = arith.divf %99, %100 : vector<16x1xf32>
    %102 = vector.broadcast %101 : vector<16x1xf32> to vector<16x128xf32>
    %103 = arith.subf %97, %102 : vector<16x128xf32>
    %104 = arith.mulf %103, %103 : vector<16x128xf32>
    %cst_42 = arith.constant dense<0.000000e+00> : vector<16xf32>
    %105 = vector.multi_reduction <add>, %104, %cst_42 [1] : vector<16x128xf32> to vector<16xf32>
    %106 = vector.shape_cast %105 : vector<16xf32> to vector<16x1xf32>
    %cst_43 = arith.constant 1.280000e+02 : f32
    %107 = vector.broadcast %cst_43 : f32 to vector<16x1xf32>
    %108 = arith.divf %106, %107 : vector<16x1xf32>
    %109 = vector.broadcast %101 : vector<16x1xf32> to vector<16x128xf32>
    %110 = arith.subf %97, %109 : vector<16x128xf32>
    %cst_44 = arith.constant 9.99999974E-6 : f32
    %111 = vector.broadcast %cst_44 : f32 to vector<16x1xf32>
    %112 = arith.addf %108, %111 : vector<16x1xf32>
    %113 = math.rsqrt %112 : vector<16x1xf32>
    %114 = vector.broadcast %113 : vector<16x1xf32> to vector<16x128xf32>
    %115 = arith.mulf %110, %114 : vector<16x128xf32>
    %116 = vector.shape_cast %115 : vector<16x128xf32> to vector<2x8x128xf32>
    %117 = arith.truncf %85 : vector<2x16x128xf32> to vector<2x16x128xbf16>
    %118 = vector.shape_cast %117 : vector<2x16x128xbf16> to vector<32x128xbf16>
    %119 = tpu.concatenate %118, %23 in 1 : vector<32x128xbf16>, vector<32x128xbf16> -> vector<32x256xbf16>
    %c1_45 = arith.constant 1 : index
    %c0_46 = arith.constant 0 : index
    %c0_47 = arith.constant 0 : index
    %120 = vector.load %arg4[%c1_45, %c0_46, %c0_47] : memref<4x256x128xbf16, #tpu.memory_space<vmem>>, vector<1x256x128xbf16>
    %121 = vector.shape_cast %120 : vector<1x256x128xbf16> to vector<256x128xbf16>
    %cst_48 = arith.constant dense<0.000000e+00> : vector<32x128xf32>
    %122 = tpu.matmul %119, %121, %cst_48 {dimension_numbers = #tpu.dot_dimension_numbers<[1], [0], [0], [1], [0, 0, 1, 1], [], []>} : vector<32x256xbf16>, vector<256x128xbf16>, vector<32x128xf32> -> vector<32x128xf32>
    %cst_49 = arith.constant 0.000000e+00 : f32
    %123 = vector.broadcast %cst_49 : f32 to vector<32x128xf32>
    %124 = arith.maximumf %122, %123 : vector<32x128xf32>
    %125 = arith.truncf %124 : vector<32x128xf32> to vector<32x128xbf16>
    %c1_50 = arith.constant 1 : index
    %c0_51 = arith.constant 0 : index
    %c0_52 = arith.constant 0 : index
    %126 = vector.load %arg5[%c1_50, %c0_51, %c0_52] : memref<4x128x128xbf16, #tpu.memory_space<vmem>>, vector<1x128x128xbf16>
    %127 = vector.shape_cast %126 : vector<1x128x128xbf16> to vector<128x128xbf16>
    %cst_53 = arith.constant dense<0.000000e+00> : vector<32x128xf32>
    %128 = tpu.matmul %125, %127, %cst_53 {dimension_numbers = #tpu.dot_dimension_numbers<[1], [0], [0], [1], [0, 0, 1, 1], [], []>} : vector<32x128xbf16>, vector<128x128xbf16>, vector<32x128xf32> -> vector<32x128xf32>
    %cst_54 = arith.constant dense<0.000000e+00> : vector<32xf32>
    %129 = vector.multi_reduction <add>, %128, %cst_54 [1] : vector<32x128xf32> to vector<32xf32>
    %130 = vector.shape_cast %129 : vector<32xf32> to vector<32x1xf32>
    %cst_55 = arith.constant 1.280000e+02 : f32
    %131 = vector.broadcast %cst_55 : f32 to vector<32x1xf32>
    %132 = arith.divf %130, %131 : vector<32x1xf32>
    %133 = vector.broadcast %132 : vector<32x1xf32> to vector<32x128xf32>
    %134 = arith.subf %128, %133 : vector<32x128xf32>
    %135 = arith.mulf %134, %134 : vector<32x128xf32>
    %cst_56 = arith.constant dense<0.000000e+00> : vector<32xf32>
    %136 = vector.multi_reduction <add>, %135, %cst_56 [1] : vector<32x128xf32> to vector<32xf32>
    %137 = vector.shape_cast %136 : vector<32xf32> to vector<32x1xf32>
    %cst_57 = arith.constant 1.280000e+02 : f32
    %138 = vector.broadcast %cst_57 : f32 to vector<32x1xf32>
    %139 = arith.divf %137, %138 : vector<32x1xf32>
    %140 = vector.broadcast %132 : vector<32x1xf32> to vector<32x128xf32>
    %141 = arith.subf %128, %140 : vector<32x128xf32>
    %cst_58 = arith.constant 9.99999974E-6 : f32
    %142 = vector.broadcast %cst_58 : f32 to vector<32x1xf32>
    %143 = arith.addf %139, %142 : vector<32x1xf32>
    %144 = math.rsqrt %143 : vector<32x1xf32>
    %145 = vector.broadcast %144 : vector<32x1xf32> to vector<32x128xf32>
    %146 = arith.mulf %141, %145 : vector<32x128xf32>
    %147 = vector.shape_cast %146 : vector<32x128xf32> to vector<2x16x128xf32>
    %148 = arith.truncf %116 : vector<2x8x128xf32> to vector<2x8x128xbf16>
    %149 = arith.truncf %147 : vector<2x16x128xf32> to vector<2x16x128xbf16>
    %150 = vector.shape_cast %148 : vector<2x8x128xbf16> to vector<16x128xbf16>
    %151 = vector.shape_cast %149 : vector<2x16x128xbf16> to vector<32x128xbf16>
    %c2 = arith.constant 2 : index
    %c0_59 = arith.constant 0 : index
    %c0_60 = arith.constant 0 : index
    %152 = vector.load %arg3[%c2, %c0_59, %c0_60] : memref<4x128x256xbf16, #tpu.memory_space<vmem>>, vector<1x128x256xbf16>
    %153 = vector.shape_cast %152 : vector<1x128x256xbf16> to vector<128x256xbf16>
    %cst_61 = arith.constant dense<0.000000e+00> : vector<16x256xf32>
    %154 = tpu.matmul %150, %153, %cst_61 {dimension_numbers = #tpu.dot_dimension_numbers<[1], [0], [0], [1], [0, 0, 1, 1], [], []>} : vector<16x128xbf16>, vector<128x256xbf16>, vector<16x256xf32> -> vector<16x256xf32>
    %c3 = arith.constant 3 : index
    %c0_62 = arith.constant 0 : index
    %c0_63 = arith.constant 0 : index
    %155 = vector.load %arg3[%c3, %c0_62, %c0_63] : memref<4x128x256xbf16, #tpu.memory_space<vmem>>, vector<1x128x256xbf16>
    %156 = vector.shape_cast %155 : vector<1x128x256xbf16> to vector<128x256xbf16>
    %cst_64 = arith.constant dense<0.000000e+00> : vector<32x256xf32>
    %157 = tpu.matmul %151, %156, %cst_64 {dimension_numbers = #tpu.dot_dimension_numbers<[1], [0], [0], [1], [0, 0, 1, 1], [], []>} : vector<32x128xbf16>, vector<128x256xbf16>, vector<32x256xf32> -> vector<32x256xf32>
    %158 = vector.extract_strided_slice %154 {offsets = [0, 0], sizes = [16, 128], strides = [1, 1]} : vector<16x256xf32> to vector<16x128xf32>
    %159 = arith.truncf %158 : vector<16x128xf32> to vector<16x128xbf16>
    %160 = vector.shape_cast %159 : vector<16x128xbf16> to vector<2x8x128xbf16>
    %161 = vector.extract_strided_slice %154 {offsets = [0, 128], sizes = [16, 128], strides = [1, 1]} : vector<16x256xf32> to vector<16x128xf32>
    %162 = arith.truncf %161 : vector<16x128xf32> to vector<16x128xbf16>
    %163 = vector.shape_cast %162 : vector<16x128xbf16> to vector<2x8x128xbf16>
    %164 = vector.extract_strided_slice %157 {offsets = [0, 0], sizes = [32, 128], strides = [1, 1]} : vector<32x256xf32> to vector<32x128xf32>
    %165 = arith.truncf %164 : vector<32x128xf32> to vector<32x128xbf16>
    %166 = vector.shape_cast %165 : vector<32x128xbf16> to vector<2x16x128xbf16>
    %167 = vector.extract_strided_slice %157 {offsets = [0, 128], sizes = [32, 128], strides = [1, 1]} : vector<32x256xf32> to vector<32x128xf32>
    %168 = arith.truncf %167 : vector<32x128xf32> to vector<32x128xbf16>
    %169 = vector.shape_cast %168 : vector<32x128xbf16> to vector<2x16x128xbf16>
    "tpu.trace_start"() <{level = 10 : i32, message = "bqd,bkd->bqk"}> : () -> ()
    %cst_65 = arith.constant dense<0.000000e+00> : vector<2x8x16xf32>
    %170 = tpu.matmul %160, %166, %cst_65 {dimension_numbers = #tpu.dot_dimension_numbers<[2], [2], [1], [1], [0, 0, 0, 1, 1, 1], [0], [0]>} : vector<2x8x128xbf16>, vector<2x16x128xbf16>, vector<2x8x16xf32> -> vector<2x8x16xf32>
    "tpu.trace_stop"() : () -> ()
    %cst_66 = arith.constant 0.0883883461 : f32
    %171 = vector.broadcast %cst_66 : f32 to vector<2x8x16xf32>
    %172 = arith.mulf %170, %171 : vector<2x8x16xf32>
    %cst_67 = arith.constant 0xFF800000 : f32
    %173 = vector.shape_cast %21 : vector<2x1x16xi1> to vector<2x1x16xi1>
    %174 = vector.broadcast %173 : vector<2x1x16xi1> to vector<2x8x16xi1>
    %175 = vector.broadcast %cst_67 : f32 to vector<2x8x16xf32>
    %176 = arith.select %174, %175, %172 : vector<2x8x16xi1>, vector<2x8x16xf32>
    %cst_68 = arith.constant dense<0xFF800000> : vector<2x8xf32>
    %177 = vector.multi_reduction <maximumf>, %176, %cst_68 [2] : vector<2x8x16xf32> to vector<2x8xf32>
    %178 = vector.shape_cast %177 : vector<2x8xf32> to vector<2x8x1xf32>
    %179 = vector.broadcast %178 : vector<2x8x1xf32> to vector<2x8x16xf32>
    %180 = arith.subf %176, %179 : vector<2x8x16xf32>
    %181 = math.exp %180 : vector<2x8x16xf32>
    %cst_69 = arith.constant dense<0.000000e+00> : vector<2x8xf32>
    %182 = vector.multi_reduction <add>, %181, %cst_69 [2] : vector<2x8x16xf32> to vector<2x8xf32>
    %183 = vector.shape_cast %182 : vector<2x8xf32> to vector<2x8x1xf32>
    %184 = tpu.reciprocal %183 {approx = true} : vector<2x8x1xf32> -> vector<2x8x1xf32>
    %185 = vector.broadcast %184 : vector<2x8x1xf32> to vector<2x8x16xf32>
    %186 = arith.mulf %181, %185 : vector<2x8x16xf32>
    %cst_70 = arith.constant 0.000000e+00 : f32
    %187 = vector.shape_cast %6 : vector<2x8x1xi1> to vector<2x8x1xi1>
    %188 = vector.broadcast %187 : vector<2x8x1xi1> to vector<2x8x16xi1>
    %189 = vector.broadcast %cst_70 : f32 to vector<2x8x16xf32>
    %190 = arith.select %188, %189, %186 : vector<2x8x16xi1>, vector<2x8x16xf32>
    %191 = tpu.transpose %172, [0, 2, 1] : vector<2x8x16xf32> -> vector<2x16x8xf32>
    %cst_71 = arith.constant 0xFF800000 : f32
    %192 = vector.shape_cast %16 : vector<2x1x8xi1> to vector<2x1x8xi1>
    %193 = vector.broadcast %192 : vector<2x1x8xi1> to vector<2x16x8xi1>
    %194 = vector.broadcast %cst_71 : f32 to vector<2x16x8xf32>
    %195 = arith.select %193, %194, %191 : vector<2x16x8xi1>, vector<2x16x8xf32>
    %cst_72 = arith.constant dense<0xFF800000> : vector<2x16xf32>
    %196 = vector.multi_reduction <maximumf>, %195, %cst_72 [2] : vector<2x16x8xf32> to vector<2x16xf32>
    %197 = vector.shape_cast %196 : vector<2x16xf32> to vector<2x16x1xf32>
    %198 = vector.broadcast %197 : vector<2x16x1xf32> to vector<2x16x8xf32>
    %199 = arith.subf %195, %198 : vector<2x16x8xf32>
    %200 = math.exp %199 : vector<2x16x8xf32>
    %cst_73 = arith.constant dense<0.000000e+00> : vector<2x16xf32>
    %201 = vector.multi_reduction <add>, %200, %cst_73 [2] : vector<2x16x8xf32> to vector<2x16xf32>
    %202 = vector.shape_cast %201 : vector<2x16xf32> to vector<2x16x1xf32>
    %203 = tpu.reciprocal %202 {approx = true} : vector<2x16x1xf32> -> vector<2x16x1xf32>
    %204 = vector.broadcast %203 : vector<2x16x1xf32> to vector<2x16x8xf32>
    %205 = arith.mulf %200, %204 : vector<2x16x8xf32>
    %cst_74 = arith.constant 0.000000e+00 : f32
    %206 = vector.shape_cast %11 : vector<2x16x1xi1> to vector<2x16x1xi1>
    %207 = vector.broadcast %206 : vector<2x16x1xi1> to vector<2x16x8xi1>
    %208 = vector.broadcast %cst_74 : f32 to vector<2x16x8xf32>
    %209 = arith.select %207, %208, %205 : vector<2x16x8xi1>, vector<2x16x8xf32>
    %210 = arith.truncf %190 : vector<2x8x16xf32> to vector<2x8x16xbf16>
    "tpu.trace_start"() <{level = 10 : i32, message = "bqk,bkd->bqd"}> : () -> ()
    %cst_75 = arith.constant dense<0.000000e+00> : vector<2x8x128xf32>
    %211 = tpu.matmul %210, %169, %cst_75 {dimension_numbers = #tpu.dot_dimension_numbers<[2], [1], [1], [2], [0, 0, 0, 1, 1, 2], [0], [0]>} : vector<2x8x16xbf16>, vector<2x16x128xbf16>, vector<2x8x128xf32> -> vector<2x8x128xf32>
    "tpu.trace_stop"() : () -> ()
    %212 = arith.truncf %209 : vector<2x16x8xf32> to vector<2x16x8xbf16>
    "tpu.trace_start"() <{level = 10 : i32, message = "bkq,bqd->bkd"}> : () -> ()
    %cst_76 = arith.constant dense<0.000000e+00> : vector<2x16x128xf32>
    %213 = tpu.matmul %212, %163, %cst_76 {dimension_numbers = #tpu.dot_dimension_numbers<[2], [1], [1], [2], [0, 0, 0, 1, 1, 2], [0], [0]>} : vector<2x16x8xbf16>, vector<2x8x128xbf16>, vector<2x16x128xf32> -> vector<2x16x128xf32>
    "tpu.trace_stop"() : () -> ()
    %214 = arith.truncf %211 : vector<2x8x128xf32> to vector<2x8x128xbf16>
    %215 = vector.shape_cast %214 : vector<2x8x128xbf16> to vector<16x128xbf16>
    %216 = tpu.concatenate %215, %150 in 1 : vector<16x128xbf16>, vector<16x128xbf16> -> vector<16x256xbf16>
    %c2_77 = arith.constant 2 : index
    %c0_78 = arith.constant 0 : index
    %c0_79 = arith.constant 0 : index
    %217 = vector.load %arg4[%c2_77, %c0_78, %c0_79] : memref<4x256x128xbf16, #tpu.memory_space<vmem>>, vector<1x256x128xbf16>
    %218 = vector.shape_cast %217 : vector<1x256x128xbf16> to vector<256x128xbf16>
    %cst_80 = arith.constant dense<0.000000e+00> : vector<16x128xf32>
    %219 = tpu.matmul %216, %218, %cst_80 {dimension_numbers = #tpu.dot_dimension_numbers<[1], [0], [0], [1], [0, 0, 1, 1], [], []>} : vector<16x256xbf16>, vector<256x128xbf16>, vector<16x128xf32> -> vector<16x128xf32>
    %cst_81 = arith.constant 0.000000e+00 : f32
    %220 = vector.broadcast %cst_81 : f32 to vector<16x128xf32>
    %221 = arith.maximumf %219, %220 : vector<16x128xf32>
    %222 = arith.truncf %221 : vector<16x128xf32> to vector<16x128xbf16>
    %c2_82 = arith.constant 2 : index
    %c0_83 = arith.constant 0 : index
    %c0_84 = arith.constant 0 : index
    %223 = vector.load %arg5[%c2_82, %c0_83, %c0_84] : memref<4x128x128xbf16, #tpu.memory_space<vmem>>, vector<1x128x128xbf16>
    %224 = vector.shape_cast %223 : vector<1x128x128xbf16> to vector<128x128xbf16>
    %cst_85 = arith.constant dense<0.000000e+00> : vector<16x128xf32>
    %225 = tpu.matmul %222, %224, %cst_85 {dimension_numbers = #tpu.dot_dimension_numbers<[1], [0], [0], [1], [0, 0, 1, 1], [], []>} : vector<16x128xbf16>, vector<128x128xbf16>, vector<16x128xf32> -> vector<16x128xf32>
    %cst_86 = arith.constant dense<0.000000e+00> : vector<16xf32>
    %226 = vector.multi_reduction <add>, %225, %cst_86 [1] : vector<16x128xf32> to vector<16xf32>
    %227 = vector.shape_cast %226 : vector<16xf32> to vector<16x1xf32>
    %cst_87 = arith.constant 1.280000e+02 : f32
    %228 = vector.broadcast %cst_87 : f32 to vector<16x1xf32>
    %229 = arith.divf %227, %228 : vector<16x1xf32>
    %230 = vector.broadcast %229 : vector<16x1xf32> to vector<16x128xf32>
    %231 = arith.subf %225, %230 : vector<16x128xf32>
    %232 = arith.mulf %231, %231 : vector<16x128xf32>
    %cst_88 = arith.constant dense<0.000000e+00> : vector<16xf32>
    %233 = vector.multi_reduction <add>, %232, %cst_88 [1] : vector<16x128xf32> to vector<16xf32>
    %234 = vector.shape_cast %233 : vector<16xf32> to vector<16x1xf32>
    %cst_89 = arith.constant 1.280000e+02 : f32
    %235 = vector.broadcast %cst_89 : f32 to vector<16x1xf32>
    %236 = arith.divf %234, %235 : vector<16x1xf32>
    %237 = vector.broadcast %229 : vector<16x1xf32> to vector<16x128xf32>
    %238 = arith.subf %225, %237 : vector<16x128xf32>
    %cst_90 = arith.constant 9.99999974E-6 : f32
    %239 = vector.broadcast %cst_90 : f32 to vector<16x1xf32>
    %240 = arith.addf %236, %239 : vector<16x1xf32>
    %241 = math.rsqrt %240 : vector<16x1xf32>
    %242 = vector.broadcast %241 : vector<16x1xf32> to vector<16x128xf32>
    %243 = arith.mulf %238, %242 : vector<16x128xf32>
    %244 = vector.shape_cast %243 : vector<16x128xf32> to vector<2x8x128xf32>
    %245 = arith.truncf %213 : vector<2x16x128xf32> to vector<2x16x128xbf16>
    %246 = vector.shape_cast %245 : vector<2x16x128xbf16> to vector<32x128xbf16>
    %247 = tpu.concatenate %246, %151 in 1 : vector<32x128xbf16>, vector<32x128xbf16> -> vector<32x256xbf16>
    %c3_91 = arith.constant 3 : index
    %c0_92 = arith.constant 0 : index
    %c0_93 = arith.constant 0 : index
    %248 = vector.load %arg4[%c3_91, %c0_92, %c0_93] : memref<4x256x128xbf16, #tpu.memory_space<vmem>>, vector<1x256x128xbf16>
    %249 = vector.shape_cast %248 : vector<1x256x128xbf16> to vector<256x128xbf16>
    %cst_94 = arith.constant dense<0.000000e+00> : vector<32x128xf32>
    %250 = tpu.matmul %247, %249, %cst_94 {dimension_numbers = #tpu.dot_dimension_numbers<[1], [0], [0], [1], [0, 0, 1, 1], [], []>} : vector<32x256xbf16>, vector<256x128xbf16>, vector<32x128xf32> -> vector<32x128xf32>
    %cst_95 = arith.constant 0.000000e+00 : f32
    %251 = vector.broadcast %cst_95 : f32 to vector<32x128xf32>
    %252 = arith.maximumf %250, %251 : vector<32x128xf32>
    %253 = arith.truncf %252 : vector<32x128xf32> to vector<32x128xbf16>
    %c3_96 = arith.constant 3 : index
    %c0_97 = arith.constant 0 : index
    %c0_98 = arith.constant 0 : index
    %254 = vector.load %arg5[%c3_96, %c0_97, %c0_98] : memref<4x128x128xbf16, #tpu.memory_space<vmem>>, vector<1x128x128xbf16>
    %255 = vector.shape_cast %254 : vector<1x128x128xbf16> to vector<128x128xbf16>
    %cst_99 = arith.constant dense<0.000000e+00> : vector<32x128xf32>
    %256 = tpu.matmul %253, %255, %cst_99 {dimension_numbers = #tpu.dot_dimension_numbers<[1], [0], [0], [1], [0, 0, 1, 1], [], []>} : vector<32x128xbf16>, vector<128x128xbf16>, vector<32x128xf32> -> vector<32x128xf32>
    %cst_100 = arith.constant dense<0.000000e+00> : vector<32xf32>
    %257 = vector.multi_reduction <add>, %256, %cst_100 [1] : vector<32x128xf32> to vector<32xf32>
    %258 = vector.shape_cast %257 : vector<32xf32> to vector<32x1xf32>
    %cst_101 = arith.constant 1.280000e+02 : f32
    %259 = vector.broadcast %cst_101 : f32 to vector<32x1xf32>
    %260 = arith.divf %258, %259 : vector<32x1xf32>
    %261 = vector.broadcast %260 : vector<32x1xf32> to vector<32x128xf32>
    %262 = arith.subf %256, %261 : vector<32x128xf32>
    %263 = arith.mulf %262, %262 : vector<32x128xf32>
    %cst_102 = arith.constant dense<0.000000e+00> : vector<32xf32>
    %264 = vector.multi_reduction <add>, %263, %cst_102 [1] : vector<32x128xf32> to vector<32xf32>
    %265 = vector.shape_cast %264 : vector<32xf32> to vector<32x1xf32>
    %cst_103 = arith.constant 1.280000e+02 : f32
    %266 = vector.broadcast %cst_103 : f32 to vector<32x1xf32>
    %267 = arith.divf %265, %266 : vector<32x1xf32>
    %268 = vector.broadcast %260 : vector<32x1xf32> to vector<32x128xf32>
    %269 = arith.subf %256, %268 : vector<32x128xf32>
    %cst_104 = arith.constant 9.99999974E-6 : f32
    %270 = vector.broadcast %cst_104 : f32 to vector<32x1xf32>
    %271 = arith.addf %267, %270 : vector<32x1xf32>
    %272 = math.rsqrt %271 : vector<32x1xf32>
    %273 = vector.broadcast %272 : vector<32x1xf32> to vector<32x128xf32>
    %274 = arith.mulf %269, %273 : vector<32x128xf32>
    %275 = vector.shape_cast %274 : vector<32x128xf32> to vector<2x16x128xf32>
    %c0_105 = arith.constant 0 : index
    %c0_106 = arith.constant 0 : index
    %c0_107 = arith.constant 0 : index
    %276 = vector.load %arg6[%c0_105, %c0_106, %c0_107] : memref<2x8x128xf32, #tpu.memory_space<vmem>>, vector<2x8x128xf32>
    tpu.vector_store %arg6[%c0_105, %c0_106, %c0_107], %244 {strides = array<i32>} : memref<2x8x128xf32, #tpu.memory_space<vmem>>, vector<2x8x128xf32>,
    %c0_108 = arith.constant 0 : index
    %c0_109 = arith.constant 0 : index
    %c0_110 = arith.constant 0 : index
    %277 = vector.load %arg7[%c0_108, %c0_109, %c0_110] : memref<2x16x128xf32, #tpu.memory_space<vmem>>, vector<2x16x128xf32>
    tpu.vector_store %arg7[%c0_108, %c0_109, %c0_110], %275 {strides = array<i32>} : memref<2x16x128xf32, #tpu.memory_space<vmem>>, vector<2x16x128xf32>,
    return
  }
  func.func @transform_0(%arg0: i32) -> (i32, i32, i32) {
    %c0_i32 = arith.constant 0 : i32
    %c0_i32_0 = arith.constant 0 : i32
    %c0_i32_1 = arith.constant 0 : i32
    return %arg0, %c0_i32, %c0_i32_0 : i32, i32, i32
  }
  func.func @transform_1(%arg0: i32) -> (i32, i32, i32) {
    %c0_i32 = arith.constant 0 : i32
    %c0_i32_0 = arith.constant 0 : i32
    %c0_i32_1 = arith.constant 0 : i32
    return %arg0, %c0_i32, %c0_i32_0 : i32, i32, i32
  }
  func.func @transform_2(%arg0: i32) -> (i32, i32, i32) {
    %c0_i32 = arith.constant 0 : i32
    %c0_i32_0 = arith.constant 0 : i32
    %c0_i32_1 = arith.constant 0 : i32
    %c0_i32_2 = arith.constant 0 : i32
    return %c0_i32, %c0_i32_0, %c0_i32_1 : i32, i32, i32
  }
  func.func @transform_3(%arg0: i32) -> (i32, i32, i32) {
    %c0_i32 = arith.constant 0 : i32
    %c0_i32_0 = arith.constant 0 : i32
    %c0_i32_1 = arith.constant 0 : i32
    %c0_i32_2 = arith.constant 0 : i32
    return %c0_i32, %c0_i32_0, %c0_i32_1 : i32, i32, i32
  }
  func.func @transform_4(%arg0: i32) -> (i32, i32, i32) {
    %c0_i32 = arith.constant 0 : i32
    %c0_i32_0 = arith.constant 0 : i32
    %c0_i32_1 = arith.constant 0 : i32
    %c0_i32_2 = arith.constant 0 : i32
    return %c0_i32, %c0_i32_0, %c0_i32_1 : i32, i32, i32
  }
  func.func @transform_5(%arg0: i32) -> (i32, i32, i32) {
    %c0_i32 = arith.constant 0 : i32
    %c0_i32_0 = arith.constant 0 : i32
    %c0_i32_1 = arith.constant 0 : i32
    return %arg0, %c0_i32, %c0_i32_0 : i32, i32, i32
  }
  func.func @transform_6(%arg0: i32) -> (i32, i32, i32) {
    %c0_i32 = arith.constant 0 : i32
    %c0_i32_0 = arith.constant 0 : i32
    %c0_i32_1 = arith.constant 0 : i32
    return %arg0, %c0_i32, %c0_i32_0 : i32, i32, i32
  }
}

</mosaic_0001>

<bundles_post_ra>
// kernel: co_concat_attention.1
= control target key start
LH: loop header
LB: loop body
LE: loop exit
PB: predicated region body
PF: predicated region fallthrough
CT: control target
= control target key end

     0   :  { %12 = vsyncpa [#allocation3], 0  ;;  %s13020_s0 = inlined_call_operand.vmem [shape: bf16[4,8,128], index: 0, kind: input, shape index: {}]   ;;  %s13021_s1 = inlined_call_operand.vmem [shape: bf16[4,16,128], index: 1, kind: input, shape index: {}]   ;;  %s13022_s2 = inlined_call_operand.vmem [shape: bf16[4,128,256], index: 2, kind: input, shape index: {}]   ;;  %s13023_s3 = inlined_call_operand.vmem [shape: bf16[4,256,128], index: 3, kind: input, shape index: {}]   ;;  %s13024_s4 = inlined_call_operand.vmem [shape: bf16[4,128,128], index: 4, kind: input, shape index: {}]   ;;  %s13025_s5 = inlined_call_operand.hbm [shape: f32[4,8,128], index: 5, kind: output, shape index: {0}]   ;;  %s13026_s6 = inlined_call_operand.hbm [shape: f32[4,16,128], index: 6, kind: output, shape index: {1}]  }
   0x1   :  { %14 = vsyncpa [#allocation3 + $0x1], 0 }
   0x2   :  { %15 = vsyncpa [#allocation5], 0 }
   0x3   :  { %17 = vsyncpa [#allocation5 + $0x1], 0  ;;  %s9131_s21 = smov 0   ;;  %s9133_s22 = smov 0  }
   0x4   :  { %s9135_s23 = smov 0   ;;  %s9137_s24 = smov 0  }
   0x5 LB: > { %s9152_s25 = sadd.s32 4294967295, %s9090_s24   ;;  %s7229_s26 = sadd.s32 4294967294, %s9090_s24   ;;  %s9090_s24 = sphi %s9137_s24, %s13609_s24   ;;  %s9086_s23 = sphi %s9135_s23, %s13608_s23   ;;  %s9082_s22 = sphi %s9133_s22, %s13607_s22   ;;  %s9078_s21 = sphi %s9131_s21, %s13606_s21  }
   0x6   : > { %s9156_s27 = sadd.s32 1, %s9090_s24   ;;  %s145_s28 = sadd.s32 1, %s9086_s23 }
   0x7   : > { %s142_s29 = ssub.s32 %s9090_s24, %s9156_s27  ;;  %p155_p0 = scmp.ne.s32.totalorder %s9086_s23, %s9082_s22 }
   0x8   : > { %p143_p1 = scmp.eq.s32.totalorder %s142_s29, 0  ;;  %p156_p2 = scmp.eq.s32.totalorder %s9152_s25, 1 }
   0x9   : > { %p161_p3 = scmp.ne.s32.totalorder %s9082_s22, %s9078_s21  ;;  %p162_p4 = scmp.eq.s32.totalorder %s7229_s26, 1 }
   0xa   : > { %s9167_s30 = scalar_select %p143_p1, %s9086_s23, %s145_s28  }
   0xb   : > { %p9169_p5 = por %p156_p2, %p155_p0  ;;  %p9173_p6 = por %p162_p4, %p161_p3 }
   0xc   : > { %p7232_p7 = scmp.ge.s32.totalorder %s9090_s24, 1  ;;  %p234_p8 = scmp.lt.s32.totalorder %s9090_s24, 3 }
   0xe   : > { %p235_p9 = pnand %p7232_p7, %p234_p8 }
  0x10   : > { %238 = sbr.rel (%p235_p9) target bundleno = 4538 (0x11ba), region = 40 }
  0x15   : > { %v7390_v0 = vld [vmem:[%s13022_s2 + $0xf0] sm:$0xf]  ;;  %v8136_v1 = vld [vmem:[%s13022_s2 + $0xf4] sm:$0xf0]  ;;  %v7382_v2 = vld [vmem:[%s13022_s2 + $0xe0] sm:$0xf] }
  0x16   : > { %v7391_v3 = vor.u32 %v8136_v1, %v7390_v0  ;;  %v8134_v4 = vld [vmem:[%s13022_s2 + $0xe4] sm:$0xf0]  ;;  %v7374_v6 = vld [vmem:[%s13022_s2 + $0xd0] sm:$0xf]  ;;  %v8132_v7 = vld [vmem:[%s13022_s2 + $0xd4] sm:$0xf0] }
  0x17   : > { %v7383_v5 = vor.u32 %v8134_v4, %v7382_v2  ;;  %v7302_v8 = vld [vmem:[%s13022_s2 + $0x70] sm:$0xf]  ;;  %v8120_v9 = vld [vmem:[%s13022_s2 + $0x74] sm:$0xf0]  ;;  %v7294_v11 = vld [vmem:[%s13022_s2 + $0x60] sm:$0xf]  ;;  %v7375_v13 = vor.u32 %v8132_v7, %v7374_v6 }
  0x18   : > { %560 = vmatpush.bf16.msra.mxu2 %v7391_v3  ;;  %v7303_v10 = vor.u32 %v8120_v9, %v7302_v8  ;;  %v8118_v12 = vld [vmem:[%s13022_s2 + $0x64] sm:$0xf0]  ;;  %v7366_v14 = vld [vmem:[%s13022_s2 + $0xc0] sm:$0xf]  ;;  %v7286_v17 = vld [vmem:[%s13022_s2 + $0x50] sm:$0xf] }
  0x19   : > { %v8130_v15 = vld [vmem:[%s13022_s2 + $0xc4] sm:$0xf0]  ;;  %v7295_v16 = vor.u32 %v8118_v12, %v7294_v11  ;;  %v8116_v18 = vld [vmem:[%s13022_s2 + $0x54] sm:$0xf0]  ;;  %v7358_v20 = vld [vmem:[%s13022_s2 + $0xb0] sm:$0xf] }
  0x1a   : > { %423 = vmatpush.bf16.msra.mxu0 %v7303_v10  ;;  %v7367_v19 = vor.u32 %v8130_v15, %v7366_v14  ;;  %v8128_v21 = vld [vmem:[%s13022_s2 + $0xb4] sm:$0xf0]  ;;  %v7287_v22 = vor.u32 %v8116_v18, %v7286_v17  ;;  %s7235_s11 = sshll.u32 %s9152_s25, 1  ;;  %v7278_v23 = vld [vmem:[%s13022_s2 + $0x40] sm:$0xf]  ;;  %vm13085_vm0 = vcmask 1043456  }
  0x1b   : > { %v8114_v24 = vld [vmem:[%s13022_s2 + $0x44] sm:$0xf0]  ;;  %v7359_v25 = vor.u32 %v8128_v21, %v7358_v20  ;;  %v7350_v26 = vld [vmem:[%s13022_s2 + $0xa0] sm:$0xf]  ;;  %p9240_p10 = scmp.lt.s32.totalorder %s7235_s11, 3  ;;  %vm1065_vm7 = vcmask 130112  }
  0x1c   : > { %561 = vmatpush.bf16.msra.mxu2 %v7383_v5  ;;  %v8126_v27 = vld [vmem:[%s13022_s2 + $0xa4] sm:$0xf0]  ;;  %v7279_v28 = vor.u32 %v8114_v24, %v7278_v23  ;;  %v7270_v29 = vld [vmem:[%s13022_s2 + $0x30] sm:$0xf]  ;;  %v8112_v30 = vld [vmem:[%s13022_s2 + $0x34] sm:$0xf0] }
  0x1d   : > { %v8119_v31 = vld [vmem:[%s13022_s2 + $0x74] sm:$0xf]  ;;  %v7304_v32 = vld [vmem:[%s13022_s2 + $0x78] sm:$0xf0]  ;;  %v8117_v33 = vld [vmem:[%s13022_s2 + $0x64] sm:$0xf]  ;;  %v7351_v34 = vor.u32 %v8126_v27, %v7350_v26  ;;  %v7271_v39 = vor.u32 %v8112_v30, %v7270_v29 }
  0x1e   : > { %424 = vmatpush.bf16.msra.mxu0 %v7295_v16  ;;  %v7307_v35 = vor.u32 %v8119_v31, %v7304_v32  ;;  %v7296_v36 = vld [vmem:[%s13022_s2 + $0x68] sm:$0xf0]  ;;  %v7342_v37 = vld [vmem:[%s13022_s2 + $0x90] sm:$0xf]  ;;  %v8124_v38 = vld [vmem:[%s13022_s2 + $0x94] sm:$0xf0] }
  0x1f   : > { %s13611_s11 = smov (!%p9240_p10, %s7235_s11), 3  ;;  %v7262_v40 = vld [vmem:[%s13022_s2 + $0x20] sm:$0xf]  ;;  %v8110_v41 = vld [vmem:[%s13022_s2 + $0x24] sm:$0xf0]  ;;  %v7299_v42 = vor.u32 %v8117_v33, %v7296_v36  ;;  %v7343_v45 = vor.u32 %v8124_v38, %v7342_v37  ;;  %v13029_v38 = vlaneseq  ;;  %vm1112_vm8 = vcmask 1041409  }
  0x20   : > { %562 = vmatpush.bf16.msra.mxu2 %v7375_v13  ;;  %437 = vmatpush.bf16.msra.mxu1 %v7307_v35  ;;  %v8115_v43 = vld [vmem:[%s13022_s2 + $0x54] sm:$0xf]  ;;  %v7288_v44 = vld [vmem:[%s13022_s2 + $0x58] sm:$0xf0]  ;;  %v7334_v46 = vld [vmem:[%s13022_s2 + $0x80] sm:$0xf]  ;;  %v7263_v48 = vor.u32 %v8110_v41, %v7262_v40 }
  0x21   : > { %v8122_v47 = vld [vmem:[%s13022_s2 + $0x84] sm:$0xf0]  ;;  %s8101_s28 = sshll.u32 %s13611_s11, 3  ;;  %v7254_v49 = vld [vmem:[%s13022_s2 + $0x10] sm:$0xf]  ;;  %v7291_v51 = vor.u32 %v8115_v43, %v7288_v44  ;;  %s7236_s19 = sshll.u32 %s13611_s11, 2 }
  0x22   : > { %425 = vmatpush.bf16.msra.mxu0 %v7287_v22  ;;  %v8108_v50 = vld [vmem:[%s13022_s2 + $0x14] sm:$0xf0]  ;;  %v7335_v52 = vor.u32 %v8122_v47, %v7334_v46  ;;  %s9300_s15 = scalar_lea.vmem %s13021_s1, %s8101_s28  ;;  %v7246_v54 = vld [vmem:[%s13022_s2] sm:$0xf]  ;;  %v8106_v55 = vld [vmem:[%s13022_s2 + $0x4] sm:$0xf0]  ;;  %s9315_s29 = scalar_lea.vmem %s13020_s0, %s7236_s19 }
  0x23   : > { %v7255_v53 = vor.u32 %v8108_v50, %v7254_v49  ;;  %v9310_v56 = vld [vmem:[%s9300_s15] sm:$0xff]  ;;  %v7247_v57 = vor.u32 %v8106_v55, %v7246_v54  ;;  %v9320_v59 = vld [vmem:[%s9300_s15 + $0x8] sm:$0xff]  ;;  %v8111_v63 = vld [vmem:[%s13022_s2 + $0x34] sm:$0xf]  ;;  %vm1114_vm9 = vcmask 1042434   ;;  %vm1116_vm10 = vcmask 1043459  }
  0x24   : > { %563 = vmatpush.bf16.msra.mxu2 %v7367_v19  ;;  %438 = vmatpush.bf16.msra.mxu1 %v7299_v42  ;;  %v8102_v58 = vld [vmem:[%s9315_s29] sm:$0xff]  ;;  %v7280_v61 = vld [vmem:[%s13022_s2 + $0x48] sm:$0xf0]  ;;  %v7272_v0 = vld [vmem:[%s13022_s2 + $0x38] sm:$0xf0]  ;;  %vm13135_vm11 = vcmask 1044484  }
  0x25   : > { %v8113_v60 = vld [vmem:[%s13022_s2 + $0x44] sm:$0xf]  ;;  %v7275_v1 = vor.u32 %v8111_v63, %v7272_v0  ;;  %v7264_v3 = vld [vmem:[%s13022_s2 + $0x28] sm:$0xf0]  ;;  %v8107_v5 = vld [vmem:[%s13022_s2 + $0x14] sm:$0xf] }
  0x26   : > { %426 = vmatpush.bf16.msra.mxu0 %v7279_v28  ;;  %v7283_v62 = vor.u32 %v8113_v60, %v7280_v61  ;;  %v8109_v2 = vld [vmem:[%s13022_s2 + $0x24] sm:$0xf]  ;;  %v7256_v6 = vld [vmem:[%s13022_s2 + $0x18] sm:$0xf0]  ;;  %v7248_v9 = vld [vmem:[%s13022_s2 + $0x8] sm:$0xf0] }
  0x27   : > { %v7267_v4 = vor.u32 %v8109_v2, %v7264_v3  ;;  %v7259_v7 = vor.u32 %v8107_v5, %v7256_v6  ;;  %v8105_v8 = vld [vmem:[%s13022_s2 + $0x4] sm:$0xf]  ;;  %v295_v12 = vld [vmem:[%s9300_s15 + $0x8] sm:$0xff]   ;;  %v8135_v55 = vld [vmem:[%s13022_s2 + $0xf4] sm:$0xf]  ;;  %vm13134_vm12 = vcmask 1045509  }
  0x28   : > { %564 = vmatpush.bf16.msra.mxu2 %v7359_v25  ;;  %439 = vmatpush.bf16.msra.mxu1 %v7291_v51  ;;  %v7251_v10 = vor.u32 %v8105_v8, %v7248_v9  ;;  %v293_v13 = vld [vmem:[%s9300_s15] sm:$0xff]   ;;  %v307_v16 = vunpack.c.l.bf16 %v295_v12  ;;  %v308_v24 = vunpack.c.h.bf16 %v295_v12  ;;  %v8131_v2 = vld [vmem:[%s13022_s2 + $0xd4] sm:$0xf]  ;;  %v7376_v3 = vld [vmem:[%s13022_s2 + $0xd8] sm:$0xf0]  ;;  %vm13133_vm13 = vcmask 1046534  }
  0x29   : > { %v291_v14 = vld [vmem:[%s9315_s29] sm:$0xff]   ;;  %v305_v17 = vunpack.c.l.bf16 %v293_v13  ;;  %v306_v25 = vunpack.c.h.bf16 %v293_v13  ;;  %v7368_v6 = vld [vmem:[%s13022_s2 + $0xc8] sm:$0xf0]  ;;  %v8127_v8 = vld [vmem:[%s13022_s2 + $0xb4] sm:$0xf]  ;;  %vm13132_vm14 = vcmask 1047559  }
  0x2a   : > { %427 = vmatpush.bf16.msra.mxu0 %v7271_v39  ;;  %v297_v18 = vunpack.c.l.bf16 %v291_v14  ;;  %313 = vadd.xlane.f32.xlu2 %v307_v16  ;;  %v298_v26 = vunpack.c.h.bf16 %v291_v14  ;;  %v9357_v39 = vshrl.u32 %v13029_v38, 7  ;;  %v8133_v61 = vld [vmem:[%s13022_s2 + $0xe4] sm:$0xf]  ;;  %v7360_v9 = vld [vmem:[%s13022_s2 + $0xb8] sm:$0xf0]  ;;  %vm13131_vm15 = vcmask 130048  }
  0x2b   : > { %309 = vadd.xlane.f32.xlu1 %v305_v17  ;;  %v8129_v5 = vld [vmem:[%s13022_s2 + $0xc4] sm:$0xf]  ;;  %v7352_v12 = vld [vmem:[%s13022_s2 + $0xa8] sm:$0xf0]  ;;  %v8123_v16 = vld [vmem:[%s13022_s2 + $0x94] sm:$0xf] }
  0x2c   : > { %565 = vmatpush.bf16.msra.mxu2 %v7351_v34  ;;  %440 = vmatpush.bf16.msra.mxu1 %v7283_v62  ;;  %13208 = vst [vmem:[#allocation8_spill] sm:$0xff] %v9357_v39  ;;  %v9361_v40 = vadd.s32 8, %v9357_v39  ;;  %v7384_v62 = vld [vmem:[%s13022_s2 + $0xe8] sm:$0xf0]  ;;  %v7344_v17 = vld [vmem:[%s13022_s2 + $0x98] sm:$0xf0] }
  0x2d   : > { %299 = vadd.xlane.f32.xlu0 %v297_v18  ;;  %v7387_v63 = vor.u32 %v8133_v61, %v7384_v62  ;;  %v7347_v18 = vor.u32 %v8123_v16, %v7344_v17  ;;  %s12948_s26 = sand.u32 1, %s9082_s22   ;;  %s8265_s11 = sshll.u32 %s9152_s25, 4 }
  0x2e   : > { %428 = vmatpush.bf16.msra.mxu0 %v7263_v48  ;;  %8317 = vset.pattern.permute.xlu0 %v9357_v39  ;;  %13209 = vst [vmem:[#allocation9_spill] sm:$0xff] %v9361_v40  ;;  %s7233_s28 = sshll.u32 %s12948_s26, 4  ;;  %s7100_s12 = scalar_lea.hbm %s13025_s5, %s8265_s11 }
  0x2f   : > { %8318 = vset.pattern.permute.xlu1 %v9361_v40  ;;  %s267_s13 = scalar_lea.vmem [#allocation2], %s7233_s28  ;;  %s7103_s14 = sshll.u32 %s7100_s12, 4  ;;  %s7104_s14 = int_to_ptr.hbm [resolvable:$true] %s7103_s14 }
  0x30   : > { %566 = vmatpush.bf16.msra.mxu2 %v7343_v45  ;;  %441 = vmatpush.bf16.msra.mxu1 %v7275_v1  ;;  %s7084_s20 = scalar_lea.sflag [#allocation3], %s12948_s26  ;;  %s9016_s19 = scalar_lea.hbm %s13025_s5, 32 }
  0x32   : > { %429 = vmatpush.bf16.msra.mxu0 %v7255_v53  ;;  %315 = vadd.xlane.f32.xlu2 %v308_v24 }
  0x33   : > { %311 = vadd.xlane.f32.xlu1 %v306_v25 }
  0x34   : > { %567 = vmatpush.bf16.msra.mxu2 %v7335_v52  ;;  %442 = vmatpush.bf16.msra.mxu1 %v7267_v4  ;;  %v7379_v4 = vor.u32 %v8131_v2, %v7376_v3 }
  0x35   : > { %301 = vadd.xlane.f32.xlu0 %v298_v26 }
  0x36   : > { %430 = vmatpush.bf16.msra.mxu0 %v7247_v57  ;;  %v7392_v57 = vld [vmem:[%s13022_s2 + $0xf8] sm:$0xf0] }
  0x37   : > { %568 = vmatmul.bf16.vlgmr.msra.gmra.mxu2 %v9310_v56 }
  0x38   : > { %443 = vmatpush.bf16.msra.mxu1 %v7259_v7  ;;  %v7371_v7 = vor.u32 %v8129_v5, %v7368_v6 }
  0x39   : > { %431 = vmatmul.bf16.vlgmr.msra.gmra.mxu0 %v8102_v58 }
  0x3c   : > { %444 = vmatpush.bf16.msra.mxu1 %v7251_v10  ;;  %v7363_v10 = vor.u32 %v8127_v8, %v7360_v9 }
  0x3f   : > { %445 = vmatmul.bf16.vlgmr.msra.gmra.mxu1 %v8102_v58  ;;  %v7395_v58 = vor.u32 %v8135_v55, %v7392_v57 }
  0x41   : > { %579 = vmatpush.bf16.msra.mxu3 %v7395_v58 }
  0x45   : > { %580 = vmatpush.bf16.msra.mxu3 %v7387_v63 }
  0x47   : > { %573 = vmatmul.bf16.gmra.mxu2 %v9320_v59 }
  0x49   : > { %581 = vmatpush.bf16.msra.mxu3 %v7379_v4 }
  0x4d   : > { %582 = vmatpush.bf16.msra.mxu3 %v7371_v7 }
  0x51   : > { %583 = vmatpush.bf16.msra.mxu3 %v7363_v10 }
  0xb6   : > { %v432_v28 = vpop.f32.mrf.mxu0 }
  0xb7   : > { %v598_v29 = vpack.c.bf16 %v432_v28, %v432_v28 }
  0xba   : > { %v569_v11 = vpop.f32.mrf.mxu2 }
  0xbb   : > { %v602_v15 = vpack.c.bf16 %v569_v11, %v569_v11  ;;  %v8125_v11 = vld [vmem:[%s13022_s2 + $0xa4] sm:$0xf] }
  0xbc   : > { %v446_v41 = vpop.f32.mrf.mxu1  ;;  %v7355_v13 = vor.u32 %v8125_v11, %v7352_v12 }
  0xbd   : > { %v612_v21 = vunpack.c.l.b16 %v602_v15  ;;  %v600_v42 = vpack.c.bf16 %v446_v41, %v446_v41 }
  0xbe   : > { %v434_v36 = vpop.f32.mrf.mxu0  ;;  %584 = vmatpush.bf16.msra.mxu3 %v7355_v13 }
  0xbf   : > { %v599_v37 = vpack.c.bf16 %v434_v36, %v434_v36  ;;  %v3025_v43 = vsel %vm13085_vm0, %v600_v42, 0  ;;  %v9482_v36 = vpop.xlane.xlu0 %299 }
  0xc0   : > { %13212 = vst [vmem:[#allocation12_spill] sm:$0xff] %v9482_v36  ;;  %vm303_vm5 = vcmp.eq.f32.partialorder %v9482_v36, 0.0 }
  0xc2   : > { %v571_v19 = vpop.f32.mrf.mxu2  ;;  %585 = vmatpush.bf16.msra.mxu3 %v7347_v18 }
  0xc3   : > { %v603_v20 = vpack.c.bf16 %v571_v19, %v571_v19 }
  0xc4   : > { %v9365_v45 = vpop.f32.mrf.mxu1 }
  0xc5   : > { %v613_v22 = vunpack.c.l.b16 %v603_v20  ;;  %v601_v19 = vpack.c.bf16 %v9365_v45, %v9365_v45  ;;  %v8121_v20 = vld [vmem:[%s13022_s2 + $0x84] sm:$0xf] }
  0xc7   : > { %v614_v23 = vpack.c.b16 %v613_v22, %v612_v21  ;;  %v7336_v21 = vld [vmem:[%s13022_s2 + $0x88] sm:$0xf0]  ;;  %v9485_v42 = vpop.xlane.xlu0 %301 }
  0xc8   : > { %v7339_v22 = vor.u32 %v8121_v20, %v7336_v21  ;;  %13213 = vst [vmem:[#allocation13_spill] sm:$0xff] %v9485_v42  ;;  %vm304_vm6 = vcmp.eq.f32.partialorder %v9485_v42, 0.0 }
  0xc9   : > { %623 = vmatpush.bf16.xpose.msrb.mxu2 %v614_v23  ;;  %v3050_v23 = vsel %vm13085_vm0, %v601_v19, 0  ;;  %vm13130_vm0 = vcmask 64512  }
  0xca   : > { %v574_v27 = vpop.f32.mrf.mxu2  ;;  %586 = vmatpush.bf16.msra.mxu3 %v7339_v22 }
  0xcb   : > { %v604_v30 = vpack.c.bf16 %v574_v27, %v574_v27 }
  0xcd   : > { %v631_v32 = vunpack.c.l.b16 %v604_v30  ;;  %587 = vmatmul.bf16.vlgmr.msra.gmra.mxu3 %v9310_v56  ;;  %v9460_v56 = vpop.xlane.xlu2 %313 }
  0xce   : > { %3059 = vmatpush.bf16.msrb.mxu3 %v3050_v23  ;;  %13210 = vst [vmem:[#allocation10_spill] sm:$0xff] %v9460_v56  ;;  %vm319_vm3 = vcmp.eq.f32.partialorder %v9460_v56, 0.0 }
  0xd0   : > { %624 = vmatmul.bf16.vlgmr.msrb.gmra.mxu2 %v598_v29 }
  0xd1   : > { %3034 = vmatpush.bf16.msra.mxu2 %v3025_v43  ;;  %v9487_v43 = vpop.xlane.xlu1 %309 }
  0xd2   : > { %v576_v31 = vpop.f32.mrf.mxu2  ;;  %13214 = vst [vmem:[#allocation14_spill] sm:$0xff] %v9487_v43  ;;  %vm317_vm2 = vcmp.eq.f32.partialorder %v9487_v43, 0.0 }
  0xd3   : > { %v605_v33 = vpack.c.bf16 %v576_v31, %v576_v31 }
  0xd5   : > { %v632_v34 = vunpack.c.l.b16 %v605_v33  ;;  %v9464_v26 = vpop.xlane.xlu2 %315 }
  0xd6   : > { %13211 = vst [vmem:[#allocation11_spill] sm:$0xff] %v9464_v26  ;;  %vm320_vm4 = vcmp.eq.f32.partialorder %v9464_v26, 0.0 }
  0xd7   : > { %v633_v35 = vpack.c.b16 %v632_v34, %v631_v32 }
  0xd9   : > { %642 = vmatpush.bf16.xpose.msrb.mxu1 %v633_v35 }
  0xdd   : > { %592 = vmatmul.bf16.gmra.mxu3 %v9320_v59 }
  0xe0   : > { %643 = vmatmul.bf16.vlgmr.msrb.gmra.mxu1 %v599_v37 }
 0x153   : > { %v625_v44 = vpop.f32.mrf.mxu2 }
 0x154   : > { %v9367_v46 = vmul.f32 0.088388346, %v625_v44 }
 0x156   : > { %1736 = vxpose.xlu2.b32.start.end [1/1] (short) (narrow) %v9367_v46, 16  ;;  %v660_v47 = vperm.slane %v9367_v46, 0  ;;  %v686_v51 = vperm.slane %v9367_v46, 2  ;;  %v699_v52 = vperm.slane %v9367_v46, 3  ;;  %v738_v53 = vperm.slane %v9367_v46, 6 }
 0x157   : > { %v712_v54 = vperm.slane %v9367_v46, 4  ;;  %v725_v0 = vperm.slane %v9367_v46, 5  ;;  %v751_v14 = vperm.slane %v9367_v46, 7  ;;  %v673_v25 = vperm.slane %v9367_v46, 1  ;;  %v9494_v46 = vpop.xlane.xlu1 %311 }
 0x158   : > { %671 = vperm.xlu1 %8318, %v660_v47   ;;  %665 = vperm.xlu0 %8317, %v660_v47   ;;  %13215 = vst [vmem:[#allocation15_spill] sm:$0xff] %v9494_v46  ;;  %vm318_vm1 = vcmp.eq.f32.partialorder %v9494_v46, 0.0 }
 0x15b   : > { %v627_v48 = vpop.f32.mrf.mxu2 }
 0x15d   : > { %v644_v49 = vpop.f32.mrf.mxu1 }
 0x15e   : > { %v9392_v60 = vmul.f32 0.088388346, %v644_v49 }
 0x160   : > { %8321 = vset.pattern.permute.xlu1 %v9357_v39  ;;  %8322 = vset.pattern.permute.xlu0 %v9361_v40  ;;  %v764_v1 = vperm.slane %v9392_v60, 0  ;;  %v803_v15 = vperm.slane %v9392_v60, 3  ;;  %v829_v24 = vperm.slane %v9392_v60, 5  ;;  %v777_v34 = vperm.slane %v9392_v60, 1 }
 0x161   : > { %v790_v37 = vperm.slane %v9392_v60, 2  ;;  %v842_v57 = vperm.slane %v9392_v60, 6 }
 0x165   : > { %v646_v50 = vpop.f32.mrf.mxu1 }
 0x166   : > { %v816_v50 = vperm.slane %v9392_v60, 4 }
 0x168   : > { %691 = vperm.xlu1 %8321, %v686_v51   ;;  %710 = vperm.xlu0 %8322, %v699_v52  }
 0x170   : > { %704 = vperm.xlu1 %8321, %v699_v52   ;;  %8325 = vset.pattern.permute.xlu0 %v9357_v39 }
 0x178   : > { %8324 = vset.pattern.permute.xlu1 %v9361_v40  ;;  %743 = vperm.xlu0 %8325, %v738_v53  }
 0x180   : > { %723 = vperm.xlu1 %8324, %v712_v54   ;;  %8328 = vset.pattern.permute.xlu0 %v9361_v40 }
 0x188   : > { %736 = vperm.xlu1 %8324, %v725_v0   ;;  %775 = vperm.xlu0 %8328, %v764_v1  }
 0x190   : > { %8327 = vset.pattern.permute.xlu1 %v9357_v39  ;;  %8331 = vset.pattern.permute.xlu0 %v9357_v39 }
 0x198   : > { %756 = vperm.xlu1 %8327, %v751_v14   ;;  %808 = vperm.xlu0 %8331, %v803_v15  }
 0x1a0   : > { %8334 = vset.pattern.permute.xlu0 %v9361_v40 }
 0x1a8   : > { %840 = vperm.xlu0 %8334, %v829_v24  }
 0x1b0   : > { %8337 = vset.pattern.permute.xlu0 %v9357_v39 }
 0x1b8   : > { %8319 = vset.pattern.permute.xlu2 %v9357_v39 }
 0x1c7   : > { %678 = vperm.xlu2 %8319, %v673_v25  }
 0x1ca   : > { %v9492_v45 = vpop.permute.xlu0 %665  ;;  %v9501_v49 = vpop.permute.xlu1 %671 }
 0x1cd   : > { %1768 = vxpose.xlu1.b32.start.end [1/1] (short) (narrow) %v9392_v60, 16 }
 0x1cf   : > { %8320 = vset.pattern.permute.xlu2 %v9361_v40 }
 0x1d7   : > { %684 = vperm.xlu2 %8320, %v673_v25  }
 0x1da   : > { %v9499_v48 = vpop.permute.xlu0 %710 }
 0x1df   : > { %697 = vperm.xlu2 %8320, %v686_v51  }
 0x1e7   : > { %8323 = vset.pattern.permute.xlu2 %v9357_v39 }
 0x1ea   : > { %v9504_v52 = vpop.permute.xlu0 %743 }
 0x1ef   : > { %v9467_v59 = vpop.trf.xlu2  ;;  %717 = vperm.xlu2 %8323, %v712_v54  }
 0x1f0   : > { %v1804_v27 = vperm.slane %v9467_v59, 0  ;;  %v1811_v28 = vperm.slane %v9467_v59, 1  ;;  %v1818_v29 = vperm.slane %v9467_v59, 2  ;;  %v1825_v30 = vperm.slane %v9467_v59, 3 }
 0x1f1   : > { %v1839_v31 = vperm.slane %v9467_v59, 5  ;;  %v1846_v32 = vperm.slane %v9467_v59, 6  ;;  %v1832_v5 = vperm.slane %v9467_v59, 4 }
 0x1f2   : > { %1809 = vperm.xlu0 %8337, %v1804_v27  }
 0x1f7   : > { %730 = vperm.xlu2 %8323, %v725_v0   ;;  %v1753_v33 = vpop.trf.xlu2  ;;  %v855_v0 = vperm.slane %v9392_v60, 7 }
 0x1f8   : > { %v1860_v35 = vperm.slane %v1753_v33, 0  ;;  %v1867_v41 = vperm.slane %v1753_v33, 1  ;;  %v1874_v44 = vperm.slane %v1753_v33, 2  ;;  %v1881_v47 = vperm.slane %v1753_v33, 3 }
 0x1f9   : > { %v1888_v51 = vperm.slane %v1753_v33, 4  ;;  %v1895_v54 = vperm.slane %v1753_v33, 5  ;;  %v1902_v62 = vperm.slane %v1753_v33, 6  ;;  %v1909_v3 = vperm.slane %v1753_v33, 7 }
 0x1fa   : > { %1816 = vperm.xlu0 %8337, %v1811_v28   ;;  %v9509_v55 = vpop.permute.xlu0 %775 }
 0x1ff   : > { %8326 = vset.pattern.permute.xlu2 %v9361_v40 }
 0x202   : > { %1823 = vperm.xlu0 %8337, %v1818_v29  }
 0x207   : > { %749 = vperm.xlu2 %8326, %v738_v53   ;;  %v9506_v53 = vpop.permute.xlu1 %691 }
 0x20a   : > { %1830 = vperm.xlu0 %8337, %v1825_v30   ;;  %v9517_v63 = vpop.permute.xlu0 %808 }
 0x20f   : > { %762 = vperm.xlu2 %8326, %v751_v14   ;;  %v9512_v58 = vpop.permute.xlu1 %704 }
 0x212   : > { %1844 = vperm.xlu0 %8337, %v1839_v31  }
 0x217   : > { %8329 = vset.pattern.permute.xlu2 %v9357_v39 }
 0x21a   : > { %1851 = vperm.xlu0 %8337, %v1846_v32   ;;  %v9522_v4 = vpop.permute.xlu0 %840 }
 0x21f   : > { %782 = vperm.xlu2 %8329, %v777_v34  }
 0x221   : > { %v9515_v61 = vpop.permute.xlu2 %678 }
 0x222   : > { %1865 = vperm.xlu0 %8337, %v1860_v35  }
 0x227   : > { %795 = vperm.xlu2 %8329, %v790_v37  }
 0x22a   : > { %1872 = vperm.xlu0 %8337, %v1867_v41  }
 0x22f   : > { %8332 = vset.pattern.permute.xlu2 %v9361_v40  ;;  %769 = vperm.xlu1 %8327, %v764_v1   ;;  %v9520_v1 = vpop.permute.xlu1 %723 }
 0x231   : > { %v685_v2 = vpop.permute.xlu2 %684 }
 0x232   : > { %1879 = vperm.xlu0 %8337, %v1874_v44   ;;  %v9568_v44 = vsel %vm318_vm1, -inf, %v685_v2 }
 0x237   : > { %814 = vperm.xlu2 %8332, %v803_v15   ;;  %8330 = vset.pattern.permute.xlu1 %v9361_v40  ;;  %v9527_v6 = vpop.permute.xlu1 %736 }
 0x239   : > { %v9529_v7 = vpop.permute.xlu2 %697 }
 0x23a   : > { %1886 = vperm.xlu0 %8337, %v1881_v47  }
 0x23f   : > { %827 = vperm.xlu2 %8332, %v816_v50   ;;  %788 = vperm.xlu1 %8330, %v777_v34   ;;  %v9534_v9 = vpop.permute.xlu1 %756  ;;  %v13027_v34 = vmov 0  }
 0x242   : > { %1893 = vperm.xlu0 %8337, %v1888_v51  }
 0x247   : > { %8335 = vset.pattern.permute.xlu2 %v9357_v39  ;;  %801 = vperm.xlu1 %8330, %v790_v37  }
 0x249   : > { %v9536_v10 = vpop.permute.xlu2 %717 }
 0x24a   : > { %1900 = vperm.xlu0 %8337, %v1895_v54   ;;  %v9579_v54 = vsel %vm317_vm2, -inf, %v9512_v58  ;;  %v9596_v58 = vsel %vm317_vm2, -inf, %v9515_v61 }
 0x24f   : > { %847 = vperm.xlu2 %8335, %v842_v57   ;;  %8333 = vset.pattern.permute.xlu1 %v9357_v39 }
 0x251   : > { %v9540_v60 = vpop.permute.xlu2 %730 }
 0x252   : > { %1907 = vperm.xlu0 %8337, %v1902_v62  }
 0x257   : > { %860 = vperm.xlu2 %8335, %v855_v0   ;;  %821 = vperm.xlu1 %8333, %v816_v50  }
 0x25a   : > { %1914 = vperm.xlu0 %8337, %v1909_v3   ;;  %v9589_v3 = vsel %vm318_vm1, -inf, %v9520_v1  ;;  %v9605_v1 = vsel %vm317_vm2, -inf, %v9492_v45 }
 0x25f   : > { %1837 = vperm.xlu2 %8335, %v1832_v5   ;;  %834 = vperm.xlu1 %8333, %v829_v24   ;;  %v1853_v24 = vperm.slane %v9467_v59, 7  ;;  %v9559_v59 = vsel %vm318_vm1, -inf, %v9501_v49 }
 0x261   : > { %v9544_v18 = vpop.permute.xlu2 %749 }
 0x264   : > { %v9531_v8 = vpop.permute.xlu0 %1809 }
 0x267   : > { %8336 = vset.pattern.permute.xlu1 %v9361_v40 }
 0x269   : > { %v763_v25 = vpop.permute.xlu2 %762 }
 0x26c   : > { %v9538_v11 = vpop.permute.xlu0 %1816 }
 0x26d   : > { %v9820_v26 = vsel %vm303_vm5, -inf, %v9538_v11 }
 0x26e   : > { %13228 = vst [vmem:[#allocation28_spill] sm:$0xff] %v9820_v26 }
 0x26f   : > { %853 = vperm.xlu1 %8336, %v842_v57  }
 0x271   : > { %v1784_v12 = vpop.trf.xlu1 }
 0x272   : > { %v1944_v13 = vperm.slane %v1784_v12, 4  ;;  %v1916_v14 = vperm.slane %v1784_v12, 0  ;;  %v1965_v16 = vperm.slane %v1784_v12, 7  ;;  %v1923_v17 = vperm.slane %v1784_v12, 1 }
 0x273   : > { %v1930_v22 = vperm.slane %v1784_v12, 2  ;;  %v1937_v28 = vperm.slane %v1784_v12, 3  ;;  %v1951_v29 = vperm.slane %v1784_v12, 5  ;;  %v1958_v32 = vperm.slane %v1784_v12, 6 }
 0x274   : > { %1949 = vperm.xlu2 %8335, %v1944_v13   ;;  %1921 = vperm.xlu0 %8337, %v1916_v14   ;;  %v9542_v15 = vpop.permute.xlu0 %1823  ;;  %v9610_v12 = vsel %vm317_vm2, -inf, %v9504_v52  ;;  %v9619_v14 = vsel %vm317_vm2, -inf, %v9506_v53  ;;  %v9625_v52 = vsel %vm318_vm1, -inf, %v9529_v7  ;;  %v9636_v53 = vsel %vm318_vm1, -inf, %v9499_v48 }
 0x275   : > { %v9645_v7 = vsel %vm317_vm2, -inf, %v9536_v10 }
 0x277   : > { %866 = vperm.xlu1 %8336, %v855_v0  }
 0x279   : > { %v1785_v20 = vpop.trf.xlu1  ;;  %v783_v30 = vpop.permute.xlu2 %782 }
 0x27a   : > { %v1986_v21 = vperm.slane %v1785_v20, 2  ;;  %v2007_v27 = vperm.slane %v1785_v20, 5  ;;  %v1972_v33 = vperm.slane %v1785_v20, 0  ;;  %v1979_v41 = vperm.slane %v1785_v20, 1 }
 0x27b   : > { %v1993_v47 = vperm.slane %v1785_v20, 3  ;;  %v2000_v51 = vperm.slane %v1785_v20, 4  ;;  %v2014_v57 = vperm.slane %v1785_v20, 6  ;;  %v2021_v0 = vperm.slane %v1785_v20, 7 }
 0x27c   : > { %1970 = vperm.xlu2 %8335, %v1965_v16   ;;  %1928 = vperm.xlu0 %8337, %v1923_v17   ;;  %v9546_v19 = vpop.permute.xlu0 %1830  ;;  %v9629_v16 = vsel %vm318_vm1, -inf, %v763_v25  ;;  %v9667_v25 = vsel %vm318_vm1, -inf, %v9527_v6 }
 0x27d   : > { %13216 = vst [vmem:[#allocation16_spill] sm:$0xff] %v9667_v25 }
 0x27f   : > { %8338 = vset.pattern.permute.xlu1 %v9357_v39 }
 0x281   : > { %v9562_v35 = vpop.permute.xlu2 %795 }
 0x284   : > { %1991 = vperm.xlu2 %8335, %v1986_v21   ;;  %1935 = vperm.xlu0 %8337, %v1930_v22   ;;  %v9549_v23 = vpop.permute.xlu0 %1844  ;;  %v9649_v21 = vsel %vm319_vm3, -inf, %v783_v30  ;;  %v9658_v22 = vsel %vm317_vm2, -inf, %v9540_v60  ;;  %v9688_v30 = vsel %vm317_vm2, -inf, %v9534_v9  ;;  %v9706_v9 = vsel %vm320_vm4, -inf, %v9509_v55 }
 0x285   : > { %13217 = vst [vmem:[#allocation17_spill] sm:$0xff] %v9688_v30  ;;  %v9727_v55 = vsel %vm319_vm3, -inf, %v9562_v35 }
 0x286   : > { %13218 = vst [vmem:[#allocation18_spill] sm:$0xff] %v9706_v9 }
 0x287   : > { %1858 = vperm.xlu1 %8338, %v1853_v24   ;;  %13219 = vst [vmem:[#allocation19_spill] sm:$0xff] %v9727_v55 }
 0x28c   : > { %2012 = vperm.xlu2 %8335, %v2007_v27   ;;  %1942 = vperm.xlu0 %8337, %v1937_v28   ;;  %v9552_v31 = vpop.permute.xlu0 %1851  ;;  %v9680_v28 = vsel %vm318_vm1, -inf, %v9544_v18 }
 0x28f   : > { %1956 = vperm.xlu1 %8338, %v1951_v29  }
 0x291   : > { %v9571_v50 = vpop.permute.xlu2 %814 }
 0x294   : > { %8340 = vset.pattern.permute.xlu2 %v13027_v34  ;;  %1963 = vperm.xlu0 %8337, %v1958_v32   ;;  %v9564_v37 = vpop.permute.xlu0 %1865 }
 0x295   : > { %968 = vperm.xlu2 %8340, %v9559_v59  }
 0x297   : > { %1977 = vperm.xlu1 %8338, %v1972_v33  }
 0x299   : > { %v9582_v62 = vpop.permute.xlu2 %827 }
 0x29c   : > { %1984 = vperm.xlu0 %8337, %v1979_v41   ;;  %v9573_v49 = vpop.permute.xlu0 %1872  ;;  %v9711_v41 = vsel %vm320_vm4, -inf, %v9522_v4 }
 0x29d   : > { %974 = vperm.xlu2 %8340, %v9568_v44  }
 0x29f   : > { %1998 = vperm.xlu1 %8338, %v1993_v47  }
 0x2a1   : > { %v770_v13 = vpop.permute.xlu1 %769 }
 0x2a2   : > { %v9700_v33 = vsel %vm319_vm3, -inf, %v770_v13 }
 0x2a4   : > { %2005 = vperm.xlu0 %8337, %v2000_v51   ;;  %v9584_v2 = vpop.permute.xlu0 %1879 }
 0x2a5   : > { %983 = vperm.xlu2 %8340, %v9579_v54  }
 0x2a7   : > { %2019 = vperm.xlu1 %8338, %v2014_v57  }
 0x2a9   : > { %v9599_v5 = vpop.permute.xlu2 %847 }
 0x2aa   : > { %v9782_v43 = vsel %vm319_vm3, -inf, %v9599_v5 }
 0x2ac   : > { %2026 = vperm.xlu0 %8337, %v2021_v0   ;;  %v9614_v61 = vpop.permute.xlu0 %1886 }
 0x2ad   : > { %992 = vperm.xlu2 %8340, %v9589_v3  }
 0x2af   : > { %8341 = vset.pattern.permute.xlu1 %v13027_v34 }
 0x2b0   : > { %971 = vperm.xlu1 %8341, %v9596_v58  }
 0x2b1   : > { %v861_v45 = vpop.permute.xlu2 %860  ;;  %v789_v17 = vpop.permute.xlu1 %788 }
 0x2b2   : > { %v9719_v57 = vsel %vm320_vm4, -inf, %v789_v17  ;;  %v9731_v4 = vsel %vm319_vm3, -inf, %v861_v45  ;;  %v9749_v45 = vsel %vm320_vm4, -inf, %v9571_v50 }
 0x2b3   : > { %13220 = vst [vmem:[#allocation20_spill] sm:$0xff] %v9749_v45 }
 0x2b4   : > { %8339 = vset.pattern.permute.xlu0 %v13027_v34  ;;  %v9638_v20 = vpop.permute.xlu0 %1893  ;;  %v9761_v34 = vsel %vm320_vm4, -inf, %v9582_v62 }
 0x2b5   : > { %965 = vperm.xlu0 %8339, %v9605_v1   ;;  %1001 = vperm.xlu2 %8340, %v9610_v12  }
 0x2b8   : > { %977 = vperm.xlu1 %8341, %v9619_v14  }
 0x2b9   : > { %v9653_v48 = vpop.permute.xlu2 %1837  ;;  %v802_v24 = vpop.permute.xlu1 %801 }
 0x2ba   : > { %v9671_v27 = vsel %vm320_vm4, -inf, %v802_v24  ;;  %v9740_v24 = vsel %vm319_vm3, -inf, %v9517_v63 }
 0x2bc   : > { %v9661_v10 = vpop.permute.xlu0 %1900 }
 0x2bd   : > { %980 = vperm.xlu0 %8339, %v9625_v52   ;;  %1010 = vperm.xlu2 %8340, %v9629_v16  }
 0x2c0   : > { %986 = vperm.xlu1 %8341, %v9636_v53  }
 0x2c4   : > { %v9683_v6 = vpop.permute.xlu0 %1907 }
 0x2c5   : > { %989 = vperm.xlu0 %8339, %v9645_v7   ;;  %1019 = vperm.xlu2 %8340, %v9649_v21  }
 0x2c8   : > { %995 = vperm.xlu1 %8341, %v9658_v22  }
 0x2c9   : > { %v822_v29 = vpop.permute.xlu1 %821 }
 0x2ca   : > { %v9692_v32 = vsel %vm319_vm3, -inf, %v822_v29  ;;  %v9754_v29 = vsel %vm303_vm5, -inf, %v9531_v8  ;;  %v9773_v8 = vsel %vm303_vm5, -inf, %v9546_v19  ;;  %v9792_v19 = vsel %vm303_vm5, -inf, %v9549_v23 }
 0x2cb   : > { %13221 = vst [vmem:[#allocation21_spill] sm:$0xff] %v9754_v29  ;;  %v9808_v23 = vsel %vm303_vm5, -inf, %v9542_v15 }
 0x2cc   : > { %v9715_v47 = vpop.permute.xlu0 %1914  ;;  %13223 = vst [vmem:[#allocation23_spill] sm:$0xff] %v9773_v8 }
 0x2cd   : > { %998 = vperm.xlu0 %8339, %v9667_v25   ;;  %1028 = vperm.xlu2 %8340, %v9671_v27   ;;  %13225 = vst [vmem:[#allocation25_spill] sm:$0xff] %v9792_v19 }
 0x2ce   : > { %v9675_v60 = vpop.permute.xlu2 %1949  ;;  %13226 = vst [vmem:[#allocation26_spill] sm:$0xff] %v9808_v23 }
 0x2d0   : > { %1004 = vperm.xlu1 %8341, %v9680_v28  }
 0x2d1   : > { %v835_v51 = vpop.permute.xlu1 %834 }
 0x2d2   : > { %v9768_v46 = vsel %vm319_vm3, -inf, %v835_v51 }
 0x2d3   : > { %13222 = vst [vmem:[#allocation22_spill] sm:$0xff] %v9768_v46 }
 0x2d5   : > { %1007 = vperm.xlu0 %8339, %v9688_v30   ;;  %1037 = vperm.xlu2 %8340, %v9692_v32  }
 0x2d6   : > { %v9696_v18 = vpop.permute.xlu2 %1970 }
 0x2d8   : > { %1013 = vperm.xlu1 %8341, %v9700_v33  }
 0x2dd   : > { %1016 = vperm.xlu0 %8339, %v9706_v9   ;;  %1046 = vperm.xlu2 %8340, %v9711_v41  }
 0x2de   : > { %v9721_v0 = vpop.permute.xlu2 %1991 }
 0x2e0   : > { %1022 = vperm.xlu1 %8341, %v9719_v57  }
 0x2e1   : > { %v854_v17 = vpop.permute.xlu1 %853 }
 0x2e2   : > { %v9787_v40 = vsel %vm320_vm4, -inf, %v854_v17 }
 0x2e3   : > { %13224 = vst [vmem:[#allocation24_spill] sm:$0xff] %v9787_v40 }
 0x2e5   : > { %1025 = vperm.xlu0 %8339, %v9727_v55   ;;  %1055 = vperm.xlu2 %8340, %v9731_v4  }
 0x2e6   : > { %v9735_v13 = vpop.permute.xlu0 %1921  ;;  %v9743_v35 = vpop.permute.xlu2 %2012 }
 0x2e8   : > { %1031 = vperm.xlu1 %8341, %v9740_v24  }
 0x2e9   : > { %v867_v38 = vpop.permute.xlu1 %866 }
 0x2ea   : > { %v9800_v56 = vsel %vm320_vm4, -inf, %v867_v38 }
 0x2ed   : > { %1034 = vperm.xlu0 %8339, %v9749_v45   ;;  %2125 = vperm.xlu2 %8340, %v9754_v29   ;;  %v9813_v29 = vsel %vm303_vm5, -inf, %v9564_v37  ;;  %v9841_v45 = vsel %vm303_vm5, -inf, %v9653_v48 }
 0x2ee   : > { %v1929_v63 = vpop.permute.xlu0 %1928  ;;  %13227 = vst [vmem:[#allocation27_spill] sm:$0xff] %v9813_v29 }
 0x2ef   : > { %v9764_v50 = vpop.permute.xlu2 %968  ;;  %13231 = vst [vmem:[#allocation31_spill] sm:$0xff] %v9841_v45 }
 0x2f0   : > { %1040 = vperm.xlu1 %8341, %v9761_v34  }
 0x2f5   : > { %1043 = vperm.xlu0 %8339, %v9768_v46   ;;  %2134 = vperm.xlu2 %8340, %v9773_v8   ;;  %v9834_v46 = vsel %vm303_vm5, -inf, %v9614_v61  ;;  %v9851_v61 = vsel %vm303_vm5, -inf, %v9584_v2 }
 0x2f6   : > { %v9777_v62 = vpop.permute.xlu0 %1935  ;;  %13230 = vst [vmem:[#allocation30_spill] sm:$0xff] %v9834_v46 }
 0x2f7   : > { %v9796_v39 = vpop.permute.xlu2 %974  ;;  %13232 = vst [vmem:[#allocation32_spill] sm:$0xff] %v9851_v61  ;;  %v9951_v36 = vsel %vm304_vm6, -inf, %v9777_v62 }
 0x2f8   : > { %1049 = vperm.xlu1 %8341, %v9782_v43   ;;  %13246 = vst [vmem:[#allocation46_spill] sm:$0xff] %v9951_v36 }
 0x2f9   : > { %v1859_v51 = vpop.permute.xlu1 %1858 }
 0x2fa   : > { %v9829_v37 = vsel %vm303_vm5, -inf, %v1859_v51 }
 0x2fb   : > { %13229 = vst [vmem:[#allocation29_spill] sm:$0xff] %v9829_v37 }
 0x2fd   : > { %1052 = vperm.xlu0 %8339, %v9787_v40   ;;  %2140 = vperm.xlu2 %8340, %v9792_v19  }
 0x2fe   : > { %v1943_v5 = vpop.permute.xlu0 %1942 }
 0x2ff   : > { %v9822_v40 = vpop.permute.xlu2 %983 }
 0x300   : > { %1058 = vperm.xlu1 %8341, %v9800_v56  }
 0x301   : > { %v9803_v17 = vpop.permute.xlu1 %1956 }
 0x305   : > { %2131 = vperm.xlu0 %8339, %v9808_v23   ;;  %2149 = vperm.xlu2 %8340, %v9813_v29  }
 0x306   : > { %v1964_v38 = vpop.permute.xlu0 %1963 }
 0x307   : > { %v9846_v51 = vpop.permute.xlu2 %992 }
 0x308   : > { %2128 = vperm.xlu1 %8341, %v9820_v26  }
 0x309   : > { %v9825_v15 = vpop.permute.xlu1 %1977 }
 0x30d   : > { %2146 = vperm.xlu0 %8339, %v9829_v37   ;;  %2158 = vperm.xlu2 %8340, %v9834_v46   ;;  %v9856_v37 = vsel %vm303_vm5, -inf, %v9683_v6  ;;  %v9872_v6 = vsel %vm303_vm5, -inf, %v9661_v10  ;;  %v9891_v10 = vsel %vm304_vm6, -inf, %v9735_v13 }
 0x30e   : > { %v1985_v11 = vpop.permute.xlu0 %1984  ;;  %13233 = vst [vmem:[#allocation33_spill] sm:$0xff] %v9856_v37 }
 0x30f   : > { %v9867_v2 = vpop.permute.xlu2 %1001  ;;  %13235 = vst [vmem:[#allocation35_spill] sm:$0xff] %v9872_v6 }
 0x310   : > { %2137 = vperm.xlu1 %8341, %v9841_v45   ;;  %v9863_v45 = vsel %vm303_vm5, -inf, %v9552_v31  ;;  %13238 = vst [vmem:[#allocation38_spill] sm:$0xff] %v9891_v10 }
 0x311   : > { %v9844_v55 = vpop.permute.xlu1 %1998  ;;  %13234 = vst [vmem:[#allocation34_spill] sm:$0xff] %v9863_v45 }
 0x315   : > { %2155 = vperm.xlu0 %8339, %v9851_v61   ;;  %2167 = vperm.xlu2 %8340, %v9856_v37   ;;  %v9876_v61 = vsel %vm304_vm6, -inf, %v1929_v63  ;;  %v9883_v37 = vsel %vm303_vm5, -inf, %v9573_v49  ;;  %v9896_v63 = vsel %vm304_vm6, -inf, %v9675_v60  ;;  %v9915_v60 = vsel %vm304_vm6, -inf, %v9696_v18 }
 0x316   : > { %v2006_v48 = vpop.permute.xlu0 %2005  ;;  %13236 = vst [vmem:[#allocation36_spill] sm:$0xff] %v9876_v61 }
 0x317   : > { %13237 = vst [vmem:[#allocation37_spill] sm:$0xff] %v9883_v37  ;;  %v9900_v49 = vpop.permute.xlu2 %1010 }
 0x318   : > { %2143 = vperm.xlu1 %8341, %v9863_v45   ;;  %13239 = vst [vmem:[#allocation39_spill] sm:$0xff] %v9896_v63  ;;  %v13255_v45 = vlaneseq }
 0x319   : > { %v2020_v46 = vpop.permute.xlu1 %2019  ;;  %13241 = vst [vmem:[#allocation41_spill] sm:$0xff] %v9915_v60 }
 0x31a   : > { %v10019_v29 = vand.u32 127, %v13255_v45 }
 0x31c   : > { %v10022_v30 = vadd.s32 4294967288, %v10019_v29  ;;  %v1073_v19 = vperm.slane %v9822_v40, %v10019_v29  ;;  %v1082_v26 = vperm.slane %v9867_v2, %v10019_v29 }
 0x31d   : > { %2164 = vperm.xlu0 %8339, %v9872_v6   ;;  %2176 = vperm.xlu2 %8340, %v9876_v61   ;;  %v9907_v61 = vsel %vm303_vm5, -inf, %v9638_v20  ;;  %v9928_v20 = vsel %vm303_vm5, -inf, %v9715_v47 }
 0x31e   : > { %v2027_v31 = vpop.permute.xlu0 %2026  ;;  %13240 = vst [vmem:[#allocation40_spill] sm:$0xff] %v9907_v61  ;;  %v1077_v25 = vperm.slane %v9846_v51, %v10022_v30 }
 0x31f   : > { %13243 = vst [vmem:[#allocation43_spill] sm:$0xff] %v9928_v20 }
 0x320   : > { %2152 = vperm.xlu1 %8341, %v9883_v37   ;;  %v10013_v37 = vsel %vm304_vm6, -inf, %v2020_v46  ;;  %v1064_v46 = vperm.slane %v9764_v50, %v10022_v30 }
 0x321   : > { %13254 = vst [vmem:[#allocation54_spill] sm:$0xff] %v10013_v37 }
 0x322   : > { %v9886_v9 = vpop.permute.xlu1 %971 }
 0x325   : > { %2173 = vperm.xlu0 %8339, %v9891_v10   ;;  %2185 = vperm.xlu2 %8340, %v9896_v63   ;;  %v9919_v10 = vsel %vm304_vm6, -inf, %v1943_v5  ;;  %v9938_v5 = vsel %vm304_vm6, -inf, %v9721_v0 }
 0x326   : > { %13242 = vst [vmem:[#allocation42_spill] sm:$0xff] %v9919_v10 }
 0x327   : > { %v9902_v6 = vpop.permute.xlu0 %965  ;;  %13244 = vst [vmem:[#allocation44_spill] sm:$0xff] %v9938_v5 }
 0x328   : > { %2161 = vperm.xlu1 %8341, %v9907_v61   ;;  %v9930_v61 = vpop.permute.xlu2 %1019 }
 0x329   : > { %v1091_v51 = vperm.slane %v9930_v61, %v10019_v29 }
 0x32a   : > { %v9910_v13 = vpop.permute.xlu1 %977 }
 0x32d   : > { %2194 = vperm.xlu2 %8340, %v9915_v60   ;;  %2182 = vperm.xlu0 %8339, %v9919_v10   ;;  %v9942_v10 = vsel %vm304_vm6, -inf, %v1964_v38  ;;  %v9961_v38 = vsel %vm304_vm6, -inf, %v9743_v35 }
 0x32e   : > { %13245 = vst [vmem:[#allocation45_spill] sm:$0xff] %v9942_v10 }
 0x32f   : > { %v9923_v63 = vpop.permute.xlu0 %980  ;;  %13247 = vst [vmem:[#allocation47_spill] sm:$0xff] %v9961_v38 }
 0x330   : > { %2170 = vperm.xlu1 %8341, %v9928_v20   ;;  %v9954_v60 = vpop.permute.xlu2 %1028  ;;  %v10008_v20 = vsel %vm304_vm6, -inf, %v9844_v55  ;;  %v1071_v45 = vperm.slane %v9923_v63, %v10022_v30 }
 0x331   : > { %13253 = vst [vmem:[#allocation53_spill] sm:$0xff] %v10008_v20 }
 0x332   : > { %v9933_v18 = vpop.permute.xlu1 %986 }
 0x333   : > { %v1074_v50 = vperm.slane %v9933_v18, %v10022_v30 }
 0x335   : > { %2203 = vperm.xlu2 %8340, %v9938_v5   ;;  %2191 = vperm.xlu0 %8339, %v9942_v10   ;;  %v9965_v10 = vsel %vm304_vm6, -inf, %v1985_v11  ;;  %v9974_v5 = vsel %vm304_vm6, -inf, %v9803_v17  ;;  %v9983_v11 = vsel %vm304_vm6, -inf, %v2006_v48 }
 0x336   : > { %13248 = vst [vmem:[#allocation48_spill] sm:$0xff] %v9965_v10 }
 0x337   : > { %v9946_v47 = vpop.permute.xlu0 %989  ;;  %13249 = vst [vmem:[#allocation49_spill] sm:$0xff] %v9974_v5 }
 0x338   : > { %2179 = vperm.xlu1 %8341, %v9951_v36   ;;  %v9979_v35 = vpop.permute.xlu2 %1037  ;;  %13250 = vst [vmem:[#allocation50_spill] sm:$0xff] %v9983_v11  ;;  %v1076_v40 = vperm.slane %v9946_v47, %v10019_v29  ;;  %v1075_v47 = vsel %vm1065_vm7, %v1074_v50, %v1073_v19 }
 0x33a   : > { %v9956_v0 = vpop.permute.xlu1 %995 }
 0x33d   : > { %2212 = vperm.xlu2 %8340, %v9961_v38   ;;  %2200 = vperm.xlu0 %8339, %v9965_v10   ;;  %v9991_v38 = vsel %vm304_vm6, -inf, %v9825_v15 }
 0x33e   : > { %13251 = vst [vmem:[#allocation51_spill] sm:$0xff] %v9991_v38 }
 0x33f   : > { %v9969_v62 = vpop.permute.xlu0 %998 }
 0x340   : > { %2188 = vperm.xlu1 %8341, %v9974_v5   ;;  %v9998_v5 = vsel %vm304_vm6, -inf, %v2027_v31  ;;  %v10001_v48 = vpop.permute.xlu2 %1046 }
 0x341   : > { %13252 = vst [vmem:[#allocation52_spill] sm:$0xff] %v9998_v5 }
 0x342   : > { %v9977_v36 = vpop.permute.xlu1 %1004 }
 0x345   : > { %2209 = vperm.xlu0 %8339, %v9983_v11  }
 0x347   : > { %v9986_v10 = vpop.permute.xlu0 %1007 }
 0x348   : > { %2197 = vperm.xlu1 %8341, %v9991_v38   ;;  %v10015_v31 = vpop.permute.xlu2 %1055 }
 0x34a   : > { %v9994_v17 = vpop.permute.xlu1 %1013 }
 0x34d   : > { %2218 = vperm.xlu0 %8339, %v9998_v5  }
 0x34f   : > { %v10003_v11 = vpop.permute.xlu0 %1016 }
 0x350   : > { %2206 = vperm.xlu1 %8341, %v10008_v20   ;;  %v1062_v20 = vperm.slane %v9902_v6, %v10019_v29  ;;  %v10026_v8 = vpop.permute.xlu2 %2125  ;;  %v1067_v6 = vperm.slane %v9886_v9, %v10019_v29  ;;  %v1086_v9 = vperm.slane %v9900_v49, %v10022_v30  ;;  %v1089_v19 = vperm.slane %v10003_v11, %v10022_v30 }
 0x352   : > { %v1023_v15 = vpop.permute.xlu1 %1022  ;;  %v1066_v63 = vsel %vm1065_vm7, %v1064_v46, %v1062_v20  ;;  %v1095_v20 = vperm.slane %v9954_v60, %v10022_v30  ;;  %v1078_v46 = vsel %vm1065_vm7, %v1077_v25, %v1076_v40  ;;  %v1083_v60 = vperm.slane %v9977_v36, %v10022_v30 }
 0x353   : > { %v1092_v49 = vperm.slane %v1023_v15, %v10022_v30  ;;  %v1100_v25 = vperm.slane %v9979_v35, %v10019_v29  ;;  %v1088_v36 = vperm.slane %v9994_v17, %v10019_v29  ;;  %v1104_v35 = vperm.slane %v10001_v48, %v10022_v30 }
 0x357   : > { %v1026_v38 = vpop.permute.xlu0 %1025 }
 0x358   : > { %2215 = vperm.xlu1 %8341, %v10013_v37   ;;  %v1068_v37 = vperm.slane %v9796_v39, %v10022_v30  ;;  %v1070_v39 = vperm.slane %v9910_v13, %v10019_v29 }
 0x35a   : > { %v1032_v5 = vpop.permute.xlu1 %1031  ;;  %v1072_v2 = vsel %vm1065_vm7, %v1071_v45, %v1070_v39  ;;  %v1069_v23 = vsel %vm1065_vm7, %v1068_v37, %v1067_v6  ;;  %v1080_v45 = vperm.slane %v9969_v62, %v10022_v30  ;;  %v1094_v37 = vperm.slane %v1026_v38, %v10019_v29  ;;  %v2135_v62 = vpop.permute.xlu2 %2134 }
 0x35b   : > { %v1113_v18 = vsel %vm1112_vm8, %v1069_v23, %v1066_v63  ;;  %v1085_v23 = vperm.slane %v9986_v10, %v10019_v29  ;;  %v1079_v38 = vperm.slane %v9956_v0, %v10019_v29  ;;  %v1093_v10 = vsel %vm1065_vm7, %v1092_v49, %v1091_v51 }
 0x35c   : > { %v1115_v61 = vsel %vm1114_vm9, %v1072_v2, %v1113_v18  ;;  %v1097_v11 = vperm.slane %v1032_v5, %v10019_v29  ;;  %v1096_v0 = vsel %vm1065_vm7, %v1095_v20, %v1094_v37  ;;  %v1090_v2 = vsel %vm1065_vm7, %v1089_v19, %v1088_v36 }
 0x35d   : > { %v1117_v39 = vsel %vm1116_vm10, %v1075_v47, %v1115_v61  ;;  %v1081_v40 = vsel %vm1065_vm7, %v1080_v45, %v1079_v38  ;;  %v1087_v5 = vsel %vm1065_vm7, %v1086_v9, %v1085_v23  ;;  %v1109_v37 = vperm.slane %v10015_v31, %v10019_v29 }
 0x35e   : > { %v1119_v63 = vsel %vm13135_vm11, %v1078_v46, %v1117_v39 }
 0x35f   : > { %v1035_v55 = vpop.permute.xlu0 %1034 }
 0x360   : > { %v1098_v15 = vperm.slane %v1035_v55, %v10022_v30 }
 0x362   : > { %v1041_v42 = vpop.permute.xlu1 %1040  ;;  %v1099_v17 = vsel %vm1065_vm7, %v1098_v15, %v1097_v11  ;;  %v2141_v39 = vpop.permute.xlu2 %2140 }
 0x363   : > { %v1101_v50 = vperm.slane %v1041_v42, %v10022_v30  ;;  %v1084_v42 = vsel %vm1065_vm7, %v1083_v60, %v1082_v26  ;;  %v1121_v26 = vsel %vm13134_vm12, %v1081_v40, %v1119_v63 }
 0x364   : > { %v1123_v45 = vsel %vm13133_vm13, %v1084_v42, %v1121_v26 }
 0x365   : > { %v1102_v18 = vsel %vm1065_vm7, %v1101_v50, %v1100_v25  ;;  %v1125_v60 = vsel %vm13132_vm14, %v1087_v5, %v1123_v45 }
 0x366   : > { %v1136_v38 = vsel %vm13131_vm15, %v1125_v60, -inf }
 0x367   : > { %v1044_v13 = vpop.permute.xlu0 %1043 }
 0x368   : > { %v1103_v55 = vperm.slane %v1044_v13, %v10019_v29  ;;  %v1126_v13 = vsel %vm1112_vm8, %v1093_v10, %v1090_v2 }
 0x369   : > { %v1127_v49 = vsel %vm1114_vm9, %v1096_v0, %v1126_v13 }
 0x36a   : > { %v1050_v6 = vpop.permute.xlu1 %1049  ;;  %v1105_v20 = vsel %vm1065_vm7, %v1104_v35, %v1103_v55  ;;  %v1128_v61 = vsel %vm1116_vm10, %v1099_v17, %v1127_v49  ;;  %v2220_v35 = vperm.slane %v10026_v8, %v10019_v29  ;;  %v2150_v63 = vpop.permute.xlu2 %2149 }
 0x36b   : > { %v1106_v48 = vperm.slane %v1050_v6, %v10019_v29  ;;  %v1129_v23 = vsel %vm13135_vm11, %v1102_v18, %v1128_v61  ;;  %v2228_v60 = vperm.slane %v2150_v63, %v10019_v29 }
 0x36c   : > { %v1130_v19 = vsel %vm13134_vm12, %v1105_v20, %v1129_v23 }
 0x36f   : > { %v1053_v51 = vpop.permute.xlu0 %1052 }
 0x370   : > { %v1107_v47 = vperm.slane %v1053_v51, %v10022_v30  ;;  %v2223_v51 = vperm.slane %v2135_v62, %v10019_v29 }
 0x372   : > { %v1059_v46 = vpop.permute.xlu1 %1058  ;;  %v1108_v9 = vsel %vm1065_vm7, %v1107_v47, %v1106_v48  ;;  %v2225_v48 = vperm.slane %v2141_v39, %v10019_v29  ;;  %v2159_v8 = vpop.permute.xlu2 %2158 }
 0x373   : > { %v1110_v6 = vperm.slane %v1059_v46, %v10022_v30  ;;  %v1131_v25 = vsel %vm13133_vm13, %v1108_v9, %v1130_v19 }
 0x375   : > { %v1111_v15 = vsel %vm1065_vm7, %v1110_v6, %v1109_v37 }
 0x376   : > { %v1132_v50 = vsel %vm13132_vm14, %v1111_v15, %v1131_v25 }
 0x377   : > { %1137 = vmax.xlane.f32.xlu0 %v1136_v38  ;;  %v2132_v36 = vpop.permute.xlu0 %2131  ;;  %v1139_v31 = vsel %vm13131_vm15, %v1132_v50, -inf  ;;  %v2231_v38 = vperm.slane %v2159_v8, %v10019_v29 }
 0x378   : > { %1140 = vmax.xlane.f32.xlu2 %v1139_v31  ;;  %v2222_v42 = vperm.slane %v2132_v36, %v10019_v29 }
 0x37a   : > { %v2129_v10 = vpop.permute.xlu1 %2128  ;;  %v2168_v6 = vpop.permute.xlu2 %2167 }
 0x37b   : > { %v2221_v11 = vperm.slane %v2129_v10, %v10019_v29  ;;  %v2234_v63 = vperm.slane %v2168_v6, %v10019_v29 }
 0x37d   : > { %v2252_v40 = vsel %vm1112_vm8, %v2221_v11, %v2220_v35 }
 0x37e   : > { %v2253_v2 = vsel %vm1114_vm9, %v2222_v42, %v2252_v40 }
 0x37f   : > { %v2147_v55 = vpop.permute.xlu0 %2146  ;;  %v2254_v13 = vsel %vm1116_vm10, %v2223_v51, %v2253_v2 }
 0x380   : > { %v2227_v20 = vperm.slane %v2147_v55, %v10019_v29 }
 0x382   : > { %v2138_v0 = vpop.permute.xlu1 %2137  ;;  %v2177_v31 = vpop.permute.xlu2 %2176 }
 0x383   : > { %v2224_v17 = vperm.slane %v2138_v0, %v10019_v29 }
 0x385   : > { %v2255_v18 = vsel %vm13135_vm11, %v2224_v17, %v2254_v13 }
 0x386   : > { %v2256_v26 = vsel %vm13134_vm12, %v2225_v48, %v2255_v18  ;;  %v2237_v18 = vperm.slane %v2177_v31, %v10019_v29 }
 0x387   : > { %v2156_v5 = vpop.permute.xlu0 %2155 }
 0x388   : > { %v2230_v15 = vperm.slane %v2156_v5, %v10019_v29 }
 0x38a   : > { %v2144_v47 = vpop.permute.xlu1 %2143  ;;  %v2186_v51 = vpop.permute.xlu2 %2185 }
 0x38b   : > { %v2226_v49 = vperm.slane %v2144_v47, %v10019_v29 }
 0x38d   : > { %v2257_v61 = vsel %vm13133_vm13, %v2226_v49, %v2256_v26 }
 0x38e   : > { %v2258_v62 = vsel %vm13132_vm14, %v2227_v20, %v2257_v61  ;;  %v2240_v61 = vperm.slane %v2186_v51, %v10019_v29 }
 0x38f   : > { %v2165_v46 = vpop.permute.xlu0 %2164  ;;  %v2285_v45 = vsel %vm13130_vm0, %v2258_v62, -inf }
 0x390   : > { %2286 = vmax.xlane.f32.xlu2 %v2285_v45  ;;  %v2233_v11 = vperm.slane %v2165_v46, %v10019_v29 }
 0x392   : > { %v2153_v9 = vpop.permute.xlu1 %2152  ;;  %v2195_v62 = vpop.permute.xlu2 %2194 }
 0x393   : > { %v2229_v37 = vperm.slane %v2153_v9, %v10019_v29  ;;  %v2243_v6 = vperm.slane %v2195_v62, %v10019_v29 }
 0x395   : > { %v2259_v23 = vsel %vm1112_vm8, %v2229_v37, %v2228_v60 }
 0x396   : > { %v2260_v25 = vsel %vm1114_vm9, %v2230_v15, %v2259_v23 }
 0x397   : > { %v2174_v19 = vpop.permute.xlu0 %2173  ;;  %v2261_v36 = vsel %vm1116_vm10, %v2231_v38, %v2260_v25 }
 0x398   : > { %v2236_v5 = vperm.slane %v2174_v19, %v10019_v29 }
 0x39a   : > { %v2162_v39 = vpop.permute.xlu1 %2161  ;;  %v2266_v47 = vsel %vm1112_vm8, %v2237_v18, %v2236_v5  ;;  %v2204_v38 = vpop.permute.xlu2 %2203 }
 0x39b   : > { %v2232_v50 = vperm.slane %v2162_v39, %v10019_v29 }
 0x39d   : > { %v2262_v10 = vsel %vm13135_vm11, %v2232_v50, %v2261_v36 }
 0x39e   : > { %v2263_v35 = vsel %vm13134_vm12, %v2233_v11, %v2262_v10 }
 0x39f   : > { %v2183_v55 = vpop.permute.xlu0 %2182  ;;  %v2264_v42 = vsel %vm13133_vm13, %v2234_v63, %v2263_v35 }
 0x3a0   : > { %v2239_v20 = vperm.slane %v2183_v55, %v10019_v29  ;;  %v2246_v55 = vperm.slane %v2204_v38, %v10019_v29 }
 0x3a2   : > { %v2171_v40 = vpop.permute.xlu1 %2170 }
 0x3a3   : > { %v2235_v0 = vperm.slane %v2171_v40, %v10019_v29 }
 0x3a5   : > { %v2265_v2 = vsel %vm13132_vm14, %v2235_v0, %v2264_v42  ;;  %v2213_v0 = vpop.permute.xlu2 %2212 }
 0x3a6   : > { %v2288_v17 = vsel %vm13130_vm0, %v2265_v2, -inf  ;;  %v2249_v51 = vperm.slane %v2213_v0, %v10019_v29 }
 0x3a7   : > { %2289 = vmax.xlane.f32.xlu1 %v2288_v17  ;;  %v2192_v48 = vpop.permute.xlu0 %2191 }
 0x3a8   : > { %v2242_v9 = vperm.slane %v2192_v48, %v10019_v29 }
 0x3aa   : > { %v2180_v13 = vpop.permute.xlu1 %2179 }
 0x3ab   : > { %v2238_v8 = vperm.slane %v2180_v13, %v10019_v29 }
 0x3ad   : > { %v2267_v49 = vsel %vm1114_vm9, %v2238_v8, %v2266_v47 }
 0x3ae   : > { %v2268_v26 = vsel %vm1116_vm10, %v2239_v20, %v2267_v49 }
 0x3af   : > { %v2269_v37 = vsel %vm13135_vm11, %v2240_v61, %v2268_v26  ;;  %v2201_v60 = vpop.permute.xlu0 %2200 }
 0x3b0   : > { %v2245_v31 = vperm.slane %v2201_v60, %v10019_v29 }
 0x3b2   : > { %v2189_v46 = vpop.permute.xlu1 %2188 }
 0x3b3   : > { %v2241_v45 = vperm.slane %v2189_v46, %v10019_v29 }
 0x3b5   : > { %v2270_v23 = vsel %vm13134_vm12, %v2241_v45, %v2269_v37 }
 0x3b6   : > { %v2271_v19 = vsel %vm13133_vm13, %v2242_v9, %v2270_v23 }
 0x3b7   : > { %v2272_v15 = vsel %vm13132_vm14, %v2243_v6, %v2271_v19  ;;  %v2210_v36 = vpop.permute.xlu0 %2209 }
 0x3b8   : > { %v2291_v25 = vsel %vm13130_vm0, %v2272_v15, -inf  ;;  %v2248_v42 = vperm.slane %v2210_v36, %v10019_v29 }
 0x3b9   : > { %2292 = vmax.xlane.f32.xlu0 %v2291_v25 }
 0x3ba   : > { %v2198_v39 = vpop.permute.xlu1 %2197 }
 0x3bb   : > { %v2244_v50 = vperm.slane %v2198_v39, %v10019_v29 }
 0x3bd   : > { %v2273_v10 = vsel %vm1112_vm8, %v2245_v31, %v2244_v50 }
 0x3be   : > { %v2274_v63 = vsel %vm1114_vm9, %v2246_v55, %v2273_v10 }
 0x3bf   : > { %v2219_v2 = vpop.permute.xlu0 %2218 }
 0x3c0   : > { %v2251_v18 = vperm.slane %v2219_v2, %v10019_v29 }
 0x3c2   : > { %v2207_v11 = vpop.permute.xlu1 %2206 }
 0x3c3   : > { %v2247_v35 = vperm.slane %v2207_v11, %v10019_v29 }
 0x3c5   : > { %v2275_v40 = vsel %vm1116_vm10, %v2247_v35, %v2274_v63 }
 0x3c6   : > { %v2276_v17 = vsel %vm13135_vm11, %v2248_v42, %v2275_v40 }
 0x3c7   : > { %v2277_v48 = vsel %vm13134_vm12, %v2249_v51, %v2276_v17 }
 0x3ca   : > { %v2216_v5 = vpop.permute.xlu1 %2215 }
 0x3cb   : > { %v2250_v13 = vperm.slane %v2216_v5, %v10019_v29 }
 0x3cd   : > { %v2278_v8 = vsel %vm13133_vm13, %v2250_v13, %v2277_v48 }
 0x3ce   : > { %v2279_v47 = vsel %vm13132_vm14, %v2251_v18, %v2278_v8 }
 0x3cf   : > { %v2294_v49 = vsel %vm13130_vm0, %v2279_v47, -inf }
 0x3d0   : > { %2295 = vmax.xlane.f32.xlu2 %v2294_v49 }
 0x3ea   : > { %v10178_v20 = vpop.xlane.xlu0 %1137 }
 0x3eb   : > { %v1147_v26 = vperm.slane %v10178_v20, 3  ;;  %v1149_v62 = vperm.slane %v10178_v20, 5  ;;  %v1144_v60 = vperm.slane %v10178_v20, 0  ;;  %v1150_v23 = vperm.slane %v10178_v20, 6  ;;  %v10195_v25 = vpop.xlane.xlu2 %1140 }
 0x3ec   : > { %v1151_v39 = vperm.slane %v10178_v20, 7  ;;  %v1152_v36 = vperm.slane %v10195_v25, 0  ;;  %v1145_v11 = vperm.slane %v10178_v20, 1  ;;  %v1153_v63 = vperm.slane %v10195_v25, 1 }
 0x3ed   : > { %v1183_v61 = vsub.f32 %v9636_v53, %v1147_v26  ;;  %v1186_v45 = vsub.f32 %v9658_v22, %v1149_v62  ;;  %v1182_v9 = vsub.f32 %v9579_v54, %v1147_v26  ;;  %v1176_v53 = vsub.f32 %v9605_v1, %v1144_v60 }
 0x3ee   : > { %v1188_v15 = vsub.f32 %v9610_v12, %v1150_v23  ;;  %v1189_v22 = vsub.f32 %v9680_v28, %v1150_v23  ;;  %v1177_v50 = vsub.f32 %v9559_v59, %v1144_v60  ;;  %v1191_v12 = vsub.f32 %v9629_v16, %v1151_v39 }
 0x3ef   : > { %v1222_v46 = vmul.f32 1.442695, %v1183_v61  ;;  %v1228_v37 = vmul.f32 1.442695, %v1186_v45  ;;  %v1220_v6 = vmul.f32 1.442695, %v1182_v9  ;;  %v1192_v59 = vsub.f32 %v9700_v33, %v1152_v36 }
 0x3f0   : > { %v1208_v54 = vmul.f32 1.442695, %v1176_v53  ;;  %v1232_v38 = vmul.f32 1.442695, %v1188_v15  ;;  %v1234_v31 = vmul.f32 1.442695, %v1189_v22  ;;  %v1178_v16 = vsub.f32 %v9596_v58, %v1145_v11 }
 0x3f1   : > { %8687 = vpow2.f32 %v1222_v46  ;;  %v1210_v28 = vmul.f32 1.442695, %v1177_v50  ;;  %v1238_v35 = vmul.f32 1.442695, %v1191_v12  ;;  %v1240_v40 = vmul.f32 1.442695, %v1192_v59 }
 0x3f2   : > { %8689 = vpow2.f32 %v1220_v6  ;;  %v1194_v33 = vsub.f32 %v9649_v21, %v1153_v63  ;;  %v1212_v2 = vmul.f32 1.442695, %v1178_v16  ;;  %v1195_v17 = vsub.f32 %v9719_v57, %v1153_v63 }
 0x3f3   : > { %8691 = vpow2.f32 %v1228_v37  ;;  %v1154_v58 = vperm.slane %v10195_v25, 2  ;;  %v1179_v13 = vsub.f32 %v9568_v44, %v1145_v11  ;;  %v1155_v18 = vperm.slane %v10195_v25, 3 }
 0x3f4   : > { %8693 = vpow2.f32 %v1208_v54  ;;  %v1244_v5 = vmul.f32 1.442695, %v1194_v33  ;;  %v1246_v21 = vmul.f32 1.442695, %v1195_v17  ;;  %v1146_v57 = vperm.slane %v10178_v20, 2 }
 0x3f5   : > { %8695 = vpow2.f32 %v1232_v38  ;;  %v1197_v47 = vsub.f32 %v9671_v27, %v1154_v58  ;;  %v1214_v49 = vmul.f32 1.442695, %v1179_v13  ;;  %v1198_v44 = vsub.f32 %v9740_v24, %v1155_v18 }
 0x3f6   : > { %8697 = vpow2.f32 %v1234_v31  ;;  %v1180_v61 = vsub.f32 %v9619_v14, %v1146_v57  ;;  %v1156_v46 = vperm.slane %v10195_v25, 4  ;;  %v1181_v23 = vsub.f32 %v9625_v52, %v1146_v57 }
 0x3f7   : > { %v10189_v19 = vpop.eup %8687  ;;  %8699 = vpow2.f32 %v1210_v28  ;;  %v1250_v45 = vmul.f32 1.442695, %v1197_v47  ;;  %v1252_v27 = vmul.f32 1.442695, %v1198_v44  ;;  %v1157_v53 = vperm.slane %v10195_v25, 5  ;;  %v13262_v47 = vld [vmem:[#allocation26_spill] sm:$0xff] }
 0x3f8   : > { %1326 = vperm.xlu0 %8339, %v10189_v19   ;;  %v10200_v10 = vpop.eup %8689  ;;  %8701 = vpow2.f32 %v1238_v35  ;;  %v1216_v6 = vmul.f32 1.442695, %v1180_v61  ;;  %v1200_v24 = vsub.f32 %v9692_v32, %v1156_v46  ;;  %v1201_v60 = vsub.f32 %v9761_v34, %v1156_v46  ;;  %v13265_v46 = vld [vmem:[#allocation16_spill] sm:$0xff] }
 0x3f9   : > { %v10202_v1 = vpop.eup %8691  ;;  %1323 = vperm.xlu2 %8340, %v10200_v10   ;;  %8703 = vpow2.f32 %v1240_v40  ;;  %v1158_v22 = vperm.slane %v10195_v25, 6  ;;  %v1148_v34 = vperm.slane %v10178_v20, 4  ;;  %v1218_v50 = vmul.f32 1.442695, %v1181_v23  ;;  %v13275_v20 = vld [vmem:[#allocation34_spill] sm:$0xff] }
 0x3fa   : > { %v10213_v55 = vpop.eup %8693  ;;  %8705 = vpow2.f32 %v1212_v2  ;;  %v1256_v15 = vmul.f32 1.442695, %v1200_v24  ;;  %v1258_v54 = vmul.f32 1.442695, %v1201_v60  ;;  %v1203_v52 = vsub.f32 %v9711_v41, %v1157_v53 }
 0x3fb   : > { %1305 = vperm.xlu1 %8341, %v10213_v55   ;;  %v10218_v0 = vpop.eup %8695  ;;  %8707 = vpow2.f32 %v1244_v5  ;;  %v1204_v31 = vsub.f32 %v9782_v43, %v1158_v22  ;;  %v1184_v28 = vsub.f32 %v9645_v7, %v1148_v34  ;;  %v1159_v11 = vperm.slane %v10195_v25, 7 }
 0x3fc   : > { %v10220_v42 = vpop.eup %8697  ;;  %8709 = vpow2.f32 %v1246_v21  ;;  %v1262_v59 = vmul.f32 1.442695, %v1203_v52  ;;  %v1185_v2 = vsub.f32 %v9589_v3, %v1148_v34  ;;  %v13263_v3 = vld [vmem:[#allocation28_spill] sm:$0xff]  ;;  %v13268_v34 = vld [vmem:[#allocation25_spill] sm:$0xff] }
 0x3fd   : > { %v10226_v51 = vpop.eup %8699  ;;  %8711 = vpow2.f32 %v1214_v49  ;;  %v1264_v35 = vmul.f32 1.442695, %v1204_v31  ;;  %v1224_v16 = vmul.f32 1.442695, %v1184_v28  ;;  %v1206_v43 = vsub.f32 %v9731_v4, %v1159_v11 }
 0x3fe   : > { %v10232_v48 = vpop.eup %8701  ;;  %8713 = vpow2.f32 %v1250_v45  ;;  %v1207_v40 = vsub.f32 %v9800_v56, %v1159_v11  ;;  %v1226_v56 = vmul.f32 1.442695, %v1185_v2  ;;  %v1187_v45 = vsub.f32 %v13265_v46, %v1149_v62  ;;  %v13269_v62 = vld [vmem:[#allocation23_spill] sm:$0xff]  ;;  %v13271_v11 = vld [vmem:[#allocation17_spill] sm:$0xff] }
 0x3ff   : > { %13256 = vst [vmem:[#allocation55_spill] sm:$0xff] %v10232_v48  ;;  %v10234_v8 = vpop.eup %8703  ;;  %8715 = vpow2.f32 %v1252_v27  ;;  %v1268_v17 = vmul.f32 1.442695, %v1206_v43 }
 0x400   : > { %1335 = vperm.xlu0 %8339, %v10202_v1   ;;  %13257 = vst [vmem:[#allocation56_spill] sm:$0xff] %v10234_v8  ;;  %v10245_v26 = vpop.eup %8705  ;;  %8717 = vpow2.f32 %v1216_v6  ;;  %v1270_v13 = vmul.f32 1.442695, %v1207_v40 }
 0x401   : > { %1341 = vperm.xlu2 %8340, %v10218_v0   ;;  %v10250_v9 = vpop.eup %8707  ;;  %8719 = vpow2.f32 %v1256_v15 }
 0x402   : > { %13258 = vst [vmem:[#allocation57_spill] sm:$0xff] %v10250_v9  ;;  %v10252_v37 = vpop.eup %8709  ;;  %8721 = vpow2.f32 %v1258_v54  ;;  %v1230_v54 = vmul.f32 1.442695, %v1187_v45 }
 0x403   : > { %1308 = vperm.xlu1 %8341, %v10226_v51   ;;  %13259 = vst [vmem:[#allocation58_spill] sm:$0xff] %v10252_v37  ;;  %v10258_v14 = vpop.eup %8711  ;;  %8723 = vpow2.f32 %v1218_v50  ;;  %v10290_v7 = vpop.xlane.xlu2 %2286 }
 0x404   : > { %v10264_v32 = vpop.eup %8713  ;;  %8725 = vpow2.f32 %v1262_v59  ;;  %v2303_v5 = vperm.slane %v10290_v7, 2  ;;  %v2302_v4 = vperm.slane %v10290_v7, 1  ;;  %v2306_v27 = vperm.slane %v10290_v7, 5 }
 0x405   : > { %v10266_v38 = vpop.eup %8715  ;;  %8727 = vpow2.f32 %v1264_v35  ;;  %v2304_v24 = vperm.slane %v10290_v7, 3  ;;  %v1190_v59 = vsub.f32 %v13271_v11, %v1151_v39  ;;  %v2307_v43 = vperm.slane %v10290_v7, 6 }
 0x406   : > { %v10277_v12 = vpop.eup %8717  ;;  %8729 = vpow2.f32 %v1224_v16  ;;  %v2367_v49 = vsub.f32 %v13262_v47, %v2303_v5  ;;  %v2366_v44 = vsub.f32 %v13263_v3, %v2302_v4  ;;  %v2370_v50 = vsub.f32 %v13268_v34, %v2306_v27  ;;  %v13276_v47 = vld [vmem:[#allocation18_spill] sm:$0xff] }
 0x407   : > { %v10282_v41 = vpop.eup %8719  ;;  %8731 = vpow2.f32 %v1268_v17  ;;  %v2368_v52 = vsub.f32 %v13269_v62, %v2304_v24  ;;  %v1236_v5 = vmul.f32 1.442695, %v1190_v59  ;;  %v2371_v39 = vsub.f32 %v13275_v20, %v2307_v43  ;;  %v13282_v62 = vld [vmem:[#allocation19_spill] sm:$0xff] }
 0x408   : > { %1344 = vperm.xlu0 %8339, %v10220_v42   ;;  %13260 = vst [vmem:[#allocation59_spill] sm:$0xff] %v10282_v41  ;;  %v10284_v63 = vpop.eup %8721  ;;  %8733 = vpow2.f32 %v1270_v13  ;;  %v2401_v6 = vmul.f32 1.442695, %v2367_v49  ;;  %v2399_v60 = vmul.f32 1.442695, %v2366_v44  ;;  %v13274_v13 = vld [vmem:[#allocation27_spill] sm:$0xff]  ;;  %v1193_v49 = vsub.f32 %v13276_v47, %v1152_v36 }
 0x409   : > { %1350 = vperm.xlu2 %8340, %v10232_v48   ;;  %13261 = vst [vmem:[#allocation60_spill] sm:$0xff] %v10284_v63  ;;  %v10292_v33 = vpop.eup %8723  ;;  %8735 = vpow2.f32 %v1226_v56  ;;  %v2407_v35 = vmul.f32 1.442695, %v2370_v50  ;;  %v2403_v40 = vmul.f32 1.442695, %v2368_v52  ;;  %v13280_v36 = vld [vmem:[#allocation37_spill] sm:$0xff]  ;;  %v1196_v52 = vsub.f32 %v13282_v62, %v1154_v58 }
 0x40a   : > { %v10298_v21 = vpop.eup %8725  ;;  %8737 = vpow2.f32 %v2401_v6  ;;  %v2409_v46 = vmul.f32 1.442695, %v2371_v39  ;;  %v1242_v24 = vmul.f32 1.442695, %v1193_v49  ;;  %v13286_v58 = vld [vmem:[#allocation40_spill] sm:$0xff] }
 0x40b   : > { %1311 = vperm.xlu1 %8341, %v10245_v26   ;;  %v10300_v57 = vpop.eup %8727  ;;  %8739 = vpow2.f32 %v2399_v60  ;;  %v13279_v60 = vld [vmem:[#allocation30_spill] sm:$0xff]  ;;  %v13288_v49 = vld [vmem:[#allocation20_spill] sm:$0xff] }
 0x40c   : > { %v10306_v61 = vpop.eup %8729  ;;  %8741 = vpow2.f32 %v1230_v54 }
 0x40d   : > { %13264 = vst [vmem:[#allocation26_spill] sm:$0xff] %v10306_v61  ;;  %v10314_v23 = vpop.eup %8731  ;;  %8743 = vpow2.f32 %v2407_v35 }
 0x40e   : > { %13266 = vst [vmem:[#allocation28_spill] sm:$0xff] %v10314_v23  ;;  %v10316_v15 = vpop.eup %8733  ;;  %8745 = vpow2.f32 %v2403_v40 }
 0x40f   : > { %13267 = vst [vmem:[#allocation16_spill] sm:$0xff] %v10316_v15  ;;  %v10324_v28 = vpop.eup %8735  ;;  %8747 = vpow2.f32 %v1236_v5  ;;  %v1248_v5 = vmul.f32 1.442695, %v1196_v52 }
 0x410   : > { %1353 = vperm.xlu0 %8339, %v10234_v8   ;;  %13270 = vst [vmem:[#allocation25_spill] sm:$0xff] %v10324_v28  ;;  %v10332_v2 = vpop.eup %8737 }
 0x411   : > { %1359 = vperm.xlu2 %8340, %v10250_v9   ;;  %13272 = vst [vmem:[#allocation23_spill] sm:$0xff] %v10332_v2  ;;  %v10334_v17 = vpop.eup %8739 }
 0x412   : > { %13273 = vst [vmem:[#allocation17_spill] sm:$0xff] %v10334_v17  ;;  %v10340_v56 = vpop.eup %8741 }
 0x413   : > { %1314 = vperm.xlu1 %8341, %v10258_v14   ;;  %v10348_v27 = vpop.eup %8743 }
 0x414   : > { %13277 = vst [vmem:[#allocation27_spill] sm:$0xff] %v10348_v27  ;;  %v10350_v6 = vpop.eup %8745 }
 0x415   : > { %13278 = vst [vmem:[#allocation34_spill] sm:$0xff] %v10350_v6  ;;  %v10356_v50 = vpop.eup %8747 }
 0x416   : > { %13281 = vst [vmem:[#allocation18_spill] sm:$0xff] %v10356_v50 }
 0x418   : > { %1362 = vperm.xlu0 %8339, %v10252_v37  }
 0x419   : > { %1368 = vperm.xlu2 %8340, %v10264_v32  }
 0x41a   : > { %v10322_v31 = vpop.xlane.xlu1 %2289 }
 0x41b   : > { %1317 = vperm.xlu1 %8341, %v10277_v12   ;;  %v2309_v16 = vperm.slane %v10322_v31, 0  ;;  %v2312_v3 = vperm.slane %v10322_v31, 3  ;;  %v2310_v45 = vperm.slane %v10322_v31, 1  ;;  %v2315_v11 = vperm.slane %v10322_v31, 6 }
 0x41c   : > { %v2313_v35 = vperm.slane %v10322_v31, 4 }
 0x41d   : > { %v2373_v4 = vsub.f32 %v13274_v13, %v2309_v16  ;;  %v2376_v54 = vsub.f32 %v13279_v60, %v2312_v3  ;;  %v2374_v34 = vsub.f32 %v13280_v36, %v2310_v45  ;;  %v13285_v13 = vld [vmem:[#allocation33_spill] sm:$0xff]  ;;  %v1199_v3 = vsub.f32 %v13288_v49, %v1155_v18  ;;  %v13292_v18 = vld [vmem:[#allocation43_spill] sm:$0xff] }
 0x41e   : > { %v2377_v20 = vsub.f32 %v13286_v58, %v2313_v35  ;;  %v2316_v45 = vperm.slane %v10322_v31, 7 }
 0x41f   : > { %v2413_v44 = vmul.f32 1.442695, %v2373_v4  ;;  %v2419_v59 = vmul.f32 1.442695, %v2376_v54  ;;  %v2415_v16 = vmul.f32 1.442695, %v2374_v34  ;;  %v2379_v4 = vsub.f32 %v13285_v13, %v2315_v11 }
 0x420   : > { %1371 = vperm.xlu0 %8339, %v10266_v38   ;;  %v1254_v36 = vmul.f32 1.442695, %v1199_v3  ;;  %v13291_v34 = vld [vmem:[#allocation36_spill] sm:$0xff]  ;;  %v2380_v52 = vsub.f32 %v13292_v18, %v2316_v45  ;;  %v13296_v3 = vld [vmem:[#allocation39_spill] sm:$0xff] }
 0x421   : > { %1377 = vperm.xlu2 %8340, %v10282_v41   ;;  %8749 = vpow2.f32 %v2413_v44  ;;  %v2425_v44 = vmul.f32 1.442695, %v2379_v4 }
 0x422   : > { %8751 = vpow2.f32 %v2409_v46  ;;  %v2427_v13 = vmul.f32 1.442695, %v2380_v52 }
 0x423   : > { %1320 = vperm.xlu1 %8341, %v10292_v33   ;;  %8753 = vpow2.f32 %v1242_v24  ;;  %v2421_v24 = vmul.f32 1.442695, %v2377_v20 }
 0x424   : > { %8755 = vpow2.f32 %v2419_v59  ;;  %v13293_v59 = vld [vmem:[#allocation22_spill] sm:$0xff] }
 0x425   : > { %8757 = vpow2.f32 %v2415_v16  ;;  %v1202_v35 = vsub.f32 %v13293_v59, %v1157_v53  ;;  %v13297_v53 = vld [vmem:[#allocation46_spill] sm:$0xff] }
 0x426   : > { %8759 = vpow2.f32 %v1248_v5 }
 0x427   : > { %v10364_v43 = vpop.eup %8749  ;;  %8761 = vpow2.f32 %v2425_v44  ;;  %v1260_v49 = vmul.f32 1.442695, %v1202_v35 }
 0x428   : > { %1380 = vperm.xlu0 %8339, %v10284_v63   ;;  %13283 = vst [vmem:[#allocation30_spill] sm:$0xff] %v10364_v43  ;;  %v10366_v40 = vpop.eup %8751  ;;  %8763 = vpow2.f32 %v2421_v24  ;;  %v13298_v24 = vld [vmem:[#allocation24_spill] sm:$0xff] }
 0x429   : > { %1386 = vperm.xlu2 %8340, %v10298_v21   ;;  %13284 = vst [vmem:[#allocation37_spill] sm:$0xff] %v10366_v40  ;;  %v10374_v47 = vpop.eup %8753  ;;  %8765 = vpow2.f32 %v1254_v36  ;;  %v1205_v36 = vsub.f32 %v13298_v24, %v1158_v22  ;;  %v13302_v22 = vld [vmem:[#allocation49_spill] sm:$0xff] }
 0x42a   : > { %13287 = vst [vmem:[#allocation19_spill] sm:$0xff] %v10374_v47  ;;  %v10382_v60 = vpop.eup %8755 }
 0x42b   : > { %1329 = vperm.xlu1 %8341, %v10306_v61   ;;  %13289 = vst [vmem:[#allocation33_spill] sm:$0xff] %v10382_v60  ;;  %v10384_v54 = vpop.eup %8757 }
 0x42c   : > { %v10372_v39 = vpop.xlane.xlu0 %2292  ;;  %13290 = vst [vmem:[#allocation40_spill] sm:$0xff] %v10384_v54  ;;  %v10390_v11 = vpop.eup %8759 }
 0x42d   : > { %v2318_v46 = vperm.slane %v10372_v39, 1  ;;  %v2321_v16 = vperm.slane %v10372_v39, 4  ;;  %v2319_v4 = vperm.slane %v10372_v39, 2  ;;  %v10398_v58 = vpop.eup %8761  ;;  %v2322_v18 = vperm.slane %v10372_v39, 5 }
 0x42e   : > { %13294 = vst [vmem:[#allocation20_spill] sm:$0xff] %v10398_v58  ;;  %v10400_v20 = vpop.eup %8763 }
 0x42f   : > { %v2382_v62 = vsub.f32 %v13291_v34, %v2318_v46  ;;  %13295 = vst [vmem:[#allocation36_spill] sm:$0xff] %v10400_v20  ;;  %v2385_v44 = vsub.f32 %v13296_v3, %v2321_v16  ;;  %v2383_v46 = vsub.f32 %v13297_v53, %v2319_v4  ;;  %v10406_v45 = vpop.eup %8765  ;;  %v2324_v34 = vperm.slane %v10372_v39, 7 }
 0x430   : > { %1389 = vperm.xlu0 %8339, %v10300_v57   ;;  %v1266_v16 = vmul.f32 1.442695, %v1205_v36  ;;  %v2386_v4 = vsub.f32 %v13302_v22, %v2322_v18  ;;  %v2305_v18 = vperm.slane %v10290_v7, 4  ;;  %v13306_v22 = vld [vmem:[#allocation44_spill] sm:$0xff] }
 0x431   : > { %1395 = vperm.xlu2 %8340, %v10314_v23   ;;  %v2431_v5 = vmul.f32 1.442695, %v2382_v62  ;;  %v2437_v62 = vmul.f32 1.442695, %v2385_v44  ;;  %v2433_v52 = vmul.f32 1.442695, %v2383_v46 }
 0x432   : > { %v13303_v44 = vld [vmem:[#allocation21_spill] sm:$0xff]  ;;  %v2439_v36 = vmul.f32 1.442695, %v2386_v4  ;;  %v13308_v4 = vld [vmem:[#allocation31_spill] sm:$0xff] }
 0x433   : > { %1332 = vperm.xlu1 %8341, %v10324_v28   ;;  %8767 = vpow2.f32 %v2431_v5  ;;  %v2301_v5 = vperm.slane %v10290_v7, 0 }
 0x434   : > { %8769 = vpow2.f32 %v2427_v13  ;;  %v13301_v13 = vld [vmem:[#allocation41_spill] sm:$0xff] }
 0x435   : > { %8771 = vpow2.f32 %v1260_v49  ;;  %v2388_v25 = vsub.f32 %v13301_v13, %v2324_v34  ;;  %v2365_v53 = vsub.f32 %v13303_v44, %v2301_v5  ;;  %v13307_v5 = vld [vmem:[#allocation51_spill] sm:$0xff]  ;;  %v2369_v44 = vsub.f32 %v13308_v4, %v2305_v18  ;;  %v13314_v4 = vld [vmem:[#allocation29_spill] sm:$0xff] }
 0x436   : > { %8773 = vpow2.f32 %v2437_v62 }
 0x437   : > { %8775 = vpow2.f32 %v2433_v52  ;;  %v2443_v46 = vmul.f32 1.442695, %v2388_v25  ;;  %v2397_v52 = vmul.f32 1.442695, %v2365_v53 }
 0x438   : > { %1398 = vperm.xlu0 %8339, %v10316_v15   ;;  %8777 = vpow2.f32 %v1266_v16 }
 0x439   : > { %2500 = vperm.xlu2 %8340, %v10332_v2   ;;  %v10414_v59 = vpop.eup %8767  ;;  %8779 = vpow2.f32 %v2443_v46 }
 0x43a   : > { %13299 = vst [vmem:[#allocation43_spill] sm:$0xff] %v10414_v59  ;;  %v10416_v35 = vpop.eup %8769  ;;  %8781 = vpow2.f32 %v2439_v36  ;;  %v2308_v36 = vperm.slane %v10290_v7, 7 }
 0x43b   : > { %1338 = vperm.xlu1 %8341, %v10340_v56   ;;  %13300 = vst [vmem:[#allocation22_spill] sm:$0xff] %v10416_v35  ;;  %v10425_v3 = vpop.eup %8771  ;;  %8783 = vpow2.f32 %v2397_v52 }
 0x43c   : > { %v10431_v13 = vpop.eup %8773  ;;  %v2372_v15 = vsub.f32 %v13314_v4, %v2308_v36  ;;  %v13317_v36 = vld [vmem:[#allocation54_spill] sm:$0xff] }
 0x43d   : > { %13304 = vst [vmem:[#allocation39_spill] sm:$0xff] %v10431_v13  ;;  %v10433_v62 = vpop.eup %8775 }
 0x43e   : > { %13305 = vst [vmem:[#allocation46_spill] sm:$0xff] %v10433_v62  ;;  %v10440_v16 = vpop.eup %8777 }
 0x440   : > { %2497 = vperm.xlu0 %8339, %v10334_v17  }
 0x441   : > { %2509 = vperm.xlu2 %8340, %v10348_v27  }
 0x443   : > { %1347 = vperm.xlu1 %8341, %v10356_v50   ;;  %v10423_v49 = vpop.xlane.xlu2 %2295  ;;  %v13336_v50 = vld [vmem:[#allocation52_spill] sm:$0xff] }
 0x444   : > { %v2327_v24 = vperm.slane %v10423_v49, 2  ;;  %v2325_v34 = vperm.slane %v10423_v49, 0  ;;  %v2328_v53 = vperm.slane %v10423_v49, 3  ;;  %v2331_v7 = vperm.slane %v10423_v49, 6 }
 0x446   : > { %v2389_v25 = vsub.f32 %v13307_v5, %v2325_v34  ;;  %v2405_v34 = vmul.f32 1.442695, %v2369_v44  ;;  %v13311_v5 = vld [vmem:[#allocation47_spill] sm:$0xff] }
 0x448   : > { %2503 = vperm.xlu0 %8339, %v10350_v6   ;;  %v2445_v17 = vmul.f32 1.442695, %v2389_v25 }
 0x449   : > { %2518 = vperm.xlu2 %8340, %v10364_v43  }
 0x44b   : > { %1356 = vperm.xlu1 %8341, %v10374_v47  }
 0x450   : > { %2512 = vperm.xlu0 %8339, %v10366_v40  }
 0x451   : > { %2527 = vperm.xlu2 %8340, %v10382_v60   ;;  %v2330_v60 = vperm.slane %v10423_v49, 5 }
 0x453   : > { %1365 = vperm.xlu1 %8341, %v10390_v11   ;;  %v2394_v18 = vsub.f32 %v13311_v5, %v2330_v60 }
 0x455   : > { %v2455_v23 = vmul.f32 1.442695, %v2394_v18  ;;  %v2395_v18 = vsub.f32 %v13317_v36, %v2331_v7  ;;  %v10493_v36 = vpop.permute.xlu2 %1323 }
 0x457   : > { %v2457_v4 = vmul.f32 1.442695, %v2395_v18 }
 0x458   : > { %2521 = vperm.xlu0 %8339, %v10384_v54  }
 0x459   : > { %2536 = vperm.xlu2 %8340, %v10398_v58  }
 0x45b   : > { %1374 = vperm.xlu1 %8341, %v10406_v45  }
 0x460   : > { %2530 = vperm.xlu0 %8339, %v10400_v20  }
 0x461   : > { %2545 = vperm.xlu2 %8340, %v10414_v59   ;;  %v2391_v59 = vsub.f32 %v13306_v22, %v2327_v24  ;;  %v10448_v22 = vpop.eup %8779 }
 0x462   : > { %13309 = vst [vmem:[#allocation24_spill] sm:$0xff] %v10448_v22  ;;  %v10450_v46 = vpop.eup %8781 }
 0x463   : > { %1383 = vperm.xlu1 %8341, %v10425_v3   ;;  %v2449_v40 = vmul.f32 1.442695, %v2391_v59  ;;  %13310 = vst [vmem:[#allocation41_spill] sm:$0xff] %v10450_v46  ;;  %v13312_v59 = vld [vmem:[#allocation53_spill] sm:$0xff]  ;;  %v10457_v25 = vpop.eup %8783 }
 0x464   : > { %v2392_v52 = vsub.f32 %v13312_v59, %v2328_v53  ;;  %13313 = vst [vmem:[#allocation49_spill] sm:$0xff] %v10457_v25  ;;  %v2311_v53 = vperm.slane %v10322_v31, 2  ;;  %v13319_v59 = vld [vmem:[#allocation32_spill] sm:$0xff] }
 0x465   : > { %8785 = vpow2.f32 %v2449_v40 }
 0x466   : > { %8787 = vpow2.f32 %v2445_v17  ;;  %v2451_v44 = vmul.f32 1.442695, %v2392_v52  ;;  %v2411_v17 = vmul.f32 1.442695, %v2372_v15  ;;  %v2375_v52 = vsub.f32 %v13319_v59, %v2311_v53 }
 0x467   : > { %8789 = vpow2.f32 %v2405_v34 }
 0x468   : > { %2539 = vperm.xlu0 %8339, %v10416_v35   ;;  %8791 = vpow2.f32 %v2455_v23  ;;  %v2314_v23 = vperm.slane %v10322_v31, 5  ;;  %v2417_v7 = vmul.f32 1.442695, %v2375_v52  ;;  %v2317_v31 = vperm.slane %v10372_v39, 0 }
 0x469   : > { %2554 = vperm.xlu2 %8340, %v10431_v13   ;;  %8793 = vpow2.f32 %v2451_v44 }
 0x46a   : > { %v10461_v63 = vpop.permute.xlu0 %1326  ;;  %8795 = vpow2.f32 %v2411_v17  ;;  %v13323_v17 = vld [vmem:[#allocation35_spill] sm:$0xff] }
 0x46b   : > { %1392 = vperm.xlu1 %8341, %v10440_v16   ;;  %v10466_v5 = vpop.eup %8785  ;;  %8797 = vpow2.f32 %v2457_v4  ;;  %v2378_v53 = vsub.f32 %v13323_v17, %v2314_v23  ;;  %v10509_v17 = vpop.permute.xlu2 %1341 }
 0x46c   : > { %13315 = vst [vmem:[#allocation21_spill] sm:$0xff] %v10466_v5  ;;  %v10468_v40 = vpop.eup %8787  ;;  %8799 = vpow2.f32 %v2417_v7 }
 0x46d   : > { %v10446_v24 = vpop.permute.xlu1 %1305  ;;  %13316 = vst [vmem:[#allocation44_spill] sm:$0xff] %v10468_v40  ;;  %v10474_v34 = vpop.eup %8789 }
 0x46e   : > { %13318 = vst [vmem:[#allocation51_spill] sm:$0xff] %v10474_v34 }
 0x470   : > { %2548 = vperm.xlu0 %8339, %v10433_v62  }
 0x471   : > { %2563 = vperm.xlu2 %8340, %v10448_v22  }
 0x472   : > { %v10482_v15 = vpop.permute.xlu0 %1335 }
 0x473   : > { %2494 = vperm.xlu1 %8341, %v10457_v25   ;;  %v10480_v25 = vpop.eup %8791 }
 0x474   : > { %13320 = vst [vmem:[#allocation31_spill] sm:$0xff] %v10480_v25 }
 0x475   : > { %v10464_v60 = vpop.permute.xlu1 %1308 }
 0x478   : > { %2557 = vperm.xlu0 %8339, %v10450_v46  }
 0x479   : > { %2572 = vperm.xlu2 %8340, %v10466_v5   ;;  %v10484_v5 = vpop.eup %8793 }
 0x47a   : > { %13321 = vst [vmem:[#allocation47_spill] sm:$0xff] %v10484_v5  ;;  %v10489_v44 = vpop.eup %8795  ;;  %v10500_v52 = vpop.permute.xlu0 %1344 }
 0x47b   : > { %2506 = vperm.xlu1 %8341, %v10474_v34   ;;  %13322 = vst [vmem:[#allocation53_spill] sm:$0xff] %v10489_v44  ;;  %v10497_v59 = vpop.eup %8797 }
 0x47c   : > { %13324 = vst [vmem:[#allocation29_spill] sm:$0xff] %v10497_v59  ;;  %v10503_v4 = vpop.eup %8799 }
 0x47d   : > { %v10478_v22 = vpop.permute.xlu1 %1311  ;;  %13325 = vst [vmem:[#allocation54_spill] sm:$0xff] %v10503_v4 }
 0x480   : > { %2566 = vperm.xlu0 %8339, %v10468_v40  }
 0x481   : > { %2581 = vperm.xlu2 %8340, %v10480_v25   ;;  %v2423_v25 = vmul.f32 1.442695, %v2378_v53 }
 0x482   : > { %v10514_v41 = vpop.permute.xlu0 %1353 }
 0x483   : > { %2515 = vperm.xlu1 %8341, %v10489_v44   ;;  %v13326_v44 = vld [vmem:[#allocation38_spill] sm:$0xff]  ;;  %8801 = vpow2.f32 %v2423_v25  ;;  %v2323_v25 = vperm.slane %v10372_v39, 6 }
 0x484   : > { %v2381_v23 = vsub.f32 %v13326_v44, %v2317_v31  ;;  %v10521_v31 = vpop.permute.xlu2 %1350 }
 0x485   : > { %v10495_v18 = vpop.permute.xlu1 %1314 }
 0x486   : > { %v2429_v53 = vmul.f32 1.442695, %v2381_v23  ;;  %v13330_v23 = vld [vmem:[#allocation45_spill] sm:$0xff] }
 0x487   : > { %v2387_v62 = vsub.f32 %v13330_v23, %v2323_v25  ;;  %v2329_v25 = vperm.slane %v10423_v49, 4 }
 0x488   : > { %2575 = vperm.xlu0 %8339, %v10484_v5   ;;  %v2320_v5 = vperm.slane %v10372_v39, 3  ;;  %8803 = vpow2.f32 %v2429_v53  ;;  %v13332_v39 = vld [vmem:[#allocation48_spill] sm:$0xff] }
 0x489   : > { %v10512_v40 = vpop.eup %8801  ;;  %v2441_v47 = vmul.f32 1.442695, %v2387_v62  ;;  %v13334_v62 = vld [vmem:[#allocation50_spill] sm:$0xff] }
 0x48a   : > { %13327 = vst [vmem:[#allocation32_spill] sm:$0xff] %v10512_v40  ;;  %v1363_v37 = vpop.permute.xlu0 %1362  ;;  %v2393_v35 = vsub.f32 %v13334_v62, %v2329_v25 }
 0x48b   : > { %2524 = vperm.xlu1 %8341, %v10503_v4  }
 0x48c   : > { %v1360_v53 = vpop.permute.xlu2 %1359 }
 0x48d   : > { %v10507_v7 = vpop.permute.xlu1 %1317  ;;  %v1427_v34 = vperm.slane %v1360_v53, %v10019_v29 }
 0x48e   : > { %v10523_v13 = vpop.eup %8803 }
 0x48f   : > { %13329 = vst [vmem:[#allocation35_spill] sm:$0xff] %v10523_v13 }
 0x490   : > { %2584 = vperm.xlu0 %8339, %v10497_v59   ;;  %v13328_v59 = vld [vmem:[#allocation42_spill] sm:$0xff] }
 0x491   : > { %v2384_v46 = vsub.f32 %v13328_v59, %v2320_v5  ;;  %v2326_v5 = vperm.slane %v10423_v49, 1 }
 0x493   : > { %2533 = vperm.xlu1 %8341, %v10512_v40   ;;  %v2435_v44 = vmul.f32 1.442695, %v2384_v46  ;;  %v2390_v46 = vsub.f32 %v13332_v39, %v2326_v5  ;;  %v2453_v5 = vmul.f32 1.442695, %v2393_v35 }
 0x494   : > { %v1369_v58 = vpop.permute.xlu2 %1368 }
 0x495   : > { %v10518_v4 = vpop.permute.xlu1 %1320  ;;  %8805 = vpow2.f32 %v2435_v44  ;;  %v2447_v23 = vmul.f32 1.442695, %v2390_v46  ;;  %v1431_v27 = vperm.slane %v1369_v58, %v10022_v30 }
 0x496   : > { %8807 = vpow2.f32 %v2441_v47 }
 0x497   : > { %8809 = vpow2.f32 %v2447_v23 }
 0x498   : > { %8811 = vpow2.f32 %v2453_v5 }
 0x49b   : > { %2542 = vperm.xlu1 %8341, %v10523_v13   ;;  %v10530_v59 = vpop.eup %8805  ;;  %v1372_v13 = vpop.permute.xlu0 %1371 }
 0x49c   : > { %13331 = vst [vmem:[#allocation38_spill] sm:$0xff] %v10530_v59  ;;  %v10537_v44 = vpop.eup %8807  ;;  %v1433_v6 = vperm.slane %v1372_v13, %v10019_v29  ;;  %v1407_v13 = vperm.slane %v10518_v4, %v10022_v30 }
 0x49d   : > { %v10527_v9 = vpop.permute.xlu1 %1329  ;;  %13333 = vst [vmem:[#allocation42_spill] sm:$0xff] %v10537_v44  ;;  %v10544_v39 = vpop.eup %8809 }
 0x49e   : > { %13335 = vst [vmem:[#allocation45_spill] sm:$0xff] %v10544_v39  ;;  %v10550_v25 = vpop.eup %8811 }
 0x49f   : > { %13337 = vst [vmem:[#allocation48_spill] sm:$0xff] %v10550_v25 }
 0x4a3   : > { %2551 = vperm.xlu1 %8341, %v10530_v59   ;;  %v2332_v59 = vperm.slane %v10423_v49, 7  ;;  %v1381_v47 = vpop.permute.xlu0 %1380 }
 0x4a5   : > { %v10534_v8 = vpop.permute.xlu1 %1332  ;;  %v2396_v46 = vsub.f32 %v13336_v50, %v2332_v59 }
 0x4a7   : > { %v2459_v43 = vmul.f32 1.442695, %v2396_v46 }
 0x4a9   : > { %8813 = vpow2.f32 %v2459_v43  ;;  %v1428_v43 = vperm.slane %v1363_v37, %v10022_v30  ;;  %v1404_v37 = vperm.slane %v10495_v18, %v10022_v30  ;;  %v1437_v18 = vperm.slane %v1381_v47, %v10022_v30 }
 0x4ab   : > { %2560 = vperm.xlu1 %8341, %v10537_v44   ;;  %v1378_v44 = vpop.permute.xlu2 %1377  ;;  %v1390_v23 = vpop.permute.xlu0 %1389  ;;  %v1429_v58 = vsel %vm1065_vm7, %v1428_v43, %v1427_v34 }
 0x4ad   : > { %v10541_v48 = vpop.permute.xlu1 %1338 }
 0x4af   : > { %v10553_v62 = vpop.eup %8813 }
 0x4b0   : > { %13338 = vst [vmem:[#allocation50_spill] sm:$0xff] %v10553_v62 }
 0x4b3   : > { %2569 = vperm.xlu1 %8341, %v10544_v39   ;;  %v1387_v35 = vpop.permute.xlu2 %1386  ;;  %v1399_v39 = vpop.permute.xlu0 %1398 }
 0x4b5   : > { %v10548_v54 = vpop.permute.xlu1 %1347 }
 0x4bb   : > { %2578 = vperm.xlu1 %8341, %v10550_v25   ;;  %v1396_v50 = vpop.permute.xlu2 %1395  ;;  %v10556_v5 = vpop.permute.xlu0 %2497  ;;  %v1424_v25 = vperm.slane %v10514_v41, %v10019_v29  ;;  %v1401_v41 = vperm.slane %v10464_v60, %v10022_v30  ;;  %v1403_v60 = vperm.slane %v10478_v22, %v10019_v29 }
 0x4bd   : > { %v1357_v49 = vpop.permute.xlu1 %1356  ;;  %v1405_v22 = vsel %vm1065_vm7, %v1404_v37, %v1403_v60 }
 0x4be   : > { %v1425_v46 = vperm.slane %v1357_v49, %v10022_v30 }
 0x4c0   : > { %v1426_v49 = vsel %vm1065_vm7, %v1425_v46, %v1424_v25 }
 0x4c1   : > { %v1455_v46 = vsel %vm1112_vm8, %v1429_v58, %v1426_v49  ;;  %v1442_v49 = vperm.slane %v1390_v23, %v10019_v29 }
 0x4c3   : > { %2587 = vperm.xlu1 %8341, %v10553_v62   ;;  %v10563_v28 = vpop.permute.xlu2 %2500  ;;  %v10576_v2 = vpop.permute.xlu0 %2503 }
 0x4c5   : > { %v1366_v40 = vpop.permute.xlu1 %1365 }
 0x4c6   : > { %v1430_v20 = vperm.slane %v1366_v40, %v10019_v29  ;;  %v1409_v40 = vperm.slane %v10493_v36, %v10019_v29  ;;  %v1400_v36 = vperm.slane %v10446_v24, %v10019_v29  ;;  %v1436_v24 = vperm.slane %v1378_v44, %v10019_v29 }
 0x4c7   : > { %v1416_v44 = vperm.slane %v10541_v48, %v10022_v30 }
 0x4c8   : > { %v1402_v34 = vsel %vm1065_vm7, %v1401_v41, %v1400_v36  ;;  %v1438_v43 = vsel %vm1065_vm7, %v1437_v18, %v1436_v24  ;;  %v1421_v18 = vperm.slane %v10548_v54, %v10019_v29 }
 0x4c9   : > { %v1448_v37 = vsel %vm1112_vm8, %v1405_v22, %v1402_v34  ;;  %v1422_v34 = vperm.slane %v10521_v31, %v10022_v30 }
 0x4cb   : > { %v2510_v58 = vpop.permute.xlu2 %2509 }
 0x4cd   : > { %v1375_v59 = vpop.permute.xlu1 %1374 }
 0x4ce   : > { %v1434_v61 = vperm.slane %v1375_v59, %v10022_v30  ;;  %v1432_v59 = vsel %vm1065_vm7, %v1431_v27, %v1430_v20  ;;  %v1410_v27 = vperm.slane %v10461_v63, %v10022_v30  ;;  %v1440_v20 = vperm.slane %v1387_v35, %v10022_v30 }
 0x4cf   : > { %v1413_v63 = vperm.slane %v10534_v8, %v10022_v30  ;;  %v1446_v35 = vperm.slane %v1399_v39, %v10022_v30  ;;  %v1412_v8 = vperm.slane %v10527_v9, %v10019_v29 }
 0x4d0   : > { %v1435_v53 = vsel %vm1065_vm7, %v1434_v61, %v1433_v6  ;;  %v1406_v61 = vperm.slane %v10507_v7, %v10019_v29  ;;  %v1456_v6 = vsel %vm1114_vm9, %v1432_v59, %v1455_v46  ;;  %v1445_v59 = vperm.slane %v1396_v50, %v10019_v29 }
 0x4d1   : > { %v1457_v4 = vsel %vm1116_vm10, %v1435_v53, %v1456_v6  ;;  %v1411_v60 = vsel %vm1065_vm7, %v1410_v27, %v1409_v40  ;;  %v1418_v27 = vperm.slane %v10509_v17, %v10019_v29  ;;  %v2591_v17 = vperm.slane %v10563_v28, %v10019_v29 }
 0x4d2   : > { %v1408_v47 = vsel %vm1065_vm7, %v1407_v13, %v1406_v61  ;;  %v1458_v39 = vsel %vm13135_vm11, %v1438_v43, %v1457_v4  ;;  %v1415_v13 = vperm.slane %v10482_v15, %v10019_v29  ;;  %v1447_v36 = vsel %vm1065_vm7, %v1446_v35, %v1445_v59  ;;  %v2513_v15 = vpop.permute.xlu0 %2512 }
 0x4d3   : > { %v1449_v23 = vsel %vm1114_vm9, %v1408_v47, %v1448_v37  ;;  %v2590_v47 = vperm.slane %v10556_v5, %v10019_v29  ;;  %v2592_v5 = vperm.slane %v10576_v2, %v10019_v29 }
 0x4d4   : > { %v1417_v9 = vsel %vm1065_vm7, %v1416_v44, %v1415_v13  ;;  %v1450_v61 = vsel %vm1116_vm10, %v1411_v60, %v1449_v23  ;;  %v2595_v13 = vperm.slane %v2513_v15, %v10019_v29 }
 0x4d5   : > { %v1384_v62 = vpop.permute.xlu1 %1383 }
 0x4d6   : > { %v1439_v25 = vperm.slane %v1384_v62, %v10019_v29 }
 0x4d8   : > { %v1441_v62 = vsel %vm1065_vm7, %v1440_v20, %v1439_v25  ;;  %v1414_v25 = vsel %vm1065_vm7, %v1413_v63, %v1412_v8  ;;  %v1419_v20 = vperm.slane %v10500_v52, %v10022_v30  ;;  %v1423_v52 = vsel %vm1065_vm7, %v1422_v34, %v1421_v18  ;;  %v2519_v63 = vpop.permute.xlu2 %2518 }
 0x4d9   : > { %v1459_v48 = vsel %vm13134_vm12, %v1441_v62, %v1458_v39  ;;  %v1451_v40 = vsel %vm13135_vm11, %v1414_v25, %v1450_v61  ;;  %v2594_v8 = vperm.slane %v2510_v58, %v10019_v29 }
 0x4da   : > { %v1452_v24 = vsel %vm13134_vm12, %v1417_v9, %v1451_v40  ;;  %v1420_v4 = vsel %vm1065_vm7, %v1419_v20, %v1418_v27  ;;  %v2597_v9 = vperm.slane %v2519_v63, %v10019_v29 }
 0x4db   : > { %v1453_v31 = vsel %vm13133_vm13, %v1420_v4, %v1452_v24 }
 0x4dc   : > { %v1454_v35 = vsel %vm13132_vm14, %v1423_v52, %v1453_v31 }
 0x4dd   : > { %v1393_v7 = vpop.permute.xlu1 %1392  ;;  %v1464_v43 = vsel %vm13131_vm15, %v1454_v35, 0.0 }
 0x4de   : > { %v1443_v41 = vperm.slane %v1393_v7, %v10022_v30  ;;  %v2522_v7 = vpop.permute.xlu0 %2521 }
 0x4e0   : > { %v1444_v53 = vsel %vm1065_vm7, %v1443_v41, %v1442_v49  ;;  %v2528_v39 = vpop.permute.xlu2 %2527 }
 0x4e1   : > { %v1460_v50 = vsel %vm13133_vm13, %v1444_v53, %v1459_v48  ;;  %v2600_v61 = vperm.slane %v2528_v39, %v10019_v29 }
 0x4e2   : > { %v1461_v46 = vsel %vm13132_vm14, %v1447_v36, %v1460_v50  ;;  %v2598_v50 = vperm.slane %v2522_v7, %v10019_v29 }
 0x4e3   : > { %v1467_v6 = vsel %vm13131_vm15, %v1461_v46, 0.0 }
 0x4e4   : > { %1468 = vadd.xlane.f32.xlu2 %v1467_v6  ;;  %v2628_v15 = vsel %vm1112_vm8, %v2598_v50, %v2597_v9 }
 0x4e5   : > { %v2495_v54 = vpop.permute.xlu1 %2494 }
 0x4e6   : > { %v2589_v22 = vperm.slane %v2495_v54, %v10019_v29  ;;  %v2531_v53 = vpop.permute.xlu0 %2530 }
 0x4e7   : > { %v2601_v34 = vperm.slane %v2531_v53, %v10019_v29 }
 0x4e8   : > { %v2621_v62 = vsel %vm1112_vm8, %v2590_v47, %v2589_v22  ;;  %v2537_v60 = vpop.permute.xlu2 %2536 }
 0x4e9   : > { %v2622_v49 = vsel %vm1114_vm9, %v2591_v17, %v2621_v62  ;;  %v2603_v54 = vperm.slane %v2537_v60, %v10019_v29 }
 0x4ea   : > { %v2623_v37 = vsel %vm1116_vm10, %v2592_v5, %v2622_v49 }
 0x4ed   : > { %v2507_v44 = vpop.permute.xlu1 %2506  ;;  %1465 = vadd.xlane.f32.xlu1 %v1464_v43 }
 0x4ee   : > { %v2593_v41 = vperm.slane %v2507_v44, %v10019_v29  ;;  %v2540_v46 = vpop.permute.xlu0 %2539 }
 0x4ef   : > { %v2604_v52 = vperm.slane %v2540_v46, %v10019_v29 }
 0x4f0   : > { %v2624_v59 = vsel %vm13135_vm11, %v2593_v41, %v2623_v37  ;;  %v2546_v24 = vpop.permute.xlu2 %2545 }
 0x4f1   : > { %v2625_v28 = vsel %vm13134_vm12, %v2594_v8, %v2624_v59  ;;  %v2606_v43 = vperm.slane %v2546_v24, %v10019_v29 }
 0x4f2   : > { %v2626_v25 = vsel %vm13133_vm13, %v2595_v13, %v2625_v28 }
 0x4f5   : > { %v2516_v23 = vpop.permute.xlu1 %2515 }
 0x4f6   : > { %v2596_v48 = vperm.slane %v2516_v23, %v10019_v29  ;;  %v2549_v31 = vpop.permute.xlu0 %2548 }
 0x4f7   : > { %v2607_v41 = vperm.slane %v2549_v31, %v10019_v29 }
 0x4f8   : > { %v2627_v2 = vsel %vm13132_vm14, %v2596_v48, %v2626_v25  ;;  %v2555_v17 = vpop.permute.xlu2 %2554 }
 0x4f9   : > { %v2653_v36 = vsel %vm13130_vm0, %v2627_v2, 0.0  ;;  %v2609_v39 = vperm.slane %v2555_v17, %v10019_v29 }
 0x4fa   : > { %2654 = vadd.xlane.f32.xlu2 %v2653_v36 }
 0x4fd   : > { %v2525_v58 = vpop.permute.xlu1 %2524 }
 0x4fe   : > { %v2599_v18 = vperm.slane %v2525_v58, %v10019_v29  ;;  %v2558_v49 = vpop.permute.xlu0 %2557 }
 0x4ff   : > { %v2610_v23 = vperm.slane %v2558_v49, %v10019_v29 }
 0x500   : > { %v2629_v20 = vsel %vm1114_vm9, %v2599_v18, %v2628_v15  ;;  %v2564_v28 = vpop.permute.xlu2 %2563 }
 0x501   : > { %v2630_v6 = vsel %vm1116_vm10, %v2600_v61, %v2629_v20  ;;  %v2612_v2 = vperm.slane %v2564_v28, %v10019_v29 }
 0x502   : > { %v2631_v22 = vsel %vm13135_vm11, %v2601_v34, %v2630_v6 }
 0x505   : > { %v2534_v40 = vpop.permute.xlu1 %2533 }
 0x506   : > { %v2602_v27 = vperm.slane %v2534_v40, %v10019_v29  ;;  %v2567_v48 = vpop.permute.xlu0 %2566 }
 0x507   : > { %v2613_v46 = vperm.slane %v2567_v48, %v10019_v29 }
 0x508   : > { %v2632_v4 = vsel %vm13134_vm12, %v2602_v27, %v2631_v22  ;;  %v2573_v9 = vpop.permute.xlu2 %2572 }
 0x509   : > { %v2633_v47 = vsel %vm13133_vm13, %v2603_v54, %v2632_v4  ;;  %v2615_v6 = vperm.slane %v2573_v9, %v10019_v29 }
 0x50a   : > { %v2634_v63 = vsel %vm13132_vm14, %v2604_v52, %v2633_v47 }
 0x50b   : > { %v2656_v35 = vsel %vm13130_vm0, %v2634_v63, 0.0 }
 0x50c   : > { %2657 = vadd.xlane.f32.xlu0 %v2656_v35 }
 0x50d   : > { %v2543_v62 = vpop.permute.xlu1 %2542 }
 0x50e   : > { %v2605_v7 = vperm.slane %v2543_v62, %v10019_v29  ;;  %v2576_v20 = vpop.permute.xlu0 %2575 }
 0x50f   : > { %v2616_v27 = vperm.slane %v2576_v20, %v10019_v29 }
 0x510   : > { %v2635_v44 = vsel %vm1112_vm8, %v2606_v43, %v2605_v7  ;;  %v2582_v24 = vpop.permute.xlu2 %2581 }
 0x511   : > { %v2636_v59 = vsel %vm1114_vm9, %v2607_v41, %v2635_v44  ;;  %v2618_v4 = vperm.slane %v2582_v24, %v10019_v29 }
 0x515   : > { %v2552_v5 = vpop.permute.xlu1 %2551 }
 0x516   : > { %v2608_v37 = vperm.slane %v2552_v5, %v10019_v29  ;;  %v2585_v47 = vpop.permute.xlu0 %2584 }
 0x517   : > { %v2619_v63 = vperm.slane %v2585_v47, %v10019_v29  ;;  %v13340_v47 = vld [vmem:[#allocation34_spill] sm:$0xff] }
 0x518   : > { %v2637_v8 = vsel %vm1116_vm10, %v2608_v37, %v2636_v59 }
 0x519   : > { %v2638_v13 = vsel %vm13135_vm11, %v2609_v39, %v2637_v8 }
 0x51a   : > { %v2639_v36 = vsel %vm13134_vm12, %v2610_v23, %v2638_v13 }
 0x51d   : > { %v2561_v53 = vpop.permute.xlu1 %2560 }
 0x51e   : > { %v2611_v25 = vperm.slane %v2561_v53, %v10019_v29 }
 0x520   : > { %v2640_v50 = vsel %vm13133_vm13, %v2611_v25, %v2639_v36 }
 0x521   : > { %v2641_v60 = vsel %vm13132_vm14, %v2612_v2, %v2640_v50 }
 0x522   : > { %v2659_v58 = vsel %vm13130_vm0, %v2641_v60, 0.0 }
 0x523   : > { %2660 = vadd.xlane.f32.xlu1 %v2659_v58 }
 0x525   : > { %v2570_v18 = vpop.permute.xlu1 %2569 }
 0x526   : > { %v2614_v15 = vperm.slane %v2570_v18, %v10019_v29 }
 0x528   : > { %v2642_v61 = vsel %vm1112_vm8, %v2614_v15, %v2613_v46 }
 0x529   : > { %v2643_v34 = vsel %vm1114_vm9, %v2615_v6, %v2642_v61 }
 0x52a   : > { %v2644_v22 = vsel %vm1116_vm10, %v2616_v27, %v2643_v34 }
 0x52d   : > { %v2579_v40 = vpop.permute.xlu1 %2578 }
 0x52e   : > { %v2617_v54 = vperm.slane %v2579_v40, %v10019_v29 }
 0x530   : > { %v2645_v52 = vsel %vm13135_vm11, %v2617_v54, %v2644_v22 }
 0x531   : > { %v2646_v31 = vsel %vm13134_vm12, %v2618_v4, %v2645_v52  ;;  %v13339_v52 = vld [vmem:[#allocation23_spill] sm:$0xff] }
 0x532   : > { %v2647_v17 = vsel %vm13133_vm13, %v2619_v63, %v2646_v31  ;;  %v13341_v63 = vld [vmem:[#allocation51_spill] sm:$0xff] }
 0x535   : > { %v2588_v35 = vpop.permute.xlu1 %2587 }
 0x536   : > { %v2620_v62 = vperm.slane %v2588_v35, %v10019_v29 }
 0x538   : > { %v2648_v7 = vsel %vm13132_vm14, %v2620_v62, %v2647_v17  ;;  %v13342_v62 = vld [vmem:[#allocation27_spill] sm:$0xff] }
 0x539   : > { %v2662_v43 = vsel %vm13130_vm0, %v2648_v7, 0.0 }
 0x53a   : > { %2663 = vadd.xlane.f32.xlu2 %v2662_v43 }
 0x557   : > { %v1469_v49 = vpop.xlane.xlu2 %1468 }
 0x560   : > { %v1466_v44 = vpop.xlane.xlu1 %1465 }
 0x561   : > { %8815 = vrcp.f32 %v1466_v44 }
 0x562   : > { %8817 = vrcp.f32 %v1469_v49 }
 0x567   : > { %v10710_v5 = vpop.eup %8815 }
 0x568   : > { %v1474_v41 = vperm.slane %v10710_v5, 0  ;;  %v1480_v37 = vperm.slane %v10710_v5, 6  ;;  %v1479_v59 = vperm.slane %v10710_v5, 5  ;;  %v10715_v8 = vpop.eup %8817  ;;  %v1475_v36 = vperm.slane %v10710_v5, 1 }
 0x569   : > { %v1485_v50 = vperm.slane %v10715_v8, 3  ;;  %v1484_v58 = vperm.slane %v10715_v8, 2  ;;  %v1476_v46 = vperm.slane %v10710_v5, 2  ;;  %v1488_v20 = vperm.slane %v10715_v8, 6 }
 0x56a   : > { %v1506_v39 = vmul.f32 %v10213_v55, %v1474_v41  ;;  %v1507_v28 = vmul.f32 %v10226_v51, %v1474_v41  ;;  %v1518_v13 = vmul.f32 %v10218_v0, %v1480_v37  ;;  %v1519_v23 = vmul.f32 %v10220_v42, %v1480_v37 }
 0x56b   : > { %v1516_v53 = vmul.f32 %v10202_v1, %v1479_v59  ;;  %v1517_v48 = vmul.f32 %v10340_v56, %v1479_v59  ;;  %v1508_v0 = vmul.f32 %v10245_v26, %v1475_v36  ;;  %v1509_v42 = vmul.f32 %v10258_v14, %v1475_v36  ;;  %v13347_v36 = vld [vmem:[#allocation30_spill] sm:$0xff] }
 0x56c   : > { %v8342_v25 = vpack.i.bf16 %v1507_v28, %v1506_v39  ;;  %v8372_v2 = vpack.i.bf16 %v1519_v23, %v1518_v13  ;;  %v1528_v1 = vmul.f32 %v10266_v38, %v1485_v50  ;;  %v1529_v51 = vmul.f32 %v10406_v45, %v1485_v50  ;;  %v13343_v39 = vld [vmem:[#allocation26_spill] sm:$0xff]  ;;  %v13344_v13 = vld [vmem:[#allocation25_spill] sm:$0xff] }
 0x56d   : > { %v8367_v60 = vpack.i.bf16 %v1517_v48, %v1516_v53  ;;  %v2655_v55 = vpop.xlane.xlu2 %2654  ;;  %v1526_v56 = vmul.f32 %v10390_v11, %v1484_v58  ;;  %v1527_v9 = vmul.f32 %v10264_v32, %v1484_v58  ;;  %v8347_v18 = vpack.i.bf16 %v1509_v42, %v1508_v0  ;;  %v13345_v53 = vld [vmem:[#allocation36_spill] sm:$0xff] }
 0x56e   : > { %8343 = vperm.xlu0 %8339, %v8342_v25   ;;  %8373 = vperm.xlu1 %8341, %v8372_v2   ;;  %8819 = vrcp.f32 %v2655_v55  ;;  %v8397_v15 = vpack.i.bf16 %v1529_v51, %v1528_v1  ;;  %v1487_v26 = vperm.slane %v10715_v8, 5  ;;  %v1510_v14 = vmul.f32 %v10277_v12, %v1476_v46  ;;  %v13346_v25 = vld [vmem:[#allocation32_spill] sm:$0xff] }
 0x56f   : > { %8368 = vperm.xlu2 %8340, %v8367_v60   ;;  %v8392_v61 = vpack.i.bf16 %v1527_v9, %v1526_v56  ;;  %v1511_v38 = vmul.f32 %v10292_v33, %v1476_v46  ;;  %v1534_v11 = vmul.f32 %v10300_v57, %v1488_v20  ;;  %v1535_v32 = vmul.f32 %v10440_v16, %v1488_v20  ;;  %v13348_v60 = vld [vmem:[#allocation40_spill] sm:$0xff]  ;;  %v13349_v9 = vld [vmem:[#allocation18_spill] sm:$0xff] }
 0x570   : > { %v1532_v6 = vmul.f32 %v10425_v3, %v1487_v26  ;;  %v1533_v34 = vmul.f32 %v10298_v21, %v1487_v26  ;;  %v1477_v40 = vperm.slane %v10710_v5, 3  ;;  %v1478_v49 = vperm.slane %v10710_v5, 4  ;;  %v13351_v20 = vld [vmem:[#allocation20_spill] sm:$0xff]  ;;  %v13352_v26 = vld [vmem:[#allocation22_spill] sm:$0xff] }
 0x571   : > { %v8352_v27 = vpack.i.bf16 %v1511_v38, %v1510_v14  ;;  %v8412_v54 = vpack.i.bf16 %v1535_v32, %v1534_v11  ;;  %v1481_v1 = vperm.slane %v10710_v5, 7  ;;  %v1482_v32 = vperm.slane %v10715_v8, 0 }
 0x572   : > { %v8407_v22 = vpack.i.bf16 %v1533_v34, %v1532_v6  ;;  %v1512_v3 = vmul.f32 %v10200_v10, %v1477_v40  ;;  %v1513_v21 = vmul.f32 %v10189_v19, %v1477_v40  ;;  %v1514_v28 = vmul.f32 %v13343_v39, %v1478_v49  ;;  %v13353_v6 = vld [vmem:[#allocation56_spill] sm:$0xff]  ;;  %v13354_v40 = vld [vmem:[#allocation19_spill] sm:$0xff] }
 0x573   : > { %v1515_v23 = vmul.f32 %v13344_v13, %v1478_v49  ;;  %v1522_v34 = vmul.f32 %v13353_v6, %v1482_v32  ;;  %v13362_v39 = vld [vmem:[#allocation60_spill] sm:$0xff] }
 0x574   : > { %v10739_v45 = vpop.eup %8819  ;;  %v8357_v7 = vpack.i.bf16 %v1513_v21, %v1512_v3  ;;  %v13355_v3 = vld [vmem:[#allocation57_spill] sm:$0xff] }
 0x575   : > { %v2675_v24 = vperm.slane %v10739_v45, 2  ;;  %v2676_v12 = vperm.slane %v10739_v45, 3  ;;  %v2677_v33 = vperm.slane %v10739_v45, 4  ;;  %v2678_v57 = vperm.slane %v10739_v45, 5 }
 0x576   : > { %8348 = vperm.xlu0 %8339, %v8347_v18   ;;  %8398 = vperm.xlu1 %8341, %v8397_v15   ;;  %v8362_v42 = vpack.i.bf16 %v1515_v23, %v1514_v28  ;;  %v1520_v18 = vmul.f32 %v13349_v9, %v1481_v1  ;;  %v13350_v15 = vld [vmem:[#allocation55_spill] sm:$0xff]  ;;  %v1489_v23 = vperm.slane %v10715_v8, 7  ;;  %v13366_v9 = vld [vmem:[#allocation45_spill] sm:$0xff] }
 0x577   : > { %8393 = vperm.xlu2 %8340, %v8392_v61   ;;  %v2739_v4 = vmul.f32 %v13339_v52, %v2675_v24  ;;  %v2740_v31 = vmul.f32 %v13340_v47, %v2676_v12  ;;  %v2741_v35 = vmul.f32 %v13341_v63, %v2677_v33  ;;  %v2742_v17 = vmul.f32 %v13342_v62, %v2678_v57  ;;  %v13356_v52 = vld [vmem:[#allocation58_spill] sm:$0xff]  ;;  %v13359_v62 = vld [vmem:[#allocation39_spill] sm:$0xff] }
 0x578   : > { %v1521_v46 = vmul.f32 %v13350_v15, %v1481_v1  ;;  %v13357_v47 = vld [vmem:[#allocation46_spill] sm:$0xff]  ;;  %v13367_v15 = vld [vmem:[#allocation21_spill] sm:$0xff] }
 0x579   : > { %v8427_v43 = vpack.i.bf16 %v2740_v31, %v2739_v4  ;;  %v8432_v44 = vpack.i.bf16 %v2742_v17, %v2741_v35  ;;  %v13358_v63 = vld [vmem:[#allocation38_spill] sm:$0xff] }
 0x57a   : > { %v8377_v38 = vpack.i.bf16 %v1521_v46, %v1520_v18 }
 0x57e   : > { %8353 = vperm.xlu0 %8339, %v8352_v27   ;;  %8413 = vperm.xlu1 %8341, %v8412_v54   ;;  %v1523_v27 = vmul.f32 %v13354_v40, %v1482_v32  ;;  %v1483_v54 = vperm.slane %v10715_v8, 1 }
 0x57f   : > { %8408 = vperm.xlu2 %8340, %v8407_v22   ;;  %v2658_v16 = vpop.xlane.xlu0 %2657 }
 0x580   : > { %8821 = vrcp.f32 %v2658_v16  ;;  %v8382_v24 = vpack.i.bf16 %v1523_v27, %v1522_v34  ;;  %v1524_v21 = vmul.f32 %v13355_v3, %v1483_v54  ;;  %v1525_v4 = vmul.f32 %v13356_v52, %v1483_v54 }
 0x581   : > { %v2679_v27 = vperm.slane %v10739_v45, 6  ;;  %v2680_v54 = vperm.slane %v10739_v45, 7 }
 0x586   : > { %v10755_v41 = vpop.eup %8821  ;;  %8358 = vperm.xlu0 %8339, %v8357_v7   ;;  %8428 = vperm.xlu1 %8341, %v8427_v43   ;;  %v13360_v7 = vld [vmem:[#allocation41_spill] sm:$0xff] }
 0x587   : > { %8433 = vperm.xlu2 %8340, %v8432_v44   ;;  %v2685_v19 = vperm.slane %v10755_v41, 4  ;;  %v2686_v10 = vperm.slane %v10755_v41, 5  ;;  %v2681_v37 = vperm.slane %v10755_v41, 0  ;;  %v2682_v59 = vperm.slane %v10755_v41, 1 }
 0x588   : > { %v2687_v51 = vperm.slane %v10755_v41, 6  ;;  %v2688_v56 = vperm.slane %v10755_v41, 7 }
 0x589   : > { %v2749_v48 = vmul.f32 %v13345_v53, %v2685_v19  ;;  %v2750_v2 = vmul.f32 %v13346_v25, %v2686_v10  ;;  %v2745_v50 = vmul.f32 %v13347_v36, %v2681_v37  ;;  %v2746_v58 = vmul.f32 %v13348_v60, %v2682_v59  ;;  %v13361_v37 = vld [vmem:[#allocation59_spill] sm:$0xff] }
 0x58a   : > { %v2751_v61 = vmul.f32 %v13351_v20, %v2687_v51  ;;  %v2752_v14 = vmul.f32 %v13352_v26, %v2688_v56  ;;  %v8387_v19 = vpack.i.bf16 %v1525_v4, %v1524_v21  ;;  %v1486_v10 = vperm.slane %v10715_v8, 4  ;;  %v13365_v56 = vld [vmem:[#allocation44_spill] sm:$0xff]  ;;  %v13368_v20 = vld [vmem:[#allocation47_spill] sm:$0xff]  ;;  %v13369_v26 = vld [vmem:[#allocation49_spill] sm:$0xff] }
 0x58b   : > { %v8452_v55 = vpack.i.bf16 %v2750_v2, %v2749_v48  ;;  %v8442_v0 = vpack.i.bf16 %v2746_v58, %v2745_v50  ;;  %v13363_v48 = vld [vmem:[#allocation28_spill] sm:$0xff]  ;;  %v2673_v58 = vperm.slane %v10739_v45, 0  ;;  %v13374_v21 = vld [vmem:[#allocation53_spill] sm:$0xff] }
 0x58c   : > { %v8457_v11 = vpack.i.bf16 %v2752_v14, %v2751_v61  ;;  %v1530_v59 = vmul.f32 %v13361_v37, %v1486_v10  ;;  %v1531_v28 = vmul.f32 %v13362_v39, %v1486_v10  ;;  %v1536_v25 = vmul.f32 %v13363_v48, %v1489_v23  ;;  %v13364_v2 = vld [vmem:[#allocation16_spill] sm:$0xff]  ;;  %v13379_v37 = vld [vmem:[#allocation43_spill] sm:$0xff] }
 0x58d   : > { %v1537_v36 = vmul.f32 %v13364_v2, %v1489_v23  ;;  %v2737_v14 = vmul.f32 %v13369_v26, %v2673_v58  ;;  %v2744_v52 = vmul.f32 %v13374_v21, %v2680_v54  ;;  %v13382_v58 = vld [vmem:[#allocation48_spill] sm:$0xff] }
 0x58e   : > { %8363 = vperm.xlu0 %8339, %v8362_v42   ;;  %8443 = vperm.xlu1 %8341, %v8442_v0   ;;  %v8402_v13 = vpack.i.bf16 %v1531_v28, %v1530_v59 }
 0x58f   : > { %8453 = vperm.xlu2 %8340, %v8452_v55   ;;  %v8417_v60 = vpack.i.bf16 %v1537_v36, %v1536_v25  ;;  %v2674_v55 = vperm.slane %v10739_v45, 1  ;;  %v13376_v45 = vld [vmem:[#allocation54_spill] sm:$0xff] }
 0x596   : > { %8378 = vperm.xlu0 %8339, %v8377_v38   ;;  %v2661_v5 = vpop.xlane.xlu1 %2660  ;;  %8458 = vperm.xlu1 %8341, %v8457_v11   ;;  %v13370_v38 = vld [vmem:[#allocation17_spill] sm:$0xff] }
 0x597   : > { %8823 = vrcp.f32 %v2661_v5  ;;  %v2738_v11 = vmul.f32 %v13370_v38, %v2674_v55 }
 0x599   : > { %v8422_v40 = vpack.i.bf16 %v2738_v11, %v2737_v14 }
 0x59d   : > { %v10778_v12 = vpop.eup %8823 }
 0x59e   : > { %8383 = vperm.xlu0 %8339, %v8382_v24   ;;  %v2691_v22 = vperm.slane %v10778_v12, 2  ;;  %v2692_v33 = vperm.slane %v10778_v12, 3  ;;  %v2693_v57 = vperm.slane %v10778_v12, 4  ;;  %v2694_v16 = vperm.slane %v10778_v12, 5  ;;  %v13371_v24 = vld [vmem:[#allocation29_spill] sm:$0xff] }
 0x59f   : > { %v2695_v28 = vperm.slane %v10778_v12, 6 }
 0x5a0   : > { %v2755_v31 = vmul.f32 %v13357_v47, %v2691_v22  ;;  %v2756_v35 = vmul.f32 %v13358_v63, %v2692_v33  ;;  %v2757_v17 = vmul.f32 %v13359_v62, %v2693_v57  ;;  %v2758_v43 = vmul.f32 %v13360_v7, %v2694_v16  ;;  %v13372_v33 = vld [vmem:[#allocation50_spill] sm:$0xff]  ;;  %v13373_v16 = vld [vmem:[#allocation37_spill] sm:$0xff]  ;;  %v13375_v47 = vld [vmem:[#allocation8_spill] sm:$0xff] }
 0x5a1   : > { %v2743_v3 = vmul.f32 %v13373_v16, %v2679_v27  ;;  %v2683_v63 = vperm.slane %v10755_v41, 2 }
 0x5a2   : > { %v8467_v49 = vpack.i.bf16 %v2756_v35, %v2755_v31  ;;  %v8472_v44 = vpack.i.bf16 %v2758_v43, %v2757_v17  ;;  %v2684_v35 = vperm.slane %v10755_v41, 3  ;;  %v13377_v17 = vld [vmem:[#allocation33_spill] sm:$0xff]  ;;  %v2696_v41 = vperm.slane %v10778_v12, 7 }
 0x5a3   : > { %v8437_v31 = vpack.i.bf16 %v2744_v52, %v2743_v3  ;;  %v2747_v62 = vmul.f32 %v13376_v45, %v2683_v63 }
 0x5a4   : > { %8468 = vperm.xlu2 %8340, %v8467_v49   ;;  %8473 = vperm.xlu1 %8341, %v8472_v44   ;;  %v2748_v7 = vmul.f32 %v13377_v17, %v2684_v35  ;;  %v2689_v49 = vperm.slane %v10778_v12, 0  ;;  %v2690_v44 = vperm.slane %v10778_v12, 1 }
 0x5a6   : > { %8388 = vperm.xlu0 %8339, %v8387_v19   ;;  %v8447_v43 = vpack.i.bf16 %v2748_v7, %v2747_v62  ;;  %v13378_v19 = vld [vmem:[#allocation35_spill] sm:$0xff]  ;;  %v2754_v59 = vmul.f32 %v13379_v37, %v2690_v44 }
 0x5a7   : > { %v2753_v10 = vmul.f32 %v13378_v19, %v2689_v49 }
 0x5a9   : > { %v8462_v39 = vpack.i.bf16 %v2754_v59, %v2753_v10 }
 0x5ad   : > { %v2664_v53 = vpop.xlane.xlu2 %2663 }
 0x5ae   : > { %8825 = vrcp.f32 %v2664_v53  ;;  %8403 = vperm.xlu0 %8339, %v8402_v13   ;;  %v13380_v13 = vld [vmem:[#allocation42_spill] sm:$0xff]  ;;  %v13381_v53 = vld [vmem:[#allocation24_spill] sm:$0xff] }
 0x5af   : > { %v2759_v23 = vmul.f32 %v13380_v13, %v2695_v28  ;;  %v2760_v48 = vmul.f32 %v13381_v53, %v2696_v41 }
 0x5b1   : > { %v8477_v25 = vpack.i.bf16 %v2760_v48, %v2759_v23 }
 0x5b4   : > { %v8826_v50 = vpop.eup %8825 }
 0x5b5   : > { %v2697_v0 = vperm.slane %v8826_v50, 0  ;;  %v2698_v42 = vperm.slane %v8826_v50, 1  ;;  %v2699_v1 = vperm.slane %v8826_v50, 2  ;;  %v2700_v51 = vperm.slane %v8826_v50, 3 }
 0x5b6   : > { %8418 = vperm.xlu0 %8339, %v8417_v60   ;;  %v2703_v6 = vperm.slane %v8826_v50, 6  ;;  %v2704_v34 = vperm.slane %v8826_v50, 7  ;;  %v2701_v2 = vperm.slane %v8826_v50, 4  ;;  %v2702_v36 = vperm.slane %v8826_v50, 5 }
 0x5b7   : > { %v2761_v8 = vmul.f32 %v13365_v56, %v2697_v0  ;;  %v2762_v18 = vmul.f32 %v13366_v9, %v2698_v42  ;;  %v2763_v46 = vmul.f32 %v13367_v15, %v2699_v1  ;;  %v2764_v61 = vmul.f32 %v13368_v20, %v2700_v51  ;;  %v13383_v0 = vld [vmem:[#allocation31_spill] sm:$0xff]  ;;  %v588_v1 = vpop.f32.mrf.mxu3  ;;  %v13384_v20 = vld [vmem:[#allocation9_spill] sm:$0xff] }
 0x5b8   : > { %v2767_v22 = vmul.f32 %v13371_v24, %v2703_v6  ;;  %v2768_v57 = vmul.f32 %v13372_v33, %v2704_v34  ;;  %v2765_v55 = vmul.f32 %v13382_v58, %v2701_v2  ;;  %v2766_v42 = vmul.f32 %v13383_v0, %v2702_v36 }
 0x5b9   : > { %v8482_v32 = vpack.i.bf16 %v2762_v18, %v2761_v8  ;;  %v8487_v5 = vpack.i.bf16 %v2764_v61, %v2763_v46  ;;  %v606_v56 = vpack.c.bf16 %v588_v1, %v588_v1 }
 0x5ba   : > { %v8497_v4 = vpack.i.bf16 %v2768_v57, %v2767_v22  ;;  %v8492_v51 = vpack.i.bf16 %v2766_v42, %v2765_v55 }
 0x5bb   : > { %8483 = vperm.xlu2 %8340, %v8482_v32   ;;  %8488 = vperm.xlu1 %8341, %v8487_v5   ;;  %v2969_v9 = vunpack.c.l.b16 %v606_v56 }
 0x5be   : > { %8423 = vperm.xlu0 %8339, %v8422_v40  }
 0x5bf   : > { %v590_v12 = vpop.f32.mrf.mxu3 }
 0x5c0   : > { %v607_v18 = vpack.c.bf16 %v590_v12, %v590_v12 }
 0x5c2   : > { %v2970_v15 = vunpack.c.l.b16 %v607_v18 }
 0x5c3   : > { %8498 = vperm.xlu2 %8340, %v8497_v4   ;;  %8502 = vset.pattern.permute.xlu1 %v13375_v47 }
 0x5c4   : > { %v2971_v46 = vpack.c.b16 %v2970_v15, %v2969_v9 }
 0x5c6   : > { %8438 = vperm.xlu0 %8339, %v8437_v31   ;;  %2983 = vmatpush.bf16.msrb.mxu0 %v2971_v46 }
 0x5c7   : > { %v593_v35 = vpop.f32.mrf.mxu3 }
 0x5c8   : > { %v608_v23 = vpack.c.bf16 %v593_v35, %v593_v35 }
 0x5c9   : > { %v8369_v54 = vpop.permute.xlu2 %8368 }
 0x5ca   : > { %v8371_v4 = vunpack.i.h.bf16 %v8369_v54  ;;  %v8370_v31 = vunpack.i.l.bf16 %v8369_v54  ;;  %v2991_v42 = vunpack.c.l.b16 %v608_v23 }
 0x5cc   : > { %v1686_v59 = vperm.slane %v8371_v4, %v10022_v30 }
 0x5ce   : > { %8448 = vperm.xlu0 %8339, %v8447_v43  }
 0x5cf   : > { %v595_v55 = vpop.f32.mrf.mxu3 }
 0x5d0   : > { %v609_v1 = vpack.c.bf16 %v595_v55, %v595_v55 }
 0x5d2   : > { %v2992_v12 = vunpack.c.l.b16 %v609_v1 }
 0x5d4   : > { %v2993_v46 = vpack.c.b16 %v2992_v12, %v2991_v42 }
 0x5d6   : > { %8463 = vperm.xlu0 %8339, %v8462_v39   ;;  %v1685_v39 = vperm.slane %v8370_v31, %v10019_v29  ;;  %3005 = vmatpush.bf16.msra.mxu1 %v2993_v46 }
 0x5d8   : > { %v1687_v36 = vsel %vm1065_vm7, %v1686_v59, %v1685_v39 }
 0x5de   : > { %8478 = vperm.xlu0 %8339, %v8477_v25  }
 0x5e0   : > { %v8344_v60 = vpop.permute.xlu0 %8343  ;;  %v8374_v21 = vpop.permute.xlu1 %8373 }
 0x5e1   : > { %v8346_v32 = vunpack.i.h.bf16 %v8344_v60  ;;  %v8345_v5 = vunpack.i.l.bf16 %v8344_v60  ;;  %v8376_v7 = vunpack.i.h.bf16 %v8374_v21  ;;  %v8375_v44 = vunpack.i.l.bf16 %v8374_v21 }
 0x5e3   : > { %v1671_v33 = vperm.slane %v8346_v32, %v10022_v30  ;;  %v1670_v57 = vperm.slane %v8345_v5, %v10019_v29  ;;  %v1689_v48 = vperm.slane %v8376_v7, %v10022_v30  ;;  %v1688_v25 = vperm.slane %v8375_v44, %v10019_v29 }
 0x5e5   : > { %v1672_v43 = vsel %vm1065_vm7, %v1671_v33, %v1670_v57 }
 0x5e6   : > { %8493 = vperm.xlu0 %8339, %v8492_v51  }
 0x5e8   : > { %v8349_v8 = vpop.permute.xlu0 %8348 }
 0x5e9   : > { %v8351_v26 = vunpack.i.h.bf16 %v8349_v8  ;;  %v8350_v14 = vunpack.i.l.bf16 %v8349_v8  ;;  %v1690_v8 = vsel %vm1065_vm7, %v1689_v48, %v1688_v25 }
 0x5eb   : > { %v1674_v40 = vperm.slane %v8351_v26, %v10022_v30  ;;  %v1673_v27 = vperm.slane %v8350_v14, %v10019_v29 }
 0x5ed   : > { %v1675_v63 = vsel %vm1065_vm7, %v1674_v40, %v1673_v27 }
 0x5ee   : > { %8503 = vset.pattern.permute.xlu0 %v13384_v20  ;;  %v1718_v19 = vsel %vm1112_vm8, %v1675_v63, %v1672_v43 }
 0x5f0   : > { %v8354_v61 = vpop.permute.xlu0 %8353 }
 0x5f1   : > { %v8356_v38 = vunpack.i.h.bf16 %v8354_v61  ;;  %v8355_v11 = vunpack.i.l.bf16 %v8354_v61 }
 0x5f3   : > { %v1677_v24 = vperm.slane %v8356_v38, %v10022_v30  ;;  %v1676_v22 = vperm.slane %v8355_v11, %v10019_v29  ;;  %v8394_v38 = vpop.permute.xlu2 %8393  ;;  %v8399_v11 = vpop.permute.xlu1 %8398 }
 0x5f4   : > { %v8396_v27 = vunpack.i.h.bf16 %v8394_v38  ;;  %v8395_v54 = vunpack.i.l.bf16 %v8394_v38  ;;  %v8400_v21 = vunpack.i.l.bf16 %v8399_v11 }
 0x5f5   : > { %v1678_v45 = vsel %vm1065_vm7, %v1677_v24, %v1676_v22 }
 0x5f6   : > { %v1719_v28 = vsel %vm1114_vm9, %v1678_v45, %v1718_v19  ;;  %v1701_v4 = vperm.slane %v8396_v27, %v10022_v30  ;;  %v1700_v31 = vperm.slane %v8395_v54, %v10019_v29 }
 0x5f8   : > { %v8359_v50 = vpop.permute.xlu0 %8358 }
 0x5f9   : > { %v8361_v6 = vunpack.i.h.bf16 %v8359_v50  ;;  %v8360_v34 = vunpack.i.l.bf16 %v8359_v50 }
 0x5fb   : > { %v1680_v16 = vperm.slane %v8361_v6, %v10022_v30  ;;  %v1679_v3 = vperm.slane %v8360_v34, %v10019_v29 }
 0x5fd   : > { %v1681_v49 = vsel %vm1065_vm7, %v1680_v16, %v1679_v3  ;;  %v8409_v16 = vpop.permute.xlu2 %8408  ;;  %v8401_v3 = vunpack.i.h.bf16 %v8399_v11 }
 0x5fe   : > { %v1720_v41 = vsel %vm1116_vm10, %v1681_v49, %v1719_v28  ;;  %v8411_v35 = vunpack.i.h.bf16 %v8409_v16  ;;  %v8410_v45 = vunpack.i.l.bf16 %v8409_v16  ;;  %v1703_v49 = vperm.slane %v8400_v21, %v10019_v29 }
 0x5ff   : > { %v1704_v43 = vperm.slane %v8401_v3, %v10022_v30 }
 0x600   : > { %v8364_v52 = vpop.permute.xlu0 %8363  ;;  %v1709_v23 = vperm.slane %v8410_v45, %v10019_v29 }
 0x601   : > { %v8366_v62 = vunpack.i.h.bf16 %v8364_v52  ;;  %v8365_v17 = vunpack.i.l.bf16 %v8364_v52 }
 0x603   : > { %v1683_v10 = vperm.slane %v8366_v62, %v10022_v30  ;;  %v1682_v37 = vperm.slane %v8365_v17, %v10019_v29  ;;  %v8414_v62 = vpop.permute.xlu1 %8413 }
 0x604   : > { %v8416_v28 = vunpack.i.h.bf16 %v8414_v62 }
 0x605   : > { %v1684_v13 = vsel %vm1065_vm7, %v1683_v10, %v1682_v37  ;;  %v1702_v10 = vsel %vm1065_vm7, %v1701_v4, %v1700_v31 }
 0x606   : > { %v1721_v53 = vsel %vm13135_vm11, %v1684_v13, %v1720_v41  ;;  %v8415_v41 = vunpack.i.l.bf16 %v8414_v62  ;;  %v1710_v13 = vperm.slane %v8411_v35, %v10022_v30 }
 0x607   : > { %v1722_v0 = vsel %vm13134_vm12, %v1687_v36, %v1721_v53  ;;  %v1705_v53 = vsel %vm1065_vm7, %v1704_v43, %v1703_v49  ;;  %v1713_v36 = vperm.slane %v8416_v28, %v10022_v30 }
 0x608   : > { %v8379_v2 = vpop.permute.xlu0 %8378  ;;  %v1723_v18 = vsel %vm13133_vm13, %v1690_v8, %v1722_v0  ;;  %v1711_v55 = vsel %vm1065_vm7, %v1710_v13, %v1709_v23 }
 0x609   : > { %v8381_v60 = vunpack.i.h.bf16 %v8379_v2  ;;  %v8380_v58 = vunpack.i.l.bf16 %v8379_v2 }
 0x60b   : > { %v1692_v51 = vperm.slane %v8381_v60, %v10022_v30  ;;  %v1691_v56 = vperm.slane %v8380_v58, %v10019_v29  ;;  %v1712_v60 = vperm.slane %v8415_v41, %v10019_v29  ;;  %v8429_v1 = vpop.permute.xlu1 %8428 }
 0x60c   : > { %v8430_v38 = vunpack.i.l.bf16 %v8429_v1 }
 0x60d   : > { %v1693_v9 = vsel %vm1065_vm7, %v1692_v51, %v1691_v56  ;;  %v1714_v12 = vsel %vm1065_vm7, %v1713_v36, %v1712_v60 }
 0x60e   : > { %v1724_v15 = vsel %vm13132_vm14, %v1693_v9, %v1723_v18  ;;  %v2899_v54 = vperm.slane %v8430_v38, %v10019_v29 }
 0x60f   : > { %v1734_v50 = vsel %vm303_vm5, 0.0, %v1724_v15 }
 0x610   : > { %v8384_v26 = vpop.permute.xlu0 %8383  ;;  %v2965_v14 = vpack.c.bf16 %v1734_v50, %v1734_v50 }
 0x611   : > { %v8386_v32 = vunpack.i.h.bf16 %v8384_v26  ;;  %v8385_v5 = vunpack.i.l.bf16 %v8384_v26 }
 0x612   : > { %7396 = vmatmul.msk.bf16.vlgmr.msrb.gmra.mxu0 %vm13131_vm15, %v2965_v14 }
 0x613   : > { %v1695_v24 = vperm.slane %v8386_v32, %v10022_v30  ;;  %v1694_v22 = vperm.slane %v8385_v5, %v10019_v29  ;;  %v8434_v5 = vpop.permute.xlu2 %8433  ;;  %v8444_v27 = vpop.permute.xlu1 %8443 }
 0x614   : > { %v8436_v21 = vunpack.i.h.bf16 %v8434_v5  ;;  %v8445_v35 = vunpack.i.l.bf16 %v8444_v27 }
 0x615   : > { %v1696_v63 = vsel %vm1065_vm7, %v1695_v24, %v1694_v22  ;;  %v8435_v22 = vunpack.i.l.bf16 %v8434_v5 }
 0x617   : > { %v2901_v4 = vperm.slane %v8435_v22, %v10019_v29 }
 0x618   : > { %v8389_v6 = vpop.permute.xlu0 %8388 }
 0x619   : > { %v8391_v34 = vunpack.i.h.bf16 %v8389_v6  ;;  %v8390_v40 = vunpack.i.l.bf16 %v8389_v6 }
 0x61b   : > { %v1698_v33 = vperm.slane %v8391_v34, %v10022_v30  ;;  %v1697_v57 = vperm.slane %v8390_v40, %v10019_v29  ;;  %v8431_v40 = vunpack.i.h.bf16 %v8429_v1  ;;  %v8454_v31 = vpop.permute.xlu2 %8453  ;;  %v8459_v43 = vpop.permute.xlu1 %8458 }
 0x61c   : > { %v8456_v13 = vunpack.i.h.bf16 %v8454_v31  ;;  %v8460_v23 = vunpack.i.l.bf16 %v8459_v43  ;;  %v8461_v36 = vunpack.i.h.bf16 %v8459_v43 }
 0x61d   : > { %v1699_v52 = vsel %vm1065_vm7, %v1698_v33, %v1697_v57  ;;  %v2900_v57 = vperm.slane %v8431_v40, %v10019_v29 }
 0x61e   : > { %v1725_v17 = vsel %vm1112_vm8, %v1699_v52, %v1696_v63  ;;  %v8446_v63 = vunpack.i.h.bf16 %v8444_v27 }
 0x61f   : > { %v1726_v37 = vsel %vm1114_vm9, %v1702_v10, %v1725_v17 }
 0x620   : > { %v8404_v7 = vpop.permute.xlu0 %8403  ;;  %v1727_v25 = vsel %vm1116_vm10, %v1705_v53, %v1726_v37  ;;  %v2906_v49 = vperm.slane %v8446_v63, %v10019_v29 }
 0x621   : > { %v8406_v44 = vunpack.i.h.bf16 %v8404_v7  ;;  %v8405_v19 = vunpack.i.l.bf16 %v8404_v7  ;;  %v2902_v7 = vperm.slane %v8436_v21, %v10019_v29 }
 0x623   : > { %v1707_v59 = vperm.slane %v8406_v44, %v10022_v30  ;;  %v1706_v39 = vperm.slane %v8405_v19, %v10019_v29  ;;  %v2905_v44 = vperm.slane %v8445_v35, %v10019_v29 }
 0x625   : > { %v1708_v48 = vsel %vm1065_vm7, %v1707_v59, %v1706_v39  ;;  %v8455_v59 = vunpack.i.l.bf16 %v8454_v31 }
 0x626   : > { %v1728_v2 = vsel %vm13135_vm11, %v1708_v48, %v1727_v25  ;;  %v8469_v25 = vpop.permute.xlu2 %8468 }
 0x627   : > { %v1729_v51 = vsel %vm13134_vm12, %v1711_v55, %v1728_v2  ;;  %v2936_v2 = vsel %vm1112_vm8, %v2906_v49, %v2905_v44 }
 0x628   : > { %v8419_v58 = vpop.permute.xlu0 %8418  ;;  %v1730_v18 = vsel %vm13133_vm13, %v1714_v12, %v1729_v51  ;;  %v2911_v51 = vperm.slane %v8460_v23, %v10019_v29 }
 0x629   : > { %v8421_v0 = vunpack.i.h.bf16 %v8419_v58  ;;  %v8420_v42 = vunpack.i.l.bf16 %v8419_v58  ;;  %v2909_v58 = vperm.slane %v8455_v59, %v10019_v29 }
 0x62b   : > { %v1716_v56 = vperm.slane %v8421_v0, %v10022_v30  ;;  %v1715_v8 = vperm.slane %v8420_v42, %v10019_v29  ;;  %v2910_v0 = vperm.slane %v8456_v13, %v10019_v29  ;;  %v8474_v42 = vpop.permute.xlu1 %8473 }
 0x62c   : > { %v8476_v35 = vunpack.i.h.bf16 %v8474_v42 }
 0x62d   : > { %v1717_v9 = vsel %vm1065_vm7, %v1716_v56, %v1715_v8 }
 0x62e   : > { %v1731_v15 = vsel %vm13132_vm14, %v1717_v9, %v1730_v18  ;;  %v8470_v9 = vunpack.i.l.bf16 %v8469_v25  ;;  %v2912_v18 = vperm.slane %v8461_v36, %v10019_v29 }
 0x62f   : > { %v1735_v50 = vsel %vm304_vm6, 0.0, %v1731_v15 }
 0x630   : > { %v8424_v26 = vpop.permute.xlu0 %8423  ;;  %v2966_v14 = vpack.c.bf16 %v1735_v50, %v1735_v50 }
 0x631   : > { %v8426_v11 = vunpack.i.h.bf16 %v8424_v26  ;;  %v8425_v32 = vunpack.i.l.bf16 %v8424_v26 }
 0x632   : > { %7397 = vmatmul.msk.bf16.vlgmr.msra.gmra.mxu1 %vm13131_vm15, %v2966_v14 }
 0x633   : > { %v2898_v6 = vperm.slane %v8426_v11, %v10019_v29  ;;  %v2897_v34 = vperm.slane %v8425_v32, %v10019_v29  ;;  %v8471_v11 = vunpack.i.h.bf16 %v8469_v25 }
 0x635   : > { %v2929_v24 = vsel %vm1112_vm8, %v2898_v6, %v2897_v34 }
 0x636   : > { %v2930_v33 = vsel %vm1114_vm9, %v2899_v54, %v2929_v24  ;;  %v2915_v54 = vperm.slane %v8470_v9, %v10019_v29  ;;  %v8484_v24 = vpop.permute.xlu2 %8483 }
 0x637   : > { %v2931_v52 = vsel %vm1116_vm10, %v2900_v57, %v2930_v33  ;;  %v8475_v33 = vunpack.i.l.bf16 %v8474_v42  ;;  %v8486_v31 = vunpack.i.h.bf16 %v8484_v24  ;;  %v8485_v63 = vunpack.i.l.bf16 %v8484_v24 }
 0x638   : > { %v8439_v16 = vpop.permute.xlu0 %8438  ;;  %v2932_v17 = vsel %vm13135_vm11, %v2901_v4, %v2931_v52 }
 0x639   : > { %v8440_v3 = vunpack.i.l.bf16 %v8439_v16  ;;  %v8441_v45 = vunpack.i.h.bf16 %v8439_v16  ;;  %v2933_v10 = vsel %vm13134_vm12, %v2902_v7, %v2932_v17  ;;  %v2916_v16 = vperm.slane %v8471_v11, %v10019_v29 }
 0x63a   : > { %v2917_v7 = vperm.slane %v8475_v33, %v10019_v29  ;;  %v2921_v59 = vperm.slane %v8485_v63, %v10019_v29  ;;  %v8152_v33 = vld [vmem:[%s13023_s3 + $0x78] sm:$0xff] }
 0x63b   : > { %v2903_v62 = vperm.slane %v8440_v3, %v10019_v29  ;;  %v2904_v19 = vperm.slane %v8441_v45, %v10019_v29  ;;  %v8489_v3 = vpop.permute.xlu1 %8488  ;;  %3216 = vmatpush.bf16.msrb.mxu1 %v8152_v33  ;;  %v8148_v63 = vld [vmem:[%s13023_s3 + $0x58] sm:$0xff] }
 0x63c   : > { %v8490_v43 = vunpack.i.l.bf16 %v8489_v3 }
 0x63d   : > { %v2934_v39 = vsel %vm13133_vm13, %v2903_v62, %v2933_v10 }
 0x63e   : > { %v2935_v60 = vsel %vm13132_vm14, %v2904_v19, %v2934_v39  ;;  %v2918_v39 = vperm.slane %v8476_v35, %v10019_v29  ;;  %v8499_v13 = vpop.permute.xlu2 %8498  ;;  %v8139_v35 = vld [vmem:[%s13023_s3 + $0x10] sm:$0xff] }
 0x63f   : > { %v2961_v8 = vsel %vm317_vm2, 0.0, %v2935_v60  ;;  %v8500_v60 = vunpack.i.l.bf16 %v8499_v13  ;;  %v8501_v42 = vunpack.i.h.bf16 %v8499_v13  ;;  %v8165_v13 = vld [vmem:[%s13023_s3 + $0xa0] sm:$0xff] }
 0x640   : > { %v8449_v37 = vpop.permute.xlu0 %8448  ;;  %v3011_v32 = vpack.c.bf16 %v2961_v8, %v2961_v8 }
 0x641   : > { %v8451_v28 = vunpack.i.h.bf16 %v8449_v37  ;;  %v8450_v41 = vunpack.i.l.bf16 %v8449_v37  ;;  %v2922_v37 = vperm.slane %v8486_v31, %v10019_v29  ;;  %v2927_v9 = vperm.slane %v8500_v60, %v10019_v29  ;;  %v8140_v31 = vld [vmem:[%s13023_s3 + $0x18] sm:$0xff] }
 0x642   : > { %v3017_v21 = vunpack.c.l.b16 %v3011_v32 }
 0x643   : > { %v2908_v53 = vperm.slane %v8451_v28, %v10019_v29  ;;  %v2907_v48 = vperm.slane %v8450_v41, %v10019_v29  ;;  %v8491_v28 = vunpack.i.h.bf16 %v8489_v3  ;;  %v2923_v41 = vperm.slane %v8490_v43, %v10019_v29  ;;  %v8142_v3 = vld [vmem:[%s13023_s3 + $0x28] sm:$0xff]  ;;  %v8137_v43 = vld [vmem:[%s13023_s3] sm:$0xff] }
 0x644   : > { %v2950_v25 = vsel %vm1112_vm8, %v2922_v37, %v2921_v59  ;;  %v8167_v37 = vld [vmem:[%s13023_s3 + $0xb0] sm:$0xff] }
 0x645   : > { %v2937_v55 = vsel %vm1114_vm9, %v2907_v48, %v2936_v2  ;;  %v2924_v2 = vperm.slane %v8491_v28, %v10019_v29  ;;  %v8175_v59 = vld [vmem:[%s13023_s3 + $0xf0] sm:$0xff]  ;;  %v8166_v28 = vld [vmem:[%s13023_s3 + $0xa8] sm:$0xff] }
 0x646   : > { %v2938_v1 = vsel %vm1116_vm10, %v2908_v53, %v2937_v55 }
 0x647   : > { %v2939_v12 = vsel %vm13135_vm11, %v2909_v58, %v2938_v1  ;;  %v2951_v58 = vsel %vm1114_vm9, %v2923_v41, %v2950_v25  ;;  %v8174_v41 = vld [vmem:[%s13023_s3 + $0xe8] sm:$0xff] }
 0x648   : > { %v2940_v15 = vsel %vm13134_vm12, %v2910_v0, %v2939_v12  ;;  %v8464_v50 = vpop.permute.xlu0 %8463  ;;  %v2952_v12 = vsel %vm1116_vm10, %v2924_v2, %v2951_v58  ;;  %v8164_v58 = vld [vmem:[%s13023_s3 + $0x98] sm:$0xff] }
 0x649   : > { %v2941_v26 = vsel %vm13133_vm13, %v2911_v51, %v2940_v15  ;;  %v8466_v14 = vunpack.i.h.bf16 %v8464_v50  ;;  %v8465_v38 = vunpack.i.l.bf16 %v8464_v50 }
 0x64a   : > { %v2942_v5 = vsel %vm13132_vm14, %v2912_v18, %v2941_v26  ;;  %v2928_v26 = vperm.slane %v8501_v42, %v10019_v29  ;;  %v8172_v42 = vld [vmem:[%s13023_s3 + $0xd8] sm:$0xff] }
 0x64b   : > { %v2914_v6 = vperm.slane %v8466_v14, %v10019_v29  ;;  %v2913_v34 = vperm.slane %v8465_v38, %v10019_v29  ;;  %v2962_v27 = vsel %vm318_vm1, 0.0, %v2942_v5 }
 0x64c   : > { %v3012_v22 = vpack.c.bf16 %v2962_v27, %v2962_v27 }
 0x64d   : > { %v2943_v57 = vsel %vm1112_vm8, %v2914_v6, %v2913_v34 }
 0x64e   : > { %v2944_v52 = vsel %vm1114_vm9, %v2915_v54, %v2943_v57  ;;  %v3018_v4 = vunpack.c.l.b16 %v3012_v22  ;;  %v8144_v22 = vld [vmem:[%s13023_s3 + $0x38] sm:$0xff]  ;;  %v8143_v57 = vld [vmem:[%s13023_s3 + $0x30] sm:$0xff] }
 0x64f   : > { %v2945_v45 = vsel %vm1116_vm10, %v2916_v16, %v2944_v52  ;;  %3202 = vmatpush.bf16.msra.mxu0 %v8144_v22  ;;  %v8151_v16 = vld [vmem:[%s13023_s3 + $0x70] sm:$0xff]  ;;  %v8141_v52 = vld [vmem:[%s13023_s3 + $0x20] sm:$0xff] }
 0x650   : > { %v8479_v62 = vpop.permute.xlu0 %8478  ;;  %v3019_v17 = vpack.c.b16 %v3018_v4, %v3017_v21  ;;  %v2946_v10 = vsel %vm13135_vm11, %v2917_v7, %v2945_v45  ;;  %3217 = vmatpush.bf16.msrb.mxu1 %v8151_v16  ;;  %v8150_v21 = vld [vmem:[%s13023_s3 + $0x68] sm:$0xff]  ;;  %v8149_v4 = vld [vmem:[%s13023_s3 + $0x60] sm:$0xff]  ;;  %v8147_v45 = vld [vmem:[%s13023_s3 + $0x50] sm:$0xff] }
 0x651   : > { %v8480_v49 = vunpack.i.l.bf16 %v8479_v62  ;;  %v8481_v44 = vunpack.i.h.bf16 %v8479_v62  ;;  %v2947_v53 = vsel %vm13134_vm12, %v2918_v39, %v2946_v10  ;;  %v8146_v7 = vld [vmem:[%s13023_s3 + $0x48] sm:$0xff]  ;;  %v8176_v10 = vld [vmem:[%s13023_s3 + $0xf8] sm:$0xff]  ;;  %v8993_v39 = vld [vmem:[%s9315_s29] sm:$0xff]  ;;  %s9010_s29 = sshra.s32 %s7104_s14, 4  ;;  %s9011_s29 = int_to_ptr.hbm [resolvable:$true] %s9010_s29 }
 0x652   : > { %7398 = vmatmul.msk.bf16.vlgmr.msra.gmra.mxu2 %vm13130_vm0, %v3019_v17  ;;  %v8138_v17 = vld [vmem:[%s13023_s3 + $0x8] sm:$0xff]  ;;  %v8157_v22 = vld [vmem:[%s13024_s4 + $0x20] sm:$0xff]  ;;  %s9012_s16 = scalar_lea.hbm %s9011_s29, 16  ;;  %p9017_p0 = scmp.lt.s32.totalorder %s9011_s29, %s13025_s5 }
 0x653   : > { %v2919_v19 = vperm.slane %v8480_v49, %v10019_v29  ;;  %v2920_v23 = vperm.slane %v8481_v44, %v10019_v29  ;;  %3203 = vmatpush.bf16.msra.mxu0 %v8143_v57  ;;  %v8145_v49 = vld [vmem:[%s13023_s3 + $0x40] sm:$0xff]  ;;  %p9013_p11 = scmp.ne.s32.totalorder %s9011_s29, %s9012_s16  ;;  %p9018_p1 = scmp.lt.s32.totalorder %s9016_s19, %s9012_s16 }
 0x654   : > { %3218 = vmatpush.bf16.msrb.mxu1 %v8150_v21 }
 0x655   : > { %v2948_v48 = vsel %vm13133_vm13, %v2919_v19, %v2947_v53  ;;  %v8168_v19 = vld [vmem:[%s13023_s3 + $0xb8] sm:$0xff]  ;;  %p9014_p12 = pnand %p9013_p11, %p9169_p5  ;;  %p9019_p2 = por %p9018_p1, %p9017_p0 }
 0x656   : > { %v2949_v1 = vsel %vm13132_vm14, %v2920_v23, %v2948_v48  ;;  %3503 = vmatpush.bf16.msra.mxu3 %v8168_v19 }
 0x657   : > { %v2963_v50 = vsel %vm319_vm3, 0.0, %v2949_v1  ;;  %3204 = vmatpush.bf16.msra.mxu0 %v8142_v3  ;;  %v8162_v1 = vld [vmem:[%s13023_s3 + $0x88] sm:$0xff]  ;;  %p9015_p13 = pneg %p9014_p12 }
 0x658   : > { %v8494_v36 = vpop.permute.xlu0 %8493  ;;  %v3013_v32 = vpack.c.bf16 %v2963_v50, %v2963_v50  ;;  %3219 = vmatpush.bf16.msrb.mxu1 %v8149_v4 }
 0x659   : > { %v8496_v55 = vunpack.i.h.bf16 %v8494_v36  ;;  %v8495_v0 = vunpack.i.l.bf16 %v8494_v36  ;;  %p9020_p3 = pnand %p9019_p2, %p9015_p13 }
 0x65a   : > { %v3043_v27 = vunpack.c.l.b16 %v3013_v32  ;;  %3504 = vmatpush.bf16.msra.mxu3 %v8167_v37 }
 0x65b   : > { %v2926_v51 = vperm.slane %v8496_v55, %v10019_v29  ;;  %v2925_v8 = vperm.slane %v8495_v0, %v10019_v29  ;;  %3205 = vmatpush.bf16.msra.mxu0 %v8141_v52  ;;  %v8173_v55 = vld [vmem:[%s13023_s3 + $0xe0] sm:$0xff]  ;;  %v8163_v0 = vld [vmem:[%s13023_s3 + $0x90] sm:$0xff] }
 0x65c   : > { %3220 = vmatpush.bf16.msrb.mxu1 %v8148_v63  ;;  %v8155_v63 = vld [vmem:[%s13024_s4 + $0x10] sm:$0xff] }
 0x65d   : > { %v2953_v18 = vsel %vm13135_vm11, %v2925_v8, %v2952_v12  ;;  %v8161_v8 = vld [vmem:[%s13023_s3 + $0x80] sm:$0xff]  ;;  %v8170_v12 = vld [vmem:[%s13023_s3 + $0xc8] sm:$0xff] }
 0x65e   : > { %v2954_v14 = vsel %vm13134_vm12, %v2926_v51, %v2953_v18  ;;  %3505 = vmatpush.bf16.msra.mxu3 %v8166_v28  ;;  %v8171_v51 = vld [vmem:[%s13023_s3 + $0xd0] sm:$0xff]  ;;  %v8994_v18 = vld [vmem:[%s9300_s15] sm:$0xff] }
 0x65f   : > { %v2955_v38 = vsel %vm13133_vm13, %v2927_v9, %v2954_v14  ;;  %3206 = vmatpush.bf16.msra.mxu0 %v8140_v31  ;;  %v8169_v9 = vld [vmem:[%s13023_s3 + $0xc0] sm:$0xff]  ;;  %v8156_v31 = vld [vmem:[%s13024_s4 + $0x18] sm:$0xff] }
 0x660   : > { %v2956_v11 = vsel %vm13132_vm14, %v2928_v26, %v2955_v38  ;;  %3221 = vmatpush.bf16.msrb.mxu1 %v8147_v45  ;;  %v8160_v26 = vld [vmem:[%s13024_s4 + $0x38] sm:$0xff]  ;;  %v8159_v38 = vld [vmem:[%s13024_s4 + $0x30] sm:$0xff]  ;;  %v8153_v45 = vld [vmem:[%s13024_s4] sm:$0xff] }
 0x661   : > { %v2964_v6 = vsel %vm320_vm4, 0.0, %v2956_v11  ;;  %3297 = vmatpush.bf16.msrb.mxu2 %v8160_v26 }
 0x662   : > { %v3014_v34 = vpack.c.bf16 %v2964_v6, %v2964_v6  ;;  %3506 = vmatpush.bf16.msra.mxu3 %v8165_v13  ;;  %v8995_v6 = vld [vmem:[%s9300_s15 + $0x8] sm:$0xff]  ;;  %v8180_v13 = vld [vmem:[%s13024_s4 + $0x58] sm:$0xff]  ;;  %s7101_s15 = sshll.u32 %s267_s13, 4  ;;  %s7102_s15 = int_to_ptr.vmem [resolvable:$true] %s7101_s15 }
 0x663   : > { %3207 = vmatpush.bf16.msra.mxu0 %v8139_v35  ;;  %v8154_v35 = vld [vmem:[%s13024_s4 + $0x8] sm:$0xff] }
 0x664   : > { %v3044_v54 = vunpack.c.l.b16 %v3014_v34  ;;  %3222 = vmatpush.bf16.msrb.mxu1 %v8146_v7  ;;  %v8182_v7 = vld [vmem:[%s13024_s4 + $0x68] sm:$0xff] }
 0x665   : > { %3298 = vmatpush.bf16.msrb.mxu2 %v8159_v38 }
 0x666   : > { %v3045_v24 = vpack.c.b16 %v3044_v54, %v3043_v27  ;;  %3507 = vmatpush.bf16.msra.mxu3 %v8164_v58  ;;  %v8158_v54 = vld [vmem:[%s13024_s4 + $0x28] sm:$0xff] }
 0x667   : > { %3208 = vmatpush.bf16.msra.mxu0 %v8138_v17  ;;  %v8183_v17 = vld [vmem:[%s13024_s4 + $0x70] sm:$0xff] }
 0x668   : > { %7399 = vmatmul.msk.bf16.vlgmr.msrb.gmra.mxu3 %vm13130_vm0, %v3045_v24  ;;  %3223 = vmatpush.bf16.msrb.mxu1 %v8145_v49 }
 0x669   : > { %3299 = vmatpush.bf16.msrb.mxu2 %v8158_v54 }
 0x66a   : > { %3508 = vmatpush.bf16.msra.mxu3 %v8163_v0 }
 0x66b   : > { %3209 = vmatpush.bf16.msra.mxu0 %v8137_v43  ;;  %3224 = vmatmul.bf16.vlgmr.msrb.gmra.mxu1 %v8993_v39  ;;  %v8181_v43 = vld [vmem:[%s13024_s4 + $0x60] sm:$0xff] }
 0x66d   : > { %3300 = vmatpush.bf16.msrb.mxu2 %v8157_v22 }
 0x66e   : > { %3509 = vmatpush.bf16.msra.mxu3 %v8162_v1 }
 0x66f   : > { %3522 = vmatpush.bf16.msrb.mxu0 %v8176_v10 }
 0x671   : > { %3301 = vmatpush.bf16.msrb.mxu2 %v8156_v31 }
 0x672   : > { %3510 = vmatpush.bf16.msra.mxu3 %v8161_v8 }
 0x673   : > { %3523 = vmatpush.bf16.msrb.mxu0 %v8175_v59 }
 0x675   : > { %3302 = vmatpush.bf16.msrb.mxu2 %v8155_v63 }
 0x677   : > { %3524 = vmatpush.bf16.msrb.mxu0 %v8174_v41 }
 0x679   : > { %3303 = vmatpush.bf16.msrb.mxu2 %v8154_v35 }
 0x67b   : > { %3525 = vmatpush.bf16.msrb.mxu0 %v8173_v55 }
 0x67d   : > { %3304 = vmatpush.bf16.msrb.mxu2 %v8153_v45 }
 0x67f   : > { %3526 = vmatpush.bf16.msrb.mxu0 %v8172_v42 }
 0x683   : > { %3527 = vmatpush.bf16.msrb.mxu0 %v8171_v51 }
 0x687   : > { %3528 = vmatpush.bf16.msrb.mxu0 %v8170_v12 }
 0x68b   : > { %3529 = vmatpush.bf16.msrb.mxu0 %v8169_v9 }
 0x68f   : > { %v2985_v62 = vpop.f32.mrf.mxu0 }
 0x690   : > { %v3066_v23 = vpack.c.bf16 %v2985_v62, %v2985_v62  ;;  %v8184_v62 = vld [vmem:[%s13024_s4 + $0x78] sm:$0xff] }
 0x691   : > { %3612 = vmatpush.bf16.msra.mxu1 %v8184_v62 }
 0x692   : > { %v3070_v25 = vunpack.c.l.b16 %v3066_v23  ;;  %v8179_v23 = vld [vmem:[%s13024_s4 + $0x50] sm:$0xff] }
 0x695   : > { %3613 = vmatpush.bf16.msra.mxu1 %v8183_v17 }
 0x697   : > { %v2987_v44 = vpop.f32.mrf.mxu0 }
 0x699   : > { %3614 = vmatpush.bf16.msra.mxu1 %v8182_v7 }
 0x69d   : > { %3615 = vmatpush.bf16.msra.mxu1 %v8181_v43 }
 0x6a1   : > { %3616 = vmatpush.bf16.msra.mxu1 %v8180_v13 }
 0x6a5   : > { %3617 = vmatpush.bf16.msra.mxu1 %v8179_v23 }
 0x6af   : > { %v3007_v53 = vpop.f32.mrf.mxu1 }
 0x6b0   : > { %v3067_v48 = vpack.c.bf16 %v3007_v53, %v3007_v53  ;;  %v8178_v53 = vld [vmem:[%s13024_s4 + $0x48] sm:$0xff] }
 0x6b1   : > { %3618 = vmatpush.bf16.msra.mxu1 %v8178_v53 }
 0x6b2   : > { %v3071_v2 = vunpack.c.l.b16 %v3067_v48  ;;  %v8177_v48 = vld [vmem:[%s13024_s4 + $0x40] sm:$0xff] }
 0x6b4   : > { %v3072_v36 = vpack.c.b16 %v3071_v2, %v3070_v25 }
 0x6b5   : > { %3619 = vmatpush.bf16.msra.mxu1 %v8177_v48 }
 0x6b6   : > { %3210 = vmatmul.bf16.vlgmr.msra.gmra.mxu0 %v3072_v36 }
 0x6b7   : > { %v3009_v60 = vpop.f32.mrf.mxu1 }
 0x6c6   : > { %3530 = vmatmul.bf16.vlgmr.msrb.gmra.mxu0 %v8994_v18 }
 0x6d5   : > { %v3036_v50 = vpop.f32.mrf.mxu2 }
 0x6d6   : > { %v3358_v14 = vpack.c.bf16 %v3036_v50, %v3036_v50  ;;  %3535 = vmatmul.bf16.gmra.mxu0 %v8995_v6 }
 0x6d8   : > { %v3366_v34 = vunpack.c.l.b16 %v3358_v14 }
 0x6dd   : > { %v3038_v11 = vpop.f32.mrf.mxu2 }
 0x6de   : > { %v3359_v32 = vpack.c.bf16 %v3038_v11, %v3038_v11 }
 0x6e0   : > { %v3367_v27 = vunpack.c.l.b16 %v3359_v32 }
 0x6e2   : > { %v3370_v24 = vpack.c.b16 %v3367_v27, %v3366_v34 }
 0x6e4   : > { %3511 = vmatmul.bf16.vlgmr.msra.gmra.mxu3 %v3370_v24  ;;  %v9093_v24 = vmov 128.0  }
 0x6e5   : > { %8827 = vrcp.f32 %v9093_v24  ;;  %v8193_v24 = vld [vmem:[%s13022_s2 + $0x144] sm:$0xf] }
 0x6e8   : > { %v3225_v49 = vpop.f32.mrf.mxu1 }
 0x6eb   : > { %v3061_v33 = vpop.f32.mrf.mxu3  ;;  %v8828_v22 = vpop.eup %8827 }
 0x6ec   : > { %v3360_v57 = vpack.c.bf16 %v3061_v33, %v3061_v33  ;;  %v3316_v33 = vmul.f32 128.0, %v8828_v22  ;;  %vm3320_vm0 = vweird.f32 %v8828_v22 }
 0x6ee   : > { %v3368_v21 = vunpack.c.l.b16 %v3360_v57  ;;  %v3317_v57 = vsub.f32 1.0, %v3316_v33 }
 0x6f0   : > { %v3227_v19 = vpop.f32.mrf.mxu1 }
 0x6f3   : > { %v3063_v16 = vpop.f32.mrf.mxu3 }
 0x6f4   : > { %v3361_v3 = vpack.c.bf16 %v3063_v16, %v3063_v16  ;;  %v3318_v16 = vmul.f32 %v8828_v22, %v3317_v57 }
 0x6f6   : > { %v3369_v52 = vunpack.c.l.b16 %v3361_v3  ;;  %v3319_v3 = vadd.f32 %v8828_v22, %v3318_v16  ;;  %v7682_v16 = vld [vmem:[%s13022_s2 + $0x130] sm:$0xf] }
 0x6f8   : > { %v3371_v4 = vpack.c.b16 %v3369_v52, %v3368_v21  ;;  %v11111_v21 = vsel %vm3320_vm0, %v8828_v22, %v3319_v3  ;;  %v7692_v22 = vld [vmem:[%s13022_s2 + $0x148] sm:$0xf0]  ;;  %v8192_v3 = vld [vmem:[%s13022_s2 + $0x134] sm:$0xf0] }
 0x6f9   : > { %13391 = vst [vmem:[#allocation52_spill] sm:$0xff] %v11111_v21  ;;  %v7695_v57 = vor.u32 %v8193_v24, %v7692_v22 }
 0x6fa   : > { %3516 = vmatmul.bf16.gmra.mxu3 %v3371_v4 }
 0x733   : > { %v3211_v44 = vpop.f32.mrf.mxu0 }
 0x734   : > { %v3226_v10 = vadd.f32 %v3225_v49, %v3211_v44 }
 0x736   : > { %v3230_v39 = vmax.f32 %v3226_v10, 0.0 }
 0x73b   : > { %v3213_v37 = vpop.f32.mrf.mxu0 }
 0x73c   : > { %v3228_v59 = vadd.f32 %v3227_v19, %v3213_v37 }
 0x73e   : > { %v3231_v28 = vmax.f32 %v3228_v59, 0.0 }
 0x740   : > { %v3232_v41 = vpack.c.bf16 %v3231_v28, %v3230_v39 }
 0x742   : > { %3305 = vmatmul.bf16.vlgmr.msrb.gmra.mxu2 %v3232_v41 }
 0x743   : > { %v3531_v25 = vpop.f32.mrf.mxu0 }
 0x74b   : > { %v3533_v58 = vpop.f32.mrf.mxu0 }
 0x753   : > { %v3536_v51 = vpop.f32.mrf.mxu0 }
 0x75b   : > { %v3538_v12 = vpop.f32.mrf.mxu0 }
 0x767   : > { %v3512_v2 = vpop.f32.mrf.mxu3 }
 0x768   : > { %v3532_v36 = vadd.f32 %v3531_v25, %v3512_v2  ;;  %v7714_v2 = vld [vmem:[%s13022_s2 + $0x170] sm:$0xf] }
 0x76a   : > { %v3541_v0 = vmax.f32 %v3532_v36, 0.0  ;;  %v8200_v36 = vld [vmem:[%s13022_s2 + $0x174] sm:$0xf0] }
 0x76f   : > { %v3514_v60 = vpop.f32.mrf.mxu3 }
 0x770   : > { %v3534_v55 = vadd.f32 %v3533_v58, %v3514_v60  ;;  %v8199_v60 = vld [vmem:[%s13022_s2 + $0x174] sm:$0xf]  ;;  %v7715_v58 = vor.u32 %v8200_v36, %v7714_v2  ;;  %v7668_v36 = vld [vmem:[%s13022_s2 + $0x118] sm:$0xf0] }
 0x771   : > { %v8187_v2 = vld [vmem:[%s13022_s2 + $0x114] sm:$0xf] }
 0x772   : > { %v3542_v42 = vmax.f32 %v3534_v55, 0.0  ;;  %v7716_v55 = vld [vmem:[%s13022_s2 + $0x178] sm:$0xf0]  ;;  %3820 = vmatpush.bf16.msra.mxu2 %v7715_v58 }
 0x774   : > { %v3545_v1 = vpack.c.bf16 %v3542_v42, %v3541_v0  ;;  %v7719_v0 = vor.u32 %v8199_v60, %v7716_v55  ;;  %v7706_v42 = vld [vmem:[%s13022_s2 + $0x160] sm:$0xf] }
 0x776   : > { %3620 = vmatmul.bf16.vlgmr.msra.gmra.mxu1 %v3545_v1  ;;  %3834 = vmatpush.bf16.msrb.mxu3 %v7719_v0  ;;  %v8198_v1 = vld [vmem:[%s13022_s2 + $0x164] sm:$0xf0]  ;;  %v7671_v0 = vor.u32 %v8187_v2, %v7668_v36 }
 0x777   : > { %v8210_v2 = vld [vmem:[%s13022_s2 + $0x1c4] sm:$0xf0] }
 0x77d   : > { %v3517_v8 = vpop.f32.mrf.mxu3 }
 0x77e   : > { %v3537_v9 = vadd.f32 %v3536_v51, %v3517_v8  ;;  %v8197_v51 = vld [vmem:[%s13022_s2 + $0x164] sm:$0xf]  ;;  %v7707_v8 = vor.u32 %v8198_v1, %v7706_v42  ;;  %v7658_v42 = vld [vmem:[%s13022_s2 + $0x100] sm:$0xf]  ;;  %v8186_v1 = vld [vmem:[%s13022_s2 + $0x104] sm:$0xf0] }
 0x780   : > { %v3543_v26 = vmax.f32 %v3537_v9, 0.0  ;;  %v7698_v9 = vld [vmem:[%s13022_s2 + $0x150] sm:$0xf]  ;;  %3821 = vmatpush.bf16.msra.mxu2 %v7707_v8  ;;  %v8185_v8 = vld [vmem:[%s13022_s2 + $0x104] sm:$0xf] }
 0x785   : > { %v3519_v18 = vpop.f32.mrf.mxu3 }
 0x786   : > { %v3539_v50 = vadd.f32 %v3538_v12, %v3519_v18  ;;  %v7708_v12 = vld [vmem:[%s13022_s2 + $0x168] sm:$0xf0]  ;;  %v8196_v18 = vld [vmem:[%s13022_s2 + $0x154] sm:$0xf0] }
 0x788   : > { %v3544_v14 = vmax.f32 %v3539_v50, 0.0 }
 0x78a   : > { %v3546_v38 = vpack.c.bf16 %v3544_v14, %v3543_v26  ;;  %v7711_v26 = vor.u32 %v8197_v51, %v7708_v12  ;;  %v8195_v14 = vld [vmem:[%s13022_s2 + $0x154] sm:$0xf]  ;;  %v7660_v12 = vld [vmem:[%s13022_s2 + $0x108] sm:$0xf0] }
 0x78c   : > { %3625 = vmatmul.bf16.gmra.mxu1 %v3546_v38  ;;  %v7700_v38 = vld [vmem:[%s13022_s2 + $0x158] sm:$0xf0]  ;;  %3835 = vmatpush.bf16.msrb.mxu3 %v7711_v26 }
 0x7c5   : > { %v3306_v11 = vpop.f32.mrf.mxu2 }
 0x7c6   : > { %3311 = vadd.xlane.f32.xlu1 %v3306_v11 }
 0x7cd   : > { %v3308_v32 = vpop.f32.mrf.mxu2 }
 0x7ce   : > { %3313 = vadd.xlane.f32.xlu0 %v3308_v32 }
 0x7f3   : > { %v3621_v6 = vpop.f32.mrf.mxu1 }
 0x7f4   : > { %3631 = vadd.xlane.f32.xlu0 %v3621_v6 }
 0x7fb   : > { %v3623_v34 = vpop.f32.mrf.mxu1 }
 0x7fc   : > { %3633 = vadd.xlane.f32.xlu2 %v3623_v34 }
 0x809   : > { %v3626_v27 = vpop.f32.mrf.mxu1 }
 0x80a   : > { %3635 = vadd.xlane.f32.xlu1 %v3626_v27 }
 0x811   : > { %v3628_v54 = vpop.f32.mrf.mxu1 }
 0x812   : > { %3637 = vadd.xlane.f32.xlu0 %v3628_v54 }
 0x839   : > { %v3312_v52 = vpop.xlane.xlu1 %3311 }
 0x83a   : > { %v3322_v4 = vmul.f32 %v11111_v21, %v3312_v52  ;;  %v8191_v52 = vld [vmem:[%s13022_s2 + $0x134] sm:$0xf] }
 0x83c   : > { %v11114_v31 = vsub.f32 %v3306_v11, %v3322_v4  ;;  %v7684_v4 = vld [vmem:[%s13022_s2 + $0x138] sm:$0xf0] }
 0x83e   : > { %v3326_v63 = vmul.f32 %v11114_v31, %v11114_v31 }
 0x840   : > { %3328 = vadd.xlane.f32.xlu2 %v3326_v63 }
 0x841   : > { %v3314_v35 = vpop.xlane.xlu0 %3313 }
 0x842   : > { %v3323_v45 = vmul.f32 %v11111_v21, %v3314_v35 }
 0x844   : > { %v11119_v62 = vsub.f32 %v3308_v32, %v3323_v45  ;;  %v7699_v32 = vor.u32 %v8196_v18, %v7698_v9  ;;  %v7683_v45 = vor.u32 %v8192_v3, %v7682_v16  ;;  %v7794_v16 = vld [vmem:[%s13022_s2 + $0x1f0] sm:$0xf]  ;;  %v8216_v3 = vld [vmem:[%s13022_s2 + $0x1f4] sm:$0xf0] }
 0x846   : > { %v3327_v17 = vmul.f32 %v11119_v62, %v11119_v62  ;;  %3822 = vmatpush.bf16.msra.mxu2 %v7699_v32 }
 0x848   : > { %3330 = vadd.xlane.f32.xlu1 %v3327_v17  ;;  %v7687_v17 = vor.u32 %v8191_v52, %v7684_v4  ;;  %v7795_v4 = vor.u32 %v8216_v3, %v7794_v16  ;;  %v8204_v16 = vld [vmem:[%s13022_s2 + $0x194] sm:$0xf0] }
 0x84a   : > { %3957 = vmatpush.bf16.msra.mxu0 %v7795_v4  ;;  %v8203_v4 = vld [vmem:[%s13022_s2 + $0x194] sm:$0xf] }
 0x867   : > { %v3632_v7 = vpop.xlane.xlu0 %3631 }
 0x868   : > { %v3639_v43 = vmul.f32 %v3632_v7, %v11111_v21  ;;  %v7674_v7 = vld [vmem:[%s13022_s2 + $0x120] sm:$0xf] }
 0x86a   : > { %v11124_v49 = vsub.f32 %v3621_v6, %v3639_v43  ;;  %v7703_v6 = vor.u32 %v8195_v14, %v7700_v38  ;;  %v8190_v43 = vld [vmem:[%s13022_s2 + $0x124] sm:$0xf0]  ;;  %v7663_v14 = vor.u32 %v8185_v8, %v7660_v12  ;;  %v8208_v8 = vld [vmem:[%s13022_s2 + $0x1b4] sm:$0xf0]  ;;  %v8207_v12 = vld [vmem:[%s13022_s2 + $0x1b4] sm:$0xf] }
 0x86c   : > { %v3647_v44 = vmul.f32 %v11124_v49, %v11124_v49  ;;  %3836 = vmatpush.bf16.msrb.mxu3 %v7703_v6 }
 0x86e   : > { %3651 = vadd.xlane.f32.xlu2 %v3647_v44 }
 0x86f   : > { %v3634_v19 = vpop.xlane.xlu2 %3633 }
 0x870   : > { %v3640_v10 = vmul.f32 %v3634_v19, %v11111_v21  ;;  %3837 = vmatpush.bf16.msrb.mxu3 %v7695_v57 }
 0x872   : > { %v11129_v37 = vsub.f32 %v3623_v34, %v3640_v10  ;;  %v7690_v34 = vld [vmem:[%s13022_s2 + $0x140] sm:$0xf]  ;;  %v8189_v10 = vld [vmem:[%s13022_s2 + $0x124] sm:$0xf] }
 0x874   : > { %v3648_v59 = vmul.f32 %v11129_v37, %v11129_v37  ;;  %3838 = vmatpush.bf16.msrb.mxu3 %v7687_v17  ;;  %v8213_v17 = vld [vmem:[%s13022_s2 + $0x1e4] sm:$0xf] }
 0x876   : > { %3653 = vadd.xlane.f32.xlu1 %v3648_v59  ;;  %v7676_v59 = vld [vmem:[%s13022_s2 + $0x128] sm:$0xf0] }
 0x87d   : > { %v3636_v39 = vpop.xlane.xlu1 %3635 }
 0x87e   : > { %v3641_v28 = vmul.f32 %v3636_v39, %v11111_v21 }
 0x880   : > { %v11134_v41 = vsub.f32 %v3626_v27, %v3641_v28  ;;  %v8194_v27 = vld [vmem:[%s13022_s2 + $0x144] sm:$0xf0]  ;;  %v7675_v28 = vor.u32 %v8190_v43, %v7674_v7  ;;  %v7788_v43 = vld [vmem:[%s13022_s2 + $0x1e8] sm:$0xf0] }
 0x881   : > { %v7691_v33 = vor.u32 %v8194_v27, %v7690_v34 }
 0x882   : > { %v3649_v13 = vmul.f32 %v11134_v41, %v11134_v41 }
 0x883   : > { %3823 = vmatpush.bf16.msra.mxu2 %v7691_v33 }
 0x884   : > { %3655 = vadd.xlane.f32.xlu0 %v3649_v13 }
 0x885   : > { %v3638_v23 = vpop.xlane.xlu0 %3637 }
 0x886   : > { %v3642_v53 = vmul.f32 %v3638_v23, %v11111_v21  ;;  %v7679_v23 = vor.u32 %v8189_v10, %v7676_v59  ;;  %v7791_v59 = vor.u32 %v8213_v17, %v7788_v43  ;;  %v8201_v43 = vld [vmem:[%s13022_s2 + $0x184] sm:$0xf] }
 0x887   : > { %3824 = vmatpush.bf16.msra.mxu2 %v7683_v45  ;;  %v8214_v45 = vld [vmem:[%s13022_s2 + $0x1e4] sm:$0xf0] }
 0x888   : > { %v11139_v48 = vsub.f32 %v3628_v54, %v3642_v53  ;;  %v7666_v53 = vld [vmem:[%s13022_s2 + $0x110] sm:$0xf]  ;;  %3839 = vmatpush.bf16.msrb.mxu3 %v7679_v23 }
 0x88a   : > { %v3650_v25 = vmul.f32 %v11139_v48, %v11139_v48 }
 0x88b   : > { %3825 = vmatpush.bf16.msra.mxu2 %v7675_v28  ;;  %v7780_v28 = vld [vmem:[%s13022_s2 + $0x1d8] sm:$0xf0] }
 0x88c   : > { %3657 = vadd.xlane.f32.xlu2 %v3650_v25  ;;  %v8188_v25 = vld [vmem:[%s13022_s2 + $0x114] sm:$0xf0]  ;;  %3840 = vmatpush.bf16.msrb.mxu3 %v7671_v0 }
 0x88d   : > { %v7667_v58 = vor.u32 %v8188_v25, %v7666_v53  ;;  %v7770_v25 = vld [vmem:[%s13022_s2 + $0x1c0] sm:$0xf] }
 0x88f   : > { %3826 = vmatpush.bf16.msra.mxu2 %v7667_v58  ;;  %v7772_v58 = vld [vmem:[%s13022_s2 + $0x1c8] sm:$0xf0] }
 0x890   : > { %3841 = vmatpush.bf16.msrb.mxu3 %v7663_v14  ;;  %v7754_v14 = vld [vmem:[%s13022_s2 + $0x1a0] sm:$0xf] }
 0x8b3   : > { %v3329_v50 = vpop.xlane.xlu2 %3328 }
 0x8b4   : > { %v3332_v11 = vmul.f32 %v3329_v50, %v11111_v21  ;;  %v7659_v50 = vor.u32 %v8186_v1, %v7658_v42 }
 0x8b6   : > { %v3334_v54 = vadd.f32 1e-05, %v3332_v11  ;;  %3827 = vmatpush.bf16.msra.mxu2 %v7659_v50 }
 0x8b8   : > { %8829 = vrsqrt.f32 %v3334_v54  ;;  %vm3342_vm15 = vweird.f32 %v3334_v54 }
 0x8bb   : > { %v3331_v63 = vpop.xlane.xlu1 %3330 }
 0x8bc   : > { %v3333_v35 = vmul.f32 %v3331_v63, %v11111_v21 }
 0x8be   : > { %v8830_v44 = vpop.eup %8829  ;;  %v3335_v19 = vadd.f32 1e-05, %v3333_v35  ;;  %v7786_v35 = vld [vmem:[%s13022_s2 + $0x1e0] sm:$0xf] }
 0x8bf   : > { %v3337_v39 = vmul.f32 %v8830_v44, %v3334_v54  ;;  %vm3343_vm0 = vweird.f32 %v8830_v44  ;;  %v7787_v7 = vor.u32 %v8214_v45, %v7786_v35 }
 0x8c0   : > { %8831 = vrsqrt.f32 %v3335_v19  ;;  %vm3344_vm14 = vmor %vm3342_vm15, %vm3343_vm0  ;;  %vm3352_vm12 = vweird.f32 %v3335_v19 }
 0x8c1   : > { %v3338_v13 = vmul.f32 %v8830_v44, %v3337_v39  ;;  %v8211_v39 = vld [vmem:[%s13022_s2 + $0x1d4] sm:$0xf]  ;;  %3958 = vmatpush.bf16.msra.mxu0 %v7787_v7  ;;  %v8202_v7 = vld [vmem:[%s13022_s2 + $0x184] sm:$0xf0] }
 0x8c2   : > { %v7783_v53 = vor.u32 %v8211_v39, %v7780_v28 }
 0x8c3   : > { %v3339_v60 = vmul.f32 0.5, %v3338_v13 }
 0x8c5   : > { %v3340_v55 = vsub.f32 1.5, %v3339_v60  ;;  %v8209_v60 = vld [vmem:[%s13022_s2 + $0x1c4] sm:$0xf] }
 0x8c6   : > { %v8832_v51 = vpop.eup %8831  ;;  %v7775_v0 = vor.u32 %v8209_v60, %v7772_v58  ;;  %v8231_v60 = vld [vmem:[%s13023_s3 + $0x170] sm:$0xff] }
 0x8c7   : > { %v3341_v9 = vmul.f32 %v8830_v44, %v3340_v55  ;;  %v3347_v18 = vmul.f32 %v8832_v51, %v3335_v19  ;;  %vm3353_vm13 = vweird.f32 %v8832_v51  ;;  %v8212_v19 = vld [vmem:[%s13022_s2 + $0x1d4] sm:$0xf0]  ;;  %v7771_v55 = vor.u32 %v8210_v2, %v7770_v25 }
 0x8c8   : > { %vm3354_vm11 = vmor %vm3352_vm12, %vm3353_vm13 }
 0x8c9   : > { %v3348_v26 = vmul.f32 %v8832_v51, %v3347_v18  ;;  %v3345_v38 = vsel %vm3344_vm14, %v8830_v44, %v3341_v9  ;;  %v7778_v44 = vld [vmem:[%s13022_s2 + $0x1d0] sm:$0xf] }
 0x8ca   : > { %v3356_v6 = vmul.f32 %v3345_v38, %v11114_v31  ;;  %v8215_v31 = vld [vmem:[%s13022_s2 + $0x1f4] sm:$0xf]  ;;  %v7779_v23 = vor.u32 %v8212_v19, %v7778_v44  ;;  %v7740_v44 = vld [vmem:[%s13022_s2 + $0x188] sm:$0xf0] }
 0x8cb   : > { %v3349_v11 = vmul.f32 0.5, %v3348_v26  ;;  %v7764_v26 = vld [vmem:[%s13022_s2 + $0x1b8] sm:$0xf0]  ;;  %v7743_v39 = vor.u32 %v8201_v43, %v7740_v44 }
 0x8cc   : > { %v3711_v22 = vpack.c.bf16 %v3356_v6, %v3356_v6  ;;  %3959 = vmatpush.bf16.msra.mxu0 %v7779_v23  ;;  %v8205_v6 = vld [vmem:[%s13022_s2 + $0x1a4] sm:$0xf] }
 0x8cd   : > { %v3350_v32 = vsub.f32 1.5, %v3349_v11  ;;  %v7767_v11 = vor.u32 %v8207_v12, %v7764_v26 }
 0x8ce   : > { %v3736_v33 = vunpack.c.l.b16 %v3711_v22 }
 0x8cf   : > { %v3351_v34 = vmul.f32 %v8832_v51, %v3350_v32  ;;  %v8206_v32 = vld [vmem:[%s13022_s2 + $0x1a4] sm:$0xf0] }
 0x8d0   : > { %3960 = vmatpush.bf16.msra.mxu0 %v7771_v55 }
 0x8d1   : > { %v3355_v27 = vsel %vm3354_vm11, %v8832_v51, %v3351_v34  ;;  %v7762_v51 = vld [vmem:[%s13022_s2 + $0x1b0] sm:$0xf]  ;;  %v7756_v34 = vld [vmem:[%s13022_s2 + $0x1a8] sm:$0xf0] }
 0x8d2   : > { %v3357_v24 = vmul.f32 %v3355_v27, %v11119_v62  ;;  %v7796_v62 = vld [vmem:[%s13022_s2 + $0x1f8] sm:$0xf0]  ;;  %v7763_v50 = vor.u32 %v8208_v8, %v7762_v51  ;;  %v7755_v27 = vor.u32 %v8206_v32, %v7754_v14  ;;  %v7759_v22 = vor.u32 %v8205_v6, %v7756_v34 }
 0x8d3   : > { %v7799_v63 = vor.u32 %v8215_v31, %v7796_v62  ;;  %v7748_v62 = vld [vmem:[%s13022_s2 + $0x198] sm:$0xf0] }
 0x8d4   : > { %v3712_v54 = vpack.c.bf16 %v3357_v24, %v3357_v24  ;;  %3961 = vmatpush.bf16.msra.mxu0 %v7763_v50  ;;  %v7751_v17 = vor.u32 %v8203_v4, %v7748_v62  ;;  %v8228_v6 = vld [vmem:[%s13023_s3 + $0x158] sm:$0xff] }
 0x8d5   : > { %3976 = vmatpush.bf16.msrb.mxu1 %v7799_v63  ;;  %v7738_v63 = vld [vmem:[%s13022_s2 + $0x180] sm:$0xf] }
 0x8d6   : > { %v3737_v57 = vunpack.c.l.b16 %v3712_v54  ;;  %v7739_v19 = vor.u32 %v8202_v7, %v7738_v63  ;;  %v8225_v63 = vld [vmem:[%s13023_s3 + $0x140] sm:$0xff] }
 0x8d8   : > { %v11252_v52 = vpack.c.b16 %v3737_v57, %v3736_v33  ;;  %3962 = vmatpush.bf16.msra.mxu0 %v7755_v27  ;;  %v7746_v57 = vld [vmem:[%s13022_s2 + $0x190] sm:$0xf] }
 0x8d9   : > { %3977 = vmatpush.bf16.msrb.mxu1 %v7791_v59  ;;  %v7747_v31 = vor.u32 %v8204_v16, %v7746_v57 }
 0x8da   : > { %3828 = vmatmul.bf16.vlgmr.msra.gmra.mxu2 %v11252_v52  ;;  %3842 = vmatmul.bf16.vlgmr.msrb.gmra.mxu3 %v11252_v52 }
 0x8dc   : > { %3963 = vmatpush.bf16.msra.mxu0 %v7747_v31 }
 0x8dd   : > { %3978 = vmatpush.bf16.msrb.mxu1 %v7783_v53 }
 0x8e0   : > { %3964 = vmatpush.bf16.msra.mxu0 %v7739_v19 }
 0x8e1   : > { %v3652_v10 = vpop.xlane.xlu2 %3651  ;;  %3979 = vmatpush.bf16.msrb.mxu1 %v7775_v0 }
 0x8e2   : > { %v3659_v13 = vmul.f32 %v3652_v10, %v11111_v21 }
 0x8e4   : > { %v3663_v36 = vadd.f32 1e-05, %v3659_v13  ;;  %v8232_v13 = vld [vmem:[%s13023_s3 + $0x178] sm:$0xff] }
 0x8e5   : > { %3980 = vmatpush.bf16.msrb.mxu1 %v7767_v11 }
 0x8e6   : > { %8833 = vrsqrt.f32 %v3663_v36  ;;  %vm3673_vm12 = vweird.f32 %v3663_v36 }
 0x8e9   : > { %v3654_v42 = vpop.xlane.xlu1 %3653  ;;  %3981 = vmatpush.bf16.msrb.mxu1 %v7759_v22 }
 0x8ea   : > { %v3660_v1 = vmul.f32 %v3654_v42, %v11111_v21 }
 0x8ec   : > { %v8834_v9 = vpop.eup %8833  ;;  %v3664_v18 = vadd.f32 1e-05, %v3660_v1 }
 0x8ed   : > { %v3668_v38 = vmul.f32 %v8834_v9, %v3663_v36  ;;  %vm3674_vm11 = vweird.f32 %v8834_v9  ;;  %3982 = vmatpush.bf16.msrb.mxu1 %v7751_v17 }
 0x8ee   : > { %8835 = vrsqrt.f32 %v3664_v18  ;;  %vm3675_vm13 = vmor %vm3673_vm12, %vm3674_vm11  ;;  %vm3683_vm15 = vweird.f32 %v3664_v18 }
 0x8ef   : > { %v3669_v24 = vmul.f32 %v8834_v9, %v3668_v38  ;;  %v8229_v38 = vld [vmem:[%s13023_s3 + $0x160] sm:$0xff] }
 0x8f1   : > { %v3670_v54 = vmul.f32 0.5, %v3669_v24  ;;  %3983 = vmatpush.bf16.msrb.mxu1 %v7743_v39 }
 0x8f3   : > { %v3671_v33 = vsub.f32 1.5, %v3670_v54  ;;  %v8227_v54 = vld [vmem:[%s13023_s3 + $0x150] sm:$0xff] }
 0x8f4   : > { %v8836_v3 = vpop.eup %8835 }
 0x8f5   : > { %v3672_v35 = vmul.f32 %v8834_v9, %v3671_v33  ;;  %v3678_v45 = vmul.f32 %v8836_v3, %v3664_v18  ;;  %vm3684_vm14 = vweird.f32 %v8836_v3  ;;  %6588 = vmatpush.bf16.msra.mxu1 %v8232_v13 }
 0x8f6   : > { %vm3685_vm0 = vmor %vm3683_vm15, %vm3684_vm14 }
 0x8f7   : > { %v3679_v10 = vmul.f32 %v8836_v3, %v3678_v45  ;;  %v3656_v59 = vpop.xlane.xlu0 %3655  ;;  %v3676_v23 = vsel %vm3675_vm13, %v8834_v9, %v3672_v35 }
 0x8f8   : > { %v3661_v28 = vmul.f32 %v3656_v59, %v11111_v21  ;;  %v3707_v36 = vmul.f32 %v3676_v23, %v11124_v49  ;;  %v8230_v49 = vld [vmem:[%s13023_s3 + $0x168] sm:$0xff] }
 0x8f9   : > { %v3680_v53 = vmul.f32 0.5, %v3679_v10  ;;  %6589 = vmatpush.bf16.msra.mxu1 %v8231_v60 }
 0x8fa   : > { %v3665_v25 = vadd.f32 1e-05, %v3661_v28  ;;  %v3713_v51 = vpack.c.bf16 %v3707_v36, %v3707_v36 }
 0x8fb   : > { %v3681_v2 = vsub.f32 1.5, %v3680_v53 }
 0x8fc   : > { %8837 = vrsqrt.f32 %v3665_v25  ;;  %v3869_v26 = vunpack.c.l.b16 %v3713_v51  ;;  %vm3693_vm12 = vweird.f32 %v3665_v25 }
 0x8fd   : > { %v3682_v58 = vmul.f32 %v8836_v3, %v3681_v2  ;;  %6590 = vmatpush.bf16.msra.mxu1 %v8230_v49 }
 0x8ff   : > { %v3686_v55 = vsel %vm3685_vm0, %v8836_v3, %v3682_v58  ;;  %v3658_v0 = vpop.xlane.xlu2 %3657  ;;  %v8226_v3 = vld [vmem:[%s13023_s3 + $0x148] sm:$0xff] }
 0x900   : > { %v3662_v42 = vmul.f32 %v3658_v0, %v11111_v21  ;;  %v3708_v1 = vmul.f32 %v3686_v55, %v11129_v37 }
 0x901   : > { %6591 = vmatpush.bf16.msra.mxu1 %v8229_v38 }
 0x902   : > { %v8838_v8 = vpop.eup %8837  ;;  %v3666_v12 = vadd.f32 1e-05, %v3662_v42  ;;  %v3714_v9 = vpack.c.bf16 %v3708_v1, %v3708_v1 }
 0x903   : > { %v3688_v50 = vmul.f32 %v8838_v8, %v3665_v25  ;;  %vm3694_vm11 = vweird.f32 %v8838_v8 }
 0x904   : > { %8839 = vrsqrt.f32 %v3666_v12  ;;  %v3870_v18 = vunpack.c.l.b16 %v3714_v9  ;;  %vm3695_vm13 = vmor %vm3693_vm12, %vm3694_vm11  ;;  %vm3703_vm15 = vweird.f32 %v3666_v12  ;;  %vm13394_vm11 = vcmask 1043456  }
 0x905   : > { %v3689_v14 = vmul.f32 %v8838_v8, %v3688_v50  ;;  %6592 = vmatpush.bf16.msra.mxu1 %v8228_v6  ;;  %vm13395_vm12 = vmmov %vm13394_vm11 }
 0x906   : > { %v11361_v37 = vpack.c.b16 %v3870_v18, %v3869_v26 }
 0x907   : > { %v3690_v11 = vmul.f32 0.5, %v3689_v14 }
 0x908   : > { %13392 = vst [vmem:[#allocation23_spill] sm:$0xff] %v11361_v37  ;;  %3965 = vmatmul.bf16.vlgmr.msra.gmra.mxu0 %v11361_v37  ;;  %3984 = vmatmul.bf16.vlgmr.msrb.gmra.mxu1 %v11361_v37 }
 0x909   : > { %v3691_v32 = vsub.f32 1.5, %v3690_v11  ;;  %6593 = vmatpush.bf16.msra.mxu1 %v8227_v54 }
 0x90a   : > { %v8840_v34 = vpop.eup %8839 }
 0x90b   : > { %v3692_v27 = vmul.f32 %v8838_v8, %v3691_v32  ;;  %v3698_v24 = vmul.f32 %v8840_v34, %v3666_v12  ;;  %vm3704_vm14 = vweird.f32 %v8840_v34 }
 0x90c   : > { %vm3705_vm0 = vmor %vm3703_vm15, %vm3704_vm14  ;;  %vm13431_vm14 = vcmask 1045509   ;;  %vm13432_vm15 = vcmask 1046534  }
 0x90d   : > { %v3699_v22 = vmul.f32 %v8840_v34, %v3698_v24  ;;  %v3696_v57 = vsel %vm3695_vm13, %v8838_v8, %v3692_v27  ;;  %6594 = vmatpush.bf16.msra.mxu1 %v8226_v3  ;;  %vm13430_vm13 = vcmask 1044484  }
 0x90e   : > { %v3709_v31 = vmul.f32 %v3696_v57, %v11134_v41 }
 0x90f   : > { %v3700_v33 = vmul.f32 0.5, %v3699_v22 }
 0x910   : > { %v3715_v45 = vpack.c.bf16 %v3709_v31, %v3709_v31 }
 0x911   : > { %v3701_v16 = vsub.f32 1.5, %v3700_v33  ;;  %6595 = vmatpush.bf16.msra.mxu1 %v8225_v63 }
 0x912   : > { %v3871_v7 = vunpack.c.l.b16 %v3715_v45 }
 0x913   : > { %v3702_v4 = vmul.f32 %v8840_v34, %v3701_v16 }
 0x915   : > { %v3706_v62 = vsel %vm3705_vm0, %v8840_v34, %v3702_v4  ;;  %vm13433_vm0 = vcmask 1047559  }
 0x916   : > { %v3710_v35 = vmul.f32 %v3706_v62, %v11139_v48 }
 0x918   : > { %v3716_v17 = vpack.c.bf16 %v3710_v35, %v3710_v35 }
 0x91a   : > { %v3872_v43 = vunpack.c.l.b16 %v3716_v17 }
 0x91c   : > { %v11379_v44 = vpack.c.b16 %v3872_v43, %v3871_v7 }
 0x91e   : > { %13393 = vst [vmem:[#allocation34_spill] sm:$0xff] %v11379_v44  ;;  %3970 = vmatmul.bf16.gmra.mxu0 %v11379_v44  ;;  %3989 = vmatmul.bf16.gmra.mxu1 %v11379_v44 }
 0x92e   : > { %6596 = vmatmul.bf16.vlgmr.msra.gmra.mxu1 %v11252_v52 }
 0x95d   : > { %v3843_v58 = vpop.f32.mrf.mxu3  ;;  %v3829_v55 = vpop.f32.mrf.mxu2 }
 0x95e   : > { %v3997_v0 = vpack.c.bf16 %v3843_v58, %v3843_v58  ;;  %v3995_v52 = vpack.c.bf16 %v3829_v55, %v3829_v55 }
 0x960   : > { %v6396_v42 = vsel %vm13394_vm11, %v3997_v0, 0  ;;  %vm13434_vm11 = vcmask 130048  }
 0x965   : > { %v3845_v34 = vpop.f32.mrf.mxu3  ;;  %v3831_v27 = vpop.f32.mrf.mxu2 }
 0x966   : > { %v3998_v24 = vpack.c.bf16 %v3845_v34, %v3845_v34  ;;  %v3996_v22 = vpack.c.bf16 %v3831_v27, %v3831_v27 }
 0x968   : > { %v6421_v54 = vsel %vm13395_vm12, %v3998_v24, 0  ;;  %vm13435_vm12 = vmmov %vm13430_vm13 }
 0x985   : > { %v3966_v41 = vpop.f32.mrf.mxu0  ;;  %v3985_v19 = vpop.f32.mrf.mxu1 }
 0x986   : > { %v3999_v10 = vpack.c.bf16 %v3966_v41, %v3966_v41  ;;  %v4003_v59 = vpack.c.bf16 %v3985_v19, %v3985_v19 }
 0x988   : > { %v4009_v23 = vunpack.c.l.b16 %v3999_v10  ;;  %v6341_v53 = vunpack.c.l.b16 %v4003_v59 }
 0x98d   : > { %v3968_v39 = vpop.f32.mrf.mxu0  ;;  %v3987_v28 = vpop.f32.mrf.mxu1 }
 0x98e   : > { %v4000_v48 = vpack.c.bf16 %v3968_v39, %v3968_v39  ;;  %v4004_v13 = vpack.c.bf16 %v3987_v28, %v3987_v28 }
 0x990   : > { %v4010_v25 = vunpack.c.l.b16 %v4000_v48  ;;  %v6342_v2 = vunpack.c.l.b16 %v4004_v13 }
 0x992   : > { %v4011_v36 = vpack.c.b16 %v4010_v25, %v4009_v23  ;;  %v6343_v60 = vpack.c.b16 %v6342_v2, %v6341_v53 }
 0x994   : > { %4020 = vmatpush.bf16.xpose.msrb.mxu2 %v4011_v36 }
 0x99b   : > { %v3971_v1 = vpop.f32.mrf.mxu0  ;;  %v3990_v51 = vpop.f32.mrf.mxu1  ;;  %4021 = vmatmul.bf16.vlgmr.msrb.gmra.mxu2 %v3995_v52 }
 0x99c   : > { %6355 = vmatpush.bf16.msra.mxu2 %v6343_v60  ;;  %v4001_v49 = vpack.c.bf16 %v3971_v1, %v3971_v1  ;;  %v4005_v8 = vpack.c.bf16 %v3990_v51, %v3990_v51 }
 0x99e   : > { %v4028_v18 = vunpack.c.l.b16 %v4001_v49  ;;  %v6363_v14 = vunpack.c.l.b16 %v4005_v8 }
 0x9a0   : > { %6405 = vmatpush.bf16.msrb.mxu2 %v6396_v42 }
 0x9a3   : > { %v3973_v12 = vpop.f32.mrf.mxu0  ;;  %v3992_v9 = vpop.f32.mrf.mxu1 }
 0x9a4   : > { %v4002_v50 = vpack.c.bf16 %v3973_v12, %v3973_v12  ;;  %v4006_v26 = vpack.c.bf16 %v3992_v9, %v3992_v9 }
 0x9a6   : > { %v4029_v38 = vunpack.c.l.b16 %v4002_v50  ;;  %v6364_v11 = vunpack.c.l.b16 %v4006_v26 }
 0x9a8   : > { %v4030_v32 = vpack.c.b16 %v4029_v38, %v4028_v18  ;;  %v6365_v6 = vpack.c.b16 %v6364_v11, %v6363_v14 }
 0x9aa   : > { %4039 = vmatpush.bf16.xpose.msra.mxu3 %v4030_v32 }
 0x9b1   : > { %4040 = vmatmul.bf16.vlgmr.msra.gmra.mxu3 %v3996_v22 }
 0x9b2   : > { %6377 = vmatpush.bf16.msrb.mxu3 %v6365_v6 }
 0x9b6   : > { %6430 = vmatpush.bf16.msra.mxu3 %v6421_v54 }
 0xa1e   : > { %v4022_v33 = vpop.f32.mrf.mxu2 }
 0xa1f   : > { %v4045_v57 = vmul.f32 0.088388346, %v4022_v33 }
 0xa21   : > { %5109 = vxpose.xlu2.b32.start.end [1/1] (short) (narrow) %v4045_v57, 16  ;;  %v4049_v16 = vperm.slane %v4045_v57, 0  ;;  %v4088_v31 = vperm.slane %v4045_v57, 3  ;;  %v4062_v4 = vperm.slane %v4045_v57, 1  ;;  %v4114_v63 = vperm.slane %v4045_v57, 5 }
 0xa22   : > { %v4075_v35 = vperm.slane %v4045_v57, 2  ;;  %v4140_v17 = vperm.slane %v4045_v57, 7  ;;  %v4101_v7 = vperm.slane %v4045_v57, 4  ;;  %v4127_v43 = vperm.slane %v4045_v57, 6 }
 0xa23   : > { %4060 = vperm.xlu0 %8503, %v4049_v16   ;;  %4054 = vperm.xlu1 %8502, %v4049_v16  }
 0xa26   : > { %v4024_v3 = vpop.f32.mrf.mxu2 }
 0xa2b   : > { %4099 = vperm.xlu0 %8503, %v4088_v31   ;;  %8505 = vset.pattern.permute.xlu1 %v13384_v20 }
 0xa33   : > { %8508 = vset.pattern.permute.xlu0 %v13375_v47  ;;  %4073 = vperm.xlu1 %8505, %v4062_v4  }
 0xa34   : > { %v4041_v62 = vpop.f32.mrf.mxu3 }
 0xa35   : > { %v11391_v41 = vmul.f32 0.088388346, %v4041_v62 }
 0xa37   : > { %v4153_v19 = vperm.slane %v11391_v41, 0  ;;  %v4166_v10 = vperm.slane %v11391_v41, 1  ;;  %v4179_v59 = vperm.slane %v11391_v41, 2  ;;  %v4192_v39 = vperm.slane %v11391_v41, 3 }
 0xa38   : > { %v4218_v28 = vperm.slane %v11391_v41, 5  ;;  %v4231_v48 = vperm.slane %v11391_v41, 6  ;;  %v4244_v13 = vperm.slane %v11391_v41, 7  ;;  %v4205_v51 = vperm.slane %v11391_v41, 4 }
 0xa3b   : > { %4119 = vperm.xlu0 %8508, %v4114_v63   ;;  %4086 = vperm.xlu1 %8505, %v4075_v35  }
 0xa3c   : > { %v4043_v45 = vpop.f32.mrf.mxu3 }
 0xa43   : > { %8511 = vset.pattern.permute.xlu0 %v13384_v20  ;;  %8506 = vset.pattern.permute.xlu1 %v13375_v47 }
 0xa4b   : > { %4151 = vperm.xlu0 %8511, %v4140_v17   ;;  %4106 = vperm.xlu1 %8506, %v4101_v7  }
 0xa53   : > { %8509 = vset.pattern.permute.xlu1 %v13384_v20 }
 0xa5b   : > { %4125 = vperm.xlu1 %8509, %v4114_v63  }
 0xa63   : > { %4138 = vperm.xlu1 %8509, %v4127_v43  }
 0xa6b   : > { %8512 = vset.pattern.permute.xlu1 %v13375_v47 }
 0xa6d   : > { %5141 = vxpose.xlu0.b32.start.end [1/1] (short) (narrow) %v11391_v41, 16 }
 0xa73   : > { %4158 = vperm.xlu1 %8512, %v4153_v19  }
 0xa7b   : > { %4171 = vperm.xlu1 %8512, %v4166_v10  }
 0xa83   : > { %8515 = vset.pattern.permute.xlu1 %v13384_v20  ;;  %8504 = vset.pattern.permute.xlu2 %v13375_v47 }
 0xa8b   : > { %4190 = vperm.xlu1 %8515, %v4179_v59  }
 0xa92   : > { %4067 = vperm.xlu2 %8504, %v4062_v4  }
 0xa93   : > { %4203 = vperm.xlu1 %8515, %v4192_v39  }
 0xa95   : > { %v11411_v25 = vpop.permute.xlu1 %4054  ;;  %v11425_v1 = vpop.permute.xlu0 %4060 }
 0xa9a   : > { %4080 = vperm.xlu2 %8504, %v4075_v35  }
 0xa9b   : > { %8518 = vset.pattern.permute.xlu1 %v13375_v47 }
 0xa9d   : > { %v11430_v12 = vpop.permute.xlu0 %4099 }
 0xaa2   : > { %4093 = vperm.xlu2 %8504, %v4088_v31  }
 0xaa3   : > { %4223 = vperm.xlu1 %8518, %v4218_v28  }
 0xaa5   : > { %v11414_v36 = vpop.permute.xlu1 %4073 }
 0xaaa   : > { %8507 = vset.pattern.permute.xlu2 %v13384_v20 }
 0xaab   : > { %4236 = vperm.xlu1 %8518, %v4231_v48  }
 0xaad   : > { %v11417_v58 = vpop.permute.xlu1 %4086  ;;  %v11435_v26 = vpop.permute.xlu0 %4119 }
 0xab2   : > { %4112 = vperm.xlu2 %8507, %v4101_v7  }
 0xab3   : > { %8521 = vset.pattern.permute.xlu1 %v13384_v20 }
 0xaba   : > { %8510 = vset.pattern.permute.xlu2 %v13375_v47  ;;  %v5125_v23 = vpop.trf.xlu2 }
 0xabb   : > { %4255 = vperm.xlu1 %8521, %v4244_v13   ;;  %v5177_v53 = vperm.slane %v5125_v23, 0  ;;  %v5184_v2 = vperm.slane %v5125_v23, 1  ;;  %v5191_v60 = vperm.slane %v5125_v23, 2  ;;  %v5198_v55 = vperm.slane %v5125_v23, 3 }
 0xabc   : > { %v5205_v52 = vperm.slane %v5125_v23, 4  ;;  %v5212_v49 = vperm.slane %v5125_v23, 5  ;;  %v5219_v9 = vperm.slane %v5125_v23, 6  ;;  %v5226_v18 = vperm.slane %v5125_v23, 7 }
 0xabd   : > { %v11419_v0 = vpop.permute.xlu1 %4106  ;;  %v11438_v32 = vpop.permute.xlu0 %4151 }
 0xac2   : > { %4132 = vperm.xlu2 %8510, %v4127_v43   ;;  %v5126_v14 = vpop.trf.xlu2 }
 0xac3   : > { %8522 = vset.pattern.permute.xlu1 %v13375_v47  ;;  %v5240_v38 = vperm.slane %v5126_v14, 1  ;;  %v5247_v11 = vperm.slane %v5126_v14, 2  ;;  %v5254_v22 = vperm.slane %v5126_v14, 3  ;;  %v5261_v57 = vperm.slane %v5126_v14, 4 }
 0xac4   : > { %v5233_v31 = vperm.slane %v5126_v14, 0  ;;  %v5268_v63 = vperm.slane %v5126_v14, 5  ;;  %v5275_v7 = vperm.slane %v5126_v14, 6 }
 0xaca   : > { %4145 = vperm.xlu2 %8510, %v4140_v17  }
 0xacb   : > { %5182 = vperm.xlu1 %8522, %v5177_v53   ;;  %v11487_v53 = vsel %vm317_vm2, -inf, %v11419_v0 }
 0xacd   : > { %v11423_v42 = vpop.permute.xlu1 %4125 }
 0xad2   : > { %8513 = vset.pattern.permute.xlu2 %v13384_v20 }
 0xad3   : > { %5189 = vperm.xlu1 %8522, %v5184_v2  }
 0xad4   : > { %8514 = vset.pattern.permute.xlu0 %v13375_v47 }
 0xad5   : > { %v11428_v8 = vpop.permute.xlu1 %4138 }
 0xada   : > { %4164 = vperm.xlu2 %8513, %v4153_v19  }
 0xadb   : > { %5196 = vperm.xlu1 %8522, %v5191_v60  }
 0xae2   : > { %4177 = vperm.xlu2 %8513, %v4166_v10   ;;  %v5282_v10 = vperm.slane %v5126_v14, 7 }
 0xae3   : > { %4184 = vperm.xlu0 %8514, %v4179_v59   ;;  %5203 = vperm.xlu1 %8522, %v5198_v55   ;;  %v11476_v59 = vsel %vm318_vm1, -inf, %v11414_v36 }
 0xae5   : > { %v11433_v50 = vpop.permute.xlu1 %4158 }
 0xaea   : > { %8516 = vset.pattern.permute.xlu2 %v13375_v47 }
 0xaeb   : > { %8517 = vset.pattern.permute.xlu0 %v13384_v20  ;;  %5210 = vperm.xlu1 %8522, %v5205_v52   ;;  %v11497_v52 = vsel %vm318_vm1, -inf, %v11423_v42 }
 0xaec   : > { %v11442_v34 = vpop.permute.xlu2 %4067 }
 0xaed   : > { %v11440_v6 = vpop.permute.xlu1 %4171 }
 0xaf2   : > { %4197 = vperm.xlu2 %8516, %v4192_v39   ;;  %v13396_v39 = vmov 0  }
 0xaf3   : > { %4216 = vperm.xlu0 %8517, %v4205_v51   ;;  %5217 = vperm.xlu1 %8522, %v5212_v49   ;;  %v11506_v49 = vsel %vm317_vm2, -inf, %v11411_v25  ;;  %v11521_v25 = vsel %vm317_vm2, -inf, %v11442_v34  ;;  %v11535_v34 = vsel %vm318_vm1, -inf, %v11417_v58  ;;  %v11551_v58 = vsel %vm318_vm1, -inf, %v11430_v12 }
 0xaf4   : > { %v11451_v54 = vpop.permute.xlu2 %4080  ;;  %v11566_v12 = vsel %vm317_vm2, -inf, %v11435_v26  ;;  %v11581_v26 = vsel %vm318_vm1, -inf, %v11428_v8  ;;  %v11599_v8 = vsel %vm318_vm1, -inf, %v11425_v1 }
 0xaf5   : > { %v11618_v1 = vsel %vm317_vm2, -inf, %v11451_v54 }
 0xafa   : > { %4210 = vperm.xlu2 %8516, %v4205_v51  }
 0xafb   : > { %8520 = vset.pattern.permute.xlu0 %v13375_v47  ;;  %5224 = vperm.xlu1 %8522, %v5219_v9  }
 0xafc   : > { %v11460_v62 = vpop.permute.xlu2 %4093 }
 0xafd   : > { %v11444_v27 = vpop.permute.xlu1 %4190  ;;  %v11634_v54 = vsel %vm317_vm2, -inf, %v11460_v62 }
 0xb02   : > { %8519 = vset.pattern.permute.xlu2 %v13384_v20 }
 0xb03   : > { %4249 = vperm.xlu0 %8520, %v4244_v13   ;;  %5231 = vperm.xlu1 %8522, %v5226_v18  }
 0xb05   : > { %v11455_v16 = vpop.permute.xlu1 %4203 }
 0xb0a   : > { %4229 = vperm.xlu2 %8519, %v4218_v28  }
 0xb0b   : > { %5245 = vperm.xlu0 %8520, %v5240_v38   ;;  %5252 = vperm.xlu1 %8522, %v5247_v11  }
 0xb0c   : > { %v11466_v17 = vpop.permute.xlu2 %4112 }
 0xb0d   : > { %v11652_v62 = vsel %vm318_vm1, -inf, %v11466_v17 }
 0xb11   : > { %v11446_v24 = vpop.trf.xlu0 }
 0xb12   : > { %4242 = vperm.xlu2 %8519, %v4231_v48   ;;  %v5310_v20 = vperm.slane %v11446_v24, 3  ;;  %v5331_v33 = vperm.slane %v11446_v24, 6  ;;  %v5317_v45 = vperm.slane %v11446_v24, 4  ;;  %v5338_v41 = vperm.slane %v11446_v24, 7 }
 0xb13   : > { %5259 = vperm.xlu1 %8522, %v5254_v22   ;;  %v5289_v13 = vperm.slane %v11446_v24, 0  ;;  %v5296_v60 = vperm.slane %v11446_v24, 1  ;;  %v5303_v0 = vperm.slane %v11446_v24, 2  ;;  %v5324_v14 = vperm.slane %v11446_v24, 5 }
 0xb14   : > { %5315 = vperm.xlu0 %8520, %v5310_v20  }
 0xb15   : > { %v11462_v35 = vpop.permute.xlu1 %4223 }
 0xb19   : > { %v11457_v3 = vpop.trf.xlu0 }
 0xb1a   : > { %8523 = vset.pattern.permute.xlu2 %v13375_v47  ;;  %v5373_v4 = vperm.slane %v11457_v3, 4  ;;  %v5394_v47 = vperm.slane %v11457_v3, 7  ;;  %v5359_v48 = vperm.slane %v11457_v3, 2  ;;  %v5380_v36 = vperm.slane %v11457_v3, 5 }
 0xb1b   : > { %5266 = vperm.xlu1 %8522, %v5261_v57   ;;  %v5345_v24 = vperm.slane %v11457_v3, 0 }
 0xb1c   : > { %5336 = vperm.xlu0 %8520, %v5331_v33   ;;  %v11471_v19 = vpop.permute.xlu2 %4132 }
 0xb1d   : > { %v11468_v43 = vpop.permute.xlu1 %4236 }
 0xb22   : > { %5238 = vperm.xlu2 %8523, %v5233_v31  }
 0xb23   : > { %5273 = vperm.xlu1 %8522, %v5268_v63   ;;  %v11557_v63 = vsel %vm320_vm4, -inf, %v11455_v16  ;;  %v11572_v16 = vsel %vm319_vm3, -inf, %v11462_v35 }
 0xb24   : > { %5378 = vperm.xlu0 %8520, %v5373_v4   ;;  %v4146_v23 = vpop.permute.xlu2 %4145  ;;  %v5352_v4 = vperm.slane %v11457_v3, 1  ;;  %13397 = vst [vmem:[#allocation51_spill] sm:$0xff] %v11557_v63 }
 0xb25   : > { %v11512_v42 = vsel %vm317_vm2, -inf, %v4146_v23  ;;  %13398 = vst [vmem:[#allocation27_spill] sm:$0xff] %v11572_v16 }
 0xb2a   : > { %5322 = vperm.xlu2 %8523, %v5317_v45  }
 0xb2b   : > { %5280 = vperm.xlu1 %8522, %v5275_v7   ;;  %v5366_v7 = vperm.slane %v11457_v3, 3 }
 0xb2c   : > { %5399 = vperm.xlu0 %8520, %v5394_v47  }
 0xb2d   : > { %v11479_v28 = vpop.permute.xlu1 %4255 }
 0xb32   : > { %5343 = vperm.xlu2 %8523, %v5338_v41  }
 0xb33   : > { %5287 = vperm.xlu1 %8522, %v5282_v10  }
 0xb34   : > { %8526 = vset.pattern.permute.xlu0 %v13396_v39  ;;  %v4165_v55 = vpop.permute.xlu2 %4164 }
 0xb35   : > { %4363 = vperm.xlu0 %8526, %v11476_v59   ;;  %v11526_v38 = vsel %vm320_vm4, -inf, %v4165_v55 }
 0xb3a   : > { %5364 = vperm.xlu2 %8523, %v5359_v48   ;;  %v5387_v48 = vperm.slane %v11457_v3, 6  ;;  %v11594_v3 = vsel %vm319_vm3, -inf, %v11433_v50 }
 0xb3b   : > { %5294 = vperm.xlu1 %8522, %v5289_v13  }
 0xb3c   : > { %v4178_v9 = vpop.permute.xlu2 %4177 }
 0xb3d   : > { %v11489_v2 = vpop.permute.xlu1 %5182  ;;  %4378 = vperm.xlu0 %8526, %v11487_v53  }
 0xb42   : > { %5385 = vperm.xlu2 %8523, %v5380_v36  }
 0xb43   : > { %5301 = vperm.xlu1 %8522, %v5296_v60   ;;  %v11613_v60 = vsel %vm320_vm4, -inf, %v4178_v9 }
 0xb45   : > { %v11499_v51 = vpop.permute.xlu1 %5189  ;;  %4387 = vperm.xlu0 %8526, %v11497_v52  }
 0xb46   : > { %v11696_v21 = vsel %vm303_vm5, -inf, %v11499_v51 }
 0xb47   : > { %13405 = vst [vmem:[#allocation18_spill] sm:$0xff] %v11696_v21 }
 0xb4a   : > { %8524 = vset.pattern.permute.xlu2 %v13396_v39 }
 0xb4b   : > { %5308 = vperm.xlu1 %8522, %v5303_v0   ;;  %4354 = vperm.xlu2 %8524, %v11506_v49  }
 0xb4c   : > { %v4198_v11 = vpop.permute.xlu2 %4197 }
 0xb4d   : > { %v11514_v18 = vpop.permute.xlu1 %5196  ;;  %4396 = vperm.xlu0 %8526, %v11512_v42   ;;  %v11629_v0 = vsel %vm319_vm3, -inf, %v4198_v11 }
 0xb4e   : > { %v11715_v40 = vsel %vm303_vm5, -inf, %v11514_v18 }
 0xb4f   : > { %13407 = vst [vmem:[#allocation20_spill] sm:$0xff] %v11715_v40 }
 0xb53   : > { %5329 = vperm.xlu1 %8522, %v5324_v14   ;;  %4360 = vperm.xlu2 %8524, %v11521_v25  }
 0xb54   : > { %v11545_v31 = vpop.permute.xlu2 %4210 }
 0xb55   : > { %v11528_v22 = vpop.permute.xlu1 %5203  ;;  %4405 = vperm.xlu0 %8526, %v11526_v38   ;;  %v4185_v20 = vpop.permute.xlu0 %4184 }
 0xb56   : > { %v11540_v33 = vsel %vm319_vm3, -inf, %v4185_v20  ;;  %v11734_v18 = vsel %vm303_vm5, -inf, %v11528_v22 }
 0xb57   : > { %13409 = vst [vmem:[#allocation56_spill] sm:$0xff] %v11734_v18 }
 0xb5b   : > { %4369 = vperm.xlu2 %8524, %v11535_v34   ;;  %5350 = vperm.xlu1 %8522, %v5345_v24  }
 0xb5d   : > { %v11542_v57 = vpop.permute.xlu1 %5210  ;;  %4414 = vperm.xlu0 %8526, %v11540_v33  }
 0xb63   : > { %4375 = vperm.xlu2 %8524, %v11551_v58   ;;  %5357 = vperm.xlu1 %8522, %v5352_v4  }
 0xb64   : > { %v11560_v47 = vpop.permute.xlu2 %4229 }
 0xb65   : > { %v5218_v45 = vpop.permute.xlu1 %5217  ;;  %4423 = vperm.xlu0 %8526, %v11557_v63   ;;  %v4217_v20 = vpop.permute.xlu0 %4216 }
 0xb66   : > { %v11605_v23 = vsel %vm303_vm5, -inf, %v5218_v45  ;;  %v11645_v11 = vsel %vm320_vm4, -inf, %v4217_v20  ;;  %v11661_v45 = vsel %vm319_vm3, -inf, %v11468_v43  ;;  %v11680_v43 = vsel %vm320_vm4, -inf, %v11479_v28 }
 0xb67   : > { %13400 = vst [vmem:[#allocation25_spill] sm:$0xff] %v11605_v23  ;;  %v11701_v28 = vsel %vm319_vm3, -inf, %v11440_v6  ;;  %v11720_v6 = vsel %vm320_vm4, -inf, %v11444_v27  ;;  %v11741_v27 = vsel %vm319_vm3, -inf, %v11545_v31  ;;  %v11760_v31 = vsel %vm320_vm4, -inf, %v11560_v47 }
 0xb68   : > { %13404 = vst [vmem:[#allocation40_spill] sm:$0xff] %v11680_v43 }
 0xb6b   : > { %4384 = vperm.xlu2 %8524, %v11566_v12   ;;  %5371 = vperm.xlu1 %8522, %v5366_v7   ;;  %v11666_v7 = vsel %vm317_vm2, -inf, %v11471_v19  ;;  %v11685_v19 = vsel %vm318_vm1, -inf, %v11438_v32 }
 0xb6c   : > { %v4243_v10 = vpop.permute.xlu2 %4242 }
 0xb6d   : > { %v11574_v41 = vpop.permute.xlu1 %5224  ;;  %4432 = vperm.xlu0 %8526, %v11572_v16   ;;  %v11586_v13 = vsel %vm320_vm4, -inf, %v4243_v10 }
 0xb6e   : > { %13399 = vst [vmem:[#allocation26_spill] sm:$0xff] %v11586_v13  ;;  %v11755_v22 = vsel %vm303_vm5, -inf, %v11574_v41 }
 0xb6f   : > { %13411 = vst [vmem:[#allocation57_spill] sm:$0xff] %v11755_v22 }
 0xb73   : > { %4393 = vperm.xlu2 %8524, %v11581_v26   ;;  %5392 = vperm.xlu1 %8522, %v5387_v48  }
 0xb75   : > { %v11588_v35 = vpop.permute.xlu1 %5231  ;;  %4441 = vperm.xlu0 %8526, %v11586_v13   ;;  %v4250_v10 = vpop.permute.xlu0 %4249 }
 0xb76   : > { %v11774_v41 = vsel %vm319_vm3, -inf, %v4250_v10 }
 0xb7b   : > { %4402 = vperm.xlu2 %8524, %v11594_v3   ;;  %8525 = vset.pattern.permute.xlu1 %v13396_v39 }
 0xb7c   : > { %4357 = vperm.xlu1 %8525, %v11599_v8   ;;  %v5239_v50 = vpop.permute.xlu2 %5238 }
 0xb7d   : > { %v11608_v36 = vpop.permute.xlu1 %5252  ;;  %5513 = vperm.xlu0 %8526, %v11605_v23   ;;  %v11623_v39 = vsel %vm303_vm5, -inf, %v5239_v50 }
 0xb7e   : > { %13401 = vst [vmem:[#allocation36_spill] sm:$0xff] %v11623_v39 }
 0xb83   : > { %4411 = vperm.xlu2 %8524, %v11613_v60  }
 0xb84   : > { %4366 = vperm.xlu1 %8525, %v11618_v1   ;;  %v11647_v24 = vpop.permute.xlu2 %5322 }
 0xb85   : > { %v5260_v55 = vpop.permute.xlu1 %5259  ;;  %5522 = vperm.xlu0 %8526, %v11623_v39  }
 0xb86   : > { %v11639_v9 = vsel %vm303_vm5, -inf, %v5260_v55 }
 0xb87   : > { %13402 = vst [vmem:[#allocation32_spill] sm:$0xff] %v11639_v9 }
 0xb8b   : > { %4420 = vperm.xlu2 %8524, %v11629_v0  }
 0xb8c   : > { %4372 = vperm.xlu1 %8525, %v11634_v54   ;;  %v11669_v17 = vpop.permute.xlu2 %5343 }
 0xb8d   : > { %v5267_v14 = vpop.permute.xlu1 %5266  ;;  %5531 = vperm.xlu0 %8526, %v11639_v9  }
 0xb93   : > { %4429 = vperm.xlu2 %8524, %v11645_v11  }
 0xb94   : > { %4381 = vperm.xlu1 %8525, %v11652_v62   ;;  %v11689_v20 = vpop.permute.xlu2 %5364 }
 0xb95   : > { %v11656_v4 = vpop.permute.xlu1 %5273 }
 0xb9b   : > { %4438 = vperm.xlu2 %8524, %v11661_v45  }
 0xb9c   : > { %4390 = vperm.xlu1 %8525, %v11666_v7   ;;  %v11710_v37 = vpop.permute.xlu2 %5385 }
 0xb9d   : > { %v5281_v48 = vpop.permute.xlu1 %5280 }
 0xb9e   : > { %v11674_v50 = vsel %vm303_vm5, -inf, %v5281_v48  ;;  %v11691_v48 = vpop.permute.xlu0 %5245 }
 0xb9f   : > { %13403 = vst [vmem:[#allocation30_spill] sm:$0xff] %v11674_v50  ;;  %5540 = vperm.xlu0 %8526, %v11674_v50  }
 0xba3   : > { %4447 = vperm.xlu2 %8524, %v11680_v43  }
 0xba4   : > { %4399 = vperm.xlu1 %8525, %v11685_v19  }
 0xba5   : > { %v5288_v55 = vpop.permute.xlu1 %5287 }
 0xba6   : > { %v5316_v51 = vpop.permute.xlu0 %5315  ;;  %v11782_v23 = vsel %vm303_vm5, -inf, %v5288_v55  ;;  %v11799_v55 = vsel %vm304_vm6, -inf, %v11647_v24  ;;  %v11818_v24 = vsel %vm304_vm6, -inf, %v11669_v17 }
 0xba7   : > { %v11728_v56 = vsel %vm304_vm6, -inf, %v5316_v51  ;;  %13413 = vst [vmem:[#allocation46_spill] sm:$0xff] %v11782_v23 }
 0xba8   : > { %13408 = vst [vmem:[#allocation22_spill] sm:$0xff] %v11728_v56 }
 0xba9   : > { %13416 = vst [vmem:[#allocation41_spill] sm:$0xff] %v11799_v55 }
 0xbaa   : > { %13419 = vst [vmem:[#allocation28_spill] sm:$0xff] %v11818_v24 }
 0xbab   : > { %5501 = vperm.xlu2 %8524, %v11696_v21  }
 0xbac   : > { %4408 = vperm.xlu1 %8525, %v11701_v28  }
 0xbad   : > { %v5295_v32 = vpop.permute.xlu1 %5294 }
 0xbae   : > { %v11707_v44 = vsel %vm304_vm6, -inf, %v5295_v32  ;;  %v5337_v50 = vpop.permute.xlu0 %5336 }
 0xbaf   : > { %13406 = vst [vmem:[#allocation55_spill] sm:$0xff] %v11707_v44  ;;  %5546 = vperm.xlu0 %8526, %v11707_v44   ;;  %v11736_v44 = vpop.permute.xlu2 %4354 }
 0xbb3   : > { %5504 = vperm.xlu2 %8524, %v11715_v40  }
 0xbb4   : > { %4417 = vperm.xlu1 %8525, %v11720_v6  }
 0xbb5   : > { %v11724_v32 = vpop.permute.xlu1 %5301 }
 0xbb6   : > { %v11880_v40 = vsel %vm304_vm6, -inf, %v11724_v32  ;;  %v4449_v32 = vperm.slane %v11736_v44, %v10019_v29 }
 0xbb7   : > { %5555 = vperm.xlu0 %8526, %v11728_v56   ;;  %v11749_v56 = vsel %vm304_vm6, -inf, %v5337_v50  ;;  %v5379_v50 = vpop.permute.xlu0 %5378  ;;  %13428 = vst [vmem:[#allocation50_spill] sm:$0xff] %v11880_v40 }
 0xbb8   : > { %13410 = vst [vmem:[#allocation19_spill] sm:$0xff] %v11749_v56 }
 0xbbb   : > { %5507 = vperm.xlu2 %8524, %v11734_v18   ;;  %v11763_v18 = vpop.permute.xlu2 %4360 }
 0xbbc   : > { %4426 = vperm.xlu1 %8525, %v11741_v27  }
 0xbbd   : > { %v11745_v51 = vpop.permute.xlu1 %5308 }
 0xbbf   : > { %5564 = vperm.xlu0 %8526, %v11749_v56   ;;  %v11770_v56 = vsel %vm303_vm5, -inf, %v5267_v14  ;;  %v11787_v14 = vsel %vm303_vm5, -inf, %v11489_v2  ;;  %v11804_v2 = vsel %vm303_vm5, -inf, %v11542_v57  ;;  %v11825_v57 = vsel %vm303_vm5, -inf, %v11588_v35 }
 0xbc0   : > { %13412 = vst [vmem:[#allocation58_spill] sm:$0xff] %v11770_v56  ;;  %v11843_v35 = vsel %vm303_vm5, -inf, %v11691_v48 }
 0xbc1   : > { %13414 = vst [vmem:[#allocation38_spill] sm:$0xff] %v11787_v14 }
 0xbc2   : > { %13417 = vst [vmem:[#allocation59_spill] sm:$0xff] %v11804_v2 }
 0xbc3   : > { %5516 = vperm.xlu2 %8524, %v11755_v22   ;;  %v11778_v5 = vpop.permute.xlu2 %4369  ;;  %v5400_v22 = vpop.permute.xlu0 %5399  ;;  %13420 = vst [vmem:[#allocation16_spill] sm:$0xff] %v11825_v57 }
 0xbc4   : > { %4435 = vperm.xlu1 %8525, %v11760_v31   ;;  %13423 = vst [vmem:[#allocation21_spill] sm:$0xff] %v11843_v35 }
 0xbc5   : > { %v11766_v9 = vpop.permute.xlu1 %5329 }
 0xbcb   : > { %5534 = vperm.xlu2 %8524, %v11770_v56   ;;  %v4376_v56 = vpop.permute.xlu2 %4375  ;;  %v4364_v13 = vpop.permute.xlu0 %4363 }
 0xbcc   : > { %4444 = vperm.xlu1 %8525, %v11774_v41  }
 0xbcd   : > { %v5351_v47 = vpop.permute.xlu1 %5350 }
 0xbce   : > { %v11838_v17 = vsel %vm304_vm6, -inf, %v5351_v47  ;;  %v11855_v47 = vsel %vm303_vm5, -inf, %v11608_v36 }
 0xbcf   : > { %13422 = vst [vmem:[#allocation45_spill] sm:$0xff] %v11838_v17 }
 0xbd0   : > { %13425 = vst [vmem:[#allocation49_spill] sm:$0xff] %v11855_v47 }
 0xbd3   : > { %5543 = vperm.xlu2 %8524, %v11782_v23   ;;  %v11820_v23 = vpop.permute.xlu2 %4384 }
 0xbd4   : > { %5498 = vperm.xlu1 %8525, %v11787_v14  }
 0xbd5   : > { %v5358_v10 = vpop.permute.xlu1 %5357 }
 0xbd6   : > { %v11793_v15 = vsel %vm304_vm6, -inf, %v5358_v10 }
 0xbd7   : > { %13415 = vst [vmem:[#allocation39_spill] sm:$0xff] %v11793_v15  ;;  %5573 = vperm.xlu0 %8526, %v11793_v15   ;;  %v11812_v15 = vsel %vm304_vm6, -inf, %v5379_v50 }
 0xbd8   : > { %13418 = vst [vmem:[#allocation60_spill] sm:$0xff] %v11812_v15 }
 0xbdb   : > { %5558 = vperm.xlu2 %8524, %v11799_v55   ;;  %v4379_v55 = vpop.permute.xlu0 %4378 }
 0xbdc   : > { %5510 = vperm.xlu1 %8525, %v11804_v2   ;;  %v4461_v2 = vperm.slane %v4379_v55, %v10019_v29 }
 0xbdd   : > { %v11808_v10 = vpop.permute.xlu1 %5371 }
 0xbdf   : > { %5582 = vperm.xlu0 %8526, %v11812_v15   ;;  %v11833_v15 = vsel %vm304_vm6, -inf, %v5400_v22  ;;  %v11850_v22 = vsel %vm304_vm6, -inf, %v11689_v20  ;;  %v11869_v20 = vsel %vm303_vm5, -inf, %v11656_v4  ;;  %v11888_v4 = vsel %vm304_vm6, -inf, %v11745_v51 }
 0xbe0   : > { %13421 = vst [vmem:[#allocation44_spill] sm:$0xff] %v11833_v15  ;;  %v4456_v51 = vperm.slane %v11778_v5, %v10022_v30 }
 0xbe1   : > { %13424 = vst [vmem:[#allocation47_spill] sm:$0xff] %v11850_v22 }
 0xbe2   : > { %13427 = vst [vmem:[#allocation29_spill] sm:$0xff] %v11869_v20 }
 0xbe3   : > { %5567 = vperm.xlu2 %8524, %v11818_v24   ;;  %v4394_v24 = vpop.permute.xlu2 %4393  ;;  %v4388_v14 = vpop.permute.xlu0 %4387  ;;  %13429 = vst [vmem:[#allocation37_spill] sm:$0xff] %v11888_v4 }
 0xbe4   : > { %5519 = vperm.xlu1 %8525, %v11825_v57  }
 0xbe5   : > { %v11829_v50 = vpop.permute.xlu1 %5392 }
 0xbe7   : > { %5591 = vperm.xlu0 %8526, %v11833_v15  }
 0xbeb   : > { %5570 = vperm.xlu2 %8524, %v11838_v17   ;;  %v11859_v48 = vpop.permute.xlu2 %4402  ;;  %v4397_v15 = vpop.permute.xlu0 %4396 }
 0xbec   : > { %5525 = vperm.xlu1 %8525, %v11843_v35   ;;  %v11864_v35 = vsel %vm304_vm6, -inf, %v11710_v37 }
 0xbed   : > { %13426 = vst [vmem:[#allocation17_spill] sm:$0xff] %v11864_v35 }
 0xbee   : > { %v4358_v39 = vpop.permute.xlu1 %4357 }
 0xbf3   : > { %5576 = vperm.xlu2 %8524, %v11850_v22   ;;  %v11873_v22 = vpop.permute.xlu2 %4411 }
 0xbf4   : > { %5528 = vperm.xlu1 %8525, %v11855_v47   ;;  %v11875_v47 = vpop.permute.xlu0 %4405 }
 0xbf6   : > { %v4367_v17 = vpop.permute.xlu1 %4366 }
 0xbf7   : > { %v4455_v16 = vperm.slane %v4367_v17, %v10019_v29  ;;  %v4459_v17 = vperm.slane %v4376_v56, %v10022_v30  ;;  %v11916_v56 = vsel %vm304_vm6, -inf, %v11766_v9 }
 0xbf9   : > { %v4457_v44 = vsel %vm1065_vm7, %v4456_v51, %v4455_v16 }
 0xbfb   : > { %5585 = vperm.xlu2 %8524, %v11864_v35   ;;  %v11883_v61 = vpop.permute.xlu2 %4420 }
 0xbfc   : > { %5537 = vperm.xlu1 %8525, %v11869_v20   ;;  %v11890_v35 = vpop.permute.xlu0 %4414  ;;  %v4450_v20 = vperm.slane %v4358_v39, %v10022_v30  ;;  %v4453_v39 = vperm.slane %v4364_v13, %v10022_v30  ;;  %v4464_v13 = vperm.slane %v11820_v23, %v10019_v29 }
 0xbfe   : > { %v4373_v36 = vpop.permute.xlu1 %4372 }
 0xbff   : > { %v4458_v57 = vperm.slane %v4373_v36, %v10019_v29 }
 0xc01   : > { %v4460_v36 = vsel %vm1065_vm7, %v4459_v17, %v4458_v57 }
 0xc03   : > { %v4430_v55 = vpop.permute.xlu2 %4429 }
 0xc04   : > { %5549 = vperm.xlu1 %8525, %v11880_v40   ;;  %v4452_v40 = vperm.slane %v11763_v18, %v10019_v29 }
 0xc06   : > { %v4382_v37 = vpop.permute.xlu1 %4381  ;;  %v4454_v18 = vsel %vm1065_vm7, %v4453_v39, %v4452_v40  ;;  %v4468_v40 = vperm.slane %v4394_v24, %v10022_v30  ;;  %v11937_v39 = vsel %vm304_vm6, -inf, %v11808_v10 }
 0xc07   : > { %v4462_v21 = vperm.slane %v4382_v37, %v10022_v30 }
 0xc09   : > { %v4463_v5 = vsel %vm1065_vm7, %v4462_v21, %v4461_v2  ;;  %v4465_v21 = vperm.slane %v4388_v14, %v10022_v30 }
 0xc0b   : > { %v4466_v23 = vsel %vm1065_vm7, %v4465_v21, %v4464_v13 }
 0xc0c   : > { %5552 = vperm.xlu1 %8525, %v11888_v4   ;;  %v4451_v4 = vsel %vm1065_vm7, %v4450_v20, %v4449_v32 }
 0xc0d   : > { %v4497_v43 = vsel %vm1112_vm8, %v4454_v18, %v4451_v4  ;;  %v4470_v4 = vperm.slane %v4397_v15, %v10019_v29  ;;  %v4439_v15 = vpop.permute.xlu2 %4438 }
 0xc0e   : > { %v4391_v63 = vpop.permute.xlu1 %4390  ;;  %v4498_v16 = vsel %vm1114_vm9, %v4457_v44, %v4497_v43 }
 0xc0f   : > { %v4467_v37 = vperm.slane %v4391_v63, %v10019_v29  ;;  %v4499_v57 = vsel %vm1116_vm10, %v4460_v36, %v4498_v16  ;;  %v4424_v63 = vpop.permute.xlu0 %4423  ;;  %v11944_v36 = vsel %vm304_vm6, -inf, %v11829_v50  ;;  %v4477_v50 = vperm.slane %v11873_v22, %v10022_v30 }
 0xc10   : > { %v4500_v2 = vsel %vm13430_vm13, %v4463_v5, %v4499_v57  ;;  %v4482_v22 = vperm.slane %v11883_v61, %v10019_v29  ;;  %vm13436_vm13 = vmmov %vm13431_vm14 }
 0xc11   : > { %v4469_v9 = vsel %vm1065_vm7, %v4468_v40, %v4467_v37  ;;  %v4501_v24 = vsel %vm13431_vm14, %v4466_v23, %v4500_v2  ;;  %v4474_v23 = vperm.slane %v11875_v47, %v10022_v30  ;;  %vm13437_vm14 = vmmov %vm13432_vm15 }
 0xc12   : > { %v4502_v51 = vsel %vm13432_vm15, %v4469_v9, %v4501_v24  ;;  %v4473_v9 = vperm.slane %v11859_v48, %v10019_v29  ;;  %vm13438_vm15 = vmmov %vm13433_vm0 }
 0xc14   : > { %5561 = vperm.xlu1 %8525, %v11916_v56   ;;  %v4475_v48 = vsel %vm1065_vm7, %v4474_v23, %v4473_v9 }
 0xc15   : > { %v4448_v37 = vpop.permute.xlu2 %4447 }
 0xc16   : > { %v4400_v20 = vpop.permute.xlu1 %4399 }
 0xc17   : > { %v4471_v43 = vperm.slane %v4400_v20, %v10022_v30  ;;  %v4433_v18 = vpop.permute.xlu0 %4432  ;;  %v4479_v20 = vperm.slane %v11890_v35, %v10019_v29 }
 0xc19   : > { %v4472_v32 = vsel %vm1065_vm7, %v4471_v43, %v4470_v4 }
 0xc1a   : > { %v4503_v14 = vsel %vm13433_vm0, %v4472_v32, %v4502_v51  ;;  %vm13439_vm0 = vmmov %vm13434_vm11 }
 0xc1b   : > { %v4513_v17 = vsel %vm13434_vm11, %v4503_v14, -inf  ;;  %vm13440_vm11 = vmmov %vm13435_vm12 }
 0xc1c   : > { %5579 = vperm.xlu1 %8525, %v11937_v39   ;;  %4514 = vmax.xlane.f32.xlu0 %v4513_v17  ;;  %v4486_v17 = vperm.slane %v4430_v55, %v10022_v30 }
 0xc1d   : > { %v5502_v16 = vpop.permute.xlu2 %5501 }
 0xc1e   : > { %v4409_v44 = vpop.permute.xlu1 %4408 }
 0xc1f   : > { %v4442_v13 = vpop.permute.xlu0 %4441  ;;  %v4476_v21 = vperm.slane %v4409_v44, %v10019_v29  ;;  %v4483_v44 = vperm.slane %v4424_v63, %v10022_v30 }
 0xc21   : > { %v4478_v24 = vsel %vm1065_vm7, %v4477_v50, %v4476_v21  ;;  %v4495_v50 = vperm.slane %v4448_v37, %v10022_v30 }
 0xc22   : > { %v4504_v47 = vsel %vm1112_vm8, %v4478_v24, %v4475_v48 }
 0xc24   : > { %5588 = vperm.xlu1 %8525, %v11944_v36  }
 0xc25   : > { %v5505_v4 = vpop.permute.xlu2 %5504 }
 0xc26   : > { %v4418_v5 = vpop.permute.xlu1 %4417 }
 0xc27   : > { %v5514_v40 = vpop.permute.xlu0 %5513  ;;  %v4480_v2 = vperm.slane %v4418_v5, %v10022_v30  ;;  %v4488_v5 = vperm.slane %v4433_v18, %v10019_v29  ;;  %v4492_v18 = vperm.slane %v4442_v13, %v10022_v30  ;;  %v5595_v13 = vperm.slane %v5505_v4, %v10019_v29 }
 0xc29   : > { %v4481_v32 = vsel %vm1065_vm7, %v4480_v2, %v4479_v20  ;;  %v4484_v2 = vsel %vm1065_vm7, %v4483_v44, %v4482_v22 }
 0xc2a   : > { %v4505_v21 = vsel %vm1114_vm9, %v4481_v32, %v4504_v47 }
 0xc2b   : > { %v4506_v55 = vsel %vm1116_vm10, %v4484_v2, %v4505_v21 }
 0xc2d   : > { %v5508_v20 = vpop.permute.xlu2 %5507 }
 0xc2e   : > { %v4427_v10 = vpop.permute.xlu1 %4426  ;;  %v5596_v21 = vperm.slane %v5508_v20, %v10019_v29 }
 0xc2f   : > { %v11957_v43 = vpop.permute.xlu0 %5522  ;;  %v4485_v51 = vperm.slane %v4427_v10, %v10019_v29 }
 0xc31   : > { %v4487_v10 = vsel %vm1065_vm7, %v4486_v17, %v4485_v51 }
 0xc32   : > { %v4507_v63 = vsel %vm13435_vm12, %v4487_v10, %v4506_v55  ;;  %vm13441_vm12 = vmmov %vm13436_vm13 }
 0xc36   : > { %v4436_v57 = vpop.permute.xlu1 %4435 }
 0xc37   : > { %v4489_v35 = vperm.slane %v4436_v57, %v10022_v30  ;;  %v4491_v57 = vperm.slane %v4439_v15, %v10019_v29  ;;  %v5532_v32 = vpop.permute.xlu0 %5531  ;;  %v5594_v15 = vperm.slane %v5502_v16, %v10019_v29  ;;  %v5517_v16 = vpop.permute.xlu2 %5516 }
 0xc39   : > { %v4490_v9 = vsel %vm1065_vm7, %v4489_v35, %v4488_v5 }
 0xc3a   : > { %v4508_v24 = vsel %vm13436_vm13, %v4490_v9, %v4507_v63  ;;  %vm13442_vm13 = vmmov %vm13437_vm14 }
 0xc3e   : > { %v4445_v14 = vpop.permute.xlu1 %4444 }
 0xc3f   : > { %v4494_v61 = vperm.slane %v4445_v14, %v10019_v29  ;;  %v4493_v14 = vsel %vm1065_vm7, %v4492_v18, %v4491_v57  ;;  %v5541_v5 = vpop.permute.xlu0 %5540  ;;  %v5599_v57 = vperm.slane %v5517_v16, %v10019_v29 }
 0xc40   : > { %v4509_v22 = vsel %vm13437_vm14, %v4493_v14, %v4508_v24  ;;  %vm13443_vm14 = vmmov %vm13438_vm15 }
 0xc41   : > { %v4496_v48 = vsel %vm1065_vm7, %v4495_v50, %v4494_v61  ;;  %v5598_v61 = vperm.slane %v5514_v40, %v10019_v29 }
 0xc42   : > { %v4510_v37 = vsel %vm13438_vm15, %v4496_v48, %v4509_v22  ;;  %vm13444_vm15 = vcmask 64512   ;;  %v5601_v22 = vperm.slane %v11957_v43, %v10019_v29 }
 0xc43   : > { %v4516_v17 = vsel %vm13439_vm0, %v4510_v37, -inf  ;;  %vm13445_vm0 = vmmov %vm13440_vm11 }
 0xc46   : > { %v5499_v23 = vpop.permute.xlu1 %5498 }
 0xc47   : > { %v5593_v51 = vperm.slane %v5499_v23, %v10019_v29  ;;  %v5547_v50 = vpop.permute.xlu0 %5546  ;;  %v5535_v23 = vpop.permute.xlu2 %5534 }
 0xc49   : > { %v5625_v35 = vsel %vm1112_vm8, %v5594_v15, %v5593_v51 }
 0xc4a   : > { %v5626_v47 = vsel %vm1114_vm9, %v5595_v13, %v5625_v35 }
 0xc4b   : > { %v5627_v2 = vsel %vm1116_vm10, %v5596_v21, %v5626_v47  ;;  %v5605_v21 = vperm.slane %v5535_v23, %v10019_v29 }
 0xc4e   : > { %v5511_v44 = vpop.permute.xlu1 %5510  ;;  %4517 = vmax.xlane.f32.xlu1 %v4516_v17  ;;  %v5604_v17 = vperm.slane %v5532_v32, %v10019_v29 }
 0xc4f   : > { %v5597_v10 = vperm.slane %v5511_v44, %v10019_v29  ;;  %v5556_v48 = vpop.permute.xlu0 %5555  ;;  %v5544_v14 = vpop.permute.xlu2 %5543 }
 0xc51   : > { %v5628_v9 = vsel %vm13440_vm11, %v5597_v10, %v5627_v2  ;;  %vm13446_vm11 = vmmov %vm13441_vm12 }
 0xc52   : > { %v5629_v4 = vsel %vm13441_vm12, %v5598_v61, %v5628_v9  ;;  %v5607_v9 = vperm.slane %v5541_v5, %v10019_v29  ;;  %v5608_v61 = vperm.slane %v5544_v14, %v10019_v29  ;;  %vm13447_vm12 = vmmov %vm13442_vm13 }
 0xc53   : > { %v5630_v18 = vsel %vm13442_vm13, %v5599_v57, %v5629_v4  ;;  %vm13448_vm13 = vmmov %vm13443_vm14 }
 0xc56   : > { %v5520_v55 = vpop.permute.xlu1 %5519 }
 0xc57   : > { %v5600_v63 = vperm.slane %v5520_v55, %v10019_v29  ;;  %v5565_v47 = vpop.permute.xlu0 %5564  ;;  %v5559_v10 = vpop.permute.xlu2 %5558 }
 0xc59   : > { %v5631_v20 = vsel %vm13443_vm14, %v5600_v63, %v5630_v18  ;;  %vm13449_vm14 = vmmov %vm13444_vm15 }
 0xc5a   : > { %v5657_v24 = vsel %vm13444_vm15, %v5631_v20, -inf  ;;  %vm13450_vm15 = vmmov %vm13445_vm0 }
 0xc5b   : > { %5658 = vmax.xlane.f32.xlu1 %v5657_v24 }
 0xc5e   : > { %v5526_v51 = vpop.permute.xlu1 %5525 }
 0xc5f   : > { %v5602_v40 = vperm.slane %v5526_v51, %v10019_v29  ;;  %v5574_v32 = vpop.permute.xlu0 %5573  ;;  %v5568_v20 = vpop.permute.xlu2 %5567  ;;  %v5609_v51 = vperm.slane %v5547_v50, %v10019_v29 }
 0xc61   : > { %v5632_v35 = vsel %vm1112_vm8, %v5602_v40, %v5601_v22 }
 0xc66   : > { %v5529_v15 = vpop.permute.xlu1 %5528 }
 0xc67   : > { %v5603_v37 = vperm.slane %v5529_v15, %v10019_v29  ;;  %v5583_v23 = vpop.permute.xlu0 %5582  ;;  %v5571_v15 = vpop.permute.xlu2 %5570 }
 0xc69   : > { %v5633_v13 = vsel %vm1114_vm9, %v5603_v37, %v5632_v35  ;;  %v5612_v37 = vperm.slane %v5556_v48, %v10019_v29 }
 0xc6a   : > { %v5634_v44 = vsel %vm1116_vm10, %v5604_v17, %v5633_v13  ;;  %v5613_v13 = vperm.slane %v5559_v10, %v10019_v29 }
 0xc6b   : > { %v5635_v43 = vsel %vm13445_vm0, %v5605_v21, %v5634_v44  ;;  %vm13451_vm0 = vmmov %vm13446_vm11 }
 0xc6e   : > { %v5538_v16 = vpop.permute.xlu1 %5537 }
 0xc6f   : > { %v5606_v2 = vperm.slane %v5538_v16, %v10019_v29  ;;  %v5592_v44 = vpop.permute.xlu0 %5591  ;;  %v5615_v16 = vperm.slane %v5565_v47, %v10019_v29 }
 0xc71   : > { %v5636_v4 = vsel %vm13446_vm11, %v5606_v2, %v5635_v43  ;;  %v5616_v2 = vperm.slane %v5568_v20, %v10019_v29  ;;  %vm13452_vm11 = vmmov %vm13447_vm12 }
 0xc72   : > { %v5637_v57 = vsel %vm13447_vm12, %v5607_v9, %v5636_v4  ;;  %vm13453_vm12 = vmmov %vm13448_vm13 }
 0xc73   : > { %v5638_v55 = vsel %vm13448_vm13, %v5608_v61, %v5637_v57  ;;  %v5577_v61 = vpop.permute.xlu2 %5576  ;;  %vm13454_vm13 = vmmov %vm13449_vm14  ;;  %v5618_v57 = vperm.slane %v5574_v32, %v10019_v29 }
 0xc74   : > { %v5660_v63 = vsel %vm13449_vm14, %v5638_v55, -inf  ;;  %v5619_v47 = vperm.slane %v5577_v61, %v10019_v29  ;;  %vm13455_vm14 = vmmov %vm13450_vm15 }
 0xc75   : > { %5661 = vmax.xlane.f32.xlu2 %v5660_v63 }
 0xc76   : > { %v5550_v18 = vpop.permute.xlu1 %5549 }
 0xc77   : > { %v5610_v24 = vperm.slane %v5550_v18, %v10019_v29  ;;  %v5617_v18 = vperm.slane %v5571_v15, %v10019_v29 }
 0xc79   : > { %v5639_v40 = vsel %vm1112_vm8, %v5610_v24, %v5609_v51  ;;  %v5646_v51 = vsel %vm1112_vm8, %v5618_v57, %v5617_v18 }
 0xc7e   : > { %v5553_v5 = vpop.permute.xlu1 %5552 }
 0xc7f   : > { %v5611_v14 = vperm.slane %v5553_v5, %v10019_v29 }
 0xc81   : > { %v5640_v22 = vsel %vm1114_vm9, %v5611_v14, %v5639_v40  ;;  %v5647_v14 = vsel %vm1114_vm9, %v5619_v47, %v5646_v51  ;;  %v5621_v40 = vperm.slane %v5583_v23, %v10019_v29 }
 0xc82   : > { %v5641_v35 = vsel %vm1116_vm10, %v5612_v37, %v5640_v22  ;;  %v5586_v22 = vpop.permute.xlu2 %5585 }
 0xc83   : > { %v5642_v50 = vsel %vm13450_vm15, %v5613_v13, %v5641_v35  ;;  %vm13456_vm15 = vmmov %vm13451_vm0 }
 0xc86   : > { %v5562_v17 = vpop.permute.xlu1 %5561 }
 0xc87   : > { %v5614_v21 = vperm.slane %v5562_v17, %v10019_v29 }
 0xc89   : > { %v5643_v9 = vsel %vm13451_vm0, %v5614_v21, %v5642_v50  ;;  %v5622_v21 = vperm.slane %v5586_v22, %v10019_v29  ;;  %vm13457_vm0 = vmmov %vm13452_vm11 }
 0xc8a   : > { %v5644_v43 = vsel %vm13452_vm11, %v5615_v16, %v5643_v9  ;;  %vm13458_vm11 = vmmov %vm13453_vm12 }
 0xc8b   : > { %v5645_v48 = vsel %vm13453_vm12, %v5616_v2, %v5644_v43  ;;  %v5624_v2 = vperm.slane %v5592_v44, %v10019_v29  ;;  %vm13459_vm12 = vmmov %vm13454_vm13 }
 0xc8c   : > { %v5663_v4 = vsel %vm13454_vm13, %v5645_v48, -inf  ;;  %vm13502_vm13 = vmmov %vm13455_vm14 }
 0xc8d   : > { %5664 = vmax.xlane.f32.xlu0 %v5663_v4 }
 0xc8e   : > { %v5580_v10 = vpop.permute.xlu1 %5579 }
 0xc8f   : > { %v12036_v55 = vpop.xlane.xlu0 %4514  ;;  %v5620_v20 = vperm.slane %v5580_v10, %v10019_v29 }
 0xc90   : > { %v4521_v63 = vperm.slane %v12036_v55, 0  ;;  %v4524_v24 = vperm.slane %v12036_v55, 3  ;;  %v4526_v16 = vperm.slane %v12036_v55, 5  ;;  %v4527_v10 = vperm.slane %v12036_v55, 6 }
 0xc91   : > { %v5648_v32 = vsel %vm1116_vm10, %v5620_v20, %v5647_v14  ;;  %v4523_v14 = vperm.slane %v12036_v55, 2 }
 0xc92   : > { %v4553_v5 = vsub.f32 %v11506_v49, %v4521_v63  ;;  %v4559_v37 = vsub.f32 %v11634_v54, %v4524_v24  ;;  %v5649_v15 = vsel %vm13455_vm14, %v5621_v40, %v5648_v32  ;;  %v4554_v17 = vsub.f32 %v11599_v8, %v4521_v63  ;;  %vm13507_vm14 = vmmov %vm13456_vm15 }
 0xc93   : > { %v5650_v23 = vsel %vm13456_vm15, %v5622_v21, %v5649_v15  ;;  %v4522_v54 = vperm.slane %v12036_v55, 1  ;;  %v4563_v61 = vsub.f32 %v11566_v12, %v4526_v16  ;;  %v4566_v12 = vsub.f32 %v11581_v26, %v4527_v10  ;;  %vm13508_vm15 = vmmov %vm13457_vm0 }
 0xc94   : > { %v4585_v35 = vmul.f32 1.442695, %v4553_v5  ;;  %v4597_v50 = vmul.f32 1.442695, %v4559_v37  ;;  %v4587_v9 = vmul.f32 1.442695, %v4554_v17  ;;  %v4557_v26 = vsub.f32 %v11618_v1, %v4523_v14 }
 0xc95   : > { %v4555_v44 = vsub.f32 %v11521_v25, %v4522_v54  ;;  %v4605_v57 = vmul.f32 1.442695, %v4563_v61  ;;  %v4556_v20 = vsub.f32 %v11476_v59, %v4522_v54  ;;  %v4560_v25 = vsub.f32 %v11551_v58, %v4524_v24 }
 0xc96   : > { %v5589_v13 = vpop.permute.xlu1 %5588  ;;  %8841 = vpow2.f32 %v4585_v35  ;;  %v4611_v5 = vmul.f32 1.442695, %v4566_v12  ;;  %v4565_v59 = vsub.f32 %v11666_v7, %v4527_v10  ;;  %v4593_v24 = vmul.f32 1.442695, %v4557_v26 }
 0xc97   : > { %v5623_v49 = vperm.slane %v5589_v13, %v10019_v29  ;;  %8843 = vpow2.f32 %v4597_v50  ;;  %v4589_v63 = vmul.f32 1.442695, %v4555_v44  ;;  %v4591_v32 = vmul.f32 1.442695, %v4556_v20 }
 0xc98   : > { %8845 = vpow2.f32 %v4587_v9  ;;  %v4599_v40 = vmul.f32 1.442695, %v4560_v25  ;;  %v4528_v37 = vperm.slane %v12036_v55, 7  ;;  %v4609_v35 = vmul.f32 1.442695, %v4565_v59 }
 0xc99   : > { %v5651_v43 = vsel %vm13457_vm0, %v5623_v49, %v5650_v23  ;;  %8847 = vpow2.f32 %v4605_v57  ;;  %v4558_v1 = vsub.f32 %v11535_v34, %v4523_v14  ;;  %v4525_v17 = vperm.slane %v12036_v55, 4  ;;  %vm13513_vm0 = vmmov %vm13458_vm11 }
 0xc9a   : > { %v5652_v48 = vsel %vm13458_vm11, %v5624_v2, %v5651_v43  ;;  %8849 = vpow2.f32 %v4589_v63  ;;  %v4568_v7 = vsub.f32 %v11685_v19, %v4528_v37  ;;  %v4567_v59 = vsub.f32 %v11512_v42, %v4528_v37  ;;  %vm13523_vm11 = vmmov %vm13502_vm13 }
 0xc9b   : > { %v5666_v4 = vsel %vm13459_vm12, %v5652_v48, -inf  ;;  %8851 = vpow2.f32 %v4611_v5  ;;  %v4595_v49 = vmul.f32 1.442695, %v4558_v1  ;;  %v4561_v23 = vsub.f32 %v11487_v53, %v4525_v17  ;;  %vm13524_vm12 = vmmov %vm13507_vm14 }
 0xc9c   : > { %v12059_v8 = vpop.eup %8841  ;;  %5667 = vmax.xlane.f32.xlu1 %v5666_v4  ;;  %8853 = vpow2.f32 %v4591_v32  ;;  %v4615_v21 = vmul.f32 1.442695, %v4568_v7  ;;  %v4562_v53 = vsub.f32 %v11652_v62, %v4525_v17  ;;  %v4613_v1 = vmul.f32 1.442695, %v4567_v59 }
 0xc9d   : > { %4682 = vperm.xlu2 %8524, %v12059_v8   ;;  %v12068_v47 = vpop.eup %8843  ;;  %8855 = vpow2.f32 %v4599_v40  ;;  %v4601_v9 = vmul.f32 1.442695, %v4561_v23 }
 0xc9e   : > { %v12071_v18 = vpop.eup %8845  ;;  %8857 = vpow2.f32 %v4593_v24 }
 0xc9f   : > { %v12077_v51 = vpop.eup %8847  ;;  %8859 = vpow2.f32 %v4609_v35 }
 0xca0   : > { %v12081_v22 = vpop.eup %8849  ;;  %8861 = vpow2.f32 %v4595_v49 }
 0xca1   : > { %4700 = vperm.xlu0 %8526, %v12068_v47   ;;  %v12086_v58 = vpop.eup %8851  ;;  %8863 = vpow2.f32 %v4615_v21 }
 0xca2   : > { %v12090_v13 = vpop.eup %8853  ;;  %8865 = vpow2.f32 %v4601_v9 }
 0xca3   : > { %v12092_v15 = vpop.eup %8855 }
 0xca4   : > { %v12099_v50 = vpop.eup %8857 }
 0xca5   : > { %4685 = vperm.xlu2 %8524, %v12071_v18   ;;  %v12101_v2 = vpop.eup %8859 }
 0xca6   : > { %v12112_v61 = vpop.eup %8861 }
 0xca7   : > { %v12114_v4 = vpop.eup %8863 }
 0xca8   : > { %v12124_v12 = vpop.eup %8865 }
 0xca9   : > { %4712 = vperm.xlu0 %8526, %v12077_v51  }
 0xcad   : > { %4688 = vperm.xlu2 %8524, %v12081_v22  }
 0xcb1   : > { %4721 = vperm.xlu0 %8526, %v12086_v58  }
 0xcb5   : > { %4691 = vperm.xlu2 %8524, %v12090_v13   ;;  %4703 = vperm.xlu1 %8525, %v12092_v15  }
 0xcbd   : > { %4694 = vperm.xlu2 %8524, %v12099_v50   ;;  %4718 = vperm.xlu1 %8525, %v12101_v2  }
 0xcc1   : > { %v12106_v34 = vpop.xlane.xlu1 %4517 }
 0xcc2   : > { %v4529_v19 = vperm.slane %v12106_v34, 0  ;;  %v4530_v54 = vperm.slane %v12106_v34, 1  ;;  %v4531_v44 = vperm.slane %v12106_v34, 2  ;;  %v4532_v62 = vperm.slane %v12106_v34, 3 }
 0xcc3   : > { %v4533_v5 = vperm.slane %v12106_v34, 4  ;;  %v4534_v24 = vperm.slane %v12106_v34, 5  ;;  %v4535_v37 = vperm.slane %v12106_v34, 6 }
 0xcc4   : > { %v4569_v43 = vsub.f32 %v11594_v3, %v4529_v19  ;;  %v4571_v48 = vsub.f32 %v11701_v28, %v4530_v54  ;;  %v4572_v63 = vsub.f32 %v11613_v60, %v4530_v54  ;;  %v4603_v3 = vmul.f32 1.442695, %v4562_v53 }
 0xcc5   : > { %4697 = vperm.xlu2 %8524, %v12112_v61   ;;  %4727 = vperm.xlu1 %8525, %v12114_v4   ;;  %v4574_v28 = vsub.f32 %v11720_v6, %v4531_v44  ;;  %v4564_v60 = vsub.f32 %v11497_v52, %v4526_v16  ;;  %v4575_v32 = vsub.f32 %v11629_v0, %v4532_v62 }
 0xcc6   : > { %v4617_v10 = vmul.f32 1.442695, %v4569_v43  ;;  %v4621_v57 = vmul.f32 1.442695, %v4571_v48  ;;  %v4623_v20 = vmul.f32 1.442695, %v4572_v63  ;;  %v4577_v55 = vsub.f32 %v11741_v27, %v4533_v5 }
 0xcc7   : > { %v4627_v14 = vmul.f32 1.442695, %v4574_v28  ;;  %v4607_v40 = vmul.f32 1.442695, %v4564_v60  ;;  %v4629_v16 = vmul.f32 1.442695, %v4575_v32  ;;  %v4578_v27 = vsub.f32 %v11645_v11, %v4533_v5 }
 0xcc8   : > { %8867 = vpow2.f32 %v4617_v10  ;;  %v4633_v0 = vmul.f32 1.442695, %v4577_v55  ;;  %v4580_v7 = vsub.f32 %v11760_v31, %v4534_v24  ;;  %v4536_v11 = vperm.slane %v12106_v34, 7  ;;  %v13464_v63 = vld [vmem:[#allocation40_spill] sm:$0xff]  ;;  %v13468_v32 = vld [vmem:[#allocation51_spill] sm:$0xff] }
 0xcc9   : > { %8869 = vpow2.f32 %v4621_v57  ;;  %v4635_v17 = vmul.f32 1.442695, %v4578_v27  ;;  %v4570_v21 = vsub.f32 %v11526_v38, %v4529_v19  ;;  %v4581_v31 = vsub.f32 %v11661_v45, %v4535_v37  ;;  %v13469_v27 = vld [vmem:[#allocation18_spill] sm:$0xff] }
 0xcca   : > { %8871 = vpow2.f32 %v4603_v3  ;;  %v4639_v23 = vmul.f32 1.442695, %v4580_v7  ;;  %v4583_v9 = vsub.f32 %v11774_v41, %v4536_v11  ;;  %v4573_v45 = vsub.f32 %v11540_v33, %v4531_v44 }
 0xccb   : > { %8873 = vpow2.f32 %v4623_v20  ;;  %v4619_v43 = vmul.f32 1.442695, %v4570_v21  ;;  %v4641_v38 = vmul.f32 1.442695, %v4581_v31  ;;  %v4584_v3 = vsub.f32 %v13464_v63, %v4536_v11  ;;  %v13465_v20 = vld [vmem:[#allocation59_spill] sm:$0xff]  ;;  %v13472_v63 = vld [vmem:[#allocation20_spill] sm:$0xff] }
 0xccc   : > { %8875 = vpow2.f32 %v4627_v14  ;;  %v4645_v10 = vmul.f32 1.442695, %v4583_v9  ;;  %v4625_v28 = vmul.f32 1.442695, %v4573_v45  ;;  %v13471_v9 = vld [vmem:[#allocation27_spill] sm:$0xff] }
 0xccd   : > { %4706 = vperm.xlu2 %8524, %v12124_v12   ;;  %8877 = vpow2.f32 %v4607_v40  ;;  %v4647_v33 = vmul.f32 1.442695, %v4584_v3  ;;  %v4576_v40 = vsub.f32 %v13468_v32, %v4532_v62  ;;  %v13475_v32 = vld [vmem:[#allocation26_spill] sm:$0xff] }
 0xcce   : > { %v12128_v25 = vpop.eup %8867  ;;  %8879 = vpow2.f32 %v4629_v16  ;;  %v12173_v48 = vpop.xlane.xlu1 %5658 }
 0xccf   : > { %13460 = vst [vmem:[#allocation53_spill] sm:$0xff] %v12128_v25  ;;  %4730 = vperm.xlu0 %8526, %v12128_v25   ;;  %v12135_v6 = vpop.eup %8869  ;;  %8881 = vpow2.f32 %v4633_v0  ;;  %v5677_v57 = vperm.slane %v12173_v48, 4  ;;  %v5674_v44 = vperm.slane %v12173_v48, 1  ;;  %v5680_v55 = vperm.slane %v12173_v48, 7 }
 0xcd0   : > { %13461 = vst [vmem:[#allocation8_spill] sm:$0xff] %v12135_v6  ;;  %4736 = vperm.xlu1 %8525, %v12135_v6   ;;  %v12142_v52 = vpop.eup %8871  ;;  %8883 = vpow2.f32 %v4613_v1  ;;  %v4631_v7 = vmul.f32 1.442695, %v4576_v40  ;;  %v5675_v21 = vperm.slane %v12173_v48, 2  ;;  %v4582_v40 = vsub.f32 %v13475_v32, %v4535_v37 }
 0xcd1   : > { %v12145_v26 = vpop.eup %8873  ;;  %8885 = vpow2.f32 %v4635_v17  ;;  %v5741_v60 = vsub.f32 %v13465_v20, %v5677_v57  ;;  %v5738_v1 = vsub.f32 %v13469_v27, %v5674_v44  ;;  %v13470_v17 = vld [vmem:[#allocation16_spill] sm:$0xff] }
 0xcd2   : > { %13462 = vst [vmem:[#allocation54_spill] sm:$0xff] %v12145_v26  ;;  %v12150_v35 = vpop.eup %8875  ;;  %8887 = vpow2.f32 %v4639_v23  ;;  %v5744_v11 = vsub.f32 %v13470_v17, %v5680_v55  ;;  %v5739_v3 = vsub.f32 %v13472_v63, %v5675_v21  ;;  %v13473_v20 = vld [vmem:[#allocation36_spill] sm:$0xff]  ;;  %v13477_v17 = vld [vmem:[#allocation25_spill] sm:$0xff]  ;;  %v4643_v21 = vmul.f32 1.442695, %v4582_v40 }
 0xcd3   : > { %v12157_v42 = vpop.eup %8877  ;;  %8889 = vpow2.f32 %v4619_v43  ;;  %v5777_v16 = vmul.f32 1.442695, %v5741_v60  ;;  %v5771_v23 = vmul.f32 1.442695, %v5738_v1  ;;  %v4579_v43 = vsub.f32 %v13471_v9, %v4534_v24  ;;  %v13478_v9 = vld [vmem:[#allocation49_spill] sm:$0xff]  ;;  %v13481_v40 = vld [vmem:[#allocation32_spill] sm:$0xff] }
 0xcd4   : > { %v12161_v49 = vpop.eup %8879  ;;  %8891 = vpow2.f32 %v4641_v38  ;;  %v5783_v38 = vmul.f32 1.442695, %v5744_v11  ;;  %v5678_v24 = vperm.slane %v12173_v48, 5  ;;  %v5773_v44 = vmul.f32 1.442695, %v5739_v3 }
 0xcd5   : > { %4709 = vperm.xlu2 %8524, %v12142_v52   ;;  %13463 = vst [vmem:[#allocation33_spill] sm:$0xff] %v12161_v49  ;;  %v12166_v54 = vpop.eup %8881  ;;  %8893 = vpow2.f32 %v4645_v10 }
 0xcd6   : > { %v12175_v53 = vpop.eup %8883  ;;  %8895 = vpow2.f32 %v4625_v28  ;;  %v4637_v28 = vmul.f32 1.442695, %v4579_v43  ;;  %v5742_v11 = vsub.f32 %v13477_v17, %v5678_v24  ;;  %v13482_v17 = vld [vmem:[#allocation29_spill] sm:$0xff] }
 0xcd7   : > { %4739 = vperm.xlu0 %8526, %v12145_v26   ;;  %v12178_v19 = vpop.eup %8885  ;;  %8897 = vpow2.f32 %v4647_v33 }
 0xcd8   : > { %4745 = vperm.xlu1 %8525, %v12150_v35   ;;  %v12185_v41 = vpop.eup %8887  ;;  %8899 = vpow2.f32 %v5777_v16  ;;  %v5779_v63 = vmul.f32 1.442695, %v5742_v11 }
 0xcd9   : > { %v12190_v5 = vpop.eup %8889  ;;  %8901 = vpow2.f32 %v4631_v7 }
 0xcda   : > { %13466 = vst [vmem:[#allocation35_spill] sm:$0xff] %v12190_v5  ;;  %v12194_v14 = vpop.eup %8891  ;;  %8903 = vpow2.f32 %v5771_v23  ;;  %v5673_v23 = vperm.slane %v12173_v48, 0 }
 0xcdb   : > { %13467 = vst [vmem:[#allocation43_spill] sm:$0xff] %v12194_v14  ;;  %v12203_v0 = vpop.eup %8893  ;;  %8905 = vpow2.f32 %v5783_v38 }
 0xcdc   : > { %v12208_v62 = vpop.eup %8895  ;;  %8907 = vpow2.f32 %v4637_v28  ;;  %v13479_v28 = vld [vmem:[#allocation38_spill] sm:$0xff] }
 0xcdd   : > { %4715 = vperm.xlu2 %8524, %v12157_v42   ;;  %v12212_v31 = vpop.eup %8897  ;;  %8909 = vpow2.f32 %v5773_v44 }
 0xcde   : > { %v12219_v57 = vpop.eup %8899 }
 0xcdf   : > { %4748 = vperm.xlu0 %8526, %v12161_v49   ;;  %v12224_v33 = vpop.eup %8901 }
 0xce0   : > { %4754 = vperm.xlu1 %8525, %v12166_v54   ;;  %13474 = vst [vmem:[#allocation42_spill] sm:$0xff] %v12224_v33  ;;  %v12231_v55 = vpop.eup %8903 }
 0xce1   : > { %v12235_v7 = vpop.eup %8905 }
 0xce2   : > { %13476 = vst [vmem:[#allocation24_spill] sm:$0xff] %v12235_v7 }
 0xce5   : > { %4724 = vperm.xlu2 %8524, %v12175_v53  }
 0xce7   : > { %4757 = vperm.xlu0 %8526, %v12178_v19  }
 0xce8   : > { %4763 = vperm.xlu1 %8525, %v12185_v41   ;;  %v12200_v59 = vpop.xlane.xlu2 %5661 }
 0xce9   : > { %v5681_v45 = vperm.slane %v12200_v59, 0  ;;  %v5683_v16 = vperm.slane %v12200_v59, 2  ;;  %v5684_v3 = vperm.slane %v12200_v59, 3 }
 0xceb   : > { %v5745_v60 = vsub.f32 %v13473_v20, %v5681_v45  ;;  %v5747_v43 = vsub.f32 %v13478_v9, %v5683_v16  ;;  %v12244_v45 = vpop.eup %8907  ;;  %v5737_v20 = vsub.f32 %v13479_v28, %v5673_v23  ;;  %v5748_v16 = vsub.f32 %v13481_v40, %v5684_v3 }
 0xced   : > { %4733 = vperm.xlu2 %8524, %v12190_v5   ;;  %v5785_v27 = vmul.f32 1.442695, %v5745_v60  ;;  %v5686_v60 = vperm.slane %v12200_v59, 5  ;;  %v5789_v24 = vmul.f32 1.442695, %v5747_v43  ;;  %v13484_v43 = vld [vmem:[#allocation56_spill] sm:$0xff] }
 0xcee   : > { %v5791_v23 = vmul.f32 1.442695, %v5748_v16  ;;  %v5679_v16 = vperm.slane %v12173_v48, 6 }
 0xcef   : > { %4766 = vperm.xlu0 %8526, %v12194_v14   ;;  %8911 = vpow2.f32 %v5785_v27  ;;  %v5676_v27 = vperm.slane %v12173_v48, 3  ;;  %v5750_v11 = vsub.f32 %v13482_v17, %v5686_v60  ;;  %v13487_v14 = vld [vmem:[#allocation57_spill] sm:$0xff] }
 0xcf0   : > { %4772 = vperm.xlu1 %8525, %v12203_v0   ;;  %8913 = vpow2.f32 %v4643_v21  ;;  %v5687_v21 = vperm.slane %v12200_v59, 6 }
 0xcf1   : > { %8915 = vpow2.f32 %v5779_v63  ;;  %v5740_v63 = vsub.f32 %v13484_v43, %v5676_v27  ;;  %v5795_v3 = vmul.f32 1.442695, %v5750_v11  ;;  %v13486_v27 = vld [vmem:[#allocation50_spill] sm:$0xff] }
 0xcf2   : > { %8917 = vpow2.f32 %v5789_v24  ;;  %v13485_v24 = vld [vmem:[#allocation30_spill] sm:$0xff] }
 0xcf3   : > { %v5751_v40 = vsub.f32 %v13485_v24, %v5687_v21  ;;  %v5775_v46 = vmul.f32 1.442695, %v5740_v63  ;;  %v5743_v21 = vsub.f32 %v13487_v14, %v5679_v16  ;;  %v13488_v24 = vld [vmem:[#allocation55_spill] sm:$0xff]  ;;  %v5682_v16 = vperm.slane %v12200_v59, 1 }
 0xcf5   : > { %4742 = vperm.xlu2 %8524, %v12208_v62  }
 0xcf7   : > { %4775 = vperm.xlu0 %8526, %v12212_v31   ;;  %v4683_v10 = vpop.permute.xlu2 %4682 }
 0xcf8   : > { %5878 = vperm.xlu1 %8525, %v12219_v57   ;;  %v4777_v34 = vperm.slane %v4683_v10, %v10019_v29  ;;  %v12248_v10 = vpop.eup %8909 }
 0xcf9   : > { %v12253_v32 = vpop.eup %8911 }
 0xcfa   : > { %13480 = vst [vmem:[#allocation48_spill] sm:$0xff] %v12253_v32 }
 0xcfd   : > { %4751 = vperm.xlu2 %8524, %v12224_v33  }
 0xcff   : > { %5869 = vperm.xlu0 %8526, %v12231_v55   ;;  %v4686_v1 = vpop.permute.xlu2 %4685 }
 0xd00   : > { %v4778_v37 = vperm.slane %v4686_v1, %v10022_v30  ;;  %5887 = vperm.xlu1 %8525, %v12235_v7   ;;  %v5769_v1 = vmul.f32 1.442695, %v5737_v20 }
 0xd02   : > { %v4779_v38 = vsel %vm1065_vm7, %v4778_v37, %v4777_v34  ;;  %v12259_v34 = vpop.xlane.xlu0 %5664  ;;  %v12261_v37 = vpop.eup %8913  ;;  %8919 = vpow2.f32 %v5769_v1 }
 0xd03   : > { %13483 = vst [vmem:[#allocation31_spill] sm:$0xff] %v12261_v37  ;;  %v12265_v9 = vpop.eup %8915  ;;  %v5690_v28 = vperm.slane %v12259_v34, 1  ;;  %8921 = vpow2.f32 %v5791_v23  ;;  %v5691_v63 = vperm.slane %v12259_v34, 2 }
 0xd04   : > { %v12270_v60 = vpop.eup %8917  ;;  %8923 = vpow2.f32 %v5795_v3 }
 0xd05   : > { %4760 = vperm.xlu2 %8524, %v12244_v45   ;;  %v5754_v1 = vsub.f32 %v13486_v27, %v5690_v28  ;;  %8925 = vpow2.f32 %v5775_v46 }
 0xd07   : > { %5872 = vperm.xlu0 %8526, %v12248_v10   ;;  %v4689_v44 = vpop.permute.xlu2 %4688  ;;  %v5803_v3 = vmul.f32 1.442695, %v5754_v1 }
 0xd08   : > { %5890 = vperm.xlu1 %8525, %v12253_v32   ;;  %v4780_v11 = vperm.slane %v4689_v44, %v10019_v29  ;;  %v12278_v43 = vpop.eup %8919  ;;  %v5797_v32 = vmul.f32 1.442695, %v5751_v40  ;;  %v5781_v40 = vmul.f32 1.442695, %v5743_v21  ;;  %v5694_v21 = vperm.slane %v12259_v34, 5 }
 0xd09   : > { %v12284_v48 = vpop.eup %8921 }
 0xd0a   : > { %8927 = vpow2.f32 %v5797_v32  ;;  %v13490_v32 = vld [vmem:[#allocation21_spill] sm:$0xff] }
 0xd0b   : > { %8929 = vpow2.f32 %v5803_v3 }
 0xd0c   : > { %8931 = vpow2.f32 %v5781_v40  ;;  %v5685_v40 = vperm.slane %v12200_v59, 4 }
 0xd0d   : > { %4769 = vperm.xlu2 %8524, %v12261_v37   ;;  %v5689_v37 = vperm.slane %v12259_v34, 0 }
 0xd0f   : > { %5881 = vperm.xlu0 %8526, %v12265_v9   ;;  %v4692_v20 = vpop.permute.xlu2 %4691  ;;  %v5753_v14 = vsub.f32 %v13488_v24, %v5689_v37  ;;  %v5746_v37 = vsub.f32 %v13490_v32, %v5682_v16  ;;  %v12307_v49 = vpop.xlane.xlu1 %5667 }
 0xd10   : > { %5896 = vperm.xlu1 %8525, %v12270_v60   ;;  %v4781_v17 = vperm.slane %v4692_v20, %v10022_v30  ;;  %v12289_v20 = vpop.eup %8923 }
 0xd11   : > { %v12295_v1 = vpop.eup %8925  ;;  %v5787_v16 = vmul.f32 1.442695, %v5746_v37 }
 0xd12   : > { %v4782_v23 = vsel %vm1065_vm7, %v4781_v17, %v4780_v11  ;;  %v13489_v17 = vld [vmem:[#allocation37_spill] sm:$0xff]  ;;  %v5801_v11 = vmul.f32 1.442695, %v5753_v14 }
 0xd13   : > { %v4825_v28 = vsel %vm1112_vm8, %v4782_v23, %v4779_v38  ;;  %v5755_v46 = vsub.f32 %v13489_v17, %v5691_v63  ;;  %v4701_v27 = vpop.permute.xlu0 %4700  ;;  %v5692_v38 = vperm.slane %v12259_v34, 3  ;;  %v12299_v23 = vpop.eup %8927  ;;  %v13492_v17 = vld [vmem:[#allocation22_spill] sm:$0xff] }
 0xd14   : > { %v12304_v3 = vpop.eup %8929  ;;  %8933 = vpow2.f32 %v5801_v11  ;;  %v5695_v11 = vperm.slane %v12259_v34, 6  ;;  %v4786_v5 = vperm.slane %v4701_v27, %v10019_v29 }
 0xd15   : > { %5866 = vperm.xlu2 %8524, %v12278_v43   ;;  %v5805_v24 = vmul.f32 1.442695, %v5755_v46  ;;  %13491 = vst [vmem:[#allocation9_spill] sm:$0xff] %v12304_v3  ;;  %v5756_v33 = vsub.f32 %v13492_v17, %v5692_v38  ;;  %v5758_v46 = vsub.f32 %v11916_v56, %v5694_v21  ;;  %v12316_v38 = vpop.eup %8931  ;;  %v5700_v21 = vperm.slane %v12307_v49, 3 }
 0xd17   : > { %5899 = vperm.xlu0 %8526, %v12284_v48   ;;  %v4695_v44 = vpop.permute.xlu2 %4694  ;;  %8935 = vpow2.f32 %v5805_v24  ;;  %v5807_v17 = vmul.f32 1.442695, %v5756_v33  ;;  %v5811_v56 = vmul.f32 1.442695, %v5758_v46  ;;  %v13496_v24 = vld [vmem:[#allocation19_spill] sm:$0xff] }
 0xd18   : > { %5905 = vperm.xlu1 %8525, %v12289_v20   ;;  %v4783_v14 = vperm.slane %v4695_v44, %v10019_v29  ;;  %8937 = vpow2.f32 %v5787_v16 }
 0xd19   : > { %8939 = vpow2.f32 %v5807_v17 }
 0xd1a   : > { %8941 = vpow2.f32 %v5811_v56 }
 0xd1b   : > { %v12319_v44 = vpop.permute.xlu0 %4712 }
 0xd1d   : > { %5875 = vperm.xlu2 %8524, %v12295_v1  }
 0xd1f   : > { %5908 = vperm.xlu0 %8526, %v12299_v23   ;;  %v4698_v63 = vpop.permute.xlu2 %4697 }
 0xd20   : > { %v4784_v26 = vperm.slane %v4698_v63, %v10022_v30  ;;  %5917 = vperm.xlu1 %8525, %v12304_v3   ;;  %v12322_v63 = vpop.eup %8933  ;;  %v13494_v3 = vld [vmem:[#allocation58_spill] sm:$0xff] }
 0xd21   : > { %13493 = vst [vmem:[#allocation40_spill] sm:$0xff] %v12322_v63  ;;  %v5749_v37 = vsub.f32 %v13494_v3, %v5685_v40  ;;  %v5764_v40 = vsub.f32 %v11937_v39, %v5700_v21 }
 0xd22   : > { %v4785_v32 = vsel %vm1065_vm7, %v4784_v26, %v4783_v14  ;;  %v5759_v14 = vsub.f32 %v13496_v24, %v5695_v11  ;;  %v5698_v11 = vperm.slane %v12307_v49, 1 }
 0xd23   : > { %v4826_v6 = vsel %vm1114_vm9, %v4785_v32, %v4825_v28  ;;  %v12327_v28 = vpop.eup %8935  ;;  %v5688_v32 = vperm.slane %v12200_v59, 7  ;;  %v5793_v3 = vmul.f32 1.442695, %v5749_v37  ;;  %v13498_v59 = vld [vmem:[#allocation46_spill] sm:$0xff]  ;;  %v5703_v37 = vperm.slane %v12307_v49, 6  ;;  %v4722_v39 = vpop.permute.xlu0 %4721 }
 0xd24   : > { %13495 = vst [vmem:[#allocation59_spill] sm:$0xff] %v12327_v28  ;;  %v12336_v46 = vpop.eup %8937  ;;  %v5823_v56 = vmul.f32 1.442695, %v5764_v40  ;;  %v5693_v40 = vperm.slane %v12259_v34, 4 }
 0xd25   : > { %5884 = vperm.xlu2 %8524, %v12316_v38   ;;  %13497 = vst [vmem:[#allocation51_spill] sm:$0xff] %v12336_v46  ;;  %v5752_v24 = vsub.f32 %v13498_v59, %v5688_v32  ;;  %v12342_v27 = vpop.eup %8939  ;;  %8943 = vpow2.f32 %v5793_v3  ;;  %v4796_v3 = vperm.slane %v4722_v39, %v10022_v30 }
 0xd26   : > { %13499 = vst [vmem:[#allocation18_spill] sm:$0xff] %v12342_v27 }
 0xd27   : > { %v4707_v26 = vpop.permute.xlu2 %4706  ;;  %5914 = vperm.xlu0 %8526, %v12322_v63   ;;  %v4704_v33 = vpop.permute.xlu1 %4703  ;;  %v5813_v63 = vmul.f32 1.442695, %v5759_v14 }
 0xd28   : > { %v4787_v25 = vperm.slane %v4704_v33, %v10022_v30  ;;  %5920 = vperm.xlu1 %8525, %v12327_v28  }
 0xd29   : > { %8945 = vpow2.f32 %v5813_v63 }
 0xd2a   : > { %v4788_v16 = vsel %vm1065_vm7, %v4787_v25, %v4786_v5  ;;  %v12346_v25 = vpop.eup %8941  ;;  %v13501_v5 = vld [vmem:[#allocation39_spill] sm:$0xff]  ;;  %8947 = vpow2.f32 %v5823_v56 }
 0xd2b   : > { %v4827_v17 = vsel %vm1116_vm10, %v4788_v16, %v4826_v6  ;;  %13500 = vst [vmem:[#allocation16_spill] sm:$0xff] %v12346_v25  ;;  %v5762_v14 = vsub.f32 %v13501_v5, %v5698_v11  ;;  %v4789_v6 = vperm.slane %v4707_v26, %v10019_v29  ;;  %v5799_v16 = vmul.f32 1.442695, %v5752_v24  ;;  %v12359_v5 = vpop.eup %8943 }
 0xd2c   : > { %v5701_v24 = vperm.slane %v12307_v49, 4 }
 0xd2d   : > { %5893 = vperm.xlu2 %8524, %v12336_v46   ;;  %v5819_v39 = vmul.f32 1.442695, %v5762_v14  ;;  %8949 = vpow2.f32 %v5799_v16  ;;  %v5696_v16 = vperm.slane %v12259_v34, 7 }
 0xd2f   : > { %v4710_v21 = vpop.permute.xlu2 %4709  ;;  %5923 = vperm.xlu0 %8526, %v12342_v27   ;;  %v4719_v33 = vpop.permute.xlu1 %4718  ;;  %v5767_v27 = vsub.f32 %v11944_v36, %v5703_v37  ;;  %8951 = vpow2.f32 %v5819_v39 }
 0xd30   : > { %v4790_v32 = vperm.slane %v4710_v21, %v10022_v30  ;;  %v4795_v59 = vperm.slane %v4719_v33, %v10019_v29  ;;  %5929 = vperm.xlu1 %8525, %v12346_v25   ;;  %v12363_v21 = vpop.eup %8945  ;;  %v13504_v33 = vld [vmem:[#allocation41_spill] sm:$0xff] }
 0xd31   : > { %13503 = vst [vmem:[#allocation27_spill] sm:$0xff] %v12363_v21  ;;  %v5757_v46 = vsub.f32 %v13504_v33, %v5693_v40  ;;  %v5829_v36 = vmul.f32 1.442695, %v5767_v27  ;;  %v12367_v56 = vpop.eup %8947 }
 0xd32   : > { %v4791_v63 = vsel %vm1065_vm7, %v4790_v32, %v4789_v6  ;;  %v4797_v11 = vsel %vm1065_vm7, %v4796_v3, %v4795_v59  ;;  %13505 = vst [vmem:[#allocation20_spill] sm:$0xff] %v12367_v56  ;;  %v13506_v6 = vld [vmem:[#allocation60_spill] sm:$0xff]  ;;  %v4792_v32 = vperm.slane %v12319_v44, %v10019_v29 }
 0xd33   : > { %v4828_v26 = vsel %vm13502_vm13, %v4791_v63, %v4827_v17  ;;  %v5765_v17 = vsub.f32 %v13506_v6, %v5701_v24  ;;  %v5809_v3 = vmul.f32 1.442695, %v5757_v46  ;;  %8953 = vpow2.f32 %v5829_v36  ;;  %v12377_v63 = vpop.eup %8949  ;;  %vm13525_vm13 = vmmov %vm13508_vm15 }
 0xd34   : > { %v5704_v24 = vperm.slane %v12307_v49, 7 }
 0xd35   : > { %5902 = vperm.xlu2 %8524, %v12359_v5   ;;  %v5825_v39 = vmul.f32 1.442695, %v5765_v17  ;;  %v12382_v33 = vpop.eup %8951  ;;  %8955 = vpow2.f32 %v5809_v3 }
 0xd36   : > { %13509 = vst [vmem:[#allocation36_spill] sm:$0xff] %v12382_v33 }
 0xd37   : > { %v4716_v37 = vpop.permute.xlu2 %4715  ;;  %5932 = vperm.xlu0 %8526, %v12363_v21   ;;  %v4728_v59 = vpop.permute.xlu1 %4727  ;;  %8957 = vpow2.f32 %v5825_v39  ;;  %v13516_v39 = vld [vmem:[#allocation45_spill] sm:$0xff] }
 0xd38   : > { %v4793_v14 = vperm.slane %v4716_v37, %v10022_v30  ;;  %5947 = vperm.xlu1 %8525, %v12367_v56   ;;  %v13510_v37 = vld [vmem:[#allocation28_spill] sm:$0xff]  ;;  %v13519_v56 = vld [vmem:[#allocation47_spill] sm:$0xff] }
 0xd39   : > { %v5760_v34 = vsub.f32 %v13510_v37, %v5696_v16  ;;  %v12386_v36 = vpop.eup %8953 }
 0xd3a   : > { %v4794_v27 = vsel %vm1065_vm7, %v4793_v14, %v4792_v32  ;;  %13511 = vst [vmem:[#allocation26_spill] sm:$0xff] %v12386_v36  ;;  %v4799_v32 = vperm.slane %v4728_v59, %v10022_v30 }
 0xd3b   : > { %v4829_v40 = vsel %vm13507_vm14, %v4794_v27, %v4828_v26  ;;  %v13512_v26 = vld [vmem:[#allocation44_spill] sm:$0xff]  ;;  %v5815_v14 = vmul.f32 1.442695, %v5760_v34  ;;  %v5697_v27 = vperm.slane %v12307_v49, 0  ;;  %v12397_v37 = vpop.eup %8955  ;;  %vm13526_vm14 = vmmov %vm13513_vm0 }
 0xd3c   : > { %v4830_v44 = vsel %vm13508_vm15, %v4797_v11, %v4829_v40  ;;  %v5768_v6 = vsub.f32 %v13512_v26, %v5704_v24  ;;  %13514 = vst [vmem:[#allocation25_spill] sm:$0xff] %v12397_v37  ;;  %vm13527_vm15 = vcmask 130048  }
 0xd3d   : > { %5911 = vperm.xlu2 %8524, %v12377_v63   ;;  %v12400_v59 = vpop.eup %8957  ;;  %8959 = vpow2.f32 %v5815_v14 }
 0xd3e   : > { %v5831_v24 = vmul.f32 1.442695, %v5768_v6  ;;  %13515 = vst [vmem:[#allocation49_spill] sm:$0xff] %v12400_v59 }
 0xd3f   : > { %v4725_v46 = vpop.permute.xlu2 %4724  ;;  %5941 = vperm.xlu0 %8526, %v12382_v33  }
 0xd40   : > { %v4798_v17 = vperm.slane %v4725_v46, %v10019_v29  ;;  %5956 = vperm.xlu1 %8525, %v12386_v36   ;;  %v5761_v46 = vsub.f32 %v13516_v39, %v5697_v27  ;;  %8961 = vpow2.f32 %v5831_v24  ;;  %v5702_v24 = vperm.slane %v12307_v49, 5 }
 0xd41   : > { %v4731_v11 = vpop.permute.xlu0 %4730 }
 0xd42   : > { %v4800_v16 = vsel %vm1065_vm7, %v4799_v32, %v4798_v17  ;;  %v4737_v3 = vpop.permute.xlu1 %4736  ;;  %v5699_v32 = vperm.slane %v12307_v49, 2  ;;  %v5817_v17 = vmul.f32 1.442695, %v5761_v46  ;;  %v13521_v46 = vld [vmem:[#allocation17_spill] sm:$0xff] }
 0xd43   : > { %v12395_v40 = vsel %vm13513_vm0, %v4800_v16, %v4830_v44  ;;  %v12405_v16 = vpop.eup %8959  ;;  %v5766_v36 = vsub.f32 %v13521_v46, %v5702_v24  ;;  %vm13528_vm0 = vmmov %vm13523_vm11 }
 0xd44   : > { %13517 = vst [vmem:[#allocation38_spill] sm:$0xff] %v12405_v16  ;;  %v5763_v25 = vsub.f32 %v13519_v56, %v5699_v32  ;;  %8963 = vpow2.f32 %v5817_v17 }
 0xd45   : > { %5926 = vperm.xlu2 %8524, %v12397_v37   ;;  %v5827_v28 = vmul.f32 1.442695, %v5766_v36  ;;  %v4801_v36 = vperm.slane %v4731_v11, %v10019_v29 }
 0xd46   : > { %v12408_v6 = vpop.eup %8961  ;;  %v5821_v39 = vmul.f32 1.442695, %v5763_v25  ;;  %v4804_v25 = vperm.slane %v4737_v3, %v10019_v29 }
 0xd47   : > { %v4734_v26 = vpop.permute.xlu2 %4733  ;;  %5950 = vperm.xlu0 %8526, %v12400_v59   ;;  %13518 = vst [vmem:[#allocation32_spill] sm:$0xff] %v12408_v6 }
 0xd48   : > { %8965 = vpow2.f32 %v5821_v39 }
 0xd49   : > { %v4740_v34 = vpop.permute.xlu0 %4739  ;;  %8967 = vpow2.f32 %v5827_v28 }
 0xd4a   : > { %v4746_v44 = vpop.permute.xlu1 %4745  ;;  %v12413_v59 = vpop.eup %8963  ;;  %v4805_v17 = vperm.slane %v4740_v34, %v10022_v30 }
 0xd4b   : > { %13520 = vst [vmem:[#allocation29_spill] sm:$0xff] %v12413_v59  ;;  %v4808_v46 = vperm.slane %v4746_v44, %v10022_v30 }
 0xd4c   : > { %v4806_v33 = vsel %vm1065_vm7, %v4805_v17, %v4804_v25 }
 0xd4d   : > { %5935 = vperm.xlu2 %8524, %v12405_v16  }
 0xd4e   : > { %v12417_v32 = vpop.eup %8965 }
 0xd4f   : > { %v4743_v14 = vpop.permute.xlu2 %4742  ;;  %5959 = vperm.xlu0 %8526, %v12408_v6   ;;  %13522 = vst [vmem:[#allocation56_spill] sm:$0xff] %v12417_v32  ;;  %v4802_v6 = vperm.slane %v4734_v26, %v10022_v30  ;;  %v12434_v7 = vpop.eup %8967 }
 0xd50   : > { %v4807_v49 = vperm.slane %v4743_v14, %v10019_v29 }
 0xd51   : > { %v4749_v27 = vpop.permute.xlu0 %4748  ;;  %v4803_v3 = vsel %vm1065_vm7, %v4802_v6, %v4801_v36 }
 0xd52   : > { %v4755_v37 = vpop.permute.xlu1 %4754  ;;  %v4810_v34 = vperm.slane %v4749_v27, %v10019_v29  ;;  %v4809_v28 = vsel %vm1065_vm7, %v4808_v46, %v4807_v49  ;;  %v4832_v11 = vsel %vm1112_vm8, %v4806_v33, %v4803_v3 }
 0xd53   : > { %v4813_v44 = vperm.slane %v4755_v37, %v10019_v29  ;;  %v4833_v27 = vsel %vm1114_vm9, %v4809_v28, %v4832_v11 }
 0xd55   : > { %5938 = vperm.xlu2 %8524, %v12413_v59  }
 0xd57   : > { %v4752_v16 = vpop.permute.xlu2 %4751 }
 0xd58   : > { %v4811_v24 = vperm.slane %v4752_v16, %v10022_v30 }
 0xd59   : > { %v4758_v21 = vpop.permute.xlu0 %4757 }
 0xd5a   : > { %v4764_v56 = vpop.permute.xlu1 %4763  ;;  %v4814_v14 = vperm.slane %v4758_v21, %v10022_v30  ;;  %v4812_v26 = vsel %vm1065_vm7, %v4811_v24, %v4810_v34 }
 0xd5b   : > { %v4817_v17 = vperm.slane %v4764_v56, %v10022_v30  ;;  %v4834_v21 = vsel %vm1116_vm10, %v4812_v26, %v4833_v27 }
 0xd5c   : > { %v4815_v6 = vsel %vm1065_vm7, %v4814_v14, %v4813_v44 }
 0xd5d   : > { %5944 = vperm.xlu2 %8524, %v12417_v32   ;;  %v4835_v33 = vsel %vm13523_vm11, %v4815_v6, %v4834_v21  ;;  %vm13529_vm11 = vmmov %vm13524_vm12 }
 0xd5f   : > { %v4761_v39 = vpop.permute.xlu2 %4760 }
 0xd60   : > { %v4816_v16 = vperm.slane %v4761_v39, %v10019_v29 }
 0xd61   : > { %v4767_v59 = vpop.permute.xlu0 %4766 }
 0xd62   : > { %v4773_v32 = vpop.permute.xlu1 %4772  ;;  %v4818_v49 = vsel %vm1065_vm7, %v4817_v17, %v4816_v16  ;;  %v4819_v24 = vperm.slane %v4767_v59, %v10019_v29 }
 0xd63   : > { %v4822_v46 = vperm.slane %v4773_v32, %v10019_v29  ;;  %v4836_v34 = vsel %vm13524_vm12, %v4818_v49, %v4835_v33  ;;  %vm13530_vm12 = vmmov %vm13525_vm13 }
 0xd65   : > { %5953 = vperm.xlu2 %8524, %v12434_v7  }
 0xd67   : > { %v4770_v25 = vpop.permute.xlu2 %4769 }
 0xd68   : > { %v4820_v39 = vperm.slane %v4770_v25, %v10022_v30 }
 0xd69   : > { %v4776_v37 = vpop.permute.xlu0 %4775 }
 0xd6a   : > { %v4821_v56 = vsel %vm1065_vm7, %v4820_v39, %v4819_v24  ;;  %v4823_v36 = vperm.slane %v4776_v37, %v10022_v30  ;;  %v5879_v28 = vpop.permute.xlu1 %5878 }
 0xd6b   : > { %v4837_v14 = vsel %vm13525_vm13, %v4821_v56, %v4836_v34  ;;  %vm13531_vm13 = vmmov %vm13526_vm14 }
 0xd6c   : > { %v4824_v3 = vsel %vm1065_vm7, %v4823_v36, %v4822_v46  ;;  %v5965_v46 = vperm.slane %v5879_v28, %v10019_v29 }
 0xd6d   : > { %v4838_v59 = vsel %vm13526_vm14, %v4824_v3, %v4837_v14  ;;  %vm13532_vm14 = vcmask 64512  }
 0xd6e   : > { %v4844_v26 = vsel %vm13527_vm15, %v4838_v59, 0.0 }
 0xd6f   : > { %v5867_v16 = vpop.permute.xlu2 %5866  ;;  %4845 = vadd.xlane.f32.xlu1 %v4844_v26 }
 0xd70   : > { %v5961_v21 = vperm.slane %v5867_v16, %v10019_v29 }
 0xd71   : > { %v5870_v11 = vpop.permute.xlu0 %5869 }
 0xd72   : > { %v5888_v44 = vpop.permute.xlu1 %5887  ;;  %v5962_v27 = vperm.slane %v5870_v11, %v10019_v29 }
 0xd73   : > { %v5968_v59 = vperm.slane %v5888_v44, %v10019_v29 }
 0xd74   : > { %v5993_v25 = vsel %vm1112_vm8, %v5962_v27, %v5961_v21 }
 0xd77   : > { %v5876_v32 = vpop.permute.xlu2 %5875 }
 0xd78   : > { %v5964_v39 = vperm.slane %v5876_v32, %v10019_v29 }
 0xd79   : > { %v5873_v17 = vpop.permute.xlu0 %5872 }
 0xd7a   : > { %v5963_v6 = vperm.slane %v5873_v17, %v10019_v29  ;;  %v5891_v49 = vpop.permute.xlu1 %5890 }
 0xd7b   : > { %v5969_v21 = vperm.slane %v5891_v49, %v10019_v29 }
 0xd7c   : > { %v5994_v24 = vsel %vm1114_vm9, %v5963_v6, %v5993_v25 }
 0xd7d   : > { %v5995_v37 = vsel %vm1116_vm10, %v5964_v39, %v5994_v24  ;;  %v4841_v24 = vsel %vm13527_vm15, %v12395_v40, 0.0  ;;  %vm13533_vm15 = vmmov %vm13528_vm0 }
 0xd7e   : > { %v5996_v3 = vsel %vm13528_vm0, %v5965_v46, %v5995_v37 }
 0xd7f   : > { %v5885_v33 = vpop.permute.xlu2 %5884 }
 0xd80   : > { %v5967_v34 = vperm.slane %v5885_v33, %v10019_v29 }
 0xd81   : > { %v5882_v56 = vpop.permute.xlu0 %5881 }
 0xd82   : > { %v5966_v36 = vperm.slane %v5882_v56, %v10019_v29  ;;  %v5897_v14 = vpop.permute.xlu1 %5896 }
 0xd83   : > { %v5971_v44 = vperm.slane %v5897_v14, %v10019_v29 }
 0xd84   : > { %v5997_v26 = vsel %vm13529_vm11, %v5966_v36, %v5996_v3 }
 0xd85   : > { %v5998_v16 = vsel %vm13530_vm12, %v5967_v34, %v5997_v26 }
 0xd86   : > { %v5999_v11 = vsel %vm13531_vm13, %v5968_v59, %v5998_v16 }
 0xd87   : > { %v5894_v32 = vpop.permute.xlu2 %5893  ;;  %v6025_v27 = vsel %vm13532_vm14, %v5999_v11, 0.0 }
 0xd88   : > { %v5970_v28 = vperm.slane %v5894_v32, %v10019_v29  ;;  %6026 = vadd.xlane.f32.xlu1 %v6025_v27 }
 0xd89   : > { %v5900_v17 = vpop.permute.xlu0 %5899 }
 0xd8a   : > { %v5906_v6 = vpop.permute.xlu1 %5905  ;;  %v6000_v25 = vsel %vm1112_vm8, %v5970_v28, %v5969_v21  ;;  %v5972_v39 = vperm.slane %v5900_v17, %v10019_v29 }
 0xd8b   : > { %v6001_v33 = vsel %vm1114_vm9, %v5971_v44, %v6000_v25  ;;  %v5974_v3 = vperm.slane %v5906_v6, %v10019_v29 }
 0xd8c   : > { %v6002_v36 = vsel %vm1116_vm10, %v5972_v39, %v6001_v33 }
 0xd8e   : > { %4842 = vadd.xlane.f32.xlu2 %v4841_v24 }
 0xd8f   : > { %v5903_v37 = vpop.permute.xlu2 %5902 }
 0xd90   : > { %v5973_v46 = vperm.slane %v5903_v37, %v10019_v29 }
 0xd91   : > { %v5909_v56 = vpop.permute.xlu0 %5908 }
 0xd92   : > { %v6003_v49 = vsel %vm13528_vm0, %v5973_v46, %v6002_v36  ;;  %v5918_v34 = vpop.permute.xlu1 %5917  ;;  %v5975_v14 = vperm.slane %v5909_v56, %v10019_v29  ;;  %vm13534_vm0 = vmmov %vm13529_vm11 }
 0xd93   : > { %v6004_v40 = vsel %vm13529_vm11, %v5974_v3, %v6003_v49  ;;  %v5978_v21 = vperm.slane %v5918_v34, %v10019_v29  ;;  %vm13535_vm11 = vmmov %vm13530_vm12 }
 0xd94   : > { %v6005_v11 = vsel %vm13530_vm12, %v5975_v14, %v6004_v40  ;;  %vm13536_vm12 = vmmov %vm13531_vm13 }
 0xd97   : > { %v5912_v59 = vpop.permute.xlu2 %5911 }
 0xd98   : > { %v5976_v26 = vperm.slane %v5912_v59, %v10019_v29 }
 0xd99   : > { %v5915_v16 = vpop.permute.xlu0 %5914 }
 0xd9a   : > { %v6006_v32 = vsel %vm13531_vm13, %v5976_v26, %v6005_v11  ;;  %v5921_v28 = vpop.permute.xlu1 %5920  ;;  %v5977_v17 = vperm.slane %v5915_v16, %v10019_v29  ;;  %vm13537_vm13 = vmmov %vm13532_vm14 }
 0xd9b   : > { %v6028_v27 = vsel %vm13532_vm14, %v6006_v32, 0.0  ;;  %v5979_v25 = vperm.slane %v5921_v28, %v10019_v29  ;;  %vm13538_vm14 = vmmov %vm13533_vm15 }
 0xd9c   : > { %6029 = vadd.xlane.f32.xlu2 %v6028_v27  ;;  %v6007_v44 = vsel %vm1112_vm8, %v5978_v21, %v5977_v17 }
 0xd9d   : > { %v6008_v33 = vsel %vm1114_vm9, %v5979_v25, %v6007_v44 }
 0xd9f   : > { %v5927_v6 = vpop.permute.xlu2 %5926 }
 0xda0   : > { %v5981_v46 = vperm.slane %v5927_v6, %v10019_v29 }
 0xda1   : > { %v5924_v24 = vpop.permute.xlu0 %5923 }
 0xda2   : > { %v5980_v39 = vperm.slane %v5924_v24, %v10019_v29  ;;  %v5930_v56 = vpop.permute.xlu1 %5929 }
 0xda3   : > { %v5982_v34 = vperm.slane %v5930_v56, %v10019_v29 }
 0xda4   : > { %v6009_v37 = vsel %vm1116_vm10, %v5980_v39, %v6008_v33 }
 0xda5   : > { %v6010_v49 = vsel %vm13533_vm15, %v5981_v46, %v6009_v37  ;;  %vm13539_vm15 = vmmov %vm13534_vm0 }
 0xda6   : > { %v6011_v59 = vsel %vm13534_vm0, %v5982_v34, %v6010_v49  ;;  %vm13540_vm0 = vmmov %vm13535_vm11 }
 0xda7   : > { %v5936_v36 = vpop.permute.xlu2 %5935 }
 0xda8   : > { %v5984_v40 = vperm.slane %v5936_v36, %v10019_v29 }
 0xda9   : > { %v5933_v3 = vpop.permute.xlu0 %5932 }
 0xdaa   : > { %v5983_v14 = vperm.slane %v5933_v3, %v10019_v29  ;;  %v5948_v28 = vpop.permute.xlu1 %5947 }
 0xdab   : > { %v5988_v33 = vperm.slane %v5948_v28, %v10019_v29 }
 0xdac   : > { %v6012_v26 = vsel %vm13535_vm11, %v5983_v14, %v6011_v59  ;;  %vm13541_vm11 = vmmov %vm13536_vm12 }
 0xdad   : > { %v6013_v16 = vsel %vm13536_vm12, %v5984_v40, %v6012_v26  ;;  %vm13542_vm12 = vmmov %vm13537_vm13 }
 0xdae   : > { %v6031_v11 = vsel %vm13537_vm13, %v6013_v16, 0.0  ;;  %vm13569_vm13 = vmmov %vm13538_vm14 }
 0xdaf   : > { %v5939_v32 = vpop.permute.xlu2 %5938  ;;  %6032 = vadd.xlane.f32.xlu0 %v6031_v11 }
 0xdb0   : > { %v5985_v6 = vperm.slane %v5939_v32, %v10019_v29 }
 0xdb1   : > { %v5942_v27 = vpop.permute.xlu0 %5941 }
 0xdb2   : > { %v5986_v17 = vperm.slane %v5942_v27, %v10019_v29  ;;  %v5957_v46 = vpop.permute.xlu1 %5956 }
 0xdb3   : > { %v5991_v34 = vperm.slane %v5957_v46, %v10019_v29 }
 0xdb4   : > { %v6014_v24 = vsel %vm1112_vm8, %v5986_v17, %v5985_v6 }
 0xdb7   : > { %v5945_v21 = vpop.permute.xlu2 %5944 }
 0xdb8   : > { %v5987_v25 = vperm.slane %v5945_v21, %v10019_v29 }
 0xdb9   : > { %v5951_v44 = vpop.permute.xlu0 %5950 }
 0xdba   : > { %v6015_v39 = vsel %vm1114_vm9, %v5987_v25, %v6014_v24  ;;  %v5989_v37 = vperm.slane %v5951_v44, %v10019_v29 }
 0xdbb   : > { %v6016_v56 = vsel %vm1116_vm10, %v5988_v33, %v6015_v39 }
 0xdbc   : > { %v6017_v3 = vsel %vm13538_vm14, %v5989_v37, %v6016_v56  ;;  %vm13570_vm14 = vmmov %vm13539_vm15 }
 0xdbf   : > { %v5954_v36 = vpop.permute.xlu2 %5953 }
 0xdc0   : > { %v5990_v49 = vperm.slane %v5954_v36, %v10019_v29 }
 0xdc1   : > { %v5960_v14 = vpop.permute.xlu0 %5959 }
 0xdc2   : > { %v6018_v40 = vsel %vm13539_vm15, %v5990_v49, %v6017_v3  ;;  %v5992_v59 = vperm.slane %v5960_v14, %v10019_v29  ;;  %vm13571_vm15 = vmmov %vm13540_vm0 }
 0xdc3   : > { %v6019_v26 = vsel %vm13540_vm0, %v5991_v34, %v6018_v40  ;;  %vm13572_vm0 = vmmov %vm13541_vm11 }
 0xdc4   : > { %v6020_v16 = vsel %vm13541_vm11, %v5992_v59, %v6019_v26  ;;  %vm13574_vm11 = vcmask 130048  }
 0xdc5   : > { %v6034_v11 = vsel %vm13542_vm12, %v6020_v16, 0.0  ;;  %vm13576_vm12 = vmmov %vm13570_vm14 }
 0xdc6   : > { %6035 = vadd.xlane.f32.xlu2 %v6034_v11 }
 0xde2   : > { %v4846_v32 = vpop.xlane.xlu1 %4845 }
 0xdfb   : > { %v6027_v44 = vpop.xlane.xlu1 %6026 }
 0xe01   : > { %v4843_v27 = vpop.xlane.xlu2 %4842 }
 0xe02   : > { %8969 = vrcp.f32 %v4843_v27 }
 0xe03   : > { %8971 = vrcp.f32 %v4846_v32 }
 0xe04   : > { %8973 = vrcp.f32 %v6027_v44 }
 0xe08   : > { %v12521_v28 = vpop.eup %8969 }
 0xe09   : > { %v12523_v17 = vpop.eup %8971  ;;  %v4857_v21 = vperm.slane %v12521_v28, 6  ;;  %v4851_v6 = vperm.slane %v12521_v28, 0  ;;  %v4856_v25 = vperm.slane %v12521_v28, 5  ;;  %v4852_v3 = vperm.slane %v12521_v28, 1 }
 0xe0a   : > { %v4863_v36 = vperm.slane %v12523_v17, 4  ;;  %v12543_v26 = vpop.eup %8973  ;;  %v4866_v16 = vperm.slane %v12523_v17, 7  ;;  %v4853_v27 = vperm.slane %v12521_v28, 2 }
 0xe0b   : > { %v4895_v24 = vmul.f32 %v12101_v2, %v4857_v21  ;;  %v4896_v39 = vmul.f32 %v12086_v58, %v4857_v21  ;;  %v4883_v33 = vmul.f32 %v12059_v8, %v4851_v6  ;;  %v4884_v37 = vmul.f32 %v12071_v18, %v4851_v6 }
 0xe0c   : > { %v4893_v46 = vmul.f32 %v12077_v51, %v4856_v25  ;;  %v4894_v56 = vmul.f32 %v12157_v42, %v4856_v25  ;;  %v4861_v2 = vperm.slane %v12523_v17, 2  ;;  %v4907_v8 = vmul.f32 %v12166_v54, %v4863_v36 }
 0xe0d   : > { %v8557_v49 = vpack.i.bf16 %v4896_v39, %v4895_v24  ;;  %v8527_v34 = vpack.i.bf16 %v4884_v37, %v4883_v33  ;;  %v4908_v18 = vmul.f32 %v12178_v19, %v4863_v36  ;;  %v4885_v51 = vmul.f32 %v12081_v22, %v4852_v3 }
 0xe0e   : > { %v8552_v14 = vpack.i.bf16 %v4894_v56, %v4893_v46  ;;  %v4886_v42 = vmul.f32 %v12090_v13, %v4852_v3  ;;  %v4903_v40 = vmul.f32 %v12208_v62, %v4861_v2  ;;  %v4904_v59 = vmul.f32 %v12150_v35, %v4861_v2 }
 0xe0f   : > { %8558 = vperm.xlu1 %8525, %v8557_v49   ;;  %v6030_v58 = vpop.xlane.xlu2 %6029  ;;  %8528 = vperm.xlu0 %8526, %v8527_v34   ;;  %v8587_v11 = vpack.i.bf16 %v4908_v18, %v4907_v8  ;;  %v4864_v54 = vperm.slane %v12523_v17, 5  ;;  %v6048_v22 = vperm.slane %v12543_v26, 3  ;;  %v6050_v13 = vperm.slane %v12543_v26, 5 }
 0xe10   : > { %8975 = vrcp.f32 %v6030_v58  ;;  %8553 = vperm.xlu2 %8524, %v8552_v14   ;;  %v8532_v32 = vpack.i.bf16 %v4886_v42, %v4885_v51  ;;  %v8577_v19 = vpack.i.bf16 %v4904_v59, %v4903_v40  ;;  %v4913_v35 = vmul.f32 %v12203_v0, %v4866_v16 }
 0xe11   : > { %v4914_v62 = vmul.f32 %v12212_v31, %v4866_v16  ;;  %v4887_v44 = vmul.f32 %v12099_v50, %v4853_v27  ;;  %v4888_v24 = vmul.f32 %v12112_v61, %v4853_v27  ;;  %v4909_v39 = vmul.f32 %v12244_v45, %v4864_v54 }
 0xe12   : > { %v4910_v33 = vmul.f32 %v12185_v41, %v4864_v54  ;;  %v12561_v37 = vmul.f32 %v12295_v1, %v6048_v22  ;;  %v12567_v0 = vmul.f32 %v12265_v9, %v6050_v13  ;;  %v6045_v45 = vperm.slane %v12543_v26, 0 }
 0xe13   : > { %v8602_v56 = vpack.i.bf16 %v4914_v62, %v4913_v35  ;;  %v8537_v41 = vpack.i.bf16 %v4888_v24, %v4887_v44  ;;  %v6046_v1 = vperm.slane %v12543_v26, 1  ;;  %v4855_v42 = vperm.slane %v12521_v28, 4  ;;  %v13545_v44 = vld [vmem:[#allocation35_spill] sm:$0xff] }
 0xe14   : > { %v8592_v36 = vpack.i.bf16 %v4910_v33, %v4909_v39  ;;  %v6109_v49 = vmul.f32 %v12278_v43, %v6045_v45 }
 0xe15   : > { %v6110_v34 = vmul.f32 %v12231_v55, %v6046_v1  ;;  %v6049_v55 = vperm.slane %v12543_v26, 4  ;;  %v13547_v1 = vld [vmem:[#allocation54_spill] sm:$0xff] }
 0xe16   : > { %v12548_v21 = vpop.eup %8975 }
 0xe17   : > { %8588 = vperm.xlu1 %8525, %v8587_v11   ;;  %8533 = vperm.xlu0 %8526, %v8532_v32   ;;  %v6056_v6 = vperm.slane %v12548_v21, 3  ;;  %v6058_v25 = vperm.slane %v12548_v21, 5  ;;  %v6055_v9 = vperm.slane %v12548_v21, 2  ;;  %v8607_v8 = vpack.i.bf16 %v6110_v34, %v6109_v49  ;;  %v13548_v34 = vld [vmem:[#allocation29_spill] sm:$0xff] }
 0xe18   : > { %8578 = vperm.xlu2 %8524, %v8577_v19   ;;  %v6057_v51 = vperm.slane %v12548_v21, 4  ;;  %v6059_v59 = vperm.slane %v12548_v21, 6  ;;  %v6113_v16 = vmul.f32 %v12219_v57, %v6049_v55  ;;  %v6060_v54 = vperm.slane %v12548_v21, 7  ;;  %v13553_v55 = vld [vmem:[#allocation26_spill] sm:$0xff] }
 0xe19   : > { %v12564_v46 = vmul.f32 %v12284_v48, %v6056_v6  ;;  %v12570_v31 = vmul.f32 %v12289_v20, %v6058_v25  ;;  %v4854_v48 = vperm.slane %v12521_v28, 3  ;;  %v6047_v20 = vperm.slane %v12543_v26, 2  ;;  %v13544_v25 = vld [vmem:[#allocation53_spill] sm:$0xff] }
 0xe1a   : > { %v6119_v2 = vmul.f32 %v12270_v60, %v6055_v9  ;;  %v4892_v60 = vmul.f32 %v12142_v52, %v4855_v42  ;;  %v6123_v43 = vmul.f32 %v12299_v23, %v6059_v59  ;;  %v4858_v19 = vperm.slane %v12521_v28, 7 }
 0xe1b   : > { %v8622_v50 = vpack.i.bf16 %v12564_v46, %v12561_v37  ;;  %v8632_v61 = vpack.i.bf16 %v12570_v31, %v12567_v0  ;;  %v4889_v3 = vmul.f32 %v12068_v47, %v4854_v48  ;;  %v4890_v14 = vmul.f32 %v12092_v15, %v4854_v48  ;;  %v13567_v37 = vld [vmem:[#allocation20_spill] sm:$0xff] }
 0xe1c   : > { %v6111_v58 = vmul.f32 %v12248_v10, %v6047_v20  ;;  %v6051_v47 = vperm.slane %v12543_v26, 6  ;;  %v6121_v15 = vmul.f32 %v12359_v5, %v6057_v51  ;;  %v4891_v10 = vmul.f32 %v12124_v12, %v4855_v42 }
 0xe1d   : > { %v8542_v18 = vpack.i.bf16 %v4890_v14, %v4889_v3  ;;  %v6052_v5 = vperm.slane %v12543_v26, 7  ;;  %v6124_v12 = vmul.f32 %v12377_v63, %v6060_v54  ;;  %v4897_v52 = vmul.f32 %v12175_v53, %v4858_v19  ;;  %v13549_v14 = vld [vmem:[#allocation36_spill] sm:$0xff]  ;;  %v13554_v54 = vld [vmem:[#allocation33_spill] sm:$0xff] }
 0xe1e   : > { %v8617_v40 = vpack.i.bf16 %v6119_v2, %v6111_v58  ;;  %v6115_v11 = vmul.f32 %v12316_v38, %v6051_v47  ;;  %v8627_v32 = vpack.i.bf16 %v6121_v15, %v6113_v16  ;;  %v8547_v27 = vpack.i.bf16 %v4892_v60, %v4891_v10  ;;  %v13543_v38 = vld [vmem:[#allocation24_spill] sm:$0xff]  ;;  %v13550_v58 = vld [vmem:[#allocation59_spill] sm:$0xff] }
 0xe1f   : > { %8603 = vperm.xlu1 %8525, %v8602_v56   ;;  %8538 = vperm.xlu0 %8526, %v8537_v41   ;;  %v4898_v57 = vmul.f32 %v12114_v4, %v4858_v19  ;;  %v6116_v13 = vmul.f32 %v13543_v38, %v6052_v5  ;;  %v4859_v6 = vperm.slane %v12523_v17, 0  ;;  %v4860_v4 = vperm.slane %v12523_v17, 1  ;;  %v13546_v56 = vld [vmem:[#allocation8_spill] sm:$0xff] }
 0xe20   : > { %8593 = vperm.xlu2 %8524, %v8592_v36   ;;  %v8637_v22 = vpack.i.bf16 %v6123_v43, %v6115_v11  ;;  %v4862_v42 = vperm.slane %v12523_v17, 3 }
 0xe21   : > { %v8642_v35 = vpack.i.bf16 %v6124_v12, %v6116_v13  ;;  %v8562_v62 = vpack.i.bf16 %v4898_v57, %v4897_v52  ;;  %v4899_v26 = vmul.f32 %v13544_v25, %v4859_v6  ;;  %v4900_v24 = vmul.f32 %v13545_v44, %v4859_v6  ;;  %v13556_v12 = vld [vmem:[#allocation49_spill] sm:$0xff]  ;;  %v13558_v13 = vld [vmem:[#allocation16_spill] sm:$0xff] }
 0xe22   : > { %v6033_v23 = vpop.xlane.xlu0 %6032  ;;  %v4901_v41 = vmul.f32 %v13546_v56, %v4860_v4  ;;  %v4902_v48 = vmul.f32 %v13547_v1, %v4860_v4  ;;  %v4905_v19 = vmul.f32 %v13554_v54, %v4862_v42 }
 0xe23   : > { %8977 = vrcp.f32 %v6033_v23  ;;  %v8567_v53 = vpack.i.bf16 %v4900_v24, %v4899_v26  ;;  %v13557_v23 = vld [vmem:[#allocation25_spill] sm:$0xff]  ;;  %v13559_v24 = vld [vmem:[#allocation43_spill] sm:$0xff] }
 0xe24   : > { %v8572_v15 = vpack.i.bf16 %v4902_v48, %v4901_v41  ;;  %v13562_v41 = vld [vmem:[#allocation38_spill] sm:$0xff] }
 0xe27   : > { %8608 = vperm.xlu1 %8525, %v8607_v8   ;;  %8543 = vperm.xlu0 %8526, %v8542_v18   ;;  %v13551_v18 = vld [vmem:[#allocation56_spill] sm:$0xff] }
 0xe28   : > { %8618 = vperm.xlu2 %8524, %v8617_v40   ;;  %v13552_v40 = vld [vmem:[#allocation27_spill] sm:$0xff] }
 0xe29   : > { %v12608_v63 = vpop.eup %8977 }
 0xe2a   : > { %v6063_v39 = vperm.slane %v12608_v63, 2  ;;  %v6067_v45 = vperm.slane %v12608_v63, 6  ;;  %v6068_v44 = vperm.slane %v12608_v63, 7 }
 0xe2c   : > { %v6127_v8 = vmul.f32 %v13550_v58, %v6063_v39  ;;  %v6131_v59 = vmul.f32 %v13552_v40, %v6067_v45  ;;  %v13561_v39 = vld [vmem:[#allocation32_spill] sm:$0xff]  ;;  %v6132_v45 = vmul.f32 %v13562_v41, %v6068_v44  ;;  %v6064_v40 = vperm.slane %v12608_v63, 3 }
 0xe2f   : > { %8628 = vperm.xlu1 %8525, %v8627_v32   ;;  %8548 = vperm.xlu0 %8526, %v8547_v27   ;;  %v6065_v32 = vperm.slane %v12608_v63, 4  ;;  %v6066_v27 = vperm.slane %v12608_v63, 5 }
 0xe30   : > { %8638 = vperm.xlu2 %8524, %v8637_v22   ;;  %v13555_v22 = vld [vmem:[#allocation42_spill] sm:$0xff] }
 0xe31   : > { %v4906_v5 = vmul.f32 %v13555_v22, %v4862_v42  ;;  %v6129_v38 = vmul.f32 %v13557_v23, %v6065_v32 }
 0xe37   : > { %8643 = vperm.xlu1 %8525, %v8642_v35   ;;  %8563 = vperm.xlu0 %8526, %v8562_v62   ;;  %v6130_v35 = vmul.f32 %v13558_v13, %v6066_v27  ;;  %v8582_v62 = vpack.i.bf16 %v4906_v5, %v4905_v19 }
 0xe39   : > { %v6036_v28 = vpop.xlane.xlu2 %6035 }
 0xe3a   : > { %8979 = vrcp.f32 %v6036_v28  ;;  %v4865_v28 = vperm.slane %v12523_v17, 6  ;;  %v6053_v17 = vperm.slane %v12548_v21, 0 }
 0xe3c   : > { %v4911_v4 = vmul.f32 %v13559_v24, %v4865_v28 }
 0xe3f   : > { %8568 = vperm.xlu0 %8526, %v8567_v53   ;;  %v13560_v53 = vld [vmem:[#allocation31_spill] sm:$0xff] }
 0xe40   : > { %v12612_v33 = vpop.eup %8979 }
 0xe41   : > { %v6069_v36 = vperm.slane %v12612_v33, 0  ;;  %v6070_v9 = vperm.slane %v12612_v33, 1  ;;  %v6071_v20 = vperm.slane %v12612_v33, 2  ;;  %v6075_v49 = vperm.slane %v12612_v33, 6 }
 0xe42   : > { %v6073_v43 = vperm.slane %v12612_v33, 4  ;;  %v6074_v16 = vperm.slane %v12612_v33, 5  ;;  %v6076_v25 = vperm.slane %v12612_v33, 7  ;;  %v6072_v42 = vperm.slane %v12612_v33, 3 }
 0xe43   : > { %v6133_v3 = vmul.f32 %v13548_v34, %v6069_v36  ;;  %v6134_v2 = vmul.f32 %v13549_v14, %v6070_v9  ;;  %v6135_v51 = vmul.f32 %v13551_v18, %v6071_v20  ;;  %v6139_v47 = vmul.f32 %v13553_v55, %v6075_v49  ;;  %v13563_v9 = vld [vmem:[#allocation48_spill] sm:$0xff]  ;;  %v13564_v49 = vld [vmem:[#allocation51_spill] sm:$0xff] }
 0xe44   : > { %v6137_v52 = vmul.f32 %v13556_v12, %v6073_v43  ;;  %v6138_v57 = vmul.f32 %v12434_v7, %v6074_v16  ;;  %v4912_v7 = vmul.f32 %v13560_v53, %v4865_v28  ;;  %v6140_v56 = vmul.f32 %v13561_v39, %v6076_v25 }
 0xe45   : > { %v8652_v10 = vpack.i.bf16 %v6134_v2, %v6133_v3  ;;  %v8657_v60 = vpack.i.bf16 %v6135_v51, %v6127_v8  ;;  %v8677_v11 = vpack.i.bf16 %v6139_v47, %v6131_v59  ;;  %v6054_v36 = vperm.slane %v12548_v21, 1  ;;  %v13565_v21 = vld [vmem:[#allocation40_spill] sm:$0xff]  ;;  %v13566_v8 = vld [vmem:[#allocation9_spill] sm:$0xff] }
 0xe46   : > { %v8667_v6 = vpack.i.bf16 %v6137_v52, %v6129_v38  ;;  %v8672_v26 = vpack.i.bf16 %v6138_v57, %v6130_v35  ;;  %v8597_v1 = vpack.i.bf16 %v4912_v7, %v4911_v4  ;;  %v8682_v48 = vpack.i.bf16 %v6140_v56, %v6132_v45 }
 0xe47   : > { %8573 = vperm.xlu0 %8526, %v8572_v15   ;;  %8653 = vperm.xlu2 %8524, %v8652_v10   ;;  %v6117_v20 = vmul.f32 %v13563_v9, %v6053_v17  ;;  %v6118_v34 = vmul.f32 %v13564_v49, %v6054_v36  ;;  %v6061_v14 = vperm.slane %v12608_v63, 0  ;;  %v6062_v2 = vperm.slane %v12608_v63, 1 }
 0xe48   : > { %8658 = vperm.xlu1 %8525, %v8657_v60   ;;  %v6136_v46 = vmul.f32 %v13567_v37, %v6072_v42 }
 0xe49   : > { %v8612_v3 = vpack.i.bf16 %v6118_v34, %v6117_v20  ;;  %v6125_v58 = vmul.f32 %v13565_v21, %v6061_v14  ;;  %v6126_v18 = vmul.f32 %v13566_v8, %v6062_v2 }
 0xe4b   : > { %v8647_v51 = vpack.i.bf16 %v6126_v18, %v6125_v58 }
 0xe4f   : > { %8583 = vperm.xlu0 %8526, %v8582_v62   ;;  %8668 = vperm.xlu2 %8524, %v8667_v6  }
 0xe50   : > { %8673 = vperm.xlu1 %8525, %v8672_v26  }
 0xe57   : > { %8598 = vperm.xlu0 %8526, %v8597_v1   ;;  %8683 = vperm.xlu2 %8524, %v8682_v48  }
 0xe5f   : > { %8613 = vperm.xlu0 %8526, %v8612_v3  }
 0xe67   : > { %8623 = vperm.xlu0 %8526, %v8622_v50   ;;  %v13568_v50 = vld [vmem:[#allocation18_spill] sm:$0xff] }
 0xe68   : > { %v6128_v59 = vmul.f32 %v13568_v50, %v6064_v40 }
 0xe6a   : > { %v8662_v55 = vpack.i.bf16 %v6136_v46, %v6128_v59  ;;  %v8554_v63 = vpop.permute.xlu2 %8553 }
 0xe6b   : > { %v8556_v23 = vunpack.i.h.bf16 %v8554_v63  ;;  %v8555_v13 = vunpack.i.l.bf16 %v8554_v63 }
 0xe6d   : > { %v5059_v56 = vperm.slane %v8556_v23, %v10022_v30  ;;  %v5058_v41 = vperm.slane %v8555_v13, %v10019_v29 }
 0xe6f   : > { %8633 = vperm.xlu0 %8526, %v8632_v61   ;;  %v5060_v49 = vsel %vm1065_vm7, %v5059_v56, %v5058_v41 }
 0xe72   : > { %v8579_v59 = vpop.permute.xlu2 %8578 }
 0xe77   : > { %8648 = vperm.xlu0 %8526, %v8647_v51  }
 0xe7f   : > { %8663 = vperm.xlu0 %8526, %v8662_v55  }
 0xe81   : > { %v8529_v47 = vpop.permute.xlu0 %8528  ;;  %v8559_v35 = vpop.permute.xlu1 %8558 }
 0xe82   : > { %v8531_v16 = vunpack.i.h.bf16 %v8529_v47  ;;  %v8530_v33 = vunpack.i.l.bf16 %v8529_v47  ;;  %v8561_v53 = vunpack.i.h.bf16 %v8559_v35  ;;  %v8560_v7 = vunpack.i.l.bf16 %v8559_v35 }
 0xe84   : > { %v5044_v5 = vperm.slane %v8531_v16, %v10022_v30  ;;  %v5043_v12 = vperm.slane %v8530_v33, %v10019_v29  ;;  %v5062_v36 = vperm.slane %v8561_v53, %v10022_v30  ;;  %v5061_v9 = vperm.slane %v8560_v7, %v10019_v29 }
 0xe86   : > { %v5045_v26 = vsel %vm1065_vm7, %v5044_v5, %v5043_v12  ;;  %v5063_v58 = vsel %vm1065_vm7, %v5062_v36, %v5061_v9 }
 0xe87   : > { %8678 = vperm.xlu0 %8526, %v8677_v11  }
 0xe89   : > { %v8534_v0 = vpop.permute.xlu0 %8533  ;;  %v8589_v50 = vpop.permute.xlu1 %8588 }
 0xe8a   : > { %v8536_v15 = vunpack.i.h.bf16 %v8534_v0  ;;  %v8535_v10 = vunpack.i.l.bf16 %v8534_v0  ;;  %v8590_v5 = vunpack.i.l.bf16 %v8589_v50 }
 0xe8c   : > { %v5047_v54 = vperm.slane %v8536_v15, %v10022_v30  ;;  %v5046_v19 = vperm.slane %v8535_v10, %v10019_v29  ;;  %v8581_v15 = vunpack.i.h.bf16 %v8579_v59  ;;  %v8580_v10 = vunpack.i.l.bf16 %v8579_v59 }
 0xe8e   : > { %v5048_v62 = vsel %vm1065_vm7, %v5047_v54, %v5046_v19  ;;  %v5073_v63 = vperm.slane %v8580_v10, %v10019_v29 }
 0xe8f   : > { %v5091_v39 = vsel %vm1112_vm8, %v5048_v62, %v5045_v26 }
 0xe91   : > { %v8539_v31 = vpop.permute.xlu0 %8538 }
 0xe92   : > { %v8541_v60 = vunpack.i.h.bf16 %v8539_v31  ;;  %v8540_v43 = vunpack.i.l.bf16 %v8539_v31 }
 0xe94   : > { %v5050_v22 = vperm.slane %v8541_v60, %v10022_v30  ;;  %v5049_v11 = vperm.slane %v8540_v43, %v10019_v29 }
 0xe96   : > { %v5051_v25 = vsel %vm1065_vm7, %v5050_v22, %v5049_v11  ;;  %v8594_v22 = vpop.permute.xlu2 %8593  ;;  %v8591_v11 = vunpack.i.h.bf16 %v8589_v50 }
 0xe97   : > { %v5092_v45 = vsel %vm1114_vm9, %v5051_v25, %v5091_v39  ;;  %v8596_v35 = vunpack.i.h.bf16 %v8594_v22  ;;  %v8595_v62 = vunpack.i.l.bf16 %v8594_v22  ;;  %v5079_v25 = vperm.slane %v8590_v5, %v10019_v29 }
 0xe99   : > { %v8544_v61 = vpop.permute.xlu0 %8543  ;;  %v5083_v7 = vperm.slane %v8596_v35, %v10022_v30  ;;  %v5082_v39 = vperm.slane %v8595_v62, %v10019_v29 }
 0xe9a   : > { %v8546_v32 = vunpack.i.h.bf16 %v8544_v61  ;;  %v8545_v27 = vunpack.i.l.bf16 %v8544_v61 }
 0xe9c   : > { %v5053_v52 = vperm.slane %v8546_v32, %v10022_v30  ;;  %v5052_v57 = vperm.slane %v8545_v27, %v10019_v29  ;;  %v8604_v32 = vpop.permute.xlu1 %8603  ;;  %v5074_v27 = vperm.slane %v8581_v15, %v10022_v30 }
 0xe9e   : > { %v5054_v44 = vsel %vm1065_vm7, %v5053_v52, %v5052_v57 }
 0xe9f   : > { %v5093_v48 = vsel %vm1116_vm10, %v5054_v44, %v5092_v45  ;;  %v8606_v44 = vunpack.i.h.bf16 %v8604_v32 }
 0xea1   : > { %v8549_v38 = vpop.permute.xlu0 %8548 }
 0xea2   : > { %v8551_v6 = vunpack.i.h.bf16 %v8549_v38  ;;  %v8550_v28 = vunpack.i.l.bf16 %v8549_v38 }
 0xea4   : > { %v5056_v24 = vperm.slane %v8551_v6, %v10022_v30  ;;  %v5055_v4 = vperm.slane %v8550_v28, %v10019_v29  ;;  %v5075_v6 = vsel %vm1065_vm7, %v5074_v27, %v5073_v63  ;;  %v5080_v28 = vperm.slane %v8591_v11, %v10022_v30  ;;  %v8609_v45 = vpop.permute.xlu1 %8608 }
 0xea6   : > { %v5057_v1 = vsel %vm1065_vm7, %v5056_v24, %v5055_v4  ;;  %v8605_v24 = vunpack.i.l.bf16 %v8604_v32  ;;  %v5081_v41 = vsel %vm1065_vm7, %v5080_v28, %v5079_v25 }
 0xea7   : > { %v5094_v17 = vsel %vm13569_vm13, %v5057_v1, %v5093_v48 }
 0xea8   : > { %v5095_v14 = vsel %vm13570_vm14, %v5060_v49, %v5094_v17  ;;  %v5089_v17 = vperm.slane %v8606_v44, %v10022_v30  ;;  %v5088_v36 = vperm.slane %v8605_v24, %v10019_v29  ;;  %vm13578_vm14 = vmmov %vm13572_vm0 }
 0xea9   : > { %v8564_v20 = vpop.permute.xlu0 %8563  ;;  %v5096_v18 = vsel %vm13571_vm15, %v5063_v58, %v5095_v14  ;;  %v8619_v58 = vpop.permute.xlu2 %8618 }
 0xeaa   : > { %v8566_v34 = vunpack.i.h.bf16 %v8564_v20  ;;  %v8565_v3 = vunpack.i.l.bf16 %v8564_v20 }
 0xeac   : > { %v5065_v2 = vperm.slane %v8566_v34, %v10022_v30  ;;  %v5064_v21 = vperm.slane %v8565_v3, %v10019_v29  ;;  %v5084_v34 = vsel %vm1065_vm7, %v5083_v7, %v5082_v39 }
 0xeae   : > { %v5066_v8 = vsel %vm1065_vm7, %v5065_v2, %v5064_v21  ;;  %v5090_v2 = vsel %vm1065_vm7, %v5089_v17, %v5088_v36 }
 0xeaf   : > { %v5097_v51 = vsel %vm13572_vm0, %v5066_v8, %v5096_v18  ;;  %vm13583_vm0 = vmmov %vm13576_vm12 }
 0xeb0   : > { %v5107_v40 = vsel %vm303_vm5, 0.0, %v5097_v51  ;;  %vm13575_vm5 = vmmov %vm13569_vm13 }
 0xeb1   : > { %v6337_v37 = vpack.c.bf16 %v5107_v40, %v5107_v40  ;;  %v8569_v46 = vpop.permute.xlu0 %8568  ;;  %vm13577_vm13 = vmmov %vm13571_vm15  ;;  %v8629_v40 = vpop.permute.xlu1 %8628 }
 0xeb2   : > { %v8571_v31 = vunpack.i.h.bf16 %v8569_v46  ;;  %v8570_v61 = vunpack.i.l.bf16 %v8569_v46  ;;  %vm13580_vm15 = vmmov %vm13574_vm11  ;;  %v8610_v46 = vunpack.i.l.bf16 %v8609_v45  ;;  %v8631_v11 = vunpack.i.h.bf16 %v8629_v40 }
 0xeb3   : > { %7800 = vmatmul.msk.bf16.vlgmr.msra.gmra.mxu2 %vm13574_vm11, %v6337_v37  ;;  %v8611_v37 = vunpack.i.h.bf16 %v8609_v45  ;;  %v8630_v5 = vunpack.i.l.bf16 %v8629_v40  ;;  %vm13584_vm11 = vmmov %vm13583_vm0 }
 0xeb4   : > { %v5068_v16 = vperm.slane %v8571_v31, %v10022_v30  ;;  %v5067_v33 = vperm.slane %v8570_v61, %v10019_v29  ;;  %v8639_v31 = vpop.permute.xlu2 %8638  ;;  %v6281_v44 = vperm.slane %v8631_v11, %v10019_v29 }
 0xeb5   : > { %v6273_v24 = vperm.slane %v8630_v5, %v10019_v29 }
 0xeb6   : > { %v5069_v57 = vsel %vm1065_vm7, %v5068_v16, %v5067_v33  ;;  %v8620_v16 = vunpack.i.l.bf16 %v8619_v58 }
 0xeb8   : > { %v6271_v22 = vperm.slane %v8620_v16, %v10019_v29 }
 0xeb9   : > { %v8574_v55 = vpop.permute.xlu0 %8573  ;;  %v8644_v32 = vpop.permute.xlu1 %8643 }
 0xeba   : > { %v8576_v47 = vunpack.i.h.bf16 %v8574_v55  ;;  %v8575_v0 = vunpack.i.l.bf16 %v8574_v55  ;;  %v6270_v55 = vperm.slane %v8611_v37, %v10019_v29 }
 0xebc   : > { %v5071_v60 = vperm.slane %v8576_v47, %v10022_v30  ;;  %v5070_v43 = vperm.slane %v8575_v0, %v10019_v29  ;;  %v6269_v47 = vperm.slane %v8610_v46, %v10019_v29  ;;  %v8654_v62 = vpop.permute.xlu2 %8653 }
 0xebe   : > { %v5072_v54 = vsel %vm1065_vm7, %v5071_v60, %v5070_v43  ;;  %v8621_v43 = vunpack.i.h.bf16 %v8619_v58  ;;  %v6301_v33 = vsel %vm1112_vm8, %v6270_v55, %v6269_v47 }
 0xebf   : > { %v5098_v23 = vsel %vm1112_vm8, %v5072_v54, %v5069_v57  ;;  %v8646_v57 = vunpack.i.h.bf16 %v8644_v32 }
 0xec0   : > { %v5099_v4 = vsel %vm1114_vm9, %v5075_v6, %v5098_v23  ;;  %v8645_v23 = vunpack.i.l.bf16 %v8644_v32 }
 0xec1   : > { %v8584_v19 = vpop.permute.xlu0 %8583  ;;  %v6284_v45 = vperm.slane %v8646_v57, %v10019_v29 }
 0xec2   : > { %v8586_v12 = vunpack.i.h.bf16 %v8584_v19  ;;  %v8585_v52 = vunpack.i.l.bf16 %v8584_v19  ;;  %v6279_v19 = vperm.slane %v8621_v43, %v10019_v29 }
 0xec4   : > { %v5077_v38 = vperm.slane %v8586_v12, %v10022_v30  ;;  %v5076_v13 = vperm.slane %v8585_v52, %v10019_v29  ;;  %v8641_v12 = vunpack.i.h.bf16 %v8639_v31  ;;  %v8640_v52 = vunpack.i.l.bf16 %v8639_v31  ;;  %v8669_v40 = vpop.permute.xlu2 %8668 }
 0xec5   : > { %v8671_v32 = vunpack.i.h.bf16 %v8669_v40 }
 0xec6   : > { %v5078_v26 = vsel %vm1065_vm7, %v5077_v38, %v5076_v13  ;;  %v6302_v38 = vsel %vm1114_vm9, %v6271_v22, %v6301_v33  ;;  %v6283_v7 = vperm.slane %v8641_v12, %v10019_v29  ;;  %v6275_v39 = vperm.slane %v8640_v52, %v10019_v29 }
 0xec7   : > { %v5100_v53 = vsel %vm1116_vm10, %v5078_v26, %v5099_v4 }
 0xec8   : > { %v5101_v9 = vsel %vm13575_vm5, %v5081_v41, %v5100_v53 }
 0xec9   : > { %v8599_v56 = vpop.permute.xlu0 %8598  ;;  %v5102_v14 = vsel %vm13576_vm12, %v5084_v34, %v5101_v9 }
 0xeca   : > { %v8601_v1 = vunpack.i.h.bf16 %v8599_v56  ;;  %v8600_v48 = vunpack.i.l.bf16 %v8599_v56 }
 0xecc   : > { %v5086_v20 = vperm.slane %v8601_v1, %v10022_v30  ;;  %v5085_v49 = vperm.slane %v8600_v48, %v10019_v29  ;;  %v6276_v1 = vperm.slane %v8645_v23, %v10019_v29  ;;  %v8684_v12 = vpop.permute.xlu2 %8683 }
 0xece   : > { %v5087_v3 = vsel %vm1065_vm7, %v5086_v20, %v5085_v49  ;;  %vm13582_vm7 = vmmov %vm13575_vm5  ;;  %v8224_v20 = vld [vmem:[%s13023_s3 + $0x138] sm:$0xff] }
 0xecf   : > { %v5103_v21 = vsel %vm13577_vm13, %v5087_v3, %v5102_v14  ;;  %6574 = vmatpush.bf16.msrb.mxu0 %v8224_v20 }
 0xed0   : > { %v5104_v8 = vsel %vm13578_vm14, %v5090_v2, %v5103_v21 }
 0xed1   : > { %v8614_v18 = vpop.permute.xlu0 %8613  ;;  %v5108_v42 = vsel %vm304_vm6, 0.0, %v5104_v8  ;;  %vm13581_vm6 = vmmov %vm13575_vm5  ;;  %v8659_v8 = vpop.permute.xlu1 %8658 }
 0xed2   : > { %v6338_v30 = vpack.c.bf16 %v5108_v42, %v5108_v42  ;;  %v8616_v50 = vunpack.i.h.bf16 %v8614_v18  ;;  %v8615_v59 = vunpack.i.l.bf16 %v8614_v18  ;;  %vm13585_vm5 = vmmov %vm13577_vm13  ;;  %v8661_v55 = vunpack.i.h.bf16 %v8659_v8 }
 0xed3   : > { %vm13586_vm12 = vmmov %vm13585_vm5 }
 0xed4   : > { %7801 = vmatmul.msk.bf16.vlgmr.msrb.gmra.mxu3 %vm13580_vm15, %v6338_v30  ;;  %v6278_v61 = vperm.slane %v8616_v50, %v10019_v29  ;;  %v6277_v15 = vperm.slane %v8615_v59, %v10019_v29  ;;  %vm13587_vm13 = vmmov %vm13578_vm14  ;;  %v8656_v50 = vunpack.i.h.bf16 %v8654_v62  ;;  %v8655_v59 = vunpack.i.l.bf16 %v8654_v62 }
 0xed5   : > { %vm13588_vm14 = vmmov %vm13587_vm13  ;;  %v6295_v43 = vperm.slane %v8661_v55, %v10019_v29  ;;  %v6297_v62 = vperm.slane %v8671_v32, %v10019_v29  ;;  %v8255_v55 = vld [vmem:[%s13023_s3 + $0x1f0] sm:$0xff]  ;;  %v8249_v32 = vld [vmem:[%s13023_s3 + $0x1c0] sm:$0xff] }
 0xed6   : > { %v6308_v27 = vsel %vm1112_vm8, %v6278_v61, %v6277_v15  ;;  %v8660_v61 = vunpack.i.l.bf16 %v8659_v8  ;;  %v6294_v15 = vperm.slane %v8656_v50, %v10019_v29  ;;  %vm13596_vm15 = vmmov %vm13585_vm5  ;;  %v8217_v50 = vld [vmem:[%s13023_s3 + $0x100] sm:$0xff] }
 0xed7   : > { %v6309_v13 = vsel %vm1114_vm9, %v6279_v19, %v6308_v27 }
 0xed9   : > { %v8624_v0 = vpop.permute.xlu0 %8623  ;;  %v8674_v19 = vpop.permute.xlu1 %8673 }
 0xeda   : > { %v8626_v10 = vunpack.i.h.bf16 %v8624_v0  ;;  %v8625_v60 = vunpack.i.l.bf16 %v8624_v0  ;;  %v8676_v23 = vunpack.i.h.bf16 %v8674_v19 }
 0xedc   : > { %v6280_v63 = vperm.slane %v8626_v10, %v10019_v29  ;;  %v6272_v54 = vperm.slane %v8625_v60, %v10019_v29  ;;  %v6293_v10 = vperm.slane %v8655_v59, %v10019_v29  ;;  %v8256_v59 = vld [vmem:[%s13023_s3 + $0x1f8] sm:$0xff] }
 0xede   : > { %v6303_v6 = vsel %vm1116_vm10, %v6272_v54, %v6302_v38  ;;  %v6310_v28 = vsel %vm1116_vm10, %v6280_v63, %v6309_v13  ;;  %v8670_v63 = vunpack.i.l.bf16 %v8669_v40  ;;  %v6287_v54 = vperm.slane %v8660_v61, %v10019_v29  ;;  %v8220_v40 = vld [vmem:[%s13023_s3 + $0x118] sm:$0xff]  ;;  %v8253_v61 = vld [vmem:[%s13023_s3 + $0x1e0] sm:$0xff] }
 0xedf   : > { %v6304_v56 = vsel %vm13581_vm6, %v6273_v24, %v6303_v6  ;;  %v6311_v41 = vsel %vm13582_vm7, %v6281_v44, %v6310_v28  ;;  %v6322_v5 = vsel %vm1112_vm8, %v6294_v15, %v6293_v10  ;;  %v8675_v38 = vunpack.i.l.bf16 %v8674_v19  ;;  %vm13598_vm7 = vmmov %vm13587_vm13  ;;  %v8248_v15 = vld [vmem:[%s13023_s3 + $0x1b8] sm:$0xff]  ;;  %v8247_v10 = vld [vmem:[%s13023_s3 + $0x1b0] sm:$0xff] }
 0xee0   : > { %v6323_v52 = vsel %vm1114_vm9, %v6295_v43, %v6322_v5  ;;  %v6289_v6 = vperm.slane %v8670_v63, %v10019_v29  ;;  %v8686_v28 = vunpack.i.h.bf16 %v8684_v12  ;;  %6869 = vmatpush.bf16.msrb.mxu3 %v8248_v15  ;;  %v8246_v43 = vld [vmem:[%s13023_s3 + $0x1a8] sm:$0xff] }
 0xee1   : > { %v8634_v35 = vpop.permute.xlu0 %8633 }
 0xee2   : > { %v8636_v25 = vunpack.i.h.bf16 %v8634_v35  ;;  %v8635_v26 = vunpack.i.l.bf16 %v8634_v35 }
 0xee4   : > { %v6282_v4 = vperm.slane %v8636_v25, %v10019_v29  ;;  %v6274_v53 = vperm.slane %v8635_v26, %v10019_v29  ;;  %v8685_v25 = vunpack.i.l.bf16 %v8684_v12  ;;  %6870 = vmatpush.bf16.msrb.mxu3 %v8247_v10 }
 0xee6   : > { %v6305_v48 = vsel %vm13583_vm0, %v6274_v53, %v6304_v56  ;;  %v6312_v17 = vsel %vm13584_vm11, %v6282_v4, %v6311_v41 }
 0xee7   : > { %v6306_v36 = vsel %vm13585_vm5, %v6275_v39, %v6305_v48  ;;  %v6313_v9 = vsel %vm13586_vm12, %v6283_v7, %v6312_v17  ;;  %v6298_v7 = vperm.slane %v8676_v23, %v10019_v29  ;;  %v6290_v39 = vperm.slane %v8675_v38, %v10019_v29  ;;  %v8242_v23 = vld [vmem:[%s13023_s3 + $0x188] sm:$0xff]  ;;  %v8241_v38 = vld [vmem:[%s13023_s3 + $0x180] sm:$0xff] }
 0xee8   : > { %v6307_v49 = vsel %vm13587_vm13, %v6276_v1, %v6306_v36  ;;  %v6314_v34 = vsel %vm13588_vm14, %v6284_v45, %v6313_v9  ;;  %v6300_v45 = vperm.slane %v8686_v28, %v10019_v29  ;;  %v6292_v1 = vperm.slane %v8685_v25, %v10019_v29  ;;  %6871 = vmatpush.bf16.msrb.mxu3 %v8246_v43  ;;  %v8239_v25 = vld [vmem:[%s13024_s4 + $0xb0] sm:$0xff] }
 0xee9   : > { %v6333_v14 = vsel %vm317_vm2, 0.0, %v6307_v49  ;;  %v6334_v21 = vsel %vm318_vm1, 0.0, %v6314_v34  ;;  %v8649_v58 = vpop.permute.xlu0 %8648  ;;  %vm13591_vm1 = vcmask 64512   ;;  %vm13592_vm2 = vmmov %vm13581_vm6  ;;  %v8233_v34 = vld [vmem:[%s13024_s4 + $0x80] sm:$0xff] }
 0xeea   : > { %v6383_v18 = vpack.c.bf16 %v6333_v14, %v6333_v14  ;;  %v6384_v51 = vpack.c.bf16 %v6334_v21, %v6334_v21  ;;  %v8651_v42 = vunpack.i.h.bf16 %v8649_v58  ;;  %v8650_v30 = vunpack.i.l.bf16 %v8649_v58  ;;  %vm13597_vm6 = vmmov %vm13585_vm5  ;;  %v8263_v14 = vld [vmem:[%s13024_s4 + $0xf0] sm:$0xff] }
 0xeeb   : > { %vm13602_vm11 = vmmov %vm13591_vm1 }
 0xeec   : > { %v6389_v37 = vunpack.c.l.b16 %v6383_v18  ;;  %v6390_v46 = vunpack.c.l.b16 %v6384_v51  ;;  %v6286_v0 = vperm.slane %v8651_v42, %v10019_v29  ;;  %v6285_v31 = vperm.slane %v8650_v30, %v10019_v29  ;;  %v8223_v51 = vld [vmem:[%s13023_s3 + $0x130] sm:$0xff]  ;;  %v8222_v42 = vld [vmem:[%s13023_s3 + $0x128] sm:$0xff]  ;;  %v8221_v30 = vld [vmem:[%s13023_s3 + $0x120] sm:$0xff] }
 0xeed   : > { %6575 = vmatpush.bf16.msrb.mxu0 %v8223_v51 }
 0xeee   : > { %v6391_v47 = vpack.c.b16 %v6390_v46, %v6389_v37  ;;  %v6315_v27 = vsel %vm1112_vm8, %v6286_v0, %v6285_v31  ;;  %vm13593_vm8 = vmmov %vm13592_vm2  ;;  %v8219_v37 = vld [vmem:[%s13023_s3 + $0x110] sm:$0xff]  ;;  %v8218_v46 = vld [vmem:[%s13023_s3 + $0x108] sm:$0xff] }
 0xeef   : > { %v6316_v57 = vsel %vm1114_vm9, %v6287_v54, %v6315_v27  ;;  %vm13594_vm9 = vmmov %vm13583_vm0  ;;  %v8254_v0 = vld [vmem:[%s13023_s3 + $0x1e8] sm:$0xff]  ;;  %v8245_v27 = vld [vmem:[%s13023_s3 + $0x1a0] sm:$0xff] }
 0xef0   : > { %7802 = vmatmul.msk.bf16.vlgmr.msrb.gmra.mxu2 %vm13591_vm1, %v6391_v47  ;;  %6872 = vmatpush.bf16.msrb.mxu3 %v8245_v27  ;;  %v8244_v54 = vld [vmem:[%s13023_s3 + $0x198] sm:$0xff] }
 0xef1   : > { %v8664_v60 = vpop.permute.xlu0 %8663  ;;  %6576 = vmatpush.bf16.msrb.mxu0 %v8222_v42 }
 0xef2   : > { %v8666_v16 = vunpack.i.h.bf16 %v8664_v60  ;;  %v8665_v33 = vunpack.i.l.bf16 %v8664_v60  ;;  %v8252_v60 = vld [vmem:[%s13023_s3 + $0x1d8] sm:$0xff] }
 0xef4   : > { %v6296_v22 = vperm.slane %v8666_v16, %v10019_v29  ;;  %v6288_v11 = vperm.slane %v8665_v33, %v10019_v29  ;;  %v8251_v16 = vld [vmem:[%s13023_s3 + $0x1d0] sm:$0xff]  ;;  %v8250_v33 = vld [vmem:[%s13023_s3 + $0x1c8] sm:$0xff]  ;;  %6873 = vmatpush.bf16.msrb.mxu3 %v8244_v54 }
 0xef5   : > { %6577 = vmatpush.bf16.msrb.mxu0 %v8221_v30 }
 0xef6   : > { %v6324_v13 = vsel %vm1116_vm10, %v6296_v22, %v6323_v52  ;;  %v6317_v35 = vsel %vm1116_vm10, %v6288_v11, %v6316_v57  ;;  %vm13595_vm10 = vmmov %vm13583_vm0  ;;  %v8243_v11 = vld [vmem:[%s13023_s3 + $0x190] sm:$0xff] }
 0xef7   : > { %v6325_v44 = vsel %vm13592_vm2, %v6297_v62, %v6324_v13  ;;  %v6318_v24 = vsel %vm13593_vm8, %v6289_v6, %v6317_v35  ;;  %vm13599_vm0 = vmmov %vm13598_vm7  ;;  %v13603_v13 = vld [vmem:[#allocation23_spill] sm:$0xff] }
 0xef8   : > { %v6319_v48 = vsel %vm13594_vm9, %v6290_v39, %v6318_v24  ;;  %v6326_v17 = vsel %vm13595_vm10, %v6298_v7, %v6325_v44  ;;  %6874 = vmatpush.bf16.msrb.mxu3 %v8243_v11  ;;  %v8240_v62 = vld [vmem:[%s13024_s4 + $0xb8] sm:$0xff]  ;;  %v8237_v39 = vld [vmem:[%s13024_s4 + $0xa0] sm:$0xff] }
 0xef9   : > { %v8679_v26 = vpop.permute.xlu0 %8678  ;;  %6578 = vmatpush.bf16.msrb.mxu0 %v8220_v40  ;;  %6670 = vmatpush.bf16.msra.mxu2 %v8240_v62  ;;  %v13605_v62 = vld [vmem:[#allocation52_spill] sm:$0xff] }
 0xefa   : > { %v8681_v4 = vunpack.i.h.bf16 %v8679_v26  ;;  %v8680_v53 = vunpack.i.l.bf16 %v8679_v26 }
 0xefc   : > { %v6299_v56 = vperm.slane %v8681_v4, %v10019_v29  ;;  %v6291_v41 = vperm.slane %v8680_v53, %v10019_v29  ;;  %6875 = vmatpush.bf16.msrb.mxu3 %v8242_v23  ;;  %v13604_v4 = vld [vmem:[#allocation34_spill] sm:$0xff]  ;;  %v8238_v53 = vld [vmem:[%s13024_s4 + $0xa8] sm:$0xff] }
 0xefd   : > { %6579 = vmatpush.bf16.msrb.mxu0 %v8219_v37  ;;  %6671 = vmatpush.bf16.msra.mxu2 %v8239_v25 }
 0xefe   : > { %v6320_v36 = vsel %vm13596_vm15, %v6291_v41, %v6319_v48  ;;  %v6327_v9 = vsel %vm13597_vm6, %v6299_v56, %v6326_v17 }
 0xeff   : > { %v6321_v20 = vsel %vm13598_vm7, %v6292_v1, %v6320_v36  ;;  %v6328_v49 = vsel %vm13599_vm0, %v6300_v45, %v6327_v9  ;;  %v8236_v9 = vld [vmem:[%s13024_s4 + $0x98] sm:$0xff] }
 0xf00   : > { %v6335_v3 = vsel %vm319_vm3, 0.0, %v6321_v20  ;;  %v6336_v2 = vsel %vm320_vm4, 0.0, %v6328_v49  ;;  %6876 = vmatpush.bf16.msrb.mxu3 %v8241_v38  ;;  %v8235_v20 = vld [vmem:[%s13024_s4 + $0x90] sm:$0xff]  ;;  %v8234_v49 = vld [vmem:[%s13024_s4 + $0x88] sm:$0xff] }
 0xf01   : > { %v6385_v21 = vpack.c.bf16 %v6335_v3, %v6335_v3  ;;  %v6386_v29 = vpack.c.bf16 %v6336_v2, %v6336_v2  ;;  %6580 = vmatpush.bf16.msrb.mxu0 %v8218_v46  ;;  %6672 = vmatpush.bf16.msra.mxu2 %v8238_v53  ;;  %v8264_v3 = vld [vmem:[%s13024_s4 + $0xf8] sm:$0xff]  ;;  %v6597_v2 = vpop.f32.mrf.mxu1 }
 0xf02   : > { %6978 = vmatpush.bf16.msrb.mxu1 %v8264_v3  ;;  %v8260_v46 = vld [vmem:[%s13024_s4 + $0xd8] sm:$0xff] }
 0xf03   : > { %v6414_v58 = vunpack.c.l.b16 %v6385_v21  ;;  %v6415_v8 = vunpack.c.l.b16 %v6386_v29  ;;  %v8262_v29 = vld [vmem:[%s13024_s4 + $0xe8] sm:$0xff] }
 0xf05   : > { %v6416_v18 = vpack.c.b16 %v6415_v8, %v6414_v58  ;;  %6581 = vmatpush.bf16.msrb.mxu0 %v8217_v50  ;;  %6673 = vmatpush.bf16.msra.mxu2 %v8237_v39  ;;  %v8261_v58 = vld [vmem:[%s13024_s4 + $0xe0] sm:$0xff]  ;;  %v8259_v50 = vld [vmem:[%s13024_s4 + $0xd0] sm:$0xff] }
 0xf06   : > { %6979 = vmatpush.bf16.msrb.mxu1 %v8263_v14 }
 0xf07   : > { %7803 = vmatmul.msk.bf16.vlgmr.msra.gmra.mxu3 %vm13602_vm11, %v6416_v18 }
 0xf09   : > { %6888 = vmatpush.bf16.msra.mxu0 %v8256_v59  ;;  %6674 = vmatpush.bf16.msra.mxu2 %v8236_v9  ;;  %v6599_v18 = vpop.f32.mrf.mxu1  ;;  %v8258_v59 = vld [vmem:[%s13024_s4 + $0xc8] sm:$0xff] }
 0xf0a   : > { %6980 = vmatpush.bf16.msrb.mxu1 %v8262_v29 }
 0xf0d   : > { %6889 = vmatpush.bf16.msra.mxu0 %v8255_v55  ;;  %6675 = vmatpush.bf16.msra.mxu2 %v8235_v20  ;;  %v8257_v55 = vld [vmem:[%s13024_s4 + $0xc0] sm:$0xff] }
 0xf0e   : > { %6981 = vmatpush.bf16.msrb.mxu1 %v8261_v58 }
 0xf11   : > { %6890 = vmatpush.bf16.msra.mxu0 %v8254_v0  ;;  %6676 = vmatpush.bf16.msra.mxu2 %v8234_v49 }
 0xf12   : > { %6982 = vmatpush.bf16.msrb.mxu1 %v8260_v46 }
 0xf15   : > { %6891 = vmatpush.bf16.msra.mxu0 %v8253_v61  ;;  %6677 = vmatpush.bf16.msra.mxu2 %v8233_v34 }
 0xf16   : > { %6983 = vmatpush.bf16.msrb.mxu1 %v8259_v50 }
 0xf19   : > { %6892 = vmatpush.bf16.msra.mxu0 %v8252_v60 }
 0xf1a   : > { %6984 = vmatpush.bf16.msrb.mxu1 %v8258_v59 }
 0xf1d   : > { %6893 = vmatpush.bf16.msra.mxu0 %v8251_v16 }
 0xf1e   : > { %6985 = vmatpush.bf16.msrb.mxu1 %v8257_v55 }
 0xf21   : > { %6894 = vmatpush.bf16.msra.mxu0 %v8250_v33 }
 0xf25   : > { %6895 = vmatpush.bf16.msra.mxu0 %v8249_v32 }
 0xf36   : > { %v6357_v47 = vpop.f32.mrf.mxu2 }
 0xf37   : > { %v6437_v63 = vpack.c.bf16 %v6357_v47, %v6357_v47 }
 0xf39   : > { %v6441_v5 = vunpack.c.l.b16 %v6437_v63 }
 0xf3e   : > { %v6359_v31 = vpop.f32.mrf.mxu2 }
 0xf57   : > { %v6379_v19 = vpop.f32.mrf.mxu3 }
 0xf58   : > { %v6438_v22 = vpack.c.bf16 %v6379_v19, %v6379_v19 }
 0xf5a   : > { %v6442_v12 = vunpack.c.l.b16 %v6438_v22 }
 0xf5c   : > { %v6443_v52 = vpack.c.b16 %v6442_v12, %v6441_v5 }
 0xf5e   : > { %6582 = vmatmul.bf16.vlgmr.msrb.gmra.mxu0 %v6443_v52 }
 0xf5f   : > { %v6381_v57 = vpop.f32.mrf.mxu3 }
 0xf6e   : > { %6896 = vmatmul.bf16.vlgmr.msra.gmra.mxu0 %v13603_v13 }
 0xf73   : > { %v6407_v35 = vpop.f32.mrf.mxu2 }
 0xf74   : > { %v6724_v6 = vpack.c.bf16 %v6407_v35, %v6407_v35 }
 0xf76   : > { %v6732_v44 = vunpack.c.l.b16 %v6724_v6 }
 0xf7b   : > { %v6409_v28 = vpop.f32.mrf.mxu2 }
 0xf7c   : > { %v6725_v26 = vpack.c.bf16 %v6409_v28, %v6409_v28 }
 0xf7e   : > { %v6733_v24 = vunpack.c.l.b16 %v6725_v26  ;;  %6901 = vmatmul.bf16.gmra.mxu0 %v13604_v4 }
 0xf80   : > { %v6736_v7 = vpack.c.b16 %v6733_v24, %v6732_v44 }
 0xf82   : > { %6877 = vmatmul.bf16.vlgmr.msrb.gmra.mxu3 %v6736_v7 }
 0xf8a   : > { %v6432_v56 = vpop.f32.mrf.mxu3 }
 0xf8b   : > { %v6726_v41 = vpack.c.bf16 %v6432_v56, %v6432_v56 }
 0xf8d   : > { %v6734_v48 = vunpack.c.l.b16 %v6726_v41 }
 0xf92   : > { %v6434_v45 = vpop.f32.mrf.mxu3 }
 0xf93   : > { %v6727_v1 = vpack.c.bf16 %v6434_v45, %v6434_v45 }
 0xf95   : > { %v6735_v17 = vunpack.c.l.b16 %v6727_v1 }
 0xf97   : > { %v6737_v36 = vpack.c.b16 %v6735_v17, %v6734_v48 }
 0xf99   : > { %6882 = vmatmul.bf16.gmra.mxu3 %v6737_v36 }
 0xfdb   : > { %v6583_v21 = vpop.f32.mrf.mxu0 }
 0xfdc   : > { %v6598_v8 = vadd.f32 %v6597_v2, %v6583_v21 }
 0xfde   : > { %v6602_v30 = vmax.f32 %v6598_v8, 0.0 }
 0xfe3   : > { %v6585_v51 = vpop.f32.mrf.mxu0 }
 0xfe4   : > { %v6600_v42 = vadd.f32 %v6599_v18, %v6585_v51 }
 0xfe6   : > { %v6603_v40 = vmax.f32 %v6600_v42, 0.0 }
 0xfe8   : > { %v6604_v37 = vpack.c.bf16 %v6603_v40, %v6602_v30 }
 0xfea   : > { %6678 = vmatmul.bf16.vlgmr.msra.gmra.mxu2 %v6604_v37 }
 0xfeb   : > { %v6897_v47 = vpop.f32.mrf.mxu0 }
 0xff3   : > { %v6899_v61 = vpop.f32.mrf.mxu0 }
 0xffb   : > { %v6902_v33 = vpop.f32.mrf.mxu0 }
0x1003   : > { %v6904_v63 = vpop.f32.mrf.mxu0 }
0x1005   : > { %v6878_v0 = vpop.f32.mrf.mxu3 }
0x1006   : > { %v6898_v31 = vadd.f32 %v6897_v47, %v6878_v0 }
0x1008   : > { %v6907_v60 = vmax.f32 %v6898_v31, 0.0 }
0x100d   : > { %v6880_v15 = vpop.f32.mrf.mxu3 }
0x100e   : > { %v6900_v10 = vadd.f32 %v6899_v61, %v6880_v15 }
0x1010   : > { %v6908_v43 = vmax.f32 %v6900_v10, 0.0 }
0x1012   : > { %v6911_v16 = vpack.c.bf16 %v6908_v43, %v6907_v60 }
0x1014   : > { %6986 = vmatmul.bf16.vlgmr.msrb.gmra.mxu1 %v6911_v16 }
0x101c   : > { %v6883_v32 = vpop.f32.mrf.mxu3 }
0x101d   : > { %v6903_v27 = vadd.f32 %v6902_v33, %v6883_v32 }
0x101f   : > { %v6909_v22 = vmax.f32 %v6903_v27, 0.0 }
0x1024   : > { %v6885_v54 = vpop.f32.mrf.mxu3 }
0x1025   : > { %v6905_v19 = vadd.f32 %v6904_v63, %v6885_v54 }
0x1027   : > { %v6910_v11 = vmax.f32 %v6905_v19, 0.0 }
0x1029   : > { %v6912_v5 = vpack.c.bf16 %v6910_v11, %v6909_v22 }
0x102b   : > { %6991 = vmatmul.bf16.gmra.mxu1 %v6912_v5 }
0x106d   : > { %v6679_v12 = vpop.f32.mrf.mxu2 }
0x106e   : > { %6684 = vadd.xlane.f32.xlu1 %v6679_v12 }
0x1075   : > { %v6681_v52 = vpop.f32.mrf.mxu2 }
0x1076   : > { %6686 = vadd.xlane.f32.xlu0 %v6681_v52 }
0x1091   : > { %v6987_v57 = vpop.f32.mrf.mxu1 }
0x1092   : > { %6997 = vadd.xlane.f32.xlu2 %v6987_v57 }
0x1099   : > { %v6989_v23 = vpop.f32.mrf.mxu1 }
0x109a   : > { %6999 = vadd.xlane.f32.xlu1 %v6989_v23 }
0x10a8   : > { %v6992_v38 = vpop.f32.mrf.mxu1 }
0x10a9   : > { %7001 = vadd.xlane.f32.xlu2 %v6992_v38 }
0x10b0   : > { %v6994_v13 = vpop.f32.mrf.mxu1 }
0x10b1   : > { %7003 = vadd.xlane.f32.xlu0 %v6994_v13 }
0x10e1   : > { %v6685_v35 = vpop.xlane.xlu1 %6684 }
0x10e2   : > { %v6688_v6 = vmul.f32 %v6685_v35, %v13605_v62 }
0x10e4   : > { %v6690_v28 = vsub.f32 %v6679_v12, %v6688_v6 }
0x10e6   : > { %v6692_v25 = vmul.f32 %v6690_v28, %v6690_v28 }
0x10e8   : > { %6694 = vadd.xlane.f32.xlu1 %v6692_v25 }
0x10e9   : > { %v6687_v26 = vpop.xlane.xlu0 %6686 }
0x10ea   : > { %v6689_v44 = vmul.f32 %v6687_v26, %v13605_v62 }
0x10ec   : > { %v6691_v24 = vsub.f32 %v6681_v52, %v6689_v44 }
0x10ee   : > { %v6693_v4 = vmul.f32 %v6691_v24, %v6691_v24 }
0x10f0   : > { %6696 = vadd.xlane.f32.xlu2 %v6693_v4 }
0x1105   : > { %v6998_v53 = vpop.xlane.xlu2 %6997 }
0x1106   : > { %v7005_v7 = vmul.f32 %v6998_v53, %v13605_v62 }
0x1108   : > { %v12926_v39 = vsub.f32 %v6987_v57, %v7005_v7 }
0x110a   : > { %v7013_v56 = vmul.f32 %v12926_v39, %v12926_v39 }
0x110c   : > { %7017 = vadd.xlane.f32.xlu0 %v7013_v56 }
0x110d   : > { %v7000_v41 = vpop.xlane.xlu1 %6999 }
0x110e   : > { %v7006_v45 = vmul.f32 %v7000_v41, %v13605_v62 }
0x1110   : > { %v12931_v1 = vsub.f32 %v6989_v23, %v7006_v45 }
0x1112   : > { %v7014_v48 = vmul.f32 %v12931_v1, %v12931_v1 }
0x1114   : > { %7019 = vadd.xlane.f32.xlu1 %v7014_v48 }
0x111c   : > { %v7002_v17 = vpop.xlane.xlu2 %7001 }
0x111d   : > { %v7007_v36 = vmul.f32 %v7002_v17, %v13605_v62 }
0x111f   : > { %v12936_v9 = vsub.f32 %v6992_v38, %v7007_v36 }
0x1121   : > { %v7015_v20 = vmul.f32 %v12936_v9, %v12936_v9 }
0x1123   : > { %7021 = vadd.xlane.f32.xlu2 %v7015_v20 }
0x1124   : > { %v7004_v49 = vpop.xlane.xlu0 %7003 }
0x1125   : > { %v7008_v34 = vmul.f32 %v7004_v49, %v13605_v62 }
0x1127   : > { %v12941_v3 = vsub.f32 %v6994_v13, %v7008_v34 }
0x1129   : > { %v7016_v14 = vmul.f32 %v12941_v3, %v12941_v3 }
0x112b   : > { %7023 = vadd.xlane.f32.xlu0 %v7016_v14 }
0x115b   : > { %v6695_v2 = vpop.xlane.xlu1 %6694 }
0x115c   : > { %v6698_v21 = vmul.f32 %v6695_v2, %v13605_v62 }
0x115e   : > { %v6700_v29 = vadd.f32 1e-05, %v6698_v21 }
0x1160   : > { %8981 = vrsqrt.f32 %v6700_v29  ;;  %vm6708_vm4 = vweird.f32 %v6700_v29 }
0x1163   : > { %v6697_v58 = vpop.xlane.xlu2 %6696 }
0x1164   : > { %v6699_v8 = vmul.f32 %v6697_v58, %v13605_v62 }
0x1166   : > { %v8982_v18 = vpop.eup %8981  ;;  %v6701_v51 = vadd.f32 1e-05, %v6699_v8 }
0x1167   : > { %v6703_v42 = vmul.f32 %v8982_v18, %v6700_v29  ;;  %vm6709_vm3 = vweird.f32 %v8982_v18 }
0x1168   : > { %8983 = vrsqrt.f32 %v6701_v51  ;;  %vm6710_vm5 = vmor %vm6708_vm4, %vm6709_vm3  ;;  %vm6718_vm13 = vweird.f32 %v6701_v51 }
0x1169   : > { %v6704_v30 = vmul.f32 %v8982_v18, %v6703_v42 }
0x116b   : > { %v6705_v40 = vmul.f32 0.5, %v6704_v30 }
0x116d   : > { %v6706_v37 = vsub.f32 1.5, %v6705_v40 }
0x116e   : > { %v8984_v46 = vpop.eup %8983 }
0x116f   : > { %v6707_v50 = vmul.f32 %v8982_v18, %v6706_v37  ;;  %v6713_v59 = vmul.f32 %v8984_v46, %v6701_v51  ;;  %vm6719_vm12 = vweird.f32 %v8984_v46 }
0x1170   : > { %vm6720_vm14 = vmor %vm6718_vm13, %vm6719_vm12 }
0x1171   : > { %v6711_v55 = vsel %vm6710_vm5, %v8982_v18, %v6707_v50  ;;  %v6714_v47 = vmul.f32 %v8984_v46, %v6713_v59 }
0x1172   : > { %v6722_v0 = vmul.f32 %v6711_v55, %v6690_v28 }
0x1173   : > { %v6715_v31 = vmul.f32 0.5, %v6714_v47 }
0x1174   : > { %7077 = vst [vmem:[%s267_s13] sm:$0xff] %v6722_v0 }
0x1175   : > { %v6716_v61 = vsub.f32 1.5, %v6715_v31 }
0x1177   : > { %v6717_v15 = vmul.f32 %v8984_v46, %v6716_v61 }
0x1179   : > { %v6721_v10 = vsel %vm6720_vm14, %v8984_v46, %v6717_v15 }
0x117a   : > { %v6723_v60 = vmul.f32 %v6721_v10, %v6691_v24 }
0x117c   : > { %7078 = vst [vmem:[%s267_s13 + $0x8] sm:$0xff] %v6723_v60 }
0x117d   : > { %9023 = shalt.err (!%p9020_p3)
}
0x117e   : > { %s9094_s9 = smov 128   ;;  %s9095_s10 = smov 8  }
0x117f   : > { %8268 = dma.vmem_to_hbm [thread:$0]  (%p9169_p5), %s7102_s15, 256, %s7104_s14, %s7084_s20, %s9094_s9, %s9094_s9, %s9095_s10   ;;  %v7018_v43 = vpop.xlane.xlu0 %7017 }
0x1180   : > { %v7025_v16 = vmul.f32 %v7018_v43, %v13605_v62  ;;  %s7234_s12 = sshll.u32 %s12948_s26, 5  ;;  %s8267_s15 = sshll.u32 %s9152_s25, 5 }
0x1181   : > { %s12974_s13 = scalar_lea.vmem [#allocation4], %s7234_s12  ;;  %s7118_s29 = scalar_lea.hbm %s13026_s6, %s8267_s15 }
0x1182   : > { %v7029_v33 = vadd.f32 1e-05, %v7025_v16  ;;  %s7119_s16 = sshll.u32 %s12974_s13, 4  ;;  %s7121_s17 = sshll.u32 %s7118_s29, 4  ;;  %s7120_s16 = int_to_ptr.vmem [resolvable:$true] %s7119_s16  ;;  %s7122_s17 = int_to_ptr.hbm [resolvable:$true] %s7121_s17 }
0x1183   : > { %s7089_s25 = scalar_lea.sflag [#allocation5], %s12948_s26  ;;  %s9038_s18 = sshra.s32 %s7122_s17, 4  ;;  %s9039_s18 = int_to_ptr.hbm [resolvable:$true] %s9038_s18 }
0x1184   : > { %8985 = vrsqrt.f32 %v7029_v33  ;;  %vm7039_vm2 = vweird.f32 %v7029_v33  ;;  %s9040_s19 = scalar_lea.hbm %s9039_s18, 32  ;;  %s9044_s12 = scalar_lea.hbm %s13026_s6, 64 }
0x1185   : > { %p9041_p4 = scmp.ne.s32.totalorder %s9039_s18, %s9040_s19  ;;  %p9045_p9 = scmp.lt.s32.totalorder %s9039_s18, %s13026_s6 }
0x1186   : > { %p9046_p10 = scmp.lt.s32.totalorder %s9044_s12, %s9040_s19 }
0x1187   : > { %v7020_v32 = vpop.xlane.xlu1 %7019  ;;  %p9042_p7 = pnand %p9041_p4, %p9169_p5 }
0x1188   : > { %v7026_v27 = vmul.f32 %v7020_v32, %v13605_v62  ;;  %p9047_p11 = por %p9046_p10, %p9045_p9 }
0x1189   : > { %p9043_p8 = pneg %p9042_p7 }
0x118a   : > { %v8986_v63 = vpop.eup %8985  ;;  %v7030_v54 = vadd.f32 1e-05, %v7026_v27 }
0x118b   : > { %v7034_v19 = vmul.f32 %v8986_v63, %v7029_v33  ;;  %vm7040_vm1 = vweird.f32 %v8986_v63  ;;  %p9048_p12 = pnand %p9047_p11, %p9043_p8 }
0x118c   : > { %8987 = vrsqrt.f32 %v7030_v54  ;;  %vm7041_vm8 = vmor %vm7039_vm2, %vm7040_vm1  ;;  %vm7049_vm10 = vweird.f32 %v7030_v54 }
0x118d   : > { %v7035_v22 = vmul.f32 %v8986_v63, %v7034_v19 }
0x118f   : > { %v7036_v11 = vmul.f32 0.5, %v7035_v22 }
0x1191   : > { %v7037_v5 = vsub.f32 1.5, %v7036_v11 }
0x1192   : > { %v8988_v12 = vpop.eup %8987 }
0x1193   : > { %v7038_v52 = vmul.f32 %v8986_v63, %v7037_v5  ;;  %v7044_v57 = vmul.f32 %v8988_v12, %v7030_v54  ;;  %vm7050_vm9 = vweird.f32 %v8988_v12 }
0x1194   : > { %vm7051_vm15 = vmor %vm7049_vm10, %vm7050_vm9 }
0x1195   : > { %v7042_v23 = vsel %vm7041_vm8, %v8986_v63, %v7038_v52  ;;  %v7045_v38 = vmul.f32 %v8988_v12, %v7044_v57 }
0x1196   : > { %v7073_v13 = vmul.f32 %v7042_v23, %v12926_v39  ;;  %v7022_v35 = vpop.xlane.xlu2 %7021 }
0x1197   : > { %v7046_v6 = vmul.f32 0.5, %v7045_v38  ;;  %v7027_v28 = vmul.f32 %v7022_v35, %v13605_v62 }
0x1198   : > { %7079 = vst [vmem:[%s12974_s13] sm:$0xff] %v7073_v13 }
0x1199   : > { %v7047_v25 = vsub.f32 1.5, %v7046_v6  ;;  %v7031_v26 = vadd.f32 1e-05, %v7027_v28 }
0x119b   : > { %v7048_v44 = vmul.f32 %v8988_v12, %v7047_v25  ;;  %8989 = vrsqrt.f32 %v7031_v26  ;;  %vm7059_vm7 = vweird.f32 %v7031_v26 }
0x119d   : > { %v7052_v24 = vsel %vm7051_vm15, %v8988_v12, %v7048_v44 }
0x119e   : > { %v7074_v4 = vmul.f32 %v7052_v24, %v12931_v1  ;;  %v7024_v53 = vpop.xlane.xlu0 %7023 }
0x119f   : > { %v7028_v7 = vmul.f32 %v7024_v53, %v13605_v62 }
0x11a0   : > { %7080 = vst [vmem:[%s12974_s13 + $0x8] sm:$0xff] %v7074_v4 }
0x11a1   : > { %v8990_v39 = vpop.eup %8989  ;;  %v7032_v56 = vadd.f32 1e-05, %v7028_v7 }
0x11a2   : > { %v7054_v41 = vmul.f32 %v8990_v39, %v7031_v26  ;;  %vm7060_vm6 = vweird.f32 %v8990_v39 }
0x11a3   : > { %8991 = vrsqrt.f32 %v7032_v56  ;;  %vm7061_vm0 = vmor %vm7059_vm7, %vm7060_vm6  ;;  %vm7069_vm3 = vweird.f32 %v7032_v56 }
0x11a4   : > { %v7055_v45 = vmul.f32 %v8990_v39, %v7054_v41 }
0x11a6   : > { %v7056_v48 = vmul.f32 0.5, %v7055_v45 }
0x11a8   : > { %v7057_v17 = vsub.f32 1.5, %v7056_v48 }
0x11a9   : > { %v8992_v36 = vpop.eup %8991 }
0x11aa   : > { %v7058_v20 = vmul.f32 %v8990_v39, %v7057_v17  ;;  %v7064_v49 = vmul.f32 %v8992_v36, %v7032_v56  ;;  %vm7070_vm11 = vweird.f32 %v8992_v36 }
0x11ab   : > { %vm7071_vm4 = vmor %vm7069_vm3, %vm7070_vm11 }
0x11ac   : > { %v7062_v1 = vsel %vm7061_vm0, %v8990_v39, %v7058_v20  ;;  %v7065_v34 = vmul.f32 %v8992_v36, %v7064_v49 }
0x11ad   : > { %v7075_v62 = vmul.f32 %v7062_v1, %v12936_v9 }
0x11ae   : > { %v7066_v14 = vmul.f32 0.5, %v7065_v34 }
0x11af   : > { %7081 = vst [vmem:[%s12974_s13 + $0x10] sm:$0xff] %v7075_v62 }
0x11b0   : > { %v7067_v2 = vsub.f32 1.5, %v7066_v14 }
0x11b2   : > { %v7068_v21 = vmul.f32 %v8992_v36, %v7067_v2 }
0x11b4   : > { %v7072_v29 = vsel %vm7071_vm4, %v8992_v36, %v7068_v21 }
0x11b5   : > { %v7076_v58 = vmul.f32 %v7072_v29, %v12941_v3 }
0x11b7   : > { %7082 = vst [vmem:[%s12974_s13 + $0x18] sm:$0xff] %v7076_v58 }
0x11b8   : > { %9051 = shalt.err (!%p9048_p12)
}
0x11b9   : > { %8269 = dma.vmem_to_hbm [thread:$0]  (%p9169_p5), %s7120_s16, 512, %s7122_s17, %s7089_s25, %s9094_s9, %s9094_s9, %s9095_s10  }
0x11ba PF: > { %p8279_p13 = scmp.ge.s32.totalorder %s9090_s24, 2  ;;  %s7136_s26 = sand.u32 1, %s9078_s21  }
0x11bb   : > { %s7137_s13 = scalar_lea.sflag [#allocation3], %s7136_s26 }
0x11bc   : > { %p8273_p0 = pnand %p8279_p13, %p9173_p6 }
0x11be   : > { %p8274_p1 = pneg %p8273_p0 }
0x11c0   : > { %9069 = dma.done.wait (%p8274_p1), %s7137_s13, 256  }
0x11c1   : > { %9071 = vsyncadd (%p8274_p1), %s7137_s13, 4294967040  ;;  %s7147_s20 = scalar_lea.sflag [#allocation5], %s7136_s26 }
0x11c2   : > { %9073 = dma.done.wait (%p8274_p1), %s7147_s20, 512  }
0x11c3   : > { %9075 = vsyncadd (%p8274_p1), %s7147_s20, 4294966784  ;;  %p20_p5 = scmp.ge.s32.totalorder %s9156_s27, 4   ;;  %s13606_s21 = smov %s9082_s22 }
0x11c4   : > { %s13607_s22 = smov %s9086_s23  ;;  %s13608_s23 = smov %s9167_s30 }
0x11c5   : > { %s13609_s24 = smov %s9156_s27  ;;  %22 = sbr.rel (!%p20_p5) target bundleno = 5 (0x5), region = 104 }
0x11ca   :  { %7153 = vsyncpa [#allocation3], 1 }
0x11cb   :  { %7155 = vsyncpa [#allocation3 + $0x1], 1 }
0x11cc   :  { %7156 = vsyncpa [#allocation5], 1 }
0x11cd   :  { %7158 = vsyncpa [#allocation5 + $0x1], 1 }

</bundles_post_ra>
